<compile_context>
chip_gen: v6e
topology: v6e:2x2x1
jax: 0.10.0
libtpu: 0.0.40
codegen_flags: <defaults>
</compile_context>

<pallas_src>
import functools
import math

import jax
import jax.numpy as jnp
from jax import lax
from jax.experimental import pallas as pl
from jax.experimental.pallas import tpu as pltpu

PRELU_ALPHA = 0.25            # the module builds ONE nn.PReLU() shared by every layer
K_FIRST, K_MID, K_TAIL = 5, 3, 9   # FSRCNN kernel sizes (fixed by the module)


# ---------------------------------------------------------------------------
# polyphase decomposition of the ConvTranspose2d tail
# ---------------------------------------------------------------------------
def _phase_meta(k, stride, pad):
    """Per output phase ph returns (off, flipped_taps) such that, with
    w_conv[ky, kx] = W_t[:, :, k-1-ky, k-1-kx] (flipped deconv weight),
        y[stride*q + ph] = sum_u w_conv[flipped_taps[u]] . x[q + off + u]
    (x treated as zero outside [0, H)).  Matches ConvTranspose2d(k, stride,
    padding=pad, output_padding=stride-1)."""
    metas = []
    for ph in range(stride):
        k0 = (ph + pad) % stride
        kks = list(range(k0, k, stride))                 # valid unflipped taps
        n = len(kks)
        flipped = [k - 1 - kks[n - 1 - u] for u in range(n)]
        off = (ph + pad - k0) // stride - n + 1
        metas.append((off, flipped))
    return metas


def _tail_offsets(metas):
    return sorted({off + u for off, taps in metas for u in range(len(taps))})


# ---------------------------------------------------------------------------
# one-time parameter repack (hoisted out of the per-call path)
# ---------------------------------------------------------------------------
def pack_params(params, scale):
    """Repack into MXU-friendly per-tap (Cout, Cin) bf16 matrices + f32 biases."""

    def tap_stack(w):  # (k, k, Cin, Cout) -> (k*k, Cout, Cin) bf16, (ky, kx) row-major
        k1, k2, ci, co = w.shape
        return jnp.transpose(w.reshape(k1 * k2, ci, co), (0, 2, 1)).astype(jnp.bfloat16)

    w_first, b_first = params["first"]
    mids = params["mid"]
    (w_min, b_min), (w_mout, b_mout) = mids[0], mids[-1]
    mid33 = mids[1:-1]

    # tail: ConvTranspose2d(d, nf, 9, stride=scale, padding=4, output_padding=scale-1)
    wt, bt = params["last"]                              # (d, nf, 9, 9), (nf,)
    d, nf, k = wt.shape[0], wt.shape[1], wt.shape[2]
    metas = _phase_meta(k, scale, k // 2)
    offs = _tail_offsets(metas)
    w_conv = jnp.transpose(wt[:, :, ::-1, ::-1], (2, 3, 0, 1))   # (k, k, d, nf)
    zero_blk = jnp.zeros((nf, d), jnp.float32)
    per_off = []
    for dy in offs:                                      # offset-major, matches kernel
        for dx in offs:
            blocks = []
            for off_y, taps_y in metas:                  # phase order (py, px)
                uy = dy - off_y
                for off_x, taps_x in metas:
                    ux = dx - off_x
                    if 0 <= uy < len(taps_y) and 0 <= ux < len(taps_x):
                        blocks.append(w_conv[taps_y[uy], taps_x[ux]].T)   # (nf, d)
                    else:
                        blocks.append(zero_blk)
            per_off.append(jnp.concatenate(blocks, axis=0))               # (scale^2*nf, d)
    w_tail = jnp.stack(per_off).astype(jnp.bfloat16)                      # (noff^2, s^2*nf, d)
    b_tail = jnp.tile(bt.reshape(1, nf), (scale * scale, 1)).reshape(-1, 1)

    return {
        "alpha": jnp.full((1, 1), PRELU_ALPHA, jnp.float32),
        "w_first": tap_stack(w_first), "b_first": b_first.reshape(-1, 1),
        "w_min": jnp.transpose(w_min[0, 0]).astype(jnp.bfloat16),   # (s, d)
        "b_min": b_min.reshape(-1, 1),
        "w_mid": jnp.concatenate([tap_stack(w) for w, _ in mid33], axis=0),   # (m*9, s, s)
        "b_mid": jnp.stack([b.reshape(-1, 1) for _, b in mid33]),             # (m, s, 1)
        "w_mout": jnp.transpose(w_mout[0, 0]).astype(jnp.bfloat16),  # (d, s)
        "b_mout": b_mout.reshape(-1, 1),
        "w_tail": w_tail, "b_tail": b_tail,
    }


# ---------------------------------------------------------------------------
# fused forward pass
# ---------------------------------------------------------------------------
def fsrcnn_forward(packed, x_nchw, *, scale):
    n, cin, H, W = x_nchw.shape
    kk_first, d, cin_w = packed["w_first"].shape
    assert cin_w == cin and kk_first == K_FIRST * K_FIRST
    s = packed["w_min"].shape[0]
    m = packed["w_mid"].shape[0] // (K_MID * K_MID)
    p2f = packed["w_tail"].shape[1]
    nf = p2f // (scale * scale)
    K2_MID = K_MID * K_MID

    # ---- static geometry: zero-haloed slab, flattened spatial dim on lanes ----
    metas = _phase_meta(K_TAIL, scale, K_TAIL // 2)
    tail_offs = _tail_offsets(metas)
    PAD = max(K_FIRST // 2, K_MID // 2, -min(tail_offs), max(tail_offs))
    Wp = W + 2 * PAD
    for cand in range(Wp, Wp + 17):          # prefer H*Wp % 128 == 0 (lane-dense)
        if (H * cand) % 128 == 0:
            Wp = cand
            break
    NL = H * Wp                              # per-layer slab width (lanes)
    BASE0 = PAD * Wp + PAD                   # flat offset of interior pixel (0, 0)

    def bases(offs_y, offs_x):
        return [(PAD + dy) * Wp + (PAD + dx) for dy in offs_y for dx in offs_x]

    ctr = lambda k: list(range(-(k // 2), k // 2 + 1))
    first_bases = bases(ctr(K_FIRST), ctr(K_FIRST))
    mid_bases = bases(ctr(K_MID), ctr(K_MID))
    tail_bases = bases(tail_offs, tail_offs)
    assert len(tail_bases) == packed["w_tail"].shape[0]
    all_bases = first_bases + mid_bases + tail_bases
    assert min(all_bases) >= 0

    CPAD = ((max(cin, d, s) + 15) // 16) * 16            # bf16 sublane packing
    LTOT = ((max(all_bases) + NL + 127) // 128) * 128    # scratch lane extent
    # TODO(synk): row-band tiling (halo bands, budget against 64 MiB VMEM on v7x
    # vs 128 MiB on v5e/v6e) for images that do not fit a single band.
    assert CPAD * LTOT * 2 < 8 * 1024 * 1024, "image too large for single-band fused kernel"

    # ---- kernel ----------------------------------------------------------------
    def kernel(x_ref, mask_ref, alpha_ref, wf_ref, bf_ref, wmi_ref, bmi_ref,
               wm_ref, bm_ref, wmo_ref, bmo_ref, wt_ref, bt_ref, o_ref, xq_ref):
        alpha = alpha_ref[0, 0]
        cmask = mask_ref[...]                                      # (1, NL) f32

        def prelu(v):
            return jnp.where(v >= 0.0, v, alpha * v)

        def stash(act):
            # Masked store: interior pixels get the activation; lane positions
            # aliasing halo cells are rewritten with zeros, so the zero halo
            # survives without re-zeroing the whole scratch.
            xq_ref[:act.shape[0], BASE0:BASE0 + NL] = (act * cmask).astype(jnp.bfloat16)

        def conv(tap_bases, c_in, get_w):
            # sum_t  W_t (Cout, Cin) @ slab[:, base_t : base_t + NL]  (f32 acc)
            acc = None
            for t, base in enumerate(tap_bases):
                part = jnp.dot(get_w(t), xq_ref[:c_in, base:base + NL],
                               preferred_element_type=jnp.float32)
                acc = part if acc is None else acc + part
            return acc

        # Re-zero only the halo strips the masked stash never touches (cheap;
        # done every step so a "parallel"/megacore-sharded grid stays correct).
        xq_ref[:, :BASE0] = jnp.zeros((CPAD, BASE0), jnp.bfloat16)
        if LTOT > BASE0 + NL:
            xq_ref[:, BASE0 + NL:] = jnp.zeros((CPAD, LTOT - BASE0 - NL), jnp.bfloat16)

        # first_part: 5x5 conv (cin -> d) + PReLU
        xq_ref[:cin, BASE0:BASE0 + NL] = x_ref[0].astype(jnp.bfloat16)
        a = prelu(conv(first_bases, cin, lambda t: wf_ref[t]) + bf_ref[...])

        # mid_part: 1x1 (d->s), m x 3x3 (s->s), 1x1 (s->d); PReLU after each
        a = prelu(jnp.dot(wmi_ref[...], a.astype(jnp.bfloat16),
                          preferred_element_type=jnp.float32) + bmi_ref[...])

        def mid_body(j, a_in):
            stash(a_in)                                   # writes exactly the s
            y = conv(mid_bases, s,                        # channels the conv reads
                     lambda t: wm_ref[j * K2_MID + t]) + bm_ref[j]
            return prelu(y)

        a = lax.fori_loop(0, m, mid_body, a)

        a = prelu(jnp.dot(wmo_ref[...], a.astype(jnp.bfloat16),
                          preferred_element_type=jnp.float32) + bmo_ref[...])

        # last_part: 9x9 stride-`scale` ConvTranspose2d via polyphase offset
        # matmuls; all scale^2 phases are stacked on the output-channel
        # (sublane) axis -> ONE lane-dense (scale^2*nf, NL) store per image.
        stash(a)
        y = conv(tail_bases, d, lambda t: wt_ref[t]) + bt_ref[...]
        o_ref[0] = y.astype(o_ref.dtype)

    # ---- pallas_call -----------------------------------------------------------
    lane = jnp.arange(NL, dtype=jnp.int32)
    col_mask = (lane % Wp < W).astype(jnp.float32).reshape(1, NL)
    x_slab = jnp.pad(x_nchw.astype(jnp.float32),
                     ((0, 0), (0, 0), (0, 0), (0, Wp - W))).reshape(n, cin, NL)

    def wspec(arr):
        nd = arr.ndim
        return pl.BlockSpec(tuple(arr.shape), lambda b: (0,) * nd)

    out = pl.pallas_call(
        kernel,
        out_shape=jax.ShapeDtypeStruct((n, p2f, NL), jnp.float32),
        grid=(n,),
        in_specs=[
            pl.BlockSpec((1, cin, NL), lambda b: (b, 0, 0)),
            wspec(col_mask),
            pl.BlockSpec(memory_space=pltpu.MemorySpace.SMEM),    # shared PReLU alpha
            wspec(packed["w_first"]), wspec(packed["b_first"]),
            wspec(packed["w_min"]), wspec(packed["b_min"]),
            wspec(packed["w_mid"]), wspec(packed["b_mid"]),
            wspec(packed["w_mout"]), wspec(packed["b_mout"]),
            wspec(packed["w_tail"]), wspec(packed["b_tail"]),
        ],
        out_specs=pl.BlockSpec((1, p2f, NL), lambda b: (b, 0, 0)),
        scratch_shapes=[pltpu.VMEM((CPAD, LTOT), jnp.bfloat16)],
        compiler_params=pltpu.CompilerParams(
            # TODO(synk): add a second parallel axis (row bands / output phases)
            # so a batch-1 call still uses both v7x TensorCores.
            dimension_semantics=("parallel",),
        ),
    )(x_slab, col_mask, packed["alpha"],
      packed["w_first"], packed["b_first"],
      packed["w_min"], packed["b_min"],
      packed["w_mid"], packed["b_mid"],
      packed["w_mout"], packed["b_mout"],
      packed["w_tail"], packed["b_tail"])

    # depth-to-space of the scale^2 polyphase outputs + drop garbage columns
    y = out.reshape(n, scale, scale, nf, H, Wp)[..., :W]      # (n, py, px, nf, r, col)
    y = jnp.transpose(y, (0, 3, 4, 1, 5, 2))                  # (n, nf, r, py, col, px)
    return y.reshape(n, nf, H * scale, W * scale)


# ---------------------------------------------------------------------------
# synthetic parameters + pure-XLA reference (same bf16-operand / f32-accumulate
# precision policy as the kernel, so the comparison is apples-to-apples)
# ---------------------------------------------------------------------------
def init_fsrcnn_params(key, scale, num_feat, d=56, s=12 * 3, m=8):
    keys = iter(jax.random.split(key, m + 8))

    def conv_param(cin, cout, k):
        std = math.sqrt(2.0 / (cout * k * k))
        w = std * jax.random.normal(next(keys), (k, k, cin, cout), jnp.float32)
        return w, jnp.zeros((cout,), jnp.float32)

    params = {"first": conv_param(num_feat, d, K_FIRST)}
    mids = [conv_param(d, s, 1)]
    for _ in range(m):
        mids.append(conv_param(s, s, K_MID))
    mids.append(conv_param(s, d, 1))
    params["mid"] = mids
    wt = 0.001 * jax.random.normal(next(keys), (d, num_feat, K_TAIL, K_TAIL), jnp.float32)
    params["last"] = (wt, jnp.zeros((num_feat,), jnp.float32))
    return params


def fsrcnn_reference(params, x_nchw, *, scale):
    dn = ("NHWC", "HWIO", "NHWC")
    r = lambda v: v.astype(jnp.bfloat16).astype(jnp.float32)
    prelu = lambda v: jnp.where(v >= 0, v, PRELU_ALPHA * v)

    def conv_same(v, w, b):
        return lax.conv_general_dilated(r(v), r(w), (1, 1), "SAME",
                                        dimension_numbers=dn) + b

    x = jnp.transpose(x_nchw, (0, 2, 3, 1)).astype(jnp.float32)
    w, b = params["first"]
    x = prelu(conv_same(x, w, b))
    for w, b in params["mid"]:
        x = prelu(conv_same(x, w, b))
    wt, bt = params["last"]
    k, p, op = K_TAIL, K_TAIL // 2, scale - 1
    w_conv = jnp.transpose(wt[:, :, ::-1, ::-1], (2, 3, 0, 1))
    y = lax.conv_general_dilated(
        r(x), r(w_conv), (1, 1),
        padding=((k - 1 - p, k - 1 - p + op), (k - 1 - p, k - 1 - p + op)),
        lhs_dilation=(scale, scale), dimension_numbers=dn) + bt
    return jnp.transpose(y, (0, 3, 1, 2))


if __name__ == "__main__":
    key = jax.random.PRNGKey(0)
    pkey, xkey = jax.random.split(key)

    scale, num_feat, H, W, N = 2, 4, 16, 16, 2
    params = init_fsrcnn_params(pkey, scale, num_feat)
    x = jax.random.normal(xkey, (N, num_feat, H, W), jnp.float32)

    packed = pack_params(params, scale)                    # hoisted preprocessing
    fwd = jax.jit(functools.partial(fsrcnn_forward, scale=scale))
    out = jax.block_until_ready(fwd(packed, x))

    assert out.shape == (N, num_feat, H * scale, W * scale), out.shape
    ref = fsrcnn_reference(params, x, scale=scale)
    err = float(jnp.max(jnp.abs(out - ref)))
    tol = 1e-3 * (1.0 + float(jnp.max(jnp.abs(ref))))
    assert jnp.all(jnp.isfinite(out)) and err < tol, (err, tol)

    print("KERNEL_OK")
</pallas_src>

<mosaic_0001>
module attributes {stable_mosaic.version = 11 : i64} {
  func.func @kernel(%arg0: i32, %arg1: memref<1x4x384xf32, #tpu.memory_space<vmem>>, %arg2: memref<1x384xf32, #tpu.memory_space<vmem>>, %arg3: memref<1x1xf32, #tpu.memory_space<smem>>, %arg4: memref<25x56x4xbf16, #tpu.memory_space<vmem>>, %arg5: memref<56x1xf32, #tpu.memory_space<vmem>>, %arg6: memref<36x56xbf16, #tpu.memory_space<vmem>>, %arg7: memref<36x1xf32, #tpu.memory_space<vmem>>, %arg8: memref<72x36x36xbf16, #tpu.memory_space<vmem>>, %arg9: memref<8x36x1xf32, #tpu.memory_space<vmem>>, %arg10: memref<56x36xbf16, #tpu.memory_space<vmem>>, %arg11: memref<56x1xf32, #tpu.memory_space<vmem>>, %arg12: memref<25x16x56xbf16, #tpu.memory_space<vmem>>, %arg13: memref<16x1xf32, #tpu.memory_space<vmem>>, %arg14: memref<1x16x384xf32, #tpu.memory_space<vmem>>, %arg15: memref<64x512xbf16, #tpu.memory_space<vmem>>) attributes {dimension_semantics = [#tpu.dimension_semantics<parallel>], iteration_bounds = array<i64: 2>, scalar_prefetch = 0 : i64, scratch_operands = 1 : i64, tpu.core_type = #tpu.core_type<tc>, window_params = [{transform_indices = @transform_0, window_bounds = array<i64: 1, 4, 384>}, {pipeline_mode = #tpu.pipeline_mode<synchronous>, transform_indices = @transform_1, window_bounds = array<i64: 1, 384>}, {transform_indices = @transform_2, window_bounds = array<i64: 1, 1>}, {pipeline_mode = #tpu.pipeline_mode<synchronous>, transform_indices = @transform_3, window_bounds = array<i64: 25, 56, 4>}, {pipeline_mode = #tpu.pipeline_mode<synchronous>, transform_indices = @transform_4, window_bounds = array<i64: 56, 1>}, {pipeline_mode = #tpu.pipeline_mode<synchronous>, transform_indices = @transform_5, window_bounds = array<i64: 36, 56>}, {pipeline_mode = #tpu.pipeline_mode<synchronous>, transform_indices = @transform_6, window_bounds = array<i64: 36, 1>}, {pipeline_mode = #tpu.pipeline_mode<synchronous>, transform_indices = @transform_7, window_bounds = array<i64: 72, 36, 36>}, {pipeline_mode = #tpu.pipeline_mode<synchronous>, transform_indices = @transform_8, window_bounds = array<i64: 8, 36, 1>}, {pipeline_mode = #tpu.pipeline_mode<synchronous>, transform_indices = @transform_9, window_bounds = array<i64: 56, 36>}, {pipeline_mode = #tpu.pipeline_mode<synchronous>, transform_indices = @transform_10, window_bounds = array<i64: 56, 1>}, {pipeline_mode = #tpu.pipeline_mode<synchronous>, transform_indices = @transform_11, window_bounds = array<i64: 25, 16, 56>}, {pipeline_mode = #tpu.pipeline_mode<synchronous>, transform_indices = @transform_12, window_bounds = array<i64: 16, 1>}, {transform_indices = @transform_13, window_bounds = array<i64: 1, 16, 384>}]} {
    %c0 = arith.constant 0 : index
    %c0_0 = arith.constant 0 : index
    %0 = memref.load %arg3[%c0, %c0_0] : memref<1x1xf32, #tpu.memory_space<smem>>
    %c0_1 = arith.constant 0 : index
    %c0_2 = arith.constant 0 : index
    %1 = vector.load %arg2[%c0_1, %c0_2] : memref<1x384xf32, #tpu.memory_space<vmem>>, vector<1x384xf32>
    %cst = arith.constant 0.000000e+00 : bf16
    %2 = vector.broadcast %cst : bf16 to vector<64x50xbf16>
    %c0_3 = arith.constant 0 : index
    %c0_4 = arith.constant 0 : index
    %3 = vector.load %arg15[%c0_3, %c0_4] : memref<64x512xbf16, #tpu.memory_space<vmem>>, vector<64x50xbf16>
    tpu.vector_store %arg15[%c0_3, %c0_4], %2 {strides = array<i32>} : memref<64x512xbf16, #tpu.memory_space<vmem>>, vector<64x50xbf16>,
    %cst_5 = arith.constant 0.000000e+00 : bf16
    %4 = vector.broadcast %cst_5 : bf16 to vector<64x78xbf16>
    %c0_6 = arith.constant 0 : index
    %c434 = arith.constant 434 : index
    %5 = vector.load %arg15[%c0_6, %c434] : memref<64x512xbf16, #tpu.memory_space<vmem>>, vector<64x78xbf16>
    tpu.vector_store %arg15[%c0_6, %c434], %4 {strides = array<i32>} : memref<64x512xbf16, #tpu.memory_space<vmem>>, vector<64x78xbf16>,
    %c0_7 = arith.constant 0 : index
    %c0_8 = arith.constant 0 : index
    %c0_9 = arith.constant 0 : index
    %6 = vector.load %arg1[%c0_7, %c0_8, %c0_9] : memref<1x4x384xf32, #tpu.memory_space<vmem>>, vector<1x4x384xf32>
    %7 = vector.shape_cast %6 : vector<1x4x384xf32> to vector<4x384xf32>
    %8 = arith.truncf %7 : vector<4x384xf32> to vector<4x384xbf16>
    %c0_10 = arith.constant 0 : index
    %c50 = arith.constant 50 : index
    %9 = vector.load %arg15[%c0_10, %c50] : memref<64x512xbf16, #tpu.memory_space<vmem>>, vector<4x384xbf16>
    tpu.vector_store %arg15[%c0_10, %c50], %8 {strides = array<i32>} : memref<64x512xbf16, #tpu.memory_space<vmem>>, vector<4x384xbf16>,
    %c0_11 = arith.constant 0 : index
    %c0_12 = arith.constant 0 : index
    %c0_13 = arith.constant 0 : index
    %10 = vector.load %arg4[%c0_11, %c0_12, %c0_13] : memref<25x56x4xbf16, #tpu.memory_space<vmem>>, vector<1x56x4xbf16>
    %11 = vector.shape_cast %10 : vector<1x56x4xbf16> to vector<56x4xbf16>
    %c0_14 = arith.constant 0 : index
    %c0_15 = arith.constant 0 : index
    %12 = vector.load %arg15[%c0_14, %c0_15] : memref<64x512xbf16, #tpu.memory_space<vmem>>, vector<4x384xbf16>
    %cst_16 = arith.constant dense<0.000000e+00> : vector<56x384xf32>
    %13 = tpu.matmul %11, %12, %cst_16 {dimension_numbers = #tpu.dot_dimension_numbers<[1], [0], [0], [1], [0, 0, 1, 1], [], []>} : vector<56x4xbf16>, vector<4x384xbf16>, vector<56x384xf32> -> vector<56x384xf32>
    %c1 = arith.constant 1 : index
    %c0_17 = arith.constant 0 : index
    %c0_18 = arith.constant 0 : index
    %14 = vector.load %arg4[%c1, %c0_17, %c0_18] : memref<25x56x4xbf16, #tpu.memory_space<vmem>>, vector<1x56x4xbf16>
    %15 = vector.shape_cast %14 : vector<1x56x4xbf16> to vector<56x4xbf16>
    %c0_19 = arith.constant 0 : index
    %c1_20 = arith.constant 1 : index
    %16 = vector.load %arg15[%c0_19, %c1_20] : memref<64x512xbf16, #tpu.memory_space<vmem>>, vector<4x384xbf16>
    %cst_21 = arith.constant dense<0.000000e+00> : vector<56x384xf32>
    %17 = tpu.matmul %15, %16, %cst_21 {dimension_numbers = #tpu.dot_dimension_numbers<[1], [0], [0], [1], [0, 0, 1, 1], [], []>} : vector<56x4xbf16>, vector<4x384xbf16>, vector<56x384xf32> -> vector<56x384xf32>
    %18 = arith.addf %13, %17 : vector<56x384xf32>
    %c2 = arith.constant 2 : index
    %c0_22 = arith.constant 0 : index
    %c0_23 = arith.constant 0 : index
    %19 = vector.load %arg4[%c2, %c0_22, %c0_23] : memref<25x56x4xbf16, #tpu.memory_space<vmem>>, vector<1x56x4xbf16>
    %20 = vector.shape_cast %19 : vector<1x56x4xbf16> to vector<56x4xbf16>
    %c0_24 = arith.constant 0 : index
    %c2_25 = arith.constant 2 : index
    %21 = vector.load %arg15[%c0_24, %c2_25] : memref<64x512xbf16, #tpu.memory_space<vmem>>, vector<4x384xbf16>
    %cst_26 = arith.constant dense<0.000000e+00> : vector<56x384xf32>
    %22 = tpu.matmul %20, %21, %cst_26 {dimension_numbers = #tpu.dot_dimension_numbers<[1], [0], [0], [1], [0, 0, 1, 1], [], []>} : vector<56x4xbf16>, vector<4x384xbf16>, vector<56x384xf32> -> vector<56x384xf32>
    %23 = arith.addf %18, %22 : vector<56x384xf32>
    %c3 = arith.constant 3 : index
    %c0_27 = arith.constant 0 : index
    %c0_28 = arith.constant 0 : index
    %24 = vector.load %arg4[%c3, %c0_27, %c0_28] : memref<25x56x4xbf16, #tpu.memory_space<vmem>>, vector<1x56x4xbf16>
    %25 = vector.shape_cast %24 : vector<1x56x4xbf16> to vector<56x4xbf16>
    %c0_29 = arith.constant 0 : index
    %c3_30 = arith.constant 3 : index
    %26 = vector.load %arg15[%c0_29, %c3_30] : memref<64x512xbf16, #tpu.memory_space<vmem>>, vector<4x384xbf16>
    %cst_31 = arith.constant dense<0.000000e+00> : vector<56x384xf32>
    %27 = tpu.matmul %25, %26, %cst_31 {dimension_numbers = #tpu.dot_dimension_numbers<[1], [0], [0], [1], [0, 0, 1, 1], [], []>} : vector<56x4xbf16>, vector<4x384xbf16>, vector<56x384xf32> -> vector<56x384xf32>
    %28 = arith.addf %23, %27 : vector<56x384xf32>
    %c4 = arith.constant 4 : index
    %c0_32 = arith.constant 0 : index
    %c0_33 = arith.constant 0 : index
    %29 = vector.load %arg4[%c4, %c0_32, %c0_33] : memref<25x56x4xbf16, #tpu.memory_space<vmem>>, vector<1x56x4xbf16>
    %30 = vector.shape_cast %29 : vector<1x56x4xbf16> to vector<56x4xbf16>
    %c0_34 = arith.constant 0 : index
    %c4_35 = arith.constant 4 : index
    %31 = vector.load %arg15[%c0_34, %c4_35] : memref<64x512xbf16, #tpu.memory_space<vmem>>, vector<4x384xbf16>
    %cst_36 = arith.constant dense<0.000000e+00> : vector<56x384xf32>
    %32 = tpu.matmul %30, %31, %cst_36 {dimension_numbers = #tpu.dot_dimension_numbers<[1], [0], [0], [1], [0, 0, 1, 1], [], []>} : vector<56x4xbf16>, vector<4x384xbf16>, vector<56x384xf32> -> vector<56x384xf32>
    %33 = arith.addf %28, %32 : vector<56x384xf32>
    %c5 = arith.constant 5 : index
    %c0_37 = arith.constant 0 : index
    %c0_38 = arith.constant 0 : index
    %34 = vector.load %arg4[%c5, %c0_37, %c0_38] : memref<25x56x4xbf16, #tpu.memory_space<vmem>>, vector<1x56x4xbf16>
    %35 = vector.shape_cast %34 : vector<1x56x4xbf16> to vector<56x4xbf16>
    %c0_39 = arith.constant 0 : index
    %c24 = arith.constant 24 : index
    %36 = vector.load %arg15[%c0_39, %c24] : memref<64x512xbf16, #tpu.memory_space<vmem>>, vector<4x384xbf16>
    %cst_40 = arith.constant dense<0.000000e+00> : vector<56x384xf32>
    %37 = tpu.matmul %35, %36, %cst_40 {dimension_numbers = #tpu.dot_dimension_numbers<[1], [0], [0], [1], [0, 0, 1, 1], [], []>} : vector<56x4xbf16>, vector<4x384xbf16>, vector<56x384xf32> -> vector<56x384xf32>
    %38 = arith.addf %33, %37 : vector<56x384xf32>
    %c6 = arith.constant 6 : index
    %c0_41 = arith.constant 0 : index
    %c0_42 = arith.constant 0 : index
    %39 = vector.load %arg4[%c6, %c0_41, %c0_42] : memref<25x56x4xbf16, #tpu.memory_space<vmem>>, vector<1x56x4xbf16>
    %40 = vector.shape_cast %39 : vector<1x56x4xbf16> to vector<56x4xbf16>
    %c0_43 = arith.constant 0 : index
    %c25 = arith.constant 25 : index
    %41 = vector.load %arg15[%c0_43, %c25] : memref<64x512xbf16, #tpu.memory_space<vmem>>, vector<4x384xbf16>
    %cst_44 = arith.constant dense<0.000000e+00> : vector<56x384xf32>
    %42 = tpu.matmul %40, %41, %cst_44 {dimension_numbers = #tpu.dot_dimension_numbers<[1], [0], [0], [1], [0, 0, 1, 1], [], []>} : vector<56x4xbf16>, vector<4x384xbf16>, vector<56x384xf32> -> vector<56x384xf32>
    %43 = arith.addf %38, %42 : vector<56x384xf32>
    %c7 = arith.constant 7 : index
    %c0_45 = arith.constant 0 : index
    %c0_46 = arith.constant 0 : index
    %44 = vector.load %arg4[%c7, %c0_45, %c0_46] : memref<25x56x4xbf16, #tpu.memory_space<vmem>>, vector<1x56x4xbf16>
    %45 = vector.shape_cast %44 : vector<1x56x4xbf16> to vector<56x4xbf16>
    %c0_47 = arith.constant 0 : index
    %c26 = arith.constant 26 : index
    %46 = vector.load %arg15[%c0_47, %c26] : memref<64x512xbf16, #tpu.memory_space<vmem>>, vector<4x384xbf16>
    %cst_48 = arith.constant dense<0.000000e+00> : vector<56x384xf32>
    %47 = tpu.matmul %45, %46, %cst_48 {dimension_numbers = #tpu.dot_dimension_numbers<[1], [0], [0], [1], [0, 0, 1, 1], [], []>} : vector<56x4xbf16>, vector<4x384xbf16>, vector<56x384xf32> -> vector<56x384xf32>
    %48 = arith.addf %43, %47 : vector<56x384xf32>
    %c8 = arith.constant 8 : index
    %c0_49 = arith.constant 0 : index
    %c0_50 = arith.constant 0 : index
    %49 = vector.load %arg4[%c8, %c0_49, %c0_50] : memref<25x56x4xbf16, #tpu.memory_space<vmem>>, vector<1x56x4xbf16>
    %50 = vector.shape_cast %49 : vector<1x56x4xbf16> to vector<56x4xbf16>
    %c0_51 = arith.constant 0 : index
    %c27 = arith.constant 27 : index
    %51 = vector.load %arg15[%c0_51, %c27] : memref<64x512xbf16, #tpu.memory_space<vmem>>, vector<4x384xbf16>
    %cst_52 = arith.constant dense<0.000000e+00> : vector<56x384xf32>
    %52 = tpu.matmul %50, %51, %cst_52 {dimension_numbers = #tpu.dot_dimension_numbers<[1], [0], [0], [1], [0, 0, 1, 1], [], []>} : vector<56x4xbf16>, vector<4x384xbf16>, vector<56x384xf32> -> vector<56x384xf32>
    %53 = arith.addf %48, %52 : vector<56x384xf32>
    %c9 = arith.constant 9 : index
    %c0_53 = arith.constant 0 : index
    %c0_54 = arith.constant 0 : index
    %54 = vector.load %arg4[%c9, %c0_53, %c0_54] : memref<25x56x4xbf16, #tpu.memory_space<vmem>>, vector<1x56x4xbf16>
    %55 = vector.shape_cast %54 : vector<1x56x4xbf16> to vector<56x4xbf16>
    %c0_55 = arith.constant 0 : index
    %c28 = arith.constant 28 : index
    %56 = vector.load %arg15[%c0_55, %c28] : memref<64x512xbf16, #tpu.memory_space<vmem>>, vector<4x384xbf16>
    %cst_56 = arith.constant dense<0.000000e+00> : vector<56x384xf32>
    %57 = tpu.matmul %55, %56, %cst_56 {dimension_numbers = #tpu.dot_dimension_numbers<[1], [0], [0], [1], [0, 0, 1, 1], [], []>} : vector<56x4xbf16>, vector<4x384xbf16>, vector<56x384xf32> -> vector<56x384xf32>
    %58 = arith.addf %53, %57 : vector<56x384xf32>
    %c10 = arith.constant 10 : index
    %c0_57 = arith.constant 0 : index
    %c0_58 = arith.constant 0 : index
    %59 = vector.load %arg4[%c10, %c0_57, %c0_58] : memref<25x56x4xbf16, #tpu.memory_space<vmem>>, vector<1x56x4xbf16>
    %60 = vector.shape_cast %59 : vector<1x56x4xbf16> to vector<56x4xbf16>
    %c0_59 = arith.constant 0 : index
    %c48 = arith.constant 48 : index
    %61 = vector.load %arg15[%c0_59, %c48] : memref<64x512xbf16, #tpu.memory_space<vmem>>, vector<4x384xbf16>
    %cst_60 = arith.constant dense<0.000000e+00> : vector<56x384xf32>
    %62 = tpu.matmul %60, %61, %cst_60 {dimension_numbers = #tpu.dot_dimension_numbers<[1], [0], [0], [1], [0, 0, 1, 1], [], []>} : vector<56x4xbf16>, vector<4x384xbf16>, vector<56x384xf32> -> vector<56x384xf32>
    %63 = arith.addf %58, %62 : vector<56x384xf32>
    %c11 = arith.constant 11 : index
    %c0_61 = arith.constant 0 : index
    %c0_62 = arith.constant 0 : index
    %64 = vector.load %arg4[%c11, %c0_61, %c0_62] : memref<25x56x4xbf16, #tpu.memory_space<vmem>>, vector<1x56x4xbf16>
    %65 = vector.shape_cast %64 : vector<1x56x4xbf16> to vector<56x4xbf16>
    %c0_63 = arith.constant 0 : index
    %c49 = arith.constant 49 : index
    %66 = vector.load %arg15[%c0_63, %c49] : memref<64x512xbf16, #tpu.memory_space<vmem>>, vector<4x384xbf16>
    %cst_64 = arith.constant dense<0.000000e+00> : vector<56x384xf32>
    %67 = tpu.matmul %65, %66, %cst_64 {dimension_numbers = #tpu.dot_dimension_numbers<[1], [0], [0], [1], [0, 0, 1, 1], [], []>} : vector<56x4xbf16>, vector<4x384xbf16>, vector<56x384xf32> -> vector<56x384xf32>
    %68 = arith.addf %63, %67 : vector<56x384xf32>
    %c12 = arith.constant 12 : index
    %c0_65 = arith.constant 0 : index
    %c0_66 = arith.constant 0 : index
    %69 = vector.load %arg4[%c12, %c0_65, %c0_66] : memref<25x56x4xbf16, #tpu.memory_space<vmem>>, vector<1x56x4xbf16>
    %70 = vector.shape_cast %69 : vector<1x56x4xbf16> to vector<56x4xbf16>
    %c0_67 = arith.constant 0 : index
    %c50_68 = arith.constant 50 : index
    %71 = vector.load %arg15[%c0_67, %c50_68] : memref<64x512xbf16, #tpu.memory_space<vmem>>, vector<4x384xbf16>
    %cst_69 = arith.constant dense<0.000000e+00> : vector<56x384xf32>
    %72 = tpu.matmul %70, %71, %cst_69 {dimension_numbers = #tpu.dot_dimension_numbers<[1], [0], [0], [1], [0, 0, 1, 1], [], []>} : vector<56x4xbf16>, vector<4x384xbf16>, vector<56x384xf32> -> vector<56x384xf32>
    %73 = arith.addf %68, %72 : vector<56x384xf32>
    %c13 = arith.constant 13 : index
    %c0_70 = arith.constant 0 : index
    %c0_71 = arith.constant 0 : index
    %74 = vector.load %arg4[%c13, %c0_70, %c0_71] : memref<25x56x4xbf16, #tpu.memory_space<vmem>>, vector<1x56x4xbf16>
    %75 = vector.shape_cast %74 : vector<1x56x4xbf16> to vector<56x4xbf16>
    %c0_72 = arith.constant 0 : index
    %c51 = arith.constant 51 : index
    %76 = vector.load %arg15[%c0_72, %c51] : memref<64x512xbf16, #tpu.memory_space<vmem>>, vector<4x384xbf16>
    %cst_73 = arith.constant dense<0.000000e+00> : vector<56x384xf32>
    %77 = tpu.matmul %75, %76, %cst_73 {dimension_numbers = #tpu.dot_dimension_numbers<[1], [0], [0], [1], [0, 0, 1, 1], [], []>} : vector<56x4xbf16>, vector<4x384xbf16>, vector<56x384xf32> -> vector<56x384xf32>
    %78 = arith.addf %73, %77 : vector<56x384xf32>
    %c14 = arith.constant 14 : index
    %c0_74 = arith.constant 0 : index
    %c0_75 = arith.constant 0 : index
    %79 = vector.load %arg4[%c14, %c0_74, %c0_75] : memref<25x56x4xbf16, #tpu.memory_space<vmem>>, vector<1x56x4xbf16>
    %80 = vector.shape_cast %79 : vector<1x56x4xbf16> to vector<56x4xbf16>
    %c0_76 = arith.constant 0 : index
    %c52 = arith.constant 52 : index
    %81 = vector.load %arg15[%c0_76, %c52] : memref<64x512xbf16, #tpu.memory_space<vmem>>, vector<4x384xbf16>
    %cst_77 = arith.constant dense<0.000000e+00> : vector<56x384xf32>
    %82 = tpu.matmul %80, %81, %cst_77 {dimension_numbers = #tpu.dot_dimension_numbers<[1], [0], [0], [1], [0, 0, 1, 1], [], []>} : vector<56x4xbf16>, vector<4x384xbf16>, vector<56x384xf32> -> vector<56x384xf32>
    %83 = arith.addf %78, %82 : vector<56x384xf32>
    %c15 = arith.constant 15 : index
    %c0_78 = arith.constant 0 : index
    %c0_79 = arith.constant 0 : index
    %84 = vector.load %arg4[%c15, %c0_78, %c0_79] : memref<25x56x4xbf16, #tpu.memory_space<vmem>>, vector<1x56x4xbf16>
    %85 = vector.shape_cast %84 : vector<1x56x4xbf16> to vector<56x4xbf16>
    %c0_80 = arith.constant 0 : index
    %c72 = arith.constant 72 : index
    %86 = vector.load %arg15[%c0_80, %c72] : memref<64x512xbf16, #tpu.memory_space<vmem>>, vector<4x384xbf16>
    %cst_81 = arith.constant dense<0.000000e+00> : vector<56x384xf32>
    %87 = tpu.matmul %85, %86, %cst_81 {dimension_numbers = #tpu.dot_dimension_numbers<[1], [0], [0], [1], [0, 0, 1, 1], [], []>} : vector<56x4xbf16>, vector<4x384xbf16>, vector<56x384xf32> -> vector<56x384xf32>
    %88 = arith.addf %83, %87 : vector<56x384xf32>
    %c16 = arith.constant 16 : index
    %c0_82 = arith.constant 0 : index
    %c0_83 = arith.constant 0 : index
    %89 = vector.load %arg4[%c16, %c0_82, %c0_83] : memref<25x56x4xbf16, #tpu.memory_space<vmem>>, vector<1x56x4xbf16>
    %90 = vector.shape_cast %89 : vector<1x56x4xbf16> to vector<56x4xbf16>
    %c0_84 = arith.constant 0 : index
    %c73 = arith.constant 73 : index
    %91 = vector.load %arg15[%c0_84, %c73] : memref<64x512xbf16, #tpu.memory_space<vmem>>, vector<4x384xbf16>
    %cst_85 = arith.constant dense<0.000000e+00> : vector<56x384xf32>
    %92 = tpu.matmul %90, %91, %cst_85 {dimension_numbers = #tpu.dot_dimension_numbers<[1], [0], [0], [1], [0, 0, 1, 1], [], []>} : vector<56x4xbf16>, vector<4x384xbf16>, vector<56x384xf32> -> vector<56x384xf32>
    %93 = arith.addf %88, %92 : vector<56x384xf32>
    %c17 = arith.constant 17 : index
    %c0_86 = arith.constant 0 : index
    %c0_87 = arith.constant 0 : index
    %94 = vector.load %arg4[%c17, %c0_86, %c0_87] : memref<25x56x4xbf16, #tpu.memory_space<vmem>>, vector<1x56x4xbf16>
    %95 = vector.shape_cast %94 : vector<1x56x4xbf16> to vector<56x4xbf16>
    %c0_88 = arith.constant 0 : index
    %c74 = arith.constant 74 : index
    %96 = vector.load %arg15[%c0_88, %c74] : memref<64x512xbf16, #tpu.memory_space<vmem>>, vector<4x384xbf16>
    %cst_89 = arith.constant dense<0.000000e+00> : vector<56x384xf32>
    %97 = tpu.matmul %95, %96, %cst_89 {dimension_numbers = #tpu.dot_dimension_numbers<[1], [0], [0], [1], [0, 0, 1, 1], [], []>} : vector<56x4xbf16>, vector<4x384xbf16>, vector<56x384xf32> -> vector<56x384xf32>
    %98 = arith.addf %93, %97 : vector<56x384xf32>
    %c18 = arith.constant 18 : index
    %c0_90 = arith.constant 0 : index
    %c0_91 = arith.constant 0 : index
    %99 = vector.load %arg4[%c18, %c0_90, %c0_91] : memref<25x56x4xbf16, #tpu.memory_space<vmem>>, vector<1x56x4xbf16>
    %100 = vector.shape_cast %99 : vector<1x56x4xbf16> to vector<56x4xbf16>
    %c0_92 = arith.constant 0 : index
    %c75 = arith.constant 75 : index
    %101 = vector.load %arg15[%c0_92, %c75] : memref<64x512xbf16, #tpu.memory_space<vmem>>, vector<4x384xbf16>
    %cst_93 = arith.constant dense<0.000000e+00> : vector<56x384xf32>
    %102 = tpu.matmul %100, %101, %cst_93 {dimension_numbers = #tpu.dot_dimension_numbers<[1], [0], [0], [1], [0, 0, 1, 1], [], []>} : vector<56x4xbf16>, vector<4x384xbf16>, vector<56x384xf32> -> vector<56x384xf32>
    %103 = arith.addf %98, %102 : vector<56x384xf32>
    %c19 = arith.constant 19 : index
    %c0_94 = arith.constant 0 : index
    %c0_95 = arith.constant 0 : index
    %104 = vector.load %arg4[%c19, %c0_94, %c0_95] : memref<25x56x4xbf16, #tpu.memory_space<vmem>>, vector<1x56x4xbf16>
    %105 = vector.shape_cast %104 : vector<1x56x4xbf16> to vector<56x4xbf16>
    %c0_96 = arith.constant 0 : index
    %c76 = arith.constant 76 : index
    %106 = vector.load %arg15[%c0_96, %c76] : memref<64x512xbf16, #tpu.memory_space<vmem>>, vector<4x384xbf16>
    %cst_97 = arith.constant dense<0.000000e+00> : vector<56x384xf32>
    %107 = tpu.matmul %105, %106, %cst_97 {dimension_numbers = #tpu.dot_dimension_numbers<[1], [0], [0], [1], [0, 0, 1, 1], [], []>} : vector<56x4xbf16>, vector<4x384xbf16>, vector<56x384xf32> -> vector<56x384xf32>
    %108 = arith.addf %103, %107 : vector<56x384xf32>
    %c20 = arith.constant 20 : index
    %c0_98 = arith.constant 0 : index
    %c0_99 = arith.constant 0 : index
    %109 = vector.load %arg4[%c20, %c0_98, %c0_99] : memref<25x56x4xbf16, #tpu.memory_space<vmem>>, vector<1x56x4xbf16>
    %110 = vector.shape_cast %109 : vector<1x56x4xbf16> to vector<56x4xbf16>
    %c0_100 = arith.constant 0 : index
    %c96 = arith.constant 96 : index
    %111 = vector.load %arg15[%c0_100, %c96] : memref<64x512xbf16, #tpu.memory_space<vmem>>, vector<4x384xbf16>
    %cst_101 = arith.constant dense<0.000000e+00> : vector<56x384xf32>
    %112 = tpu.matmul %110, %111, %cst_101 {dimension_numbers = #tpu.dot_dimension_numbers<[1], [0], [0], [1], [0, 0, 1, 1], [], []>} : vector<56x4xbf16>, vector<4x384xbf16>, vector<56x384xf32> -> vector<56x384xf32>
    %113 = arith.addf %108, %112 : vector<56x384xf32>
    %c21 = arith.constant 21 : index
    %c0_102 = arith.constant 0 : index
    %c0_103 = arith.constant 0 : index
    %114 = vector.load %arg4[%c21, %c0_102, %c0_103] : memref<25x56x4xbf16, #tpu.memory_space<vmem>>, vector<1x56x4xbf16>
    %115 = vector.shape_cast %114 : vector<1x56x4xbf16> to vector<56x4xbf16>
    %c0_104 = arith.constant 0 : index
    %c97 = arith.constant 97 : index
    %116 = vector.load %arg15[%c0_104, %c97] : memref<64x512xbf16, #tpu.memory_space<vmem>>, vector<4x384xbf16>
    %cst_105 = arith.constant dense<0.000000e+00> : vector<56x384xf32>
    %117 = tpu.matmul %115, %116, %cst_105 {dimension_numbers = #tpu.dot_dimension_numbers<[1], [0], [0], [1], [0, 0, 1, 1], [], []>} : vector<56x4xbf16>, vector<4x384xbf16>, vector<56x384xf32> -> vector<56x384xf32>
    %118 = arith.addf %113, %117 : vector<56x384xf32>
    %c22 = arith.constant 22 : index
    %c0_106 = arith.constant 0 : index
    %c0_107 = arith.constant 0 : index
    %119 = vector.load %arg4[%c22, %c0_106, %c0_107] : memref<25x56x4xbf16, #tpu.memory_space<vmem>>, vector<1x56x4xbf16>
    %120 = vector.shape_cast %119 : vector<1x56x4xbf16> to vector<56x4xbf16>
    %c0_108 = arith.constant 0 : index
    %c98 = arith.constant 98 : index
    %121 = vector.load %arg15[%c0_108, %c98] : memref<64x512xbf16, #tpu.memory_space<vmem>>, vector<4x384xbf16>
    %cst_109 = arith.constant dense<0.000000e+00> : vector<56x384xf32>
    %122 = tpu.matmul %120, %121, %cst_109 {dimension_numbers = #tpu.dot_dimension_numbers<[1], [0], [0], [1], [0, 0, 1, 1], [], []>} : vector<56x4xbf16>, vector<4x384xbf16>, vector<56x384xf32> -> vector<56x384xf32>
    %123 = arith.addf %118, %122 : vector<56x384xf32>
    %c23 = arith.constant 23 : index
    %c0_110 = arith.constant 0 : index
    %c0_111 = arith.constant 0 : index
    %124 = vector.load %arg4[%c23, %c0_110, %c0_111] : memref<25x56x4xbf16, #tpu.memory_space<vmem>>, vector<1x56x4xbf16>
    %125 = vector.shape_cast %124 : vector<1x56x4xbf16> to vector<56x4xbf16>
    %c0_112 = arith.constant 0 : index
    %c99 = arith.constant 99 : index
    %126 = vector.load %arg15[%c0_112, %c99] : memref<64x512xbf16, #tpu.memory_space<vmem>>, vector<4x384xbf16>
    %cst_113 = arith.constant dense<0.000000e+00> : vector<56x384xf32>
    %127 = tpu.matmul %125, %126, %cst_113 {dimension_numbers = #tpu.dot_dimension_numbers<[1], [0], [0], [1], [0, 0, 1, 1], [], []>} : vector<56x4xbf16>, vector<4x384xbf16>, vector<56x384xf32> -> vector<56x384xf32>
    %128 = arith.addf %123, %127 : vector<56x384xf32>
    %c24_114 = arith.constant 24 : index
    %c0_115 = arith.constant 0 : index
    %c0_116 = arith.constant 0 : index
    %129 = vector.load %arg4[%c24_114, %c0_115, %c0_116] : memref<25x56x4xbf16, #tpu.memory_space<vmem>>, vector<1x56x4xbf16>
    %130 = vector.shape_cast %129 : vector<1x56x4xbf16> to vector<56x4xbf16>
    %c0_117 = arith.constant 0 : index
    %c100 = arith.constant 100 : index
    %131 = vector.load %arg15[%c0_117, %c100] : memref<64x512xbf16, #tpu.memory_space<vmem>>, vector<4x384xbf16>
    %cst_118 = arith.constant dense<0.000000e+00> : vector<56x384xf32>
    %132 = tpu.matmul %130, %131, %cst_118 {dimension_numbers = #tpu.dot_dimension_numbers<[1], [0], [0], [1], [0, 0, 1, 1], [], []>} : vector<56x4xbf16>, vector<4x384xbf16>, vector<56x384xf32> -> vector<56x384xf32>
    %133 = arith.addf %128, %132 : vector<56x384xf32>
    %c0_119 = arith.constant 0 : index
    %c0_120 = arith.constant 0 : index
    %134 = vector.load %arg5[%c0_119, %c0_120] : memref<56x1xf32, #tpu.memory_space<vmem>>, vector<56x1xf32>
    %135 = vector.broadcast %134 : vector<56x1xf32> to vector<56x384xf32>
    %136 = arith.addf %133, %135 : vector<56x384xf32>
    %cst_121 = arith.constant 0.000000e+00 : f32
    %137 = vector.broadcast %cst_121 : f32 to vector<56x384xf32>
    %138 = arith.cmpf oge, %136, %137 : vector<56x384xf32>
    %139 = vector.broadcast %0 : f32 to vector<56x384xf32>
    %140 = arith.mulf %139, %136 : vector<56x384xf32>
    %141 = arith.select %138, %136, %140 : vector<56x384xi1>, vector<56x384xf32>
    %c0_122 = arith.constant 0 : index
    %c0_123 = arith.constant 0 : index
    %142 = vector.load %arg6[%c0_122, %c0_123] : memref<36x56xbf16, #tpu.memory_space<vmem>>, vector<36x56xbf16>
    %143 = arith.truncf %141 : vector<56x384xf32> to vector<56x384xbf16>
    %cst_124 = arith.constant dense<0.000000e+00> : vector<36x384xf32>
    %144 = tpu.matmul %142, %143, %cst_124 {dimension_numbers = #tpu.dot_dimension_numbers<[1], [0], [0], [1], [0, 0, 1, 1], [], []>} : vector<36x56xbf16>, vector<56x384xbf16>, vector<36x384xf32> -> vector<36x384xf32>
    %c0_125 = arith.constant 0 : index
    %c0_126 = arith.constant 0 : index
    %145 = vector.load %arg7[%c0_125, %c0_126] : memref<36x1xf32, #tpu.memory_space<vmem>>, vector<36x1xf32>
    %146 = vector.broadcast %145 : vector<36x1xf32> to vector<36x384xf32>
    %147 = arith.addf %144, %146 : vector<36x384xf32>
    %cst_127 = arith.constant 0.000000e+00 : f32
    %148 = vector.broadcast %cst_127 : f32 to vector<36x384xf32>
    %149 = arith.cmpf oge, %147, %148 : vector<36x384xf32>
    %150 = vector.broadcast %0 : f32 to vector<36x384xf32>
    %151 = arith.mulf %150, %147 : vector<36x384xf32>
    %152 = arith.select %149, %147, %151 : vector<36x384xi1>, vector<36x384xf32>
    %c0_i32 = arith.constant 0 : i32
    %c8_i32 = arith.constant 8 : i32
    %153 = arith.addi %c0_i32, %c8_i32 : i32
    %c1_i32 = arith.constant 1 : i32
    %154 = scf.for %arg16 = %c0_i32 to %153 step %c1_i32 iter_args(%arg17 = %152) -> (vector<36x384xf32>)  : i32 {
      %300 = vector.broadcast %1 : vector<1x384xf32> to vector<36x384xf32>
      %301 = arith.mulf %arg17, %300 : vector<36x384xf32>
      %302 = arith.truncf %301 : vector<36x384xf32> to vector<36x384xbf16>
      %c0_292 = arith.constant 0 : index
      %c50_293 = arith.constant 50 : index
      %303 = vector.load %arg15[%c0_292, %c50_293] : memref<64x512xbf16, #tpu.memory_space<vmem>>, vector<36x384xbf16>
      tpu.vector_store %arg15[%c0_292, %c50_293], %302 {strides = array<i32>} : memref<64x512xbf16, #tpu.memory_space<vmem>>, vector<36x384xbf16>,
      %c9_i32 = arith.constant 9 : i32
      %304 = arith.muli %arg16, %c9_i32 : i32
      %c0_i32_294 = arith.constant 0 : i32
      %305 = arith.addi %304, %c0_i32_294 : i32
      %306 = arith.index_cast %305 : i32 to index
      %c0_295 = arith.constant 0 : index
      %c0_296 = arith.constant 0 : index
      %307 = vector.load %arg8[%306, %c0_295, %c0_296] : memref<72x36x36xbf16, #tpu.memory_space<vmem>>, vector<1x36x36xbf16>
      %308 = vector.shape_cast %307 : vector<1x36x36xbf16> to vector<36x36xbf16>
      %c0_297 = arith.constant 0 : index
      %c25_298 = arith.constant 25 : index
      %309 = vector.load %arg15[%c0_297, %c25_298] : memref<64x512xbf16, #tpu.memory_space<vmem>>, vector<36x384xbf16>
      %cst_299 = arith.constant dense<0.000000e+00> : vector<36x384xf32>
      %310 = tpu.matmul %308, %309, %cst_299 {dimension_numbers = #tpu.dot_dimension_numbers<[1], [0], [0], [1], [0, 0, 1, 1], [], []>} : vector<36x36xbf16>, vector<36x384xbf16>, vector<36x384xf32> -> vector<36x384xf32>
      %c9_i32_300 = arith.constant 9 : i32
      %311 = arith.muli %arg16, %c9_i32_300 : i32
      %c1_i32_301 = arith.constant 1 : i32
      %312 = arith.addi %311, %c1_i32_301 : i32
      %313 = arith.index_cast %312 : i32 to index
      %c0_302 = arith.constant 0 : index
      %c0_303 = arith.constant 0 : index
      %314 = vector.load %arg8[%313, %c0_302, %c0_303] : memref<72x36x36xbf16, #tpu.memory_space<vmem>>, vector<1x36x36xbf16>
      %315 = vector.shape_cast %314 : vector<1x36x36xbf16> to vector<36x36xbf16>
      %c0_304 = arith.constant 0 : index
      %c26_305 = arith.constant 26 : index
      %316 = vector.load %arg15[%c0_304, %c26_305] : memref<64x512xbf16, #tpu.memory_space<vmem>>, vector<36x384xbf16>
      %cst_306 = arith.constant dense<0.000000e+00> : vector<36x384xf32>
      %317 = tpu.matmul %315, %316, %cst_306 {dimension_numbers = #tpu.dot_dimension_numbers<[1], [0], [0], [1], [0, 0, 1, 1], [], []>} : vector<36x36xbf16>, vector<36x384xbf16>, vector<36x384xf32> -> vector<36x384xf32>
      %318 = arith.addf %310, %317 : vector<36x384xf32>
      %c9_i32_307 = arith.constant 9 : i32
      %319 = arith.muli %arg16, %c9_i32_307 : i32
      %c2_i32 = arith.constant 2 : i32
      %320 = arith.addi %319, %c2_i32 : i32
      %321 = arith.index_cast %320 : i32 to index
      %c0_308 = arith.constant 0 : index
      %c0_309 = arith.constant 0 : index
      %322 = vector.load %arg8[%321, %c0_308, %c0_309] : memref<72x36x36xbf16, #tpu.memory_space<vmem>>, vector<1x36x36xbf16>
      %323 = vector.shape_cast %322 : vector<1x36x36xbf16> to vector<36x36xbf16>
      %c0_310 = arith.constant 0 : index
      %c27_311 = arith.constant 27 : index
      %324 = vector.load %arg15[%c0_310, %c27_311] : memref<64x512xbf16, #tpu.memory_space<vmem>>, vector<36x384xbf16>
      %cst_312 = arith.constant dense<0.000000e+00> : vector<36x384xf32>
      %325 = tpu.matmul %323, %324, %cst_312 {dimension_numbers = #tpu.dot_dimension_numbers<[1], [0], [0], [1], [0, 0, 1, 1], [], []>} : vector<36x36xbf16>, vector<36x384xbf16>, vector<36x384xf32> -> vector<36x384xf32>
      %326 = arith.addf %318, %325 : vector<36x384xf32>
      %c9_i32_313 = arith.constant 9 : i32
      %327 = arith.muli %arg16, %c9_i32_313 : i32
      %c3_i32 = arith.constant 3 : i32
      %328 = arith.addi %327, %c3_i32 : i32
      %329 = arith.index_cast %328 : i32 to index
      %c0_314 = arith.constant 0 : index
      %c0_315 = arith.constant 0 : index
      %330 = vector.load %arg8[%329, %c0_314, %c0_315] : memref<72x36x36xbf16, #tpu.memory_space<vmem>>, vector<1x36x36xbf16>
      %331 = vector.shape_cast %330 : vector<1x36x36xbf16> to vector<36x36xbf16>
      %c0_316 = arith.constant 0 : index
      %c49_317 = arith.constant 49 : index
      %332 = vector.load %arg15[%c0_316, %c49_317] : memref<64x512xbf16, #tpu.memory_space<vmem>>, vector<36x384xbf16>
      %cst_318 = arith.constant dense<0.000000e+00> : vector<36x384xf32>
      %333 = tpu.matmul %331, %332, %cst_318 {dimension_numbers = #tpu.dot_dimension_numbers<[1], [0], [0], [1], [0, 0, 1, 1], [], []>} : vector<36x36xbf16>, vector<36x384xbf16>, vector<36x384xf32> -> vector<36x384xf32>
      %334 = arith.addf %326, %333 : vector<36x384xf32>
      %c9_i32_319 = arith.constant 9 : i32
      %335 = arith.muli %arg16, %c9_i32_319 : i32
      %c4_i32 = arith.constant 4 : i32
      %336 = arith.addi %335, %c4_i32 : i32
      %337 = arith.index_cast %336 : i32 to index
      %c0_320 = arith.constant 0 : index
      %c0_321 = arith.constant 0 : index
      %338 = vector.load %arg8[%337, %c0_320, %c0_321] : memref<72x36x36xbf16, #tpu.memory_space<vmem>>, vector<1x36x36xbf16>
      %339 = vector.shape_cast %338 : vector<1x36x36xbf16> to vector<36x36xbf16>
      %c0_322 = arith.constant 0 : index
      %c50_323 = arith.constant 50 : index
      %340 = vector.load %arg15[%c0_322, %c50_323] : memref<64x512xbf16, #tpu.memory_space<vmem>>, vector<36x384xbf16>
      %cst_324 = arith.constant dense<0.000000e+00> : vector<36x384xf32>
      %341 = tpu.matmul %339, %340, %cst_324 {dimension_numbers = #tpu.dot_dimension_numbers<[1], [0], [0], [1], [0, 0, 1, 1], [], []>} : vector<36x36xbf16>, vector<36x384xbf16>, vector<36x384xf32> -> vector<36x384xf32>
      %342 = arith.addf %334, %341 : vector<36x384xf32>
      %c9_i32_325 = arith.constant 9 : i32
      %343 = arith.muli %arg16, %c9_i32_325 : i32
      %c5_i32 = arith.constant 5 : i32
      %344 = arith.addi %343, %c5_i32 : i32
      %345 = arith.index_cast %344 : i32 to index
      %c0_326 = arith.constant 0 : index
      %c0_327 = arith.constant 0 : index
      %346 = vector.load %arg8[%345, %c0_326, %c0_327] : memref<72x36x36xbf16, #tpu.memory_space<vmem>>, vector<1x36x36xbf16>
      %347 = vector.shape_cast %346 : vector<1x36x36xbf16> to vector<36x36xbf16>
      %c0_328 = arith.constant 0 : index
      %c51_329 = arith.constant 51 : index
      %348 = vector.load %arg15[%c0_328, %c51_329] : memref<64x512xbf16, #tpu.memory_space<vmem>>, vector<36x384xbf16>
      %cst_330 = arith.constant dense<0.000000e+00> : vector<36x384xf32>
      %349 = tpu.matmul %347, %348, %cst_330 {dimension_numbers = #tpu.dot_dimension_numbers<[1], [0], [0], [1], [0, 0, 1, 1], [], []>} : vector<36x36xbf16>, vector<36x384xbf16>, vector<36x384xf32> -> vector<36x384xf32>
      %350 = arith.addf %342, %349 : vector<36x384xf32>
      %c9_i32_331 = arith.constant 9 : i32
      %351 = arith.muli %arg16, %c9_i32_331 : i32
      %c6_i32 = arith.constant 6 : i32
      %352 = arith.addi %351, %c6_i32 : i32
      %353 = arith.index_cast %352 : i32 to index
      %c0_332 = arith.constant 0 : index
      %c0_333 = arith.constant 0 : index
      %354 = vector.load %arg8[%353, %c0_332, %c0_333] : memref<72x36x36xbf16, #tpu.memory_space<vmem>>, vector<1x36x36xbf16>
      %355 = vector.shape_cast %354 : vector<1x36x36xbf16> to vector<36x36xbf16>
      %c0_334 = arith.constant 0 : index
      %c73_335 = arith.constant 73 : index
      %356 = vector.load %arg15[%c0_334, %c73_335] : memref<64x512xbf16, #tpu.memory_space<vmem>>, vector<36x384xbf16>
      %cst_336 = arith.constant dense<0.000000e+00> : vector<36x384xf32>
      %357 = tpu.matmul %355, %356, %cst_336 {dimension_numbers = #tpu.dot_dimension_numbers<[1], [0], [0], [1], [0, 0, 1, 1], [], []>} : vector<36x36xbf16>, vector<36x384xbf16>, vector<36x384xf32> -> vector<36x384xf32>
      %358 = arith.addf %350, %357 : vector<36x384xf32>
      %c9_i32_337 = arith.constant 9 : i32
      %359 = arith.muli %arg16, %c9_i32_337 : i32
      %c7_i32 = arith.constant 7 : i32
      %360 = arith.addi %359, %c7_i32 : i32
      %361 = arith.index_cast %360 : i32 to index
      %c0_338 = arith.constant 0 : index
      %c0_339 = arith.constant 0 : index
      %362 = vector.load %arg8[%361, %c0_338, %c0_339] : memref<72x36x36xbf16, #tpu.memory_space<vmem>>, vector<1x36x36xbf16>
      %363 = vector.shape_cast %362 : vector<1x36x36xbf16> to vector<36x36xbf16>
      %c0_340 = arith.constant 0 : index
      %c74_341 = arith.constant 74 : index
      %364 = vector.load %arg15[%c0_340, %c74_341] : memref<64x512xbf16, #tpu.memory_space<vmem>>, vector<36x384xbf16>
      %cst_342 = arith.constant dense<0.000000e+00> : vector<36x384xf32>
      %365 = tpu.matmul %363, %364, %cst_342 {dimension_numbers = #tpu.dot_dimension_numbers<[1], [0], [0], [1], [0, 0, 1, 1], [], []>} : vector<36x36xbf16>, vector<36x384xbf16>, vector<36x384xf32> -> vector<36x384xf32>
      %366 = arith.addf %358, %365 : vector<36x384xf32>
      %c9_i32_343 = arith.constant 9 : i32
      %367 = arith.muli %arg16, %c9_i32_343 : i32
      %c8_i32_344 = arith.constant 8 : i32
      %368 = arith.addi %367, %c8_i32_344 : i32
      %369 = arith.index_cast %368 : i32 to index
      %c0_345 = arith.constant 0 : index
      %c0_346 = arith.constant 0 : index
      %370 = vector.load %arg8[%369, %c0_345, %c0_346] : memref<72x36x36xbf16, #tpu.memory_space<vmem>>, vector<1x36x36xbf16>
      %371 = vector.shape_cast %370 : vector<1x36x36xbf16> to vector<36x36xbf16>
      %c0_347 = arith.constant 0 : index
      %c75_348 = arith.constant 75 : index
      %372 = vector.load %arg15[%c0_347, %c75_348] : memref<64x512xbf16, #tpu.memory_space<vmem>>, vector<36x384xbf16>
      %cst_349 = arith.constant dense<0.000000e+00> : vector<36x384xf32>
      %373 = tpu.matmul %371, %372, %cst_349 {dimension_numbers = #tpu.dot_dimension_numbers<[1], [0], [0], [1], [0, 0, 1, 1], [], []>} : vector<36x36xbf16>, vector<36x384xbf16>, vector<36x384xf32> -> vector<36x384xf32>
      %374 = arith.addf %366, %373 : vector<36x384xf32>
      %375 = arith.index_cast %arg16 : i32 to index
      %c0_350 = arith.constant 0 : index
      %c0_351 = arith.constant 0 : index
      %376 = vector.load %arg9[%375, %c0_350, %c0_351] : memref<8x36x1xf32, #tpu.memory_space<vmem>>, vector<1x36x1xf32>
      %377 = vector.shape_cast %376 : vector<1x36x1xf32> to vector<36x1xf32>
      %378 = vector.broadcast %377 : vector<36x1xf32> to vector<36x384xf32>
      %379 = arith.addf %374, %378 : vector<36x384xf32>
      %cst_352 = arith.constant 0.000000e+00 : f32
      %380 = vector.broadcast %cst_352 : f32 to vector<36x384xf32>
      %381 = arith.cmpf oge, %379, %380 : vector<36x384xf32>
      %382 = vector.broadcast %0 : f32 to vector<36x384xf32>
      %383 = arith.mulf %382, %379 : vector<36x384xf32>
      %384 = arith.select %381, %379, %383 : vector<36x384xi1>, vector<36x384xf32>
      scf.yield %384 : vector<36x384xf32>
    }
    %c8_i32_128 = arith.constant 8 : i32
    %c0_129 = arith.constant 0 : index
    %c0_130 = arith.constant 0 : index
    %155 = vector.load %arg10[%c0_129, %c0_130] : memref<56x36xbf16, #tpu.memory_space<vmem>>, vector<56x36xbf16>
    %156 = arith.truncf %154 : vector<36x384xf32> to vector<36x384xbf16>
    %cst_131 = arith.constant dense<0.000000e+00> : vector<56x384xf32>
    %157 = tpu.matmul %155, %156, %cst_131 {dimension_numbers = #tpu.dot_dimension_numbers<[1], [0], [0], [1], [0, 0, 1, 1], [], []>} : vector<56x36xbf16>, vector<36x384xbf16>, vector<56x384xf32> -> vector<56x384xf32>
    %c0_132 = arith.constant 0 : index
    %c0_133 = arith.constant 0 : index
    %158 = vector.load %arg11[%c0_132, %c0_133] : memref<56x1xf32, #tpu.memory_space<vmem>>, vector<56x1xf32>
    %159 = vector.broadcast %158 : vector<56x1xf32> to vector<56x384xf32>
    %160 = arith.addf %157, %159 : vector<56x384xf32>
    %cst_134 = arith.constant 0.000000e+00 : f32
    %161 = vector.broadcast %cst_134 : f32 to vector<56x384xf32>
    %162 = arith.cmpf oge, %160, %161 : vector<56x384xf32>
    %163 = vector.broadcast %0 : f32 to vector<56x384xf32>
    %164 = arith.mulf %163, %160 : vector<56x384xf32>
    %165 = arith.select %162, %160, %164 : vector<56x384xi1>, vector<56x384xf32>
    %166 = vector.broadcast %1 : vector<1x384xf32> to vector<56x384xf32>
    %167 = arith.mulf %165, %166 : vector<56x384xf32>
    %168 = arith.truncf %167 : vector<56x384xf32> to vector<56x384xbf16>
    %c0_135 = arith.constant 0 : index
    %c50_136 = arith.constant 50 : index
    %169 = vector.load %arg15[%c0_135, %c50_136] : memref<64x512xbf16, #tpu.memory_space<vmem>>, vector<56x384xbf16>
    tpu.vector_store %arg15[%c0_135, %c50_136], %168 {strides = array<i32>} : memref<64x512xbf16, #tpu.memory_space<vmem>>, vector<56x384xbf16>,
    %c0_137 = arith.constant 0 : index
    %c0_138 = arith.constant 0 : index
    %c0_139 = arith.constant 0 : index
    %170 = vector.load %arg12[%c0_137, %c0_138, %c0_139] : memref<25x16x56xbf16, #tpu.memory_space<vmem>>, vector<1x16x56xbf16>
    %171 = vector.shape_cast %170 : vector<1x16x56xbf16> to vector<16x56xbf16>
    %c0_140 = arith.constant 0 : index
    %c0_141 = arith.constant 0 : index
    %172 = vector.load %arg15[%c0_140, %c0_141] : memref<64x512xbf16, #tpu.memory_space<vmem>>, vector<56x384xbf16>
    %cst_142 = arith.constant dense<0.000000e+00> : vector<16x384xf32>
    %173 = tpu.matmul %171, %172, %cst_142 {dimension_numbers = #tpu.dot_dimension_numbers<[1], [0], [0], [1], [0, 0, 1, 1], [], []>} : vector<16x56xbf16>, vector<56x384xbf16>, vector<16x384xf32> -> vector<16x384xf32>
    %c1_143 = arith.constant 1 : index
    %c0_144 = arith.constant 0 : index
    %c0_145 = arith.constant 0 : index
    %174 = vector.load %arg12[%c1_143, %c0_144, %c0_145] : memref<25x16x56xbf16, #tpu.memory_space<vmem>>, vector<1x16x56xbf16>
    %175 = vector.shape_cast %174 : vector<1x16x56xbf16> to vector<16x56xbf16>
    %c0_146 = arith.constant 0 : index
    %c1_147 = arith.constant 1 : index
    %176 = vector.load %arg15[%c0_146, %c1_147] : memref<64x512xbf16, #tpu.memory_space<vmem>>, vector<56x384xbf16>
    %cst_148 = arith.constant dense<0.000000e+00> : vector<16x384xf32>
    %177 = tpu.matmul %175, %176, %cst_148 {dimension_numbers = #tpu.dot_dimension_numbers<[1], [0], [0], [1], [0, 0, 1, 1], [], []>} : vector<16x56xbf16>, vector<56x384xbf16>, vector<16x384xf32> -> vector<16x384xf32>
    %178 = arith.addf %173, %177 : vector<16x384xf32>
    %c2_149 = arith.constant 2 : index
    %c0_150 = arith.constant 0 : index
    %c0_151 = arith.constant 0 : index
    %179 = vector.load %arg12[%c2_149, %c0_150, %c0_151] : memref<25x16x56xbf16, #tpu.memory_space<vmem>>, vector<1x16x56xbf16>
    %180 = vector.shape_cast %179 : vector<1x16x56xbf16> to vector<16x56xbf16>
    %c0_152 = arith.constant 0 : index
    %c2_153 = arith.constant 2 : index
    %181 = vector.load %arg15[%c0_152, %c2_153] : memref<64x512xbf16, #tpu.memory_space<vmem>>, vector<56x384xbf16>
    %cst_154 = arith.constant dense<0.000000e+00> : vector<16x384xf32>
    %182 = tpu.matmul %180, %181, %cst_154 {dimension_numbers = #tpu.dot_dimension_numbers<[1], [0], [0], [1], [0, 0, 1, 1], [], []>} : vector<16x56xbf16>, vector<56x384xbf16>, vector<16x384xf32> -> vector<16x384xf32>
    %183 = arith.addf %178, %182 : vector<16x384xf32>
    %c3_155 = arith.constant 3 : index
    %c0_156 = arith.constant 0 : index
    %c0_157 = arith.constant 0 : index
    %184 = vector.load %arg12[%c3_155, %c0_156, %c0_157] : memref<25x16x56xbf16, #tpu.memory_space<vmem>>, vector<1x16x56xbf16>
    %185 = vector.shape_cast %184 : vector<1x16x56xbf16> to vector<16x56xbf16>
    %c0_158 = arith.constant 0 : index
    %c3_159 = arith.constant 3 : index
    %186 = vector.load %arg15[%c0_158, %c3_159] : memref<64x512xbf16, #tpu.memory_space<vmem>>, vector<56x384xbf16>
    %cst_160 = arith.constant dense<0.000000e+00> : vector<16x384xf32>
    %187 = tpu.matmul %185, %186, %cst_160 {dimension_numbers = #tpu.dot_dimension_numbers<[1], [0], [0], [1], [0, 0, 1, 1], [], []>} : vector<16x56xbf16>, vector<56x384xbf16>, vector<16x384xf32> -> vector<16x384xf32>
    %188 = arith.addf %183, %187 : vector<16x384xf32>
    %c4_161 = arith.constant 4 : index
    %c0_162 = arith.constant 0 : index
    %c0_163 = arith.constant 0 : index
    %189 = vector.load %arg12[%c4_161, %c0_162, %c0_163] : memref<25x16x56xbf16, #tpu.memory_space<vmem>>, vector<1x16x56xbf16>
    %190 = vector.shape_cast %189 : vector<1x16x56xbf16> to vector<16x56xbf16>
    %c0_164 = arith.constant 0 : index
    %c4_165 = arith.constant 4 : index
    %191 = vector.load %arg15[%c0_164, %c4_165] : memref<64x512xbf16, #tpu.memory_space<vmem>>, vector<56x384xbf16>
    %cst_166 = arith.constant dense<0.000000e+00> : vector<16x384xf32>
    %192 = tpu.matmul %190, %191, %cst_166 {dimension_numbers = #tpu.dot_dimension_numbers<[1], [0], [0], [1], [0, 0, 1, 1], [], []>} : vector<16x56xbf16>, vector<56x384xbf16>, vector<16x384xf32> -> vector<16x384xf32>
    %193 = arith.addf %188, %192 : vector<16x384xf32>
    %c5_167 = arith.constant 5 : index
    %c0_168 = arith.constant 0 : index
    %c0_169 = arith.constant 0 : index
    %194 = vector.load %arg12[%c5_167, %c0_168, %c0_169] : memref<25x16x56xbf16, #tpu.memory_space<vmem>>, vector<1x16x56xbf16>
    %195 = vector.shape_cast %194 : vector<1x16x56xbf16> to vector<16x56xbf16>
    %c0_170 = arith.constant 0 : index
    %c24_171 = arith.constant 24 : index
    %196 = vector.load %arg15[%c0_170, %c24_171] : memref<64x512xbf16, #tpu.memory_space<vmem>>, vector<56x384xbf16>
    %cst_172 = arith.constant dense<0.000000e+00> : vector<16x384xf32>
    %197 = tpu.matmul %195, %196, %cst_172 {dimension_numbers = #tpu.dot_dimension_numbers<[1], [0], [0], [1], [0, 0, 1, 1], [], []>} : vector<16x56xbf16>, vector<56x384xbf16>, vector<16x384xf32> -> vector<16x384xf32>
    %198 = arith.addf %193, %197 : vector<16x384xf32>
    %c6_173 = arith.constant 6 : index
    %c0_174 = arith.constant 0 : index
    %c0_175 = arith.constant 0 : index
    %199 = vector.load %arg12[%c6_173, %c0_174, %c0_175] : memref<25x16x56xbf16, #tpu.memory_space<vmem>>, vector<1x16x56xbf16>
    %200 = vector.shape_cast %199 : vector<1x16x56xbf16> to vector<16x56xbf16>
    %c0_176 = arith.constant 0 : index
    %c25_177 = arith.constant 25 : index
    %201 = vector.load %arg15[%c0_176, %c25_177] : memref<64x512xbf16, #tpu.memory_space<vmem>>, vector<56x384xbf16>
    %cst_178 = arith.constant dense<0.000000e+00> : vector<16x384xf32>
    %202 = tpu.matmul %200, %201, %cst_178 {dimension_numbers = #tpu.dot_dimension_numbers<[1], [0], [0], [1], [0, 0, 1, 1], [], []>} : vector<16x56xbf16>, vector<56x384xbf16>, vector<16x384xf32> -> vector<16x384xf32>
    %203 = arith.addf %198, %202 : vector<16x384xf32>
    %c7_179 = arith.constant 7 : index
    %c0_180 = arith.constant 0 : index
    %c0_181 = arith.constant 0 : index
    %204 = vector.load %arg12[%c7_179, %c0_180, %c0_181] : memref<25x16x56xbf16, #tpu.memory_space<vmem>>, vector<1x16x56xbf16>
    %205 = vector.shape_cast %204 : vector<1x16x56xbf16> to vector<16x56xbf16>
    %c0_182 = arith.constant 0 : index
    %c26_183 = arith.constant 26 : index
    %206 = vector.load %arg15[%c0_182, %c26_183] : memref<64x512xbf16, #tpu.memory_space<vmem>>, vector<56x384xbf16>
    %cst_184 = arith.constant dense<0.000000e+00> : vector<16x384xf32>
    %207 = tpu.matmul %205, %206, %cst_184 {dimension_numbers = #tpu.dot_dimension_numbers<[1], [0], [0], [1], [0, 0, 1, 1], [], []>} : vector<16x56xbf16>, vector<56x384xbf16>, vector<16x384xf32> -> vector<16x384xf32>
    %208 = arith.addf %203, %207 : vector<16x384xf32>
    %c8_185 = arith.constant 8 : index
    %c0_186 = arith.constant 0 : index
    %c0_187 = arith.constant 0 : index
    %209 = vector.load %arg12[%c8_185, %c0_186, %c0_187] : memref<25x16x56xbf16, #tpu.memory_space<vmem>>, vector<1x16x56xbf16>
    %210 = vector.shape_cast %209 : vector<1x16x56xbf16> to vector<16x56xbf16>
    %c0_188 = arith.constant 0 : index
    %c27_189 = arith.constant 27 : index
    %211 = vector.load %arg15[%c0_188, %c27_189] : memref<64x512xbf16, #tpu.memory_space<vmem>>, vector<56x384xbf16>
    %cst_190 = arith.constant dense<0.000000e+00> : vector<16x384xf32>
    %212 = tpu.matmul %210, %211, %cst_190 {dimension_numbers = #tpu.dot_dimension_numbers<[1], [0], [0], [1], [0, 0, 1, 1], [], []>} : vector<16x56xbf16>, vector<56x384xbf16>, vector<16x384xf32> -> vector<16x384xf32>
    %213 = arith.addf %208, %212 : vector<16x384xf32>
    %c9_191 = arith.constant 9 : index
    %c0_192 = arith.constant 0 : index
    %c0_193 = arith.constant 0 : index
    %214 = vector.load %arg12[%c9_191, %c0_192, %c0_193] : memref<25x16x56xbf16, #tpu.memory_space<vmem>>, vector<1x16x56xbf16>
    %215 = vector.shape_cast %214 : vector<1x16x56xbf16> to vector<16x56xbf16>
    %c0_194 = arith.constant 0 : index
    %c28_195 = arith.constant 28 : index
    %216 = vector.load %arg15[%c0_194, %c28_195] : memref<64x512xbf16, #tpu.memory_space<vmem>>, vector<56x384xbf16>
    %cst_196 = arith.constant dense<0.000000e+00> : vector<16x384xf32>
    %217 = tpu.matmul %215, %216, %cst_196 {dimension_numbers = #tpu.dot_dimension_numbers<[1], [0], [0], [1], [0, 0, 1, 1], [], []>} : vector<16x56xbf16>, vector<56x384xbf16>, vector<16x384xf32> -> vector<16x384xf32>
    %218 = arith.addf %213, %217 : vector<16x384xf32>
    %c10_197 = arith.constant 10 : index
    %c0_198 = arith.constant 0 : index
    %c0_199 = arith.constant 0 : index
    %219 = vector.load %arg12[%c10_197, %c0_198, %c0_199] : memref<25x16x56xbf16, #tpu.memory_space<vmem>>, vector<1x16x56xbf16>
    %220 = vector.shape_cast %219 : vector<1x16x56xbf16> to vector<16x56xbf16>
    %c0_200 = arith.constant 0 : index
    %c48_201 = arith.constant 48 : index
    %221 = vector.load %arg15[%c0_200, %c48_201] : memref<64x512xbf16, #tpu.memory_space<vmem>>, vector<56x384xbf16>
    %cst_202 = arith.constant dense<0.000000e+00> : vector<16x384xf32>
    %222 = tpu.matmul %220, %221, %cst_202 {dimension_numbers = #tpu.dot_dimension_numbers<[1], [0], [0], [1], [0, 0, 1, 1], [], []>} : vector<16x56xbf16>, vector<56x384xbf16>, vector<16x384xf32> -> vector<16x384xf32>
    %223 = arith.addf %218, %222 : vector<16x384xf32>
    %c11_203 = arith.constant 11 : index
    %c0_204 = arith.constant 0 : index
    %c0_205 = arith.constant 0 : index
    %224 = vector.load %arg12[%c11_203, %c0_204, %c0_205] : memref<25x16x56xbf16, #tpu.memory_space<vmem>>, vector<1x16x56xbf16>
    %225 = vector.shape_cast %224 : vector<1x16x56xbf16> to vector<16x56xbf16>
    %c0_206 = arith.constant 0 : index
    %c49_207 = arith.constant 49 : index
    %226 = vector.load %arg15[%c0_206, %c49_207] : memref<64x512xbf16, #tpu.memory_space<vmem>>, vector<56x384xbf16>
    %cst_208 = arith.constant dense<0.000000e+00> : vector<16x384xf32>
    %227 = tpu.matmul %225, %226, %cst_208 {dimension_numbers = #tpu.dot_dimension_numbers<[1], [0], [0], [1], [0, 0, 1, 1], [], []>} : vector<16x56xbf16>, vector<56x384xbf16>, vector<16x384xf32> -> vector<16x384xf32>
    %228 = arith.addf %223, %227 : vector<16x384xf32>
    %c12_209 = arith.constant 12 : index
    %c0_210 = arith.constant 0 : index
    %c0_211 = arith.constant 0 : index
    %229 = vector.load %arg12[%c12_209, %c0_210, %c0_211] : memref<25x16x56xbf16, #tpu.memory_space<vmem>>, vector<1x16x56xbf16>
    %230 = vector.shape_cast %229 : vector<1x16x56xbf16> to vector<16x56xbf16>
    %c0_212 = arith.constant 0 : index
    %c50_213 = arith.constant 50 : index
    %231 = vector.load %arg15[%c0_212, %c50_213] : memref<64x512xbf16, #tpu.memory_space<vmem>>, vector<56x384xbf16>
    %cst_214 = arith.constant dense<0.000000e+00> : vector<16x384xf32>
    %232 = tpu.matmul %230, %231, %cst_214 {dimension_numbers = #tpu.dot_dimension_numbers<[1], [0], [0], [1], [0, 0, 1, 1], [], []>} : vector<16x56xbf16>, vector<56x384xbf16>, vector<16x384xf32> -> vector<16x384xf32>
    %233 = arith.addf %228, %232 : vector<16x384xf32>
    %c13_215 = arith.constant 13 : index
    %c0_216 = arith.constant 0 : index
    %c0_217 = arith.constant 0 : index
    %234 = vector.load %arg12[%c13_215, %c0_216, %c0_217] : memref<25x16x56xbf16, #tpu.memory_space<vmem>>, vector<1x16x56xbf16>
    %235 = vector.shape_cast %234 : vector<1x16x56xbf16> to vector<16x56xbf16>
    %c0_218 = arith.constant 0 : index
    %c51_219 = arith.constant 51 : index
    %236 = vector.load %arg15[%c0_218, %c51_219] : memref<64x512xbf16, #tpu.memory_space<vmem>>, vector<56x384xbf16>
    %cst_220 = arith.constant dense<0.000000e+00> : vector<16x384xf32>
    %237 = tpu.matmul %235, %236, %cst_220 {dimension_numbers = #tpu.dot_dimension_numbers<[1], [0], [0], [1], [0, 0, 1, 1], [], []>} : vector<16x56xbf16>, vector<56x384xbf16>, vector<16x384xf32> -> vector<16x384xf32>
    %238 = arith.addf %233, %237 : vector<16x384xf32>
    %c14_221 = arith.constant 14 : index
    %c0_222 = arith.constant 0 : index
    %c0_223 = arith.constant 0 : index
    %239 = vector.load %arg12[%c14_221, %c0_222, %c0_223] : memref<25x16x56xbf16, #tpu.memory_space<vmem>>, vector<1x16x56xbf16>
    %240 = vector.shape_cast %239 : vector<1x16x56xbf16> to vector<16x56xbf16>
    %c0_224 = arith.constant 0 : index
    %c52_225 = arith.constant 52 : index
    %241 = vector.load %arg15[%c0_224, %c52_225] : memref<64x512xbf16, #tpu.memory_space<vmem>>, vector<56x384xbf16>
    %cst_226 = arith.constant dense<0.000000e+00> : vector<16x384xf32>
    %242 = tpu.matmul %240, %241, %cst_226 {dimension_numbers = #tpu.dot_dimension_numbers<[1], [0], [0], [1], [0, 0, 1, 1], [], []>} : vector<16x56xbf16>, vector<56x384xbf16>, vector<16x384xf32> -> vector<16x384xf32>
    %243 = arith.addf %238, %242 : vector<16x384xf32>
    %c15_227 = arith.constant 15 : index
    %c0_228 = arith.constant 0 : index
    %c0_229 = arith.constant 0 : index
    %244 = vector.load %arg12[%c15_227, %c0_228, %c0_229] : memref<25x16x56xbf16, #tpu.memory_space<vmem>>, vector<1x16x56xbf16>
    %245 = vector.shape_cast %244 : vector<1x16x56xbf16> to vector<16x56xbf16>
    %c0_230 = arith.constant 0 : index
    %c72_231 = arith.constant 72 : index
    %246 = vector.load %arg15[%c0_230, %c72_231] : memref<64x512xbf16, #tpu.memory_space<vmem>>, vector<56x384xbf16>
    %cst_232 = arith.constant dense<0.000000e+00> : vector<16x384xf32>
    %247 = tpu.matmul %245, %246, %cst_232 {dimension_numbers = #tpu.dot_dimension_numbers<[1], [0], [0], [1], [0, 0, 1, 1], [], []>} : vector<16x56xbf16>, vector<56x384xbf16>, vector<16x384xf32> -> vector<16x384xf32>
    %248 = arith.addf %243, %247 : vector<16x384xf32>
    %c16_233 = arith.constant 16 : index
    %c0_234 = arith.constant 0 : index
    %c0_235 = arith.constant 0 : index
    %249 = vector.load %arg12[%c16_233, %c0_234, %c0_235] : memref<25x16x56xbf16, #tpu.memory_space<vmem>>, vector<1x16x56xbf16>
    %250 = vector.shape_cast %249 : vector<1x16x56xbf16> to vector<16x56xbf16>
    %c0_236 = arith.constant 0 : index
    %c73_237 = arith.constant 73 : index
    %251 = vector.load %arg15[%c0_236, %c73_237] : memref<64x512xbf16, #tpu.memory_space<vmem>>, vector<56x384xbf16>
    %cst_238 = arith.constant dense<0.000000e+00> : vector<16x384xf32>
    %252 = tpu.matmul %250, %251, %cst_238 {dimension_numbers = #tpu.dot_dimension_numbers<[1], [0], [0], [1], [0, 0, 1, 1], [], []>} : vector<16x56xbf16>, vector<56x384xbf16>, vector<16x384xf32> -> vector<16x384xf32>
    %253 = arith.addf %248, %252 : vector<16x384xf32>
    %c17_239 = arith.constant 17 : index
    %c0_240 = arith.constant 0 : index
    %c0_241 = arith.constant 0 : index
    %254 = vector.load %arg12[%c17_239, %c0_240, %c0_241] : memref<25x16x56xbf16, #tpu.memory_space<vmem>>, vector<1x16x56xbf16>
    %255 = vector.shape_cast %254 : vector<1x16x56xbf16> to vector<16x56xbf16>
    %c0_242 = arith.constant 0 : index
    %c74_243 = arith.constant 74 : index
    %256 = vector.load %arg15[%c0_242, %c74_243] : memref<64x512xbf16, #tpu.memory_space<vmem>>, vector<56x384xbf16>
    %cst_244 = arith.constant dense<0.000000e+00> : vector<16x384xf32>
    %257 = tpu.matmul %255, %256, %cst_244 {dimension_numbers = #tpu.dot_dimension_numbers<[1], [0], [0], [1], [0, 0, 1, 1], [], []>} : vector<16x56xbf16>, vector<56x384xbf16>, vector<16x384xf32> -> vector<16x384xf32>
    %258 = arith.addf %253, %257 : vector<16x384xf32>
    %c18_245 = arith.constant 18 : index
    %c0_246 = arith.constant 0 : index
    %c0_247 = arith.constant 0 : index
    %259 = vector.load %arg12[%c18_245, %c0_246, %c0_247] : memref<25x16x56xbf16, #tpu.memory_space<vmem>>, vector<1x16x56xbf16>
    %260 = vector.shape_cast %259 : vector<1x16x56xbf16> to vector<16x56xbf16>
    %c0_248 = arith.constant 0 : index
    %c75_249 = arith.constant 75 : index
    %261 = vector.load %arg15[%c0_248, %c75_249] : memref<64x512xbf16, #tpu.memory_space<vmem>>, vector<56x384xbf16>
    %cst_250 = arith.constant dense<0.000000e+00> : vector<16x384xf32>
    %262 = tpu.matmul %260, %261, %cst_250 {dimension_numbers = #tpu.dot_dimension_numbers<[1], [0], [0], [1], [0, 0, 1, 1], [], []>} : vector<16x56xbf16>, vector<56x384xbf16>, vector<16x384xf32> -> vector<16x384xf32>
    %263 = arith.addf %258, %262 : vector<16x384xf32>
    %c19_251 = arith.constant 19 : index
    %c0_252 = arith.constant 0 : index
    %c0_253 = arith.constant 0 : index
    %264 = vector.load %arg12[%c19_251, %c0_252, %c0_253] : memref<25x16x56xbf16, #tpu.memory_space<vmem>>, vector<1x16x56xbf16>
    %265 = vector.shape_cast %264 : vector<1x16x56xbf16> to vector<16x56xbf16>
    %c0_254 = arith.constant 0 : index
    %c76_255 = arith.constant 76 : index
    %266 = vector.load %arg15[%c0_254, %c76_255] : memref<64x512xbf16, #tpu.memory_space<vmem>>, vector<56x384xbf16>
    %cst_256 = arith.constant dense<0.000000e+00> : vector<16x384xf32>
    %267 = tpu.matmul %265, %266, %cst_256 {dimension_numbers = #tpu.dot_dimension_numbers<[1], [0], [0], [1], [0, 0, 1, 1], [], []>} : vector<16x56xbf16>, vector<56x384xbf16>, vector<16x384xf32> -> vector<16x384xf32>
    %268 = arith.addf %263, %267 : vector<16x384xf32>
    %c20_257 = arith.constant 20 : index
    %c0_258 = arith.constant 0 : index
    %c0_259 = arith.constant 0 : index
    %269 = vector.load %arg12[%c20_257, %c0_258, %c0_259] : memref<25x16x56xbf16, #tpu.memory_space<vmem>>, vector<1x16x56xbf16>
    %270 = vector.shape_cast %269 : vector<1x16x56xbf16> to vector<16x56xbf16>
    %c0_260 = arith.constant 0 : index
    %c96_261 = arith.constant 96 : index
    %271 = vector.load %arg15[%c0_260, %c96_261] : memref<64x512xbf16, #tpu.memory_space<vmem>>, vector<56x384xbf16>
    %cst_262 = arith.constant dense<0.000000e+00> : vector<16x384xf32>
    %272 = tpu.matmul %270, %271, %cst_262 {dimension_numbers = #tpu.dot_dimension_numbers<[1], [0], [0], [1], [0, 0, 1, 1], [], []>} : vector<16x56xbf16>, vector<56x384xbf16>, vector<16x384xf32> -> vector<16x384xf32>
    %273 = arith.addf %268, %272 : vector<16x384xf32>
    %c21_263 = arith.constant 21 : index
    %c0_264 = arith.constant 0 : index
    %c0_265 = arith.constant 0 : index
    %274 = vector.load %arg12[%c21_263, %c0_264, %c0_265] : memref<25x16x56xbf16, #tpu.memory_space<vmem>>, vector<1x16x56xbf16>
    %275 = vector.shape_cast %274 : vector<1x16x56xbf16> to vector<16x56xbf16>
    %c0_266 = arith.constant 0 : index
    %c97_267 = arith.constant 97 : index
    %276 = vector.load %arg15[%c0_266, %c97_267] : memref<64x512xbf16, #tpu.memory_space<vmem>>, vector<56x384xbf16>
    %cst_268 = arith.constant dense<0.000000e+00> : vector<16x384xf32>
    %277 = tpu.matmul %275, %276, %cst_268 {dimension_numbers = #tpu.dot_dimension_numbers<[1], [0], [0], [1], [0, 0, 1, 1], [], []>} : vector<16x56xbf16>, vector<56x384xbf16>, vector<16x384xf32> -> vector<16x384xf32>
    %278 = arith.addf %273, %277 : vector<16x384xf32>
    %c22_269 = arith.constant 22 : index
    %c0_270 = arith.constant 0 : index
    %c0_271 = arith.constant 0 : index
    %279 = vector.load %arg12[%c22_269, %c0_270, %c0_271] : memref<25x16x56xbf16, #tpu.memory_space<vmem>>, vector<1x16x56xbf16>
    %280 = vector.shape_cast %279 : vector<1x16x56xbf16> to vector<16x56xbf16>
    %c0_272 = arith.constant 0 : index
    %c98_273 = arith.constant 98 : index
    %281 = vector.load %arg15[%c0_272, %c98_273] : memref<64x512xbf16, #tpu.memory_space<vmem>>, vector<56x384xbf16>
    %cst_274 = arith.constant dense<0.000000e+00> : vector<16x384xf32>
    %282 = tpu.matmul %280, %281, %cst_274 {dimension_numbers = #tpu.dot_dimension_numbers<[1], [0], [0], [1], [0, 0, 1, 1], [], []>} : vector<16x56xbf16>, vector<56x384xbf16>, vector<16x384xf32> -> vector<16x384xf32>
    %283 = arith.addf %278, %282 : vector<16x384xf32>
    %c23_275 = arith.constant 23 : index
    %c0_276 = arith.constant 0 : index
    %c0_277 = arith.constant 0 : index
    %284 = vector.load %arg12[%c23_275, %c0_276, %c0_277] : memref<25x16x56xbf16, #tpu.memory_space<vmem>>, vector<1x16x56xbf16>
    %285 = vector.shape_cast %284 : vector<1x16x56xbf16> to vector<16x56xbf16>
    %c0_278 = arith.constant 0 : index
    %c99_279 = arith.constant 99 : index
    %286 = vector.load %arg15[%c0_278, %c99_279] : memref<64x512xbf16, #tpu.memory_space<vmem>>, vector<56x384xbf16>
    %cst_280 = arith.constant dense<0.000000e+00> : vector<16x384xf32>
    %287 = tpu.matmul %285, %286, %cst_280 {dimension_numbers = #tpu.dot_dimension_numbers<[1], [0], [0], [1], [0, 0, 1, 1], [], []>} : vector<16x56xbf16>, vector<56x384xbf16>, vector<16x384xf32> -> vector<16x384xf32>
    %288 = arith.addf %283, %287 : vector<16x384xf32>
    %c24_281 = arith.constant 24 : index
    %c0_282 = arith.constant 0 : index
    %c0_283 = arith.constant 0 : index
    %289 = vector.load %arg12[%c24_281, %c0_282, %c0_283] : memref<25x16x56xbf16, #tpu.memory_space<vmem>>, vector<1x16x56xbf16>
    %290 = vector.shape_cast %289 : vector<1x16x56xbf16> to vector<16x56xbf16>
    %c0_284 = arith.constant 0 : index
    %c100_285 = arith.constant 100 : index
    %291 = vector.load %arg15[%c0_284, %c100_285] : memref<64x512xbf16, #tpu.memory_space<vmem>>, vector<56x384xbf16>
    %cst_286 = arith.constant dense<0.000000e+00> : vector<16x384xf32>
    %292 = tpu.matmul %290, %291, %cst_286 {dimension_numbers = #tpu.dot_dimension_numbers<[1], [0], [0], [1], [0, 0, 1, 1], [], []>} : vector<16x56xbf16>, vector<56x384xbf16>, vector<16x384xf32> -> vector<16x384xf32>
    %293 = arith.addf %288, %292 : vector<16x384xf32>
    %c0_287 = arith.constant 0 : index
    %c0_288 = arith.constant 0 : index
    %294 = vector.load %arg13[%c0_287, %c0_288] : memref<16x1xf32, #tpu.memory_space<vmem>>, vector<16x1xf32>
    %295 = vector.broadcast %294 : vector<16x1xf32> to vector<16x384xf32>
    %296 = arith.addf %293, %295 : vector<16x384xf32>
    %c0_289 = arith.constant 0 : index
    %c0_290 = arith.constant 0 : index
    %c0_291 = arith.constant 0 : index
    %297 = vector.load %arg14[%c0_289, %c0_290, %c0_291] : memref<1x16x384xf32, #tpu.memory_space<vmem>>, vector<1x16x384xf32>
    %298 = vector.shape_cast %297 : vector<1x16x384xf32> to vector<16x384xf32>
    %299 = vector.shape_cast %296 : vector<16x384xf32> to vector<1x16x384xf32>
    tpu.vector_store %arg14[%c0_289, %c0_290, %c0_291], %299 {strides = array<i32>} : memref<1x16x384xf32, #tpu.memory_space<vmem>>, vector<1x16x384xf32>,
    return
  }
  func.func @transform_0(%arg0: i32) -> (i32, i32, i32) {
    %c0_i32 = arith.constant 0 : i32
    %c0_i32_0 = arith.constant 0 : i32
    %c0_i32_1 = arith.constant 0 : i32
    return %arg0, %c0_i32, %c0_i32_0 : i32, i32, i32
  }
  func.func @transform_1(%arg0: i32) -> (i32, i32) {
    %c0_i32 = arith.constant 0 : i32
    %c0_i32_0 = arith.constant 0 : i32
    %c0_i32_1 = arith.constant 0 : i32
    return %c0_i32, %c0_i32_0 : i32, i32
  }
  func.func @transform_2(%arg0: i32) -> (i32, i32) {
    %c0_i32 = arith.constant 0 : i32
    %c0_i32_0 = arith.constant 0 : i32
    %c0_i32_1 = arith.constant 0 : i32
    return %c0_i32, %c0_i32_0 : i32, i32
  }
  func.func @transform_3(%arg0: i32) -> (i32, i32, i32) {
    %c0_i32 = arith.constant 0 : i32
    %c0_i32_0 = arith.constant 0 : i32
    %c0_i32_1 = arith.constant 0 : i32
    %c0_i32_2 = arith.constant 0 : i32
    return %c0_i32, %c0_i32_0, %c0_i32_1 : i32, i32, i32
  }
  func.func @transform_4(%arg0: i32) -> (i32, i32) {
    %c0_i32 = arith.constant 0 : i32
    %c0_i32_0 = arith.constant 0 : i32
    %c0_i32_1 = arith.constant 0 : i32
    return %c0_i32, %c0_i32_0 : i32, i32
  }
  func.func @transform_5(%arg0: i32) -> (i32, i32) {
    %c0_i32 = arith.constant 0 : i32
    %c0_i32_0 = arith.constant 0 : i32
    %c0_i32_1 = arith.constant 0 : i32
    return %c0_i32, %c0_i32_0 : i32, i32
  }
  func.func @transform_6(%arg0: i32) -> (i32, i32) {
    %c0_i32 = arith.constant 0 : i32
    %c0_i32_0 = arith.constant 0 : i32
    %c0_i32_1 = arith.constant 0 : i32
    return %c0_i32, %c0_i32_0 : i32, i32
  }
  func.func @transform_7(%arg0: i32) -> (i32, i32, i32) {
    %c0_i32 = arith.constant 0 : i32
    %c0_i32_0 = arith.constant 0 : i32
    %c0_i32_1 = arith.constant 0 : i32
    %c0_i32_2 = arith.constant 0 : i32
    return %c0_i32, %c0_i32_0, %c0_i32_1 : i32, i32, i32
  }
  func.func @transform_8(%arg0: i32) -> (i32, i32, i32) {
    %c0_i32 = arith.constant 0 : i32
    %c0_i32_0 = arith.constant 0 : i32
    %c0_i32_1 = arith.constant 0 : i32
    %c0_i32_2 = arith.constant 0 : i32
    return %c0_i32, %c0_i32_0, %c0_i32_1 : i32, i32, i32
  }
  func.func @transform_9(%arg0: i32) -> (i32, i32) {
    %c0_i32 = arith.constant 0 : i32
    %c0_i32_0 = arith.constant 0 : i32
    %c0_i32_1 = arith.constant 0 : i32
    return %c0_i32, %c0_i32_0 : i32, i32
  }
  func.func @transform_10(%arg0: i32) -> (i32, i32) {
    %c0_i32 = arith.constant 0 : i32
    %c0_i32_0 = arith.constant 0 : i32
    %c0_i32_1 = arith.constant 0 : i32
    return %c0_i32, %c0_i32_0 : i32, i32
  }
  func.func @transform_11(%arg0: i32) -> (i32, i32, i32) {
    %c0_i32 = arith.constant 0 : i32
    %c0_i32_0 = arith.constant 0 : i32
    %c0_i32_1 = arith.constant 0 : i32
    %c0_i32_2 = arith.constant 0 : i32
    return %c0_i32, %c0_i32_0, %c0_i32_1 : i32, i32, i32
  }
  func.func @transform_12(%arg0: i32) -> (i32, i32) {
    %c0_i32 = arith.constant 0 : i32
    %c0_i32_0 = arith.constant 0 : i32
    %c0_i32_1 = arith.constant 0 : i32
    return %c0_i32, %c0_i32_0 : i32, i32
  }
  func.func @transform_13(%arg0: i32) -> (i32, i32, i32) {
    %c0_i32 = arith.constant 0 : i32
    %c0_i32_0 = arith.constant 0 : i32
    %c0_i32_1 = arith.constant 0 : i32
    return %arg0, %c0_i32, %c0_i32_0 : i32, i32, i32
  }
}

</mosaic_0001>

<bundles_post_ra>
// kernel: fsrcnn_forward.1
= control target key start
LH: loop header
LB: loop body
LE: loop exit
PB: predicated region body
PF: predicated region fallthrough
CT: control target
= control target key end

     0   :  { %s15758_s27 = smov 0   ;;  %s21430_s0 = inlined_call_operand.vmem [shape: f32[2,4,384], index: 0, kind: input, shape index: {}]   ;;  %s21431_s1 = inlined_call_operand.vmem [shape: f32[1,384], index: 1, kind: input, shape index: {}]   ;;  %s21432_s2 = inlined_call_operand.<no memory space> [shape: f32[1,1], index: 2, kind: input, shape index: {}]   ;;  %s21433_s3 = inlined_call_operand.vmem [shape: bf16[25,56,4], index: 3, kind: input, shape index: {}]   ;;  %s21434_s4 = inlined_call_operand.vmem [shape: f32[56,1], index: 4, kind: input, shape index: {}]   ;;  %s21435_s5 = inlined_call_operand.vmem [shape: bf16[36,56], index: 5, kind: input, shape index: {}]   ;;  %s21436_s6 = inlined_call_operand.vmem [shape: f32[36,1], index: 6, kind: input, shape index: {}]   ;;  %s21437_s7 = inlined_call_operand.vmem [shape: bf16[72,36,36], index: 7, kind: input, shape index: {}]   ;;  %s21438_s8 = inlined_call_operand.vmem [shape: f32[8,36,1], index: 8, kind: input, shape index: {}]   ;;  %s21439_s9 = inlined_call_operand.vmem [shape: bf16[56,36], index: 9, kind: input, shape index: {}]   ;;  %s21440_s10 = inlined_call_operand.vmem [shape: f32[56,1], index: 10, kind: input, shape index: {}]   ;;  %s21441_s11 = inlined_call_operand.vmem [shape: bf16[25,16,56], index: 11, kind: input, shape index: {}]   ;;  %s21442_s12 = inlined_call_operand.vmem [shape: f32[16,1], index: 12, kind: input, shape index: {}]   ;;  %s21443_s13 = inlined_call_operand.vmem [shape: f32[2,16,384], index: 13, kind: output, shape index: {}]  }
   0x1   :  { %18 = sst [smem:[#allocation3]] %s21432_s2 }
   0x2 LB: > { %s13151_s28 = sadd.s32 4294967295, %s15578_s27   ;;  %p13155_p0 = scmp.ge.s32.totalorder %s15578_s27, 1  ;;  %s15578_s27 = sphi %s15758_s27, %s24_s27  }
   0x3   : > { %p388_p1 = scmp.lt.s32.totalorder %s15578_s27, 3 }
   0x5   : > { %p389_p2 = pnand %p13155_p0, %p388_p1 }
   0x7   : > { %392 = sbr.rel (%p389_p2) target bundleno = 3443 (0xd73), region = 72 }
   0xc   : > { %p432_p3 = scmp.lt.s32.totalorder %s13151_s28, 1  ;;  %vm445_vm0 = vcmask 404480   ;;  %v21489_v0 = vmov 0   ;;  %vm21509_vm1 = vcmask 1043856   ;;  %s15645_s19 = smov 50   ;;  %vm492_vm2 = vcmask 1041808  }
   0xd   : > { %446 = vst.msk [vmem:[#allocation2] sm:$0xf] %vm445_vm0, %v21489_v0  ;;  %447 = vst.msk [vmem:[#allocation2 + $0x10] sm:$0xf] %vm445_vm0, %v21489_v0  ;;  %612 = vmatprep.mubr.bf16.mxu0 %v21489_v0  ;;  %642 = vmatprep.mubr.bf16.mxu1 %v21489_v0  ;;  %vm493_vm3 = vcmask 1045508   ;;  %vm485_vm4 = vcmask 408576  }
   0xe   : > { %448 = vst.msk [vmem:[#allocation2 + $0x20] sm:$0xf] %vm445_vm0, %v21489_v0  ;;  %449 = vst.msk [vmem:[#allocation2 + $0x30] sm:$0xf] %vm445_vm0, %v21489_v0  ;;  %s22328_s28 = smov (!%p432_p3, %s13151_s28), 1  ;;  %15326 = vset.pattern.permute.xlu1 %v21489_v0  ;;  %15325 = vset.pattern.permute.xlu0 %v21489_v0  ;;  %v21588_v7 = vmov 0 }
   0xf   : > { %450 = vst.msk [vmem:[#allocation2 + $0x40] sm:$0xf] %vm445_vm0, %v21489_v0  ;;  %451 = vst.msk [vmem:[#allocation2 + $0x50] sm:$0xf] %vm445_vm0, %v21489_v0  ;;  %s15146_s2 = smul.u32 12, %s22328_s28  ;;  %vm21507_vm6 = vcmask 1041408  }
  0x10   : > { %452 = vst.msk [vmem:[#allocation2 + $0x60] sm:$0xf] %vm445_vm0, %v21489_v0  ;;  %s15147_s29 = smul.u32 48, %s22328_s28  ;;  %vm15801_vm5 = vmor %vm493_vm3, %vm492_vm2  ;;  %vm497_vm7 = vcmask 406532   ;;  %vm487_vm8 = vcmask 1043456   ;;  %v21591_v12 = vmov 0 }
  0x11   : > { %s436_s15 = scalar_lea.vmem %s21430_s0, %s15146_s2  ;;  %455 = vst.msk [vmem:[#allocation2 + $0xc] sm:$0xf] %vm21509_vm1, %v21489_v0  ;;  %456 = vst.msk [vmem:[#allocation2 + $0x1c] sm:$0xf] %vm21509_vm1, %v21489_v0  ;;  %v21589_v7 = vsel %vm15801_vm5, 4294967295, %v21588_v7  ;;  %s15646_s22 = smov 127  }
  0x12   : > { %457 = vst.msk [vmem:[#allocation2 + $0x2c] sm:$0xf] %vm21509_vm1, %v21489_v0  ;;  %458 = vst.msk [vmem:[#allocation2 + $0x3c] sm:$0xf] %vm21509_vm1, %v21489_v0  ;;  %s15797_s18 = scalar_lea.vmem %s21443_s13, %s15147_s29  ;;  %v463_v1 = vld [vmem:[%s436_s15] sm:$0xff]  ;;  %s15647_s23 = smov 126  }
  0x13   : > { %459 = vst.msk [vmem:[#allocation2 + $0x4c] sm:$0xf] %vm21509_vm1, %v21489_v0  ;;  %460 = vst.msk [vmem:[#allocation2 + $0x5c] sm:$0xf] %vm21509_vm1, %v21489_v0  ;;  %v464_v2 = vld [vmem:[%s436_s15 + $0x8] sm:$0xf]  ;;  %v466_v3 = vcombine.high %v463_v1, %v463_v1 }
  0x14   : > { %461 = vst.msk [vmem:[#allocation2 + $0x6c] sm:$0xf] %vm21509_vm1, %v21489_v0  ;;  %v14028_v5 = vpack.c.bf16 %v464_v2, %v464_v2  ;;  %21590 = vst [vmem:[#allocation4_spill] sm:$0xff] %v21589_v7  ;;  %v15817_v14 = vld [vmem:[%s21431_s1] sm:$0x7]  ;;  %s15648_s24 = smov 125  }
  0x15   : > { %v14027_v4 = vpack.c.bf16 %v466_v3, %v463_v1  ;;  %vm15809_vm9 = vmor %vm497_vm7, %vm21507_vm6  ;;  %21594 = vst [vmem:[#allocation6_spill] sm:$0xff] %v15817_v14  ;;  %s15649_s25 = smov 124   ;;  %s15650_s26 = smov 104   ;;  %vm21481_vm10 = vcmask 1039360   ;;  %v15333_v29 = vld [vmem:[%s21433_s3 + $0x1c] sm:$0xff]   ;;  %vm558_vm11 = vcmask 31744  }
  0x16   : > { %v21592_v12 = vsel %vm15809_vm9, 4294967295, %v21591_v12  ;;  %s21516_s28 = smov 103   ;;  %s21514_s2 = smov 102   ;;  %v15334_v31 = vld [vmem:[%s21433_s3 + $0x34] ss:$0 sps:$4 sm:$0xff]   ;;  %vm21479_vm12 = vcmask 1031168  }
  0x17   : > { %479 = vrot.lane.b32.xlu0 %v14027_v4, %s15645_s19  ;;  %21593 = vst [vmem:[#allocation5_spill] sm:$0xff] %v21592_v12  ;;  %s21512_s29 = smov 101   ;;  %s21510_s30 = smov 100   ;;  %v15335_v39 = vld [vmem:[%s21433_s3 + $0x24] sm:$0xff]   ;;  %v15336_v40 = vld [vmem:[%s21433_s3 + $0x2c] sm:$0xff]   ;;  %vm21478_vm13 = vcmask 1022976  }
  0x18   : > { %s21454_s14 = smov 80   ;;  %s21452_s15 = smov 79   ;;  %v15337_v44 = vld [vmem:[%s21433_s3] sm:$0xff]   ;;  %v15338_v47 = vld [vmem:[%s21433_s3 + $0x8] sm:$0xff]   ;;  %v15339_v53 = vld [vmem:[%s21433_s3 + $0x10] sm:$0xff]   ;;  %vm21477_vm14 = vcmask 1014784  }
  0x19   : > { %s21448_s16 = smov 78   ;;  %s21446_s17 = smov 77   ;;  %v15340_v56 = vld [vmem:[%s21433_s3 + $0x18] ss:$0 sps:$4 sm:$0xff]   ;;  %v15342_v63 = vld [vmem:[%s21433_s3 + $0x40] sm:$0xff]   ;;  %v15343_v1 = vld [vmem:[%s21433_s3 + $0x48] sm:$0xff]  }
  0x1a   : > { %s21444_s20 = smov 76   ;;  %s21450_s21 = smov 56   ;;  %v15341_v58 = vld [vmem:[%s21433_s3 + $0x38] sm:$0xff]   ;;  %vm21474_vm15 = vcmask 850944   ;;  %vm21506_vm0 = vcmask 842752   ;;  %vm21508_vm2 = vcmask 834560  }
  0x1b   : > { %481 = vrot.lane.b32.xlu0 %v14028_v5, %s15645_s19  ;;  %vm21505_vm3 = vcmask 826368   ;;  %vm21475_vm7 = vcmask 818176  }
  0x89   : > { %v480_v6 = vpop.permute.xlu0 %479 }
  0x8a   : > { %v483_v8 = vrot.slane %v480_v6, 4 }
  0x8c   : > { %v486_v9 = vsel %vm485_vm4, %v483_v8, %v480_v6  ;;  %v15344_v6 = vld [vmem:[%s21433_s3 + $0x50] ss:$0 sps:$4 sm:$0xff]  }
  0x8d   : > { %495 = vst.msk [vmem:[#allocation2] sm:$0x33] %vm15801_vm5, %v486_v9  ;;  %v482_v10 = vpop.permute.xlu0 %481 }
  0x8e   : > { %v484_v11 = vrot.slane %v482_v10, 4 }
  0x90   : > { %v488_v13 = vsel %vm487_vm8, %v483_v8, %v484_v11  ;;  %v15345_v8 = vld [vmem:[%s21433_s3 + $0x54] sm:$0xff]   ;;  %v15346_v11 = vld [vmem:[%s21433_s3 + $0x5c] sm:$0xff]  }
  0x91   : > { %v489_v15 = vsel %vm485_vm4, %v488_v13, %v482_v10 }
  0x92   : > { %499 = vst.msk [vmem:[#allocation2 + $0x8] sm:$0x33] %vm15809_vm9, %v489_v15 }
  0x94   : > { %v507_v16 = vld [vmem:[#allocation2] sm:$0x33] }
  0x95   : > { %v15822_v17 = vcombine.low %v507_v16, %v507_v16  ;;  %v15826_v18 = vcombine.high %v507_v16, %v507_v16 }
  0x97   : > { %546 = vrot.lane.b32.xlu1 %v15822_v17, %s15646_s22  ;;  %v749_v42 = vsel %vm21507_vm6, %v15822_v17, 0 }
  0x99   : > { %v517_v19 = vld [vmem:[#allocation2 + $0x8] sm:$0x33] }
  0x9a   : > { %v15828_v20 = vcombine.low %v517_v19, %v517_v19  ;;  %v15834_v21 = vcombine.high %v517_v19, %v517_v19  ;;  %v15332_v28 = vld [vmem:[#allocation2 + $0x8] ss:$0 sps:$4 sm:$0x33]  }
  0x9b   : > { %548 = vrot.lane.b32.xlu1 %v15826_v18, %s15646_s22  ;;  %v755_v35 = vsel %vm21507_vm6, %v15332_v28, 0 }
  0x9c   : > { %550 = vrot.lane.b32.xlu0 %v15828_v20, %s15646_s22 }
  0x9f   : > { %552 = vrot.lane.b32.xlu1 %v15834_v21, %s15646_s22 }
  0xa0   : > { %918 = vrot.lane.b32.xlu0 %v15822_v17, %s15647_s23 }
  0xa3   : > { %920 = vrot.lane.b32.xlu1 %v15826_v18, %s15647_s23 }
  0xa4   : > { %922 = vrot.lane.b32.xlu0 %v15828_v20, %s15647_s23 }
  0xa7   : > { %924 = vrot.lane.b32.xlu1 %v15834_v21, %s15647_s23 }
  0xa8   : > { %1137 = vrot.lane.b32.xlu0 %v15828_v20, %s15648_s24 }
  0xab   : > { %1139 = vrot.lane.b32.xlu1 %v15834_v21, %s15648_s24 }
  0xac   : > { %1133 = vrot.lane.b32.xlu0 %v15822_v17, %s15648_s24 }
  0xaf   : > { %1135 = vrot.lane.b32.xlu1 %v15826_v18, %s15648_s24 }
  0xb0   : > { %1348 = vrot.lane.b32.xlu0 %v15822_v17, %s15649_s25 }
  0xb3   : > { %1350 = vrot.lane.b32.xlu1 %v15826_v18, %s15649_s25 }
  0xb4   : > { %1352 = vrot.lane.b32.xlu0 %v15828_v20, %s15649_s25 }
  0xb7   : > { %1354 = vrot.lane.b32.xlu1 %v15834_v21, %s15649_s25 }
  0xb8   : > { %1567 = vrot.lane.b32.xlu0 %v15828_v20, %s15650_s26 }
  0xbb   : > { %1569 = vrot.lane.b32.xlu1 %v15834_v21, %s15650_s26 }
  0xbc   : > { %1563 = vrot.lane.b32.xlu0 %v15822_v17, %s15650_s26 }
  0xbf   : > { %1565 = vrot.lane.b32.xlu1 %v15826_v18, %s15650_s26 }
  0xc0   : > { %1778 = vrot.lane.b32.xlu0 %v15822_v17, %s21516_s28 }
  0xc3   : > { %1780 = vrot.lane.b32.xlu1 %v15826_v18, %s21516_s28 }
  0xc4   : > { %1782 = vrot.lane.b32.xlu0 %v15828_v20, %s21516_s28 }
  0xc7   : > { %1784 = vrot.lane.b32.xlu1 %v15834_v21, %s21516_s28 }
  0xc8   : > { %1997 = vrot.lane.b32.xlu0 %v15828_v20, %s21514_s2 }
  0xcb   : > { %1999 = vrot.lane.b32.xlu1 %v15834_v21, %s21514_s2 }
  0xcc   : > { %1993 = vrot.lane.b32.xlu0 %v15822_v17, %s21514_s2 }
  0xcf   : > { %1995 = vrot.lane.b32.xlu1 %v15826_v18, %s21514_s2 }
  0xd0   : > { %2208 = vrot.lane.b32.xlu0 %v15822_v17, %s21512_s29 }
  0xd3   : > { %2210 = vrot.lane.b32.xlu1 %v15826_v18, %s21512_s29 }
  0xd4   : > { %2212 = vrot.lane.b32.xlu0 %v15828_v20, %s21512_s29 }
  0xd7   : > { %2214 = vrot.lane.b32.xlu1 %v15834_v21, %s21512_s29 }
  0xd8   : > { %2427 = vrot.lane.b32.xlu0 %v15828_v20, %s21510_s30 }
  0xdb   : > { %2429 = vrot.lane.b32.xlu1 %v15834_v21, %s21510_s30 }
  0xdc   : > { %2423 = vrot.lane.b32.xlu0 %v15822_v17, %s21510_s30 }
  0xdf   : > { %2425 = vrot.lane.b32.xlu1 %v15826_v18, %s21510_s30 }
  0xe0   : > { %2638 = vrot.lane.b32.xlu0 %v15822_v17, %s21454_s14 }
  0xe3   : > { %2640 = vrot.lane.b32.xlu1 %v15826_v18, %s21454_s14 }
  0xe4   : > { %2642 = vrot.lane.b32.xlu0 %v15828_v20, %s21454_s14 }
  0xe7   : > { %2644 = vrot.lane.b32.xlu1 %v15834_v21, %s21454_s14  ;;  %s21456_s14 = smov 53  }
  0xe8   : > { %2857 = vrot.lane.b32.xlu0 %v15828_v20, %s21452_s15 }
  0xeb   : > { %2859 = vrot.lane.b32.xlu1 %v15834_v21, %s21452_s15 }
  0xec   : > { %2853 = vrot.lane.b32.xlu0 %v15822_v17, %s21452_s15 }
  0xef   : > { %2855 = vrot.lane.b32.xlu1 %v15826_v18, %s21452_s15  ;;  %s21458_s15 = smov 54  }
  0xf0   : > { %3068 = vrot.lane.b32.xlu0 %v15822_v17, %s21448_s16 }
  0xf3   : > { %3070 = vrot.lane.b32.xlu1 %v15826_v18, %s21448_s16 }
  0xf4   : > { %3072 = vrot.lane.b32.xlu0 %v15828_v20, %s21448_s16 }
  0xf7   : > { %3074 = vrot.lane.b32.xlu1 %v15834_v21, %s21448_s16 }
  0xf8   : > { %3287 = vrot.lane.b32.xlu0 %v15828_v20, %s21446_s17 }
  0xfb   : > { %3289 = vrot.lane.b32.xlu1 %v15834_v21, %s21446_s17 }
  0xfc   : > { %3283 = vrot.lane.b32.xlu0 %v15822_v17, %s21446_s17 }
  0xff   : > { %3285 = vrot.lane.b32.xlu1 %v15826_v18, %s21446_s17  ;;  %s21464_s17 = smov 30  }
 0x100   : > { %3498 = vrot.lane.b32.xlu0 %v15822_v17, %s21444_s20 }
 0x103   : > { %3500 = vrot.lane.b32.xlu1 %v15826_v18, %s21444_s20 }
 0x104   : > { %3502 = vrot.lane.b32.xlu0 %v15828_v20, %s21444_s20 }
 0x107   : > { %3504 = vrot.lane.b32.xlu1 %v15834_v21, %s21444_s20  ;;  %s21468_s20 = smov 55  }
 0x108   : > { %3717 = vrot.lane.b32.xlu0 %v15828_v20, %s21450_s21 }
 0x109   : > { %v547_v22 = vpop.permute.xlu1 %546 }
 0x10b   : > { %3719 = vrot.lane.b32.xlu1 %v15834_v21, %s21450_s21 }
 0x10c   : > { %3713 = vrot.lane.b32.xlu0 %v15822_v17, %s21450_s21 }
 0x10d   : > { %v549_v23 = vpop.permute.xlu1 %548 }
 0x10e   : > { %v551_v24 = vpop.permute.xlu0 %550  ;;  %v555_v25 = vsel %vm21481_vm10, %v547_v22, %v549_v23  ;;  %v15348_v22 = vld [vmem:[%s21433_s3 + $0x6c] ss:$0 sps:$4 sm:$0xff]  }
 0x10f   : > { %3715 = vrot.lane.b32.xlu1 %v15826_v18, %s21450_s21  ;;  %v556_v26 = vsel %vm21481_vm10, %v549_v23, %v551_v24  ;;  %v572_v27 = vsel %vm21507_vm6, %v555_v25, 0  ;;  %s21466_s21 = smov 52  }
 0x110   : > { %3928 = vrot.lane.b32.xlu0 %v15822_v17, %s21468_s20  ;;  %13175 = vmatprep.subr.msk.bf16.mxu0 %vm21507_vm6, %v556_v26 }
 0x111   : > { %15118 = vmatprep.subr.msk.bf16.mxu1 %vm21507_vm6, %v556_v26  ;;  %v553_v30 = vpop.permute.xlu1 %552  ;;  %595 = vmatpush1.bf16.msra.mxu0 %v572_v27 }
 0x112   : > { %v557_v32 = vsel %vm21481_vm10, %v551_v24, %v553_v30  ;;  %15119 = vmatpush1.bf16.msra.mxu1 %v572_v27  ;;  %v919_v33 = vpop.permute.xlu0 %918  ;;  %15121 = vmatprep.subr.msk.bf16.mxu0 %vm21507_vm6, %v15332_v28  ;;  %v15349_v24 = vld [vmem:[%s21433_s3 + $0x70] sm:$0xff]   ;;  %v15351_v30 = vld [vmem:[%s21433_s3 + $0x80] sm:$0xff]   ;;  %vm21483_vm10 = vcmask 441344  }
 0x113   : > { %v578_v34 = vsel %vm21507_vm6, %v557_v32, 0  ;;  %3930 = vrot.lane.b32.xlu1 %v15826_v18, %s21468_s20  ;;  %15120 = vmatprep.subr.msk.bf16.mxu1 %vm21507_vm6, %v557_v32 }
 0x114   : > { %3932 = vrot.lane.b32.xlu0 %v15828_v20, %s21468_s20  ;;  %13176 = vmatmul.mubr.msk.bf16.vlgmr.msra.gmra.mxu0 %vm558_vm11, %v15333_v29 }
 0x115   : > { %13179 = vmatmul.mubr.msk.bf16.vlgmr.msra.gmra.mxu1 %vm558_vm11, %v15334_v31  ;;  %v921_v36 = vpop.permute.xlu1 %920  ;;  %14383 = vmatpush3.bf16.msra.mxu0 %v755_v35  ;;  %v15352_v35 = vld [vmem:[%s21433_s3 + $0x88] ss:$0 sps:$4 sm:$0xff]  }
 0x116   : > { %14373 = vmatpush3.bf16.msra.mxu1 %v578_v34  ;;  %v923_v37 = vpop.permute.xlu0 %922  ;;  %622 = vmatprep.mubr.bf16.mxu0 %v21489_v0  ;;  %v927_v48 = vsel %vm21479_vm12, %v919_v33, %v921_v36 }
 0x117   : > { %13189 = vmatprep.subr.msk.bf16.mxu1 %vm21507_vm6, %v15826_v18  ;;  %3934 = vrot.lane.b32.xlu1 %v15834_v21, %s21468_s20  ;;  %v928_v38 = vsel %vm21479_vm12, %v921_v36, %v923_v37  ;;  %v943_v50 = vsel %vm21507_vm6, %v927_v48, 0  ;;  %v15353_v36 = vld [vmem:[%s21433_s3 + $0x8c] sm:$0xff]   ;;  %v15356_v48 = vld [vmem:[%s21433_s3 + $0xa4] ss:$0 sps:$4 sm:$0xff]   ;;  %s443_s20 = sld [smem:[#allocation3]] }
 0x118   : > { %4147 = vrot.lane.b32.xlu0 %v15828_v20, %s21458_s15  ;;  %13209 = vmatprep.subr.msk.bf16.mxu0 %vm21507_vm6, %v928_v38 }
 0x119   : > { %14374 = vmatprep.mubr.msk.bf16.mxu1 %vm558_vm11, %v15333_v29  ;;  %v925_v41 = vpop.permute.xlu1 %924  ;;  %v15350_v29 = vld [vmem:[%s21433_s3 + $0x78] sm:$0xff]  }
 0x11a   : > { %v929_v43 = vsel %vm21479_vm12, %v923_v37, %v925_v41  ;;  %v1138_v46 = vpop.permute.xlu0 %1137  ;;  %vm3721_vm12 = vcmask 457728  }
 0x11b   : > { %4149 = vrot.lane.b32.xlu1 %v15834_v21, %s21458_s15  ;;  %v949_v51 = vsel %vm21507_vm6, %v929_v43, 0 }
 0x11c   : > { %4143 = vrot.lane.b32.xlu0 %v15822_v17, %s21458_s15  ;;  %13177 = vmatmul.mubr.msk.bf16.gmra.mxu0 %vm558_vm11, %v15335_v39 }
 0x11d   : > { %14375 = vmatmul.mubr.msk.bf16.vlgmr.msra.gmra.mxu1 %vm558_vm11, %v15335_v39  ;;  %632 = vmatprep.mubr.bf16.mxu0 %v21489_v0  ;;  %v1140_v45 = vpop.permute.xlu1 %1139  ;;  %v15354_v39 = vld [vmem:[%s21433_s3 + $0x94] sm:$0xff]   ;;  %v17644_v7 = vstv %s443_s20 }
 0x11e   : > { %772 = vmatpush1.bf16.msra.mxu1 %v749_v42  ;;  %14378 = vmatprep.mubr.msk.bf16.mxu1 %vm558_vm11, %v15336_v40  ;;  %v1144_v52 = vsel %vm21478_vm13, %v1138_v46, %v1140_v45  ;;  %v1134_v54 = vpop.permute.xlu0 %1133 }
 0x11f   : > { %15122 = vmatprep.subr.msk.bf16.mxu1 %vm21507_vm6, %v929_v43  ;;  %4145 = vrot.lane.b32.xlu1 %v15826_v18, %s21458_s15  ;;  %s21462_s15 = smov 31   ;;  %v1164_v61 = vsel %vm21507_vm6, %v1144_v52, 0  ;;  %v15355_v43 = vld [vmem:[%s21433_s3 + $0x9c] sm:$0xff]  }
 0x120   : > { %4358 = vrot.lane.b32.xlu0 %v15822_v17, %s21456_s14 }
 0x121   : > { %v1136_v49 = vpop.permute.xlu1 %1135 }
 0x122   : > { %v1143_v55 = vsel %vm21478_vm13, %v1136_v49, %v1138_v46  ;;  %v16051_v57 = vpop.permute.xlu0 %1348  ;;  %v1142_v2 = vsel %vm21478_vm13, %v1134_v54, %v1136_v49  ;;  %vm21480_vm13 = vcmask 621568  }
 0x123   : > { %4360 = vrot.lane.b32.xlu1 %v15826_v18, %s21456_s14  ;;  %v1158_v4 = vsel %vm21507_vm6, %v1142_v2, 0  ;;  %v15362_v2 = vld [vmem:[%s21433_s3 + $0xcc] sm:$0xff]  }
 0x124   : > { %4362 = vrot.lane.b32.xlu0 %v15828_v20, %s21456_s14  ;;  %13178 = vmatmul.mubr.msk.bf16.gmra.mxu0 %vm558_vm11, %v15336_v40 }
 0x125   : > { %14379 = vmatmul.mubr.msk.bf16.gmra.mxu1 %vm558_vm11, %v15334_v31  ;;  %14384 = vmatprep.mubr.msk.bf16.mxu0 %vm558_vm11, %v15337_v44  ;;  %v1351_v59 = vpop.permute.xlu1 %1350 }
 0x126   : > { %789 = vmatprep.mubr.bf16.mxu1 %v21489_v0  ;;  %v1353_v60 = vpop.permute.xlu0 %1352  ;;  %v1357_v13 = vsel %vm21477_vm14, %v16051_v57, %v1351_v59 }
 0x127   : > { %4364 = vrot.lane.b32.xlu1 %v15834_v21, %s21456_s14  ;;  %s21460_s14 = smov 32   ;;  %v1358_v62 = vsel %vm21477_vm14, %v1351_v59, %v1353_v60  ;;  %v1373_v16 = vsel %vm21507_vm6, %v1357_v13, 0  ;;  %v15364_v13 = vld [vmem:[%s21433_s3 + $0xdc] ss:$0 sps:$4 sm:$0xff]  }
 0x128   : > { %4577 = vrot.lane.b32.xlu0 %v15828_v20, %s21466_s21 }
 0x129   : > { %v1355_v3 = vpop.permute.xlu1 %1354 }
 0x12a   : > { %v1359_v5 = vsel %vm21477_vm14, %v1353_v60, %v1355_v3  ;;  %v1568_v10 = vpop.permute.xlu0 %1567  ;;  %vm21502_vm14 = vcmask 629760  }
 0x12b   : > { %4579 = vrot.lane.b32.xlu1 %v15834_v21, %s21466_s21 }
 0x12c   : > { %4573 = vrot.lane.b32.xlu0 %v15822_v17, %s21466_s21  ;;  %14385 = vmatmul.mubr.msk.bf16.vlgmr.msra.gmra.mxu0 %vm558_vm11, %v15338_v47 }
 0x12d   : > { %13190 = vmatmul.mubr.msk.bf16.vlgmr.msra.gmra.mxu1 %vm558_vm11, %v15337_v44  ;;  %966 = vmatpush1.bf16.msra.mxu0 %v943_v50  ;;  %v1570_v9 = vpop.permute.xlu1 %1569  ;;  %v15357_v50 = vld [vmem:[%s21433_s3 + $0xa8] sm:$0xff]  }
 0x12e   : > { %14393 = vmatpush3.bf16.msra.mxu1 %v949_v51  ;;  %15123 = vmatprep.subr.msk.bf16.mxu0 %vm21507_vm6, %v1144_v52  ;;  %v1574_v19 = vsel %vm21474_vm15, %v1568_v10, %v1570_v9 }
 0x12f   : > { %13229 = vmatprep.subr.msk.bf16.mxu1 %vm21507_vm6, %v1143_v55  ;;  %4575 = vrot.lane.b32.xlu1 %v15826_v18, %s21466_s21  ;;  %v1594_v27 = vsel %vm21507_vm6, %v1574_v19, 0  ;;  %v15358_v55 = vld [vmem:[%s21433_s3 + $0xb0] sm:$0xff]   ;;  %s17891_s21 = smov 0  }
 0x130   : > { %4788 = vrot.lane.b32.xlu0 %v15822_v17, %s21460_s14  ;;  %799 = vmatprep.mubr.bf16.mxu1 %v21489_v0 }
 0x131   : > { %14388 = vmatprep.mubr.msk.bf16.mxu0 %vm558_vm11, %v15339_v53  ;;  %v1566_v15 = vpop.permute.xlu1 %1565 }
 0x133   : > { %4790 = vrot.lane.b32.xlu1 %v15826_v18, %s21460_s14 }
 0x134   : > { %4792 = vrot.lane.b32.xlu0 %v15828_v20, %s21460_s14  ;;  %14389 = vmatmul.mubr.msk.bf16.gmra.mxu0 %vm558_vm11, %v15340_v56 }
 0x135   : > { %13191 = vmatmul.mubr.msk.bf16.gmra.mxu1 %vm558_vm11, %v15338_v47  ;;  %983 = vmatprep.mubr.bf16.mxu0 %v21489_v0  ;;  %v1781_v25 = vpop.permute.xlu1 %1780 }
 0x136   : > { %809 = vmatprep.mubr.bf16.mxu1 %v21489_v0 }
 0x137   : > { %4794 = vrot.lane.b32.xlu1 %v15834_v21, %s21460_s14  ;;  %s21470_s14 = smov 28  }
 0x138   : > { %5007 = vrot.lane.b32.xlu0 %v15828_v20, %s21462_s15 }
 0x139   : > { %v1785_v32 = vpop.permute.xlu1 %1784 }
 0x13b   : > { %5009 = vrot.lane.b32.xlu1 %v15834_v21, %s21462_s15 }
 0x13c   : > { %5003 = vrot.lane.b32.xlu0 %v15822_v17, %s21462_s15  ;;  %13210 = vmatmul.mubr.msk.bf16.vlgmr.msra.gmra.mxu0 %vm558_vm11, %v15341_v58 }
 0x13d   : > { %13192 = vmatmul.mubr.msk.bf16.gmra.mxu1 %vm558_vm11, %v15339_v53  ;;  %14403 = vmatpush3.bf16.msra.mxu0 %v1164_v61  ;;  %v2000_v37 = vpop.permute.xlu1 %1999  ;;  %v15360_v61 = vld [vmem:[%s21433_s3 + $0xc0] ss:$0 sps:$4 sm:$0xff]  }
 0x13e   : > { %13249 = vmatprep.subr.msk.bf16.mxu0 %vm21507_vm6, %v1358_v62  ;;  %819 = vmatprep.mubr.bf16.mxu1 %v21489_v0  ;;  %v15361_v62 = vld [vmem:[%s21433_s3 + $0xc4] sm:$0xff]  }
 0x13f   : > { %5005 = vrot.lane.b32.xlu1 %v15826_v18, %s21462_s15  ;;  %993 = vmatprep.mubr.bf16.mxu0 %v21489_v0  ;;  %s21472_s15 = smov 29  }
 0x140   : > { %5218 = vrot.lane.b32.xlu0 %v15822_v17, %s21464_s17 }
 0x141   : > { %v1996_v41 = vpop.permute.xlu1 %1995 }
 0x143   : > { %5220 = vrot.lane.b32.xlu1 %v15826_v18, %s21464_s17 }
 0x144   : > { %5222 = vrot.lane.b32.xlu0 %v15828_v20, %s21464_s17  ;;  %13211 = vmatmul.mubr.msk.bf16.gmra.mxu0 %vm558_vm11, %v15342_v63 }
 0x145   : > { %13193 = vmatmul.mubr.msk.bf16.gmra.mxu1 %vm558_vm11, %v15340_v56  ;;  %1003 = vmatprep.mubr.bf16.mxu0 %v21489_v0  ;;  %v2211_v51 = vpop.permute.xlu1 %2210  ;;  %v15359_v56 = vld [vmem:[%s21433_s3 + $0xb8] sm:$0xff]  }
 0x146   : > { %14394 = vmatprep.mubr.msk.bf16.mxu1 %vm558_vm11, %v15341_v58 }
 0x147   : > { %5224 = vrot.lane.b32.xlu1 %v15834_v21, %s21464_s17 }
 0x148   : > { %5437 = vrot.lane.b32.xlu0 %v15828_v20, %s21472_s15 }
 0x149   : > { %v2215_v58 = vpop.permute.xlu1 %2214 }
 0x14b   : > { %5439 = vrot.lane.b32.xlu1 %v15834_v21, %s21472_s15 }
 0x14c   : > { %5433 = vrot.lane.b32.xlu0 %v15822_v17, %s21472_s15  ;;  %13212 = vmatmul.mubr.msk.bf16.gmra.mxu0 %vm558_vm11, %v15343_v1 }
 0x14d   : > { %14395 = vmatmul.mubr.msk.bf16.vlgmr.msra.gmra.mxu1 %vm558_vm11, %v15342_v63  ;;  %1013 = vmatprep.mubr.bf16.mxu0 %v21489_v0  ;;  %v2430_v63 = vpop.permute.xlu1 %2429 }
 0x14e   : > { %1181 = vmatpush1.bf16.msra.mxu1 %v1158_v4  ;;  %14398 = vmatprep.mubr.msk.bf16.mxu1 %vm558_vm11, %v15343_v1 }
 0x14f   : > { %15124 = vmatprep.subr.msk.bf16.mxu1 %vm21507_vm6, %v1359_v5  ;;  %5435 = vrot.lane.b32.xlu1 %v15826_v18, %s21472_s15 }
 0x150   : > { %5648 = vrot.lane.b32.xlu0 %v15822_v17, %s21470_s14  ;;  %v15347_v17 = vld [vmem:[%s21433_s3 + $0x64] sm:$0xff]  }
 0x151   : > { %v2426_v4 = vpop.permute.xlu1 %2425 }
 0x153   : > { %5650 = vrot.lane.b32.xlu1 %v15826_v18, %s21470_s14  ;;  %v1379_v18 = vsel %vm21507_vm6, %v1359_v5, 0 }
 0x154   : > { %5652 = vrot.lane.b32.xlu0 %v15828_v20, %s21470_s14  ;;  %13213 = vmatmul.mubr.msk.bf16.gmra.mxu0 %vm558_vm11, %v15344_v6  ;;  %v1564_v20 = vpop.permute.xlu0 %1563 }
 0x155   : > { %14399 = vmatmul.mubr.msk.bf16.gmra.mxu1 %vm558_vm11, %v15344_v6  ;;  %14404 = vmatprep.mubr.msk.bf16.mxu0 %vm558_vm11, %v15345_v8  ;;  %v1572_v31 = vsel %vm21474_vm15, %v1564_v20, %v1566_v15  ;;  %v15363_v6 = vld [vmem:[%s21433_s3 + $0xd4] sm:$0xff]  }
 0x156   : > { %1198 = vmatprep.mubr.bf16.mxu1 %v21489_v0  ;;  %v1588_v33 = vsel %vm21507_vm6, %v1572_v31, 0 }
 0x157   : > { %5654 = vrot.lane.b32.xlu1 %v15834_v21, %s21470_s14  ;;  %v1573_v21 = vsel %vm21474_vm15, %v1566_v15, %v1568_v10  ;;  %vm21476_vm15 = vcmask 654336  }
 0x158   : > { %v1779_v23 = vpop.permute.xlu0 %1778 }
 0x159   : > { %v1787_v40 = vsel %vm21506_vm0, %v1779_v23, %v1781_v25 }
 0x15a   : > { %v1803_v42 = vsel %vm21507_vm6, %v1787_v40, 0  ;;  %v15368_v40 = vld [vmem:[%s21433_s3 + $0xf8] ss:$0 sps:$4 sm:$0xff]  }
 0x15c   : > { %14405 = vmatmul.mubr.msk.bf16.vlgmr.msra.gmra.mxu0 %vm558_vm11, %v15346_v11  ;;  %v1783_v26 = vpop.permute.xlu0 %1782 }
 0x15d   : > { %13230 = vmatmul.mubr.msk.bf16.vlgmr.msra.gmra.mxu1 %vm558_vm11, %v15345_v8  ;;  %1396 = vmatpush1.bf16.msra.mxu0 %v1373_v16  ;;  %v1788_v28 = vsel %vm21506_vm0, %v1781_v25, %v1783_v26  ;;  %v1789_v34 = vsel %vm21506_vm0, %v1783_v26, %v1785_v32  ;;  %v15365_v16 = vld [vmem:[%s21433_s3 + $0xe0] sm:$0xff]  }
 0x15e   : > { %14413 = vmatpush3.bf16.msra.mxu1 %v1379_v18  ;;  %15125 = vmatprep.subr.msk.bf16.mxu0 %vm21507_vm6, %v1574_v19  ;;  %v1809_v44 = vsel %vm21507_vm6, %v1789_v34, 0 }
 0x15f   : > { %13269 = vmatprep.subr.msk.bf16.mxu1 %vm21507_vm6, %v1573_v21  ;;  %1208 = vmatprep.mubr.bf16.mxu1 %v21489_v0  ;;  %v15366_v21 = vld [vmem:[%s21433_s3 + $0xe8] sm:$0xff]  }
 0x160   : > { %14408 = vmatprep.mubr.msk.bf16.mxu0 %vm558_vm11, %v15347_v17  ;;  %v1998_v38 = vpop.permute.xlu0 %1997 }
 0x161   : > { %v2004_v45 = vsel %vm21508_vm2, %v1998_v38, %v2000_v37  ;;  %v2003_v47 = vsel %vm21508_vm2, %v1996_v41, %v1998_v38 }
 0x162   : > { %v2024_v53 = vsel %vm21507_vm6, %v2004_v45, 0 }
 0x164   : > { %14409 = vmatmul.mubr.msk.bf16.gmra.mxu0 %vm558_vm11, %v15348_v22  ;;  %v1994_v46 = vpop.permute.xlu0 %1993 }
 0x165   : > { %13231 = vmatmul.mubr.msk.bf16.gmra.mxu1 %vm558_vm11, %v15346_v11  ;;  %1413 = vmatprep.mubr.bf16.mxu0 %v21489_v0  ;;  %v2002_v57 = vsel %vm21508_vm2, %v1994_v46, %v1996_v41 }
 0x166   : > { %1218 = vmatprep.mubr.bf16.mxu1 %v21489_v0  ;;  %v2018_v59 = vsel %vm21507_vm6, %v2002_v57, 0 }
 0x168   : > { %v2209_v49 = vpop.permute.xlu0 %2208 }
 0x169   : > { %v2217_v3 = vsel %vm21505_vm3, %v2209_v49, %v2211_v51 }
 0x16a   : > { %v2233_v5 = vsel %vm21507_vm6, %v2217_v3, 0 }
 0x16c   : > { %13250 = vmatmul.mubr.msk.bf16.vlgmr.msra.gmra.mxu0 %vm558_vm11, %v15349_v24  ;;  %v2213_v52 = vpop.permute.xlu0 %2212 }
 0x16d   : > { %13232 = vmatmul.mubr.msk.bf16.gmra.mxu1 %vm558_vm11, %v15347_v17  ;;  %14423 = vmatpush3.bf16.msra.mxu0 %v1594_v27  ;;  %v2218_v54 = vsel %vm21505_vm3, %v2211_v51, %v2213_v52  ;;  %v2219_v60 = vsel %vm21505_vm3, %v2213_v52, %v2215_v58  ;;  %v2641_v17 = vpop.permute.xlu1 %2640  ;;  %v15367_v27 = vld [vmem:[%s21433_s3 + $0xf0] sm:$0xff]   ;;  %v15370_v52 = vld [vmem:[%s21433_s3 + $0x104] sm:$0xff]  }
 0x16e   : > { %13289 = vmatprep.subr.msk.bf16.mxu0 %vm21507_vm6, %v1788_v28  ;;  %1228 = vmatprep.mubr.bf16.mxu1 %v21489_v0  ;;  %v2239_v8 = vsel %vm21507_vm6, %v2219_v60, 0 }
 0x16f   : > { %1423 = vmatprep.mubr.bf16.mxu0 %v21489_v0 }
 0x170   : > { %v2428_v1 = vpop.permute.xlu0 %2427 }
 0x171   : > { %v2434_v9 = vsel %vm21475_vm7, %v2428_v1, %v2430_v63  ;;  %v2433_v11 = vsel %vm21475_vm7, %v2426_v4, %v2428_v1  ;;  %v2645_v31 = vpop.permute.xlu1 %2644 }
 0x172   : > { %v2454_v19 = vsel %vm21507_vm6, %v2434_v9, 0 }
 0x174   : > { %13251 = vmatmul.mubr.msk.bf16.gmra.mxu0 %vm558_vm11, %v15350_v29  ;;  %v2424_v10 = vpop.permute.xlu0 %2423 }
 0x175   : > { %13233 = vmatmul.mubr.msk.bf16.gmra.mxu1 %vm558_vm11, %v15348_v22  ;;  %1433 = vmatprep.mubr.bf16.mxu0 %v21489_v0  ;;  %v2860_v46 = vpop.permute.xlu1 %2859 }
 0x176   : > { %14414 = vmatprep.mubr.msk.bf16.mxu1 %vm558_vm11, %v15349_v24 }
 0x178   : > { %v16276_v15 = vpop.permute.xlu0 %2638 }
 0x17c   : > { %13252 = vmatmul.mubr.msk.bf16.gmra.mxu0 %vm558_vm11, %v15351_v30  ;;  %v2643_v18 = vpop.permute.xlu0 %2642 }
 0x17d   : > { %14415 = vmatmul.mubr.msk.bf16.vlgmr.msra.gmra.mxu1 %vm558_vm11, %v15350_v29  ;;  %1443 = vmatprep.mubr.bf16.mxu0 %v21489_v0  ;;  %v2648_v20 = vsel %vm21476_vm15, %v2641_v17, %v2643_v18  ;;  %v2432_v29 = vsel %vm21475_vm7, %v2424_v10, %v2426_v4  ;;  %vm21504_vm7 = vcmask 646144  }
 0x17e   : > { %1611 = vmatpush1.bf16.msra.mxu1 %v1588_v33  ;;  %14418 = vmatprep.mubr.msk.bf16.mxu1 %vm558_vm11, %v15351_v30 }
 0x17f   : > { %15126 = vmatprep.subr.msk.bf16.mxu1 %vm21507_vm6, %v1789_v34  ;;  %v2448_v34 = vsel %vm21507_vm6, %v2432_v29, 0 }
 0x184   : > { %13253 = vmatmul.mubr.msk.bf16.gmra.mxu0 %vm558_vm11, %v15352_v35 }
 0x185   : > { %14419 = vmatmul.mubr.msk.bf16.gmra.mxu1 %vm558_vm11, %v15352_v35  ;;  %14424 = vmatprep.mubr.msk.bf16.mxu0 %vm558_vm11, %v15353_v36 }
 0x186   : > { %1628 = vmatprep.mubr.bf16.mxu1 %v21489_v0 }
 0x18c   : > { %14425 = vmatmul.mubr.msk.bf16.vlgmr.msra.gmra.mxu0 %vm558_vm11, %v15354_v39 }
 0x18d   : > { %13270 = vmatmul.mubr.msk.bf16.vlgmr.msra.gmra.mxu1 %vm558_vm11, %v15353_v36  ;;  %1826 = vmatpush1.bf16.msra.mxu0 %v1803_v42  ;;  %v2649_v36 = vsel %vm21476_vm15, %v2643_v18, %v2645_v31  ;;  %v15369_v42 = vld [vmem:[%s21433_s3 + $0xfc] sm:$0xff]  }
 0x18e   : > { %14433 = vmatpush3.bf16.msra.mxu1 %v1809_v44  ;;  %15127 = vmatprep.subr.msk.bf16.mxu0 %vm21507_vm6, %v2004_v45 }
 0x18f   : > { %13309 = vmatprep.subr.msk.bf16.mxu1 %vm21507_vm6, %v2003_v47  ;;  %1638 = vmatprep.mubr.bf16.mxu1 %v21489_v0 }
 0x190   : > { %14428 = vmatprep.mubr.msk.bf16.mxu0 %vm558_vm11, %v15355_v43 }
 0x194   : > { %14429 = vmatmul.mubr.msk.bf16.gmra.mxu0 %vm558_vm11, %v15356_v48 }
 0x195   : > { %13271 = vmatmul.mubr.msk.bf16.gmra.mxu1 %vm558_vm11, %v15354_v39  ;;  %1843 = vmatprep.mubr.bf16.mxu0 %v21489_v0 }
 0x196   : > { %1648 = vmatprep.mubr.bf16.mxu1 %v21489_v0 }
 0x19c   : > { %13290 = vmatmul.mubr.msk.bf16.vlgmr.msra.gmra.mxu0 %vm558_vm11, %v15357_v50 }
 0x19d   : > { %13272 = vmatmul.mubr.msk.bf16.gmra.mxu1 %vm558_vm11, %v15355_v43  ;;  %14443 = vmatpush3.bf16.msra.mxu0 %v2024_v53  ;;  %v2647_v53 = vsel %vm21476_vm15, %v16276_v15, %v2641_v17  ;;  %vm21503_vm15 = vcmask 637952  }
 0x19e   : > { %13329 = vmatprep.subr.msk.bf16.mxu0 %vm21507_vm6, %v2218_v54  ;;  %1658 = vmatprep.mubr.bf16.mxu1 %v21489_v0  ;;  %v2663_v58 = vsel %vm21507_vm6, %v2647_v53, 0 }
 0x19f   : > { %1853 = vmatprep.mubr.bf16.mxu0 %v21489_v0 }
 0x1a4   : > { %13291 = vmatmul.mubr.msk.bf16.gmra.mxu0 %vm558_vm11, %v15358_v55 }
 0x1a5   : > { %13273 = vmatmul.mubr.msk.bf16.gmra.mxu1 %vm558_vm11, %v15356_v48  ;;  %1863 = vmatprep.mubr.bf16.mxu0 %v21489_v0 }
 0x1a6   : > { %14434 = vmatprep.mubr.msk.bf16.mxu1 %vm558_vm11, %v15357_v50  ;;  %v2858_v50 = vpop.permute.xlu0 %2857 }
 0x1ac   : > { %13292 = vmatmul.mubr.msk.bf16.gmra.mxu0 %vm558_vm11, %v15359_v56 }
 0x1ad   : > { %14435 = vmatmul.mubr.msk.bf16.vlgmr.msra.gmra.mxu1 %vm558_vm11, %v15358_v55  ;;  %1873 = vmatprep.mubr.bf16.mxu0 %v21489_v0 }
 0x1ae   : > { %2041 = vmatpush1.bf16.msra.mxu1 %v2018_v59  ;;  %14438 = vmatprep.mubr.msk.bf16.mxu1 %vm558_vm11, %v15359_v56  ;;  %v16353_v56 = vpop.permute.xlu1 %2855 }
 0x1af   : > { %15128 = vmatprep.subr.msk.bf16.mxu1 %vm21507_vm6, %v2219_v60  ;;  %v15371_v60 = vld [vmem:[%s21433_s3 + $0x10c] sm:$0xff]   ;;  %v2863_v3 = vsel %vm21504_vm7, %v16353_v56, %v2858_v50 }
 0x1b4   : > { %13293 = vmatmul.mubr.msk.bf16.gmra.mxu0 %vm558_vm11, %v15360_v61 }
 0x1b5   : > { %14439 = vmatmul.mubr.msk.bf16.gmra.mxu1 %vm558_vm11, %v15360_v61  ;;  %14444 = vmatprep.mubr.msk.bf16.mxu0 %vm558_vm11, %v15361_v62  ;;  %v2669_v61 = vsel %vm21507_vm6, %v2649_v36, 0 }
 0x1b6   : > { %2058 = vmatprep.mubr.bf16.mxu1 %v21489_v0 }
 0x1bc   : > { %14445 = vmatmul.mubr.msk.bf16.vlgmr.msra.gmra.mxu0 %vm558_vm11, %v15362_v2 }
 0x1bd   : > { %13310 = vmatmul.mubr.msk.bf16.vlgmr.msra.gmra.mxu1 %vm558_vm11, %v15361_v62  ;;  %2256 = vmatpush1.bf16.msra.mxu0 %v2233_v5  ;;  %v2864_v62 = vsel %vm21504_vm7, %v2858_v50, %v2860_v46 }
 0x1be   : > { %14453 = vmatpush3.bf16.msra.mxu1 %v2239_v8  ;;  %15129 = vmatprep.subr.msk.bf16.mxu0 %vm21507_vm6, %v2434_v9 }
 0x1bf   : > { %13349 = vmatprep.subr.msk.bf16.mxu1 %vm21507_vm6, %v2433_v11  ;;  %2068 = vmatprep.mubr.bf16.mxu1 %v21489_v0  ;;  %v15372_v11 = vld [vmem:[%s21433_s3 + $0x114] ss:$0 sps:$4 sm:$0xff]  }
 0x1c0   : > { %14448 = vmatprep.mubr.msk.bf16.mxu0 %vm558_vm11, %v15363_v6 }
 0x1c4   : > { %14449 = vmatmul.mubr.msk.bf16.gmra.mxu0 %vm558_vm11, %v15364_v13 }
 0x1c5   : > { %13311 = vmatmul.mubr.msk.bf16.gmra.mxu1 %vm558_vm11, %v15362_v2  ;;  %2273 = vmatprep.mubr.bf16.mxu0 %v21489_v0  ;;  %v16365_v2 = vpop.permute.xlu0 %2853 }
 0x1c6   : > { %2078 = vmatprep.mubr.bf16.mxu1 %v21489_v0 }
 0x1cc   : > { %13330 = vmatmul.mubr.msk.bf16.vlgmr.msra.gmra.mxu0 %vm558_vm11, %v15365_v16 }
 0x1cd   : > { %13312 = vmatmul.mubr.msk.bf16.gmra.mxu1 %vm558_vm11, %v15363_v6  ;;  %14463 = vmatpush3.bf16.msra.mxu0 %v2454_v19 }
 0x1ce   : > { %13369 = vmatprep.subr.msk.bf16.mxu0 %vm21507_vm6, %v2648_v20  ;;  %2088 = vmatprep.mubr.bf16.mxu1 %v21489_v0  ;;  %v16385_v20 = vpop.permute.xlu0 %3068 }
 0x1cf   : > { %2283 = vmatprep.mubr.bf16.mxu0 %v21489_v0 }
 0x1d4   : > { %v16295_v22 = vpop.f32.mrf.mxu0  ;;  %13331 = vmatmul.mubr.msk.bf16.gmra.mxu0 %vm558_vm11, %v15366_v21 }
 0x1d5   : > { %v16298_v23 = vpop.f32.mrf.mxu1  ;;  %13313 = vmatmul.mubr.msk.bf16.gmra.mxu1 %vm558_vm11, %v15364_v13  ;;  %2293 = vmatprep.mubr.bf16.mxu0 %v21489_v0 }
 0x1d6   : > { %v16302_v24 = vpop.f32.mrf.mxu0  ;;  %14454 = vmatprep.mubr.msk.bf16.mxu1 %vm558_vm11, %v15365_v16 }
 0x1d7   : > { %v16305_v25 = vpop.f32.mrf.mxu1 }
 0x1d8   : > { %v16307_v26 = vpop.f32.mrf.mxu0 }
 0x1d9   : > { %v648_v28 = vpop.f32.mrf.mxu1 }
 0x1da   : > { %v16313_v30 = vpop.f32.mrf.mxu0 }
 0x1db   : > { %v649_v32 = vpop.f32.mrf.mxu1 }
 0x1dc   : > { %v16315_v33 = vpop.f32.mrf.mxu0  ;;  %13332 = vmatmul.mubr.msk.bf16.gmra.mxu0 %vm558_vm11, %v15367_v27 }
 0x1dd   : > { %v14376_v35 = vpop.f32.mrf.mxu1  ;;  %14455 = vmatmul.mubr.msk.bf16.vlgmr.msra.gmra.mxu1 %vm558_vm11, %v15366_v21  ;;  %2303 = vmatprep.mubr.bf16.mxu0 %v21489_v0 }
 0x1de   : > { %2471 = vmatpush1.bf16.msra.mxu1 %v2448_v34  ;;  %v16322_v37 = vpop.f32.mrf.mxu0  ;;  %14458 = vmatprep.mubr.msk.bf16.mxu1 %vm558_vm11, %v15367_v27  ;;  %v15373_v34 = vld [vmem:[%s21433_s3 + $0x118] sm:$0xff]  }
 0x1df   : > { %15130 = vmatprep.subr.msk.bf16.mxu1 %vm21507_vm6, %v2649_v36  ;;  %v685_v38 = vpop.f32.mrf.mxu1 }
 0x1e0   : > { %v16326_v39 = vpop.f32.mrf.mxu0 }
 0x1e1   : > { %v14377_v41 = vpop.f32.mrf.mxu1 }
 0x1e2   : > { %v16334_v43 = vpop.f32.mrf.mxu0 }
 0x1e3   : > { %v688_v44 = vpop.f32.mrf.mxu1 }
 0x1e4   : > { %v16336_v45 = vpop.f32.mrf.mxu0  ;;  %13333 = vmatmul.mubr.msk.bf16.gmra.mxu0 %vm558_vm11, %v15368_v40 }
 0x1e5   : > { %v14380_v47 = vpop.f32.mrf.mxu1  ;;  %14459 = vmatmul.mubr.msk.bf16.gmra.mxu1 %vm558_vm11, %v15368_v40  ;;  %14464 = vmatprep.mubr.msk.bf16.mxu0 %vm558_vm11, %v15369_v42 }
 0x1e6   : > { %v16341_v48 = vpop.f32.mrf.mxu0  ;;  %2488 = vmatprep.mubr.bf16.mxu1 %v21489_v0 }
 0x1e7   : > { %v701_v49 = vpop.f32.mrf.mxu1 }
 0x1e8   : > { %v16344_v51 = vpop.f32.mrf.mxu0 }
 0x1e9   : > { %v14381_v54 = vpop.f32.mrf.mxu1 }
 0x1ea   : > { %v16351_v55 = vpop.f32.mrf.mxu0 }
 0x1eb   : > { %v704_v57 = vpop.f32.mrf.mxu1 }
 0x1ec   : > { %v14386_v59 = vpop.f32.mrf.mxu0  ;;  %14465 = vmatmul.mubr.msk.bf16.vlgmr.msra.gmra.mxu0 %vm558_vm11, %v15370_v52 }
 0x1ed   : > { %v791_v63 = vpop.f32.mrf.mxu1  ;;  %v16362_v1 = vadd.f32 %v14386_v59, %v14376_v35  ;;  %13350 = vmatmul.mubr.msk.bf16.vlgmr.msra.gmra.mxu1 %vm558_vm11, %v15369_v42  ;;  %2686 = vmatpush1.bf16.msra.mxu0 %v2663_v58  ;;  %v16401_v35 = vpop.permute.xlu1 %3070  ;;  %v15374_v58 = vld [vmem:[%s21433_s3 + $0x120] sm:$0xff]  }
 0x1ee   : > { %v792_v4 = vadd.f32 %v791_v63, %v16295_v22  ;;  %14473 = vmatpush3.bf16.msra.mxu1 %v2669_v61  ;;  %15131 = vmatprep.subr.msk.bf16.mxu0 %vm21507_vm6, %v2864_v62  ;;  %v862_v5 = vpop.f32.mrf.mxu0 }
 0x1ef   : > { %13389 = vmatprep.subr.msk.bf16.mxu1 %vm21507_vm6, %v2863_v3  ;;  %v793_v6 = vpop.f32.mrf.mxu1  ;;  %v16372_v8 = vadd.f32 %v862_v5, %v685_v38  ;;  %2498 = vmatprep.mubr.bf16.mxu1 %v21489_v0  ;;  %v3073_v38 = vpop.permute.xlu0 %3072 }
 0x1f0   : > { %v794_v9 = vadd.f32 %v793_v6, %v16302_v24  ;;  %v14387_v10 = vpop.f32.mrf.mxu0  ;;  %14468 = vmatprep.mubr.msk.bf16.mxu0 %vm558_vm11, %v15371_v60 }
 0x1f1   : > { %v795_v13 = vpop.f32.mrf.mxu1  ;;  %v16380_v15 = vadd.f32 %v14387_v10, %v14377_v41 }
 0x1f2   : > { %v796_v16 = vadd.f32 %v795_v13, %v16307_v26  ;;  %v865_v17 = vpop.f32.mrf.mxu0 }
 0x1f3   : > { %v797_v18 = vpop.f32.mrf.mxu1  ;;  %v16383_v19 = vadd.f32 %v865_v17, %v688_v44  ;;  %v2884_v44 = vsel %vm21507_vm6, %v2864_v62, 0 }
 0x1f4   : > { %v798_v21 = vadd.f32 %v797_v18, %v16313_v30  ;;  %v14390_v22 = vpop.f32.mrf.mxu0  ;;  %14469 = vmatmul.mubr.msk.bf16.gmra.mxu0 %vm558_vm11, %v15372_v11 }
 0x1f5   : > { %v801_v24 = vpop.f32.mrf.mxu1  ;;  %v16389_v27 = vadd.f32 %v14390_v22, %v14380_v47  ;;  %13351 = vmatmul.mubr.msk.bf16.gmra.mxu1 %vm558_vm11, %v15370_v52  ;;  %2703 = vmatprep.mubr.bf16.mxu0 %v21489_v0  ;;  %v3078_v47 = vsel %vm21503_vm15, %v16401_v35, %v3073_v38 }
 0x1f6   : > { %v802_v26 = vadd.f32 %v801_v24, %v16315_v33  ;;  %v878_v28 = vpop.f32.mrf.mxu0  ;;  %2508 = vmatprep.mubr.bf16.mxu1 %v21489_v0 }
 0x1f7   : > { %v803_v29 = vpop.f32.mrf.mxu1  ;;  %v16395_v31 = vadd.f32 %v878_v28, %v701_v49 }
 0x1f8   : > { %v804_v30 = vadd.f32 %v803_v29, %v16322_v37  ;;  %v14391_v32 = vpop.f32.mrf.mxu0 }
 0x1f9   : > { %v805_v36 = vpop.f32.mrf.mxu1 }
 0x1fa   : > { %v806_v33 = vadd.f32 %v805_v36, %v16326_v39  ;;  %v881_v40 = vpop.f32.mrf.mxu0 }
 0x1fb   : > { %v807_v41 = vpop.f32.mrf.mxu1  ;;  %v16404_v42 = vadd.f32 %v881_v40, %v704_v57  ;;  %v15376_v40 = vld [vmem:[%s21433_s3 + $0x130] ss:$0 sps:$4 sm:$0xff]  }
 0x1fc   : > { %v808_v37 = vadd.f32 %v807_v41, %v16334_v43  ;;  %v985_v46 = vpop.f32.mrf.mxu0  ;;  %13370 = vmatmul.mubr.msk.bf16.vlgmr.msra.gmra.mxu0 %vm558_vm11, %v15373_v34 }
 0x1fd   : > { %v811_v49 = vpop.f32.mrf.mxu1  ;;  %v16411_v50 = vadd.f32 %v985_v46, %v792_v4  ;;  %13352 = vmatmul.mubr.msk.bf16.gmra.mxu1 %vm558_vm11, %v15371_v60  ;;  %14483 = vmatpush3.bf16.msra.mxu0 %v2884_v44 }
 0x1fe   : > { %v812_v39 = vadd.f32 %v811_v49, %v16336_v45  ;;  %13409 = vmatprep.subr.msk.bf16.mxu0 %vm21507_vm6, %v3078_v47  ;;  %v987_v52 = vpop.f32.mrf.mxu0  ;;  %2518 = vmatprep.mubr.bf16.mxu1 %v21489_v0 }
 0x1ff   : > { %v813_v43 = vpop.f32.mrf.mxu1  ;;  %v16417_v53 = vadd.f32 %v987_v52, %v794_v9  ;;  %2713 = vmatprep.mubr.bf16.mxu0 %v21489_v0 }
 0x200   : > { %v814_v54 = vadd.f32 %v813_v43, %v16341_v48  ;;  %v989_v57 = vpop.f32.mrf.mxu0 }
 0x201   : > { %v815_v59 = vpop.f32.mrf.mxu1  ;;  %v16424_v60 = vadd.f32 %v989_v57, %v796_v16  ;;  %v15375_v16 = vld [vmem:[%s21433_s3 + $0x128] sm:$0xff]  }
 0x202   : > { %v816_v45 = vadd.f32 %v815_v59, %v16344_v51  ;;  %v991_v61 = vpop.f32.mrf.mxu0 }
 0x203   : > { %v817_v62 = vpop.f32.mrf.mxu1  ;;  %v16427_v63 = vadd.f32 %v991_v61, %v798_v21  ;;  %v3075_v21 = vpop.permute.xlu1 %3074  ;;  %v15378_v61 = vld [vmem:[%s21433_s3 + $0x13c] sm:$0xff]  }
 0x204   : > { %v818_v3 = vadd.f32 %v817_v62, %v16351_v55  ;;  %v995_v4 = vpop.f32.mrf.mxu0  ;;  %13371 = vmatmul.mubr.msk.bf16.gmra.mxu0 %vm558_vm11, %v15374_v58  ;;  %v3077_v62 = vsel %vm21503_vm15, %v16385_v20, %v16401_v35 }
 0x205   : > { %v821_v48 = vpop.f32.mrf.mxu1  ;;  %v16431_v5 = vadd.f32 %v995_v4, %v802_v26  ;;  %13353 = vmatmul.mubr.msk.bf16.gmra.mxu1 %vm558_vm11, %v15372_v11  ;;  %2723 = vmatprep.mubr.bf16.mxu0 %v21489_v0 }
 0x206   : > { %v822_v6 = vadd.f32 %v821_v48, %v16298_v23  ;;  %v997_v9 = vpop.f32.mrf.mxu0  ;;  %14474 = vmatprep.mubr.msk.bf16.mxu1 %vm558_vm11, %v15373_v34  ;;  %v2862_v23 = vsel %vm21504_vm7, %v16365_v2, %v16353_v56 }
 0x207   : > { %v823_v51 = vpop.f32.mrf.mxu1  ;;  %v16437_v10 = vadd.f32 %v997_v9, %v804_v30  ;;  %v3079_v30 = vsel %vm21503_vm15, %v3073_v38, %v3075_v21 }
 0x208   : > { %v824_v55 = vadd.f32 %v823_v51, %v16305_v25  ;;  %v999_v13 = vpop.f32.mrf.mxu0  ;;  %v2878_v25 = vsel %vm21507_vm6, %v2862_v23, 0  ;;  %v15379_v51 = vld [vmem:[%s21433_s3 + $0x144] sm:$0xff]  }
 0x209   : > { %v825_v17 = vpop.f32.mrf.mxu1  ;;  %v16443_v18 = vadd.f32 %v999_v13, %v806_v33 }
 0x20a   : > { %v1001_v11 = vpop.f32.mrf.mxu0 }
 0x20b   : > { %v826_v22 = vpop.f32.mrf.mxu1  ;;  %v16448_v24 = vadd.f32 %v1001_v11, %v808_v37 }
 0x20c   : > { %v1005_v26 = vpop.f32.mrf.mxu0  ;;  %13372 = vmatmul.mubr.msk.bf16.gmra.mxu0 %vm558_vm11, %v15375_v16 }
 0x20d   : > { %v16452_v28 = vadd.f32 %v1005_v26, %v812_v39  ;;  %v14396_v29 = vpop.f32.mrf.mxu1  ;;  %14475 = vmatmul.mubr.msk.bf16.vlgmr.msra.gmra.mxu1 %vm558_vm11, %v15374_v58  ;;  %2733 = vmatprep.mubr.bf16.mxu0 %v21489_v0  ;;  %v3290_v39 = vpop.permute.xlu1 %3289 }
 0x20e   : > { %v1094_v56 = vadd.f32 %v14396_v29, %v16362_v1  ;;  %2901 = vmatpush1.bf16.msra.mxu1 %v2878_v25  ;;  %v1007_v2 = vpop.f32.mrf.mxu0  ;;  %14478 = vmatprep.mubr.msk.bf16.mxu1 %vm558_vm11, %v15375_v16  ;;  %v15377_v1 = vld [vmem:[%s21433_s3 + $0x134] sm:$0xff]  }
 0x20f   : > { %15132 = vmatprep.subr.msk.bf16.mxu1 %vm21507_vm6, %v3079_v30  ;;  %v16460_v32 = vadd.f32 %v1007_v2, %v814_v54  ;;  %v1056_v34 = vpop.f32.mrf.mxu1 }
 0x210   : > { %v1088_v36 = vadd.f32 %v1056_v34, %v16372_v8  ;;  %v1009_v33 = vpop.f32.mrf.mxu0 }
 0x211   : > { %v16466_v41 = vadd.f32 %v1009_v33, %v816_v45  ;;  %v14397_v38 = vpop.f32.mrf.mxu1  ;;  %v16491_v4 = vpop.permute.xlu1 %3285 }
 0x212   : > { %v1097_v44 = vadd.f32 %v14397_v38, %v16380_v15  ;;  %v1011_v37 = vpop.f32.mrf.mxu0 }
 0x213   : > { %v16472_v46 = vadd.f32 %v1011_v37, %v818_v3  ;;  %v1059_v47 = vpop.f32.mrf.mxu1 }
 0x214   : > { %v1091_v8 = vadd.f32 %v1059_v47, %v16383_v19  ;;  %v1015_v49 = vpop.f32.mrf.mxu0  ;;  %13373 = vmatmul.mubr.msk.bf16.gmra.mxu0 %vm558_vm11, %v15376_v40  ;;  %v3288_v19 = vpop.permute.xlu0 %3287 }
 0x215   : > { %v16476_v52 = vadd.f32 %v1015_v49, %v822_v6  ;;  %v14400_v43 = vpop.f32.mrf.mxu1  ;;  %14479 = vmatmul.mubr.msk.bf16.gmra.mxu1 %vm558_vm11, %v15376_v40  ;;  %14484 = vmatprep.mubr.msk.bf16.mxu0 %vm558_vm11, %v15377_v1  ;;  %v3093_v6 = vsel %vm21507_vm6, %v3077_v62, 0  ;;  %v3294_v20 = vsel %vm21502_vm14, %v3288_v19, %v3290_v39  ;;  %v16540_v49 = vpop.permute.xlu1 %3500 }
 0x216   : > { %v1106_v54 = vadd.f32 %v14400_v43, %v16389_v27  ;;  %v1017_v15 = vpop.f32.mrf.mxu0  ;;  %2918 = vmatprep.mubr.bf16.mxu1 %v21489_v0 }
 0x217   : > { %v16482_v57 = vadd.f32 %v1017_v15, %v824_v55  ;;  %v1072_v58 = vpop.f32.mrf.mxu1  ;;  %v3099_v55 = vsel %vm21507_vm6, %v3079_v30, 0 }
 0x218   : > { %v1100_v59 = vadd.f32 %v1072_v58, %v16395_v31  ;;  %v1019_v45 = vpop.f32.mrf.mxu0  ;;  %v16504_v16 = vpop.permute.xlu0 %3283 }
 0x219   : > { %v14401_v3 = vpop.f32.mrf.mxu1 }
 0x21a   : > { %v1020_v27 = vpop.f32.mrf.mxu0 }
 0x21b   : > { %v1075_v48 = vpop.f32.mrf.mxu1 }
 0x21c   : > { %v1103_v9 = vadd.f32 %v1075_v48, %v16404_v42  ;;  %v14406_v31 = vpop.f32.mrf.mxu0  ;;  %14485 = vmatmul.mubr.msk.bf16.vlgmr.msra.gmra.mxu0 %vm558_vm11, %v15378_v61  ;;  %v3293_v42 = vsel %vm21502_vm14, %v16491_v4, %v3288_v19  ;;  %v3314_v19 = vsel %vm21507_vm6, %v3294_v20, 0 }
 0x21d   : > { %v1200_v35 = vpop.f32.mrf.mxu1  ;;  %v16501_v13 = vadd.f32 %v14406_v31, %v1094_v56  ;;  %13390 = vmatmul.mubr.msk.bf16.vlgmr.msra.gmra.mxu1 %vm558_vm11, %v15377_v1  ;;  %3116 = vmatpush1.bf16.msra.mxu0 %v3093_v6 }
 0x21e   : > { %v1301_v17 = vadd.f32 %v1200_v35, %v16411_v50  ;;  %14493 = vmatpush3.bf16.msra.mxu1 %v3099_v55  ;;  %15133 = vmatprep.subr.msk.bf16.mxu0 %vm21507_vm6, %v3294_v20  ;;  %v1271_v23 = vpop.f32.mrf.mxu0  ;;  %v15380_v50 = vld [vmem:[%s21433_s3 + $0x14c] ss:$0 sps:$4 sm:$0xff]  }
 0x21f   : > { %13429 = vmatprep.subr.msk.bf16.mxu1 %vm21507_vm6, %v3293_v42  ;;  %v1202_v11 = vpop.f32.mrf.mxu1  ;;  %v16511_v21 = vadd.f32 %v1271_v23, %v1088_v36  ;;  %2928 = vmatprep.mubr.bf16.mxu1 %v21489_v0  ;;  %v16524_v36 = vpop.permute.xlu0 %3498 }
 0x220   : > { %v1302_v22 = vadd.f32 %v1202_v11, %v16417_v53  ;;  %v14407_v26 = vpop.f32.mrf.mxu0  ;;  %14488 = vmatprep.mubr.msk.bf16.mxu0 %vm558_vm11, %v15379_v51 }
 0x221   : > { %v1204_v25 = vpop.f32.mrf.mxu1  ;;  %v16519_v29 = vadd.f32 %v14407_v26, %v1097_v44 }
 0x222   : > { %v1304_v30 = vadd.f32 %v1204_v25, %v16424_v60  ;;  %v1274_v56 = vpop.f32.mrf.mxu0 }
 0x223   : > { %v1206_v2 = vpop.f32.mrf.mxu1  ;;  %v16522_v34 = vadd.f32 %v1274_v56, %v1091_v8  ;;  %v15381_v8 = vld [vmem:[%s21433_s3 + $0x150] sm:$0xff]   ;;  %v3503_v43 = vpop.permute.xlu0 %3502 }
 0x224   : > { %v1305_v53 = vadd.f32 %v1206_v2, %v16427_v63  ;;  %v14410_v33 = vpop.f32.mrf.mxu0  ;;  %14489 = vmatmul.mubr.msk.bf16.gmra.mxu0 %vm558_vm11, %v15380_v50  ;;  %v3508_v45 = vsel %vm21480_vm13, %v16540_v49, %v3503_v43 }
 0x225   : > { %v1210_v40 = vpop.f32.mrf.mxu1  ;;  %v16528_v38 = vadd.f32 %v14410_v33, %v1106_v54  ;;  %13391 = vmatmul.mubr.msk.bf16.gmra.mxu1 %vm558_vm11, %v15378_v61  ;;  %3133 = vmatprep.mubr.bf16.mxu0 %v21489_v0 }
 0x226   : > { %v1307_v60 = vadd.f32 %v1210_v40, %v16431_v5  ;;  %v1287_v1 = vpop.f32.mrf.mxu0  ;;  %2938 = vmatprep.mubr.bf16.mxu1 %v21489_v0 }
 0x227   : > { %v1212_v44 = vpop.f32.mrf.mxu1  ;;  %v16534_v37 = vadd.f32 %v1287_v1, %v1100_v59 }
 0x228   : > { %v1308_v63 = vadd.f32 %v1212_v44, %v16437_v10  ;;  %v14411_v47 = vpop.f32.mrf.mxu0 }
 0x229   : > { %v1214_v39 = vpop.f32.mrf.mxu1 }
 0x22a   : > { %v1310_v5 = vadd.f32 %v1214_v39, %v16443_v18  ;;  %v1290_v54 = vpop.f32.mrf.mxu0 }
 0x22b   : > { %v1216_v15 = vpop.f32.mrf.mxu1  ;;  %v16543_v58 = vadd.f32 %v1290_v54, %v1103_v9  ;;  %v15382_v9 = vld [vmem:[%s21433_s3 + $0x158] sm:$0xff]   ;;  %v15384_v54 = vld [vmem:[%s21433_s3 + $0x168] ss:$0 sps:$4 sm:$0xff]  }
 0x22c   : > { %v1311_v10 = vadd.f32 %v1216_v15, %v16448_v24  ;;  %v1415_v59 = vpop.f32.mrf.mxu0  ;;  %13410 = vmatmul.mubr.msk.bf16.vlgmr.msra.gmra.mxu0 %vm558_vm11, %v15381_v8 }
 0x22d   : > { %v1220_v61 = vpop.f32.mrf.mxu1  ;;  %v16550_v62 = vadd.f32 %v1415_v59, %v1301_v17  ;;  %13392 = vmatmul.mubr.msk.bf16.gmra.mxu1 %vm558_vm11, %v15379_v51  ;;  %14503 = vmatpush3.bf16.msra.mxu0 %v3314_v19 }
 0x22e   : > { %v1313_v18 = vadd.f32 %v1220_v61, %v16452_v28  ;;  %13449 = vmatprep.subr.msk.bf16.mxu0 %vm21507_vm6, %v3508_v45  ;;  %v1417_v3 = vpop.f32.mrf.mxu0  ;;  %2948 = vmatprep.mubr.bf16.mxu1 %v21489_v0 }
 0x22f   : > { %v1222_v24 = vpop.f32.mrf.mxu1  ;;  %v16556_v27 = vadd.f32 %v1417_v3, %v1302_v22  ;;  %3143 = vmatprep.mubr.bf16.mxu0 %v21489_v0 }
 0x230   : > { %v1314_v48 = vadd.f32 %v1222_v24, %v16460_v32  ;;  %v1419_v6 = vpop.f32.mrf.mxu0 }
 0x231   : > { %v1224_v31 = vpop.f32.mrf.mxu1  ;;  %v16563_v51 = vadd.f32 %v1419_v6, %v1304_v30  ;;  %v15383_v30 = vld [vmem:[%s21433_s3 + $0x160] sm:$0xff]  }
 0x232   : > { %v1316_v28 = vadd.f32 %v1224_v31, %v16466_v41  ;;  %v1421_v55 = vpop.f32.mrf.mxu0 }
 0x233   : > { %v1226_v20 = vpop.f32.mrf.mxu1  ;;  %v16566_v35 = vadd.f32 %v1421_v55, %v1305_v53  ;;  %v3505_v53 = vpop.permute.xlu1 %3504  ;;  %v15386_v55 = vld [vmem:[%s21433_s3 + $0x174] sm:$0xff]  }
 0x234   : > { %v1317_v42 = vadd.f32 %v1226_v20, %v16472_v46  ;;  %v1425_v17 = vpop.f32.mrf.mxu0  ;;  %13411 = vmatmul.mubr.msk.bf16.gmra.mxu0 %vm558_vm11, %v15382_v9  ;;  %v3507_v20 = vsel %vm21480_vm13, %v16524_v36, %v16540_v49 }
 0x235   : > { %v1230_v32 = vpop.f32.mrf.mxu1  ;;  %v16570_v23 = vadd.f32 %v1425_v17, %v1307_v60  ;;  %13393 = vmatmul.mubr.msk.bf16.gmra.mxu1 %vm558_vm11, %v15380_v50  ;;  %3153 = vmatprep.mubr.bf16.mxu0 %v21489_v0 }
 0x236   : > { %v1319_v11 = vadd.f32 %v1230_v32, %v16476_v52  ;;  %v1427_v22 = vpop.f32.mrf.mxu0  ;;  %14494 = vmatprep.mubr.msk.bf16.mxu1 %vm558_vm11, %v15381_v8  ;;  %v3292_v52 = vsel %vm21502_vm14, %v16504_v16, %v16491_v4 }
 0x237   : > { %v1232_v41 = vpop.f32.mrf.mxu1  ;;  %v16576_v26 = vadd.f32 %v1427_v22, %v1308_v63  ;;  %v3509_v63 = vsel %vm21480_vm13, %v3503_v43, %v3505_v53  ;;  %vm21482_vm13 = vcmask 449536  }
 0x238   : > { %v1320_v46 = vadd.f32 %v1232_v41, %v16482_v57  ;;  %v1429_v25 = vpop.f32.mrf.mxu0  ;;  %v3308_v57 = vsel %vm21507_vm6, %v3292_v52, 0  ;;  %v15387_v41 = vld [vmem:[%s21433_s3 + $0x17c] sm:$0xff]  }
 0x239   : > { %v1234_v56 = vpop.f32.mrf.mxu1  ;;  %v16582_v2 = vadd.f32 %v1429_v25, %v1310_v5 }
 0x23a   : > { %v1431_v50 = vpop.f32.mrf.mxu0 }
 0x23b   : > { %v1235_v33 = vpop.f32.mrf.mxu1  ;;  %v16587_v40 = vadd.f32 %v1431_v50, %v1311_v10 }
 0x23c   : > { %v1435_v60 = vpop.f32.mrf.mxu0  ;;  %13412 = vmatmul.mubr.msk.bf16.gmra.mxu0 %vm558_vm11, %v15383_v30 }
 0x23d   : > { %v16591_v1 = vadd.f32 %v1435_v60, %v1313_v18  ;;  %v14416_v44 = vpop.f32.mrf.mxu1  ;;  %14495 = vmatmul.mubr.msk.bf16.vlgmr.msra.gmra.mxu1 %vm558_vm11, %v15382_v9  ;;  %3163 = vmatprep.mubr.bf16.mxu0 %v21489_v0  ;;  %v3720_v18 = vpop.permute.xlu1 %3719 }
 0x23e   : > { %v1524_v4 = vadd.f32 %v14416_v44, %v16501_v13  ;;  %3331 = vmatpush1.bf16.msra.mxu1 %v3308_v57  ;;  %v1437_v16 = vpop.f32.mrf.mxu0  ;;  %14498 = vmatprep.mubr.msk.bf16.mxu1 %vm558_vm11, %v15383_v30  ;;  %v15385_v13 = vld [vmem:[%s21433_s3 + $0x16c] sm:$0xff]  }
 0x23f   : > { %15134 = vmatprep.subr.msk.bf16.mxu1 %vm21507_vm6, %v3509_v63  ;;  %v16599_v47 = vadd.f32 %v1437_v16, %v1314_v48  ;;  %v1486_v8 = vpop.f32.mrf.mxu1 }
 0x240   : > { %v1518_v39 = vadd.f32 %v1486_v8, %v16511_v21  ;;  %v1439_v5 = vpop.f32.mrf.mxu0 }
 0x241   : > { %v16605_v15 = vadd.f32 %v1439_v5, %v1316_v28  ;;  %v14417_v43 = vpop.f32.mrf.mxu1  ;;  %v16630_v17 = vpop.permute.xlu1 %3715 }
 0x242   : > { %v1527_v19 = vadd.f32 %v14417_v43, %v16519_v29  ;;  %v1441_v10 = vpop.f32.mrf.mxu0 }
 0x243   : > { %v16611_v59 = vadd.f32 %v1441_v10, %v1317_v42  ;;  %v1489_v45 = vpop.f32.mrf.mxu1 }
 0x244   : > { %v1521_v21 = vadd.f32 %v1489_v45, %v16522_v34  ;;  %v1445_v61 = vpop.f32.mrf.mxu0  ;;  %13413 = vmatmul.mubr.msk.bf16.gmra.mxu0 %vm558_vm11, %v15384_v54  ;;  %v3718_v34 = vpop.permute.xlu0 %3717 }
 0x245   : > { %v16615_v3 = vadd.f32 %v1445_v61, %v1319_v11  ;;  %v14420_v24 = vpop.f32.mrf.mxu1  ;;  %14499 = vmatmul.mubr.msk.bf16.gmra.mxu1 %vm558_vm11, %v15384_v54  ;;  %14504 = vmatprep.mubr.msk.bf16.mxu0 %vm558_vm11, %v15385_v13  ;;  %v3523_v11 = vsel %vm21507_vm6, %v3507_v20, 0  ;;  %v3724_v36 = vsel %vm3721_vm12, %v3718_v34, %v3720_v18  ;;  %v16679_v61 = vpop.permute.xlu1 %3930 }
 0x246   : > { %v1536_v48 = vadd.f32 %v14420_v24, %v16528_v38  ;;  %v1447_v29 = vpop.f32.mrf.mxu0  ;;  %3348 = vmatprep.mubr.bf16.mxu1 %v21489_v0 }
 0x247   : > { %v16621_v6 = vadd.f32 %v1447_v29, %v1320_v46  ;;  %v1502_v9 = vpop.f32.mrf.mxu1  ;;  %v3529_v46 = vsel %vm21507_vm6, %v3509_v63, 0 }
 0x248   : > { %v1530_v31 = vadd.f32 %v1502_v9, %v16534_v37  ;;  %v1449_v28 = vpop.f32.mrf.mxu0  ;;  %v16643_v30 = vpop.permute.xlu0 %3713 }
 0x249   : > { %v14421_v42 = vpop.f32.mrf.mxu1 }
 0x24a   : > { %v1450_v38 = vpop.f32.mrf.mxu0 }
 0x24b   : > { %v1505_v32 = vpop.f32.mrf.mxu1 }
 0x24c   : > { %v1533_v22 = vadd.f32 %v1505_v32, %v16543_v58  ;;  %v14426_v37 = vpop.f32.mrf.mxu0  ;;  %14505 = vmatmul.mubr.msk.bf16.vlgmr.msra.gmra.mxu0 %vm558_vm11, %v15386_v55  ;;  %v3723_v58 = vsel %vm3721_vm12, %v16630_v17, %v3718_v34  ;;  %v3744_v34 = vsel %vm21507_vm6, %v3724_v36, 0 }
 0x24d   : > { %v1630_v49 = vpop.f32.mrf.mxu1  ;;  %v16640_v25 = vadd.f32 %v14426_v37, %v1524_v4  ;;  %13430 = vmatmul.mubr.msk.bf16.vlgmr.msra.gmra.mxu1 %vm558_vm11, %v15385_v13  ;;  %3546 = vmatpush1.bf16.msra.mxu0 %v3523_v11 }
 0x24e   : > { %v1731_v56 = vadd.f32 %v1630_v49, %v16550_v62  ;;  %14513 = vmatpush3.bf16.msra.mxu1 %v3529_v46  ;;  %15135 = vmatprep.subr.msk.bf16.mxu0 %vm21507_vm6, %v3724_v36  ;;  %v1701_v52 = vpop.f32.mrf.mxu0  ;;  %v15388_v62 = vld [vmem:[%s21433_s3 + $0x184] ss:$0 sps:$4 sm:$0xff]  }
 0x24f   : > { %13469 = vmatprep.subr.msk.bf16.mxu1 %vm21507_vm6, %v3723_v58  ;;  %v1632_v50 = vpop.f32.mrf.mxu1  ;;  %v16650_v53 = vadd.f32 %v1701_v52, %v1518_v39  ;;  %3358 = vmatprep.mubr.bf16.mxu1 %v21489_v0  ;;  %v16663_v39 = vpop.permute.xlu0 %3928 }
 0x250   : > { %v1732_v33 = vadd.f32 %v1632_v50, %v16556_v27  ;;  %v14427_v60 = vpop.f32.mrf.mxu0  ;;  %14508 = vmatprep.mubr.msk.bf16.mxu0 %vm558_vm11, %v15387_v41 }
 0x251   : > { %v1634_v57 = vpop.f32.mrf.mxu1  ;;  %v16658_v44 = vadd.f32 %v14427_v60, %v1527_v19 }
 0x252   : > { %v1734_v63 = vadd.f32 %v1634_v57, %v16563_v51  ;;  %v1704_v4 = vpop.f32.mrf.mxu0 }
 0x253   : > { %v1636_v16 = vpop.f32.mrf.mxu1  ;;  %v16661_v8 = vadd.f32 %v1704_v4, %v1521_v21  ;;  %v15389_v21 = vld [vmem:[%s21433_s3 + $0x188] sm:$0xff]   ;;  %v3933_v24 = vpop.permute.xlu0 %3932 }
 0x254   : > { %v1735_v27 = vadd.f32 %v1636_v16, %v16566_v35  ;;  %v14430_v5 = vpop.f32.mrf.mxu0  ;;  %14509 = vmatmul.mubr.msk.bf16.gmra.mxu0 %vm558_vm11, %v15388_v62  ;;  %v3938_v28 = vsel %vm21482_vm13, %v16679_v61, %v3933_v24 }
 0x255   : > { %v1640_v54 = vpop.f32.mrf.mxu1  ;;  %v16667_v43 = vadd.f32 %v14430_v5, %v1536_v48  ;;  %13431 = vmatmul.mubr.msk.bf16.gmra.mxu1 %vm558_vm11, %v15386_v55  ;;  %3563 = vmatprep.mubr.bf16.mxu0 %v21489_v0 }
 0x256   : > { %v1737_v51 = vadd.f32 %v1640_v54, %v16570_v23  ;;  %v1717_v13 = vpop.f32.mrf.mxu0  ;;  %3368 = vmatprep.mubr.bf16.mxu1 %v21489_v0 }
 0x257   : > { %v1642_v19 = vpop.f32.mrf.mxu1  ;;  %v16673_v10 = vadd.f32 %v1717_v13, %v1530_v31 }
 0x258   : > { %v1738_v35 = vadd.f32 %v1642_v19, %v16576_v26  ;;  %v14431_v45 = vpop.f32.mrf.mxu0 }
 0x259   : > { %v1644_v18 = vpop.f32.mrf.mxu1 }
 0x25a   : > { %v1740_v23 = vadd.f32 %v1644_v18, %v16582_v2  ;;  %v1720_v48 = vpop.f32.mrf.mxu0 }
 0x25b   : > { %v1646_v29 = vpop.f32.mrf.mxu1  ;;  %v16682_v9 = vadd.f32 %v1720_v48, %v1533_v22  ;;  %v15390_v22 = vld [vmem:[%s21433_s3 + $0x190] sm:$0xff]   ;;  %v15392_v48 = vld [vmem:[%s21433_s3 + $0x1a0] ss:$0 sps:$4 sm:$0xff]  }
 0x25c   : > { %v1741_v26 = vadd.f32 %v1646_v29, %v16587_v40  ;;  %v1845_v31 = vpop.f32.mrf.mxu0  ;;  %13450 = vmatmul.mubr.msk.bf16.vlgmr.msra.gmra.mxu0 %vm558_vm11, %v15389_v21 }
 0x25d   : > { %v1650_v55 = vpop.f32.mrf.mxu1  ;;  %v16689_v20 = vadd.f32 %v1845_v31, %v1731_v56  ;;  %13432 = vmatmul.mubr.msk.bf16.gmra.mxu1 %vm558_vm11, %v15387_v41  ;;  %14523 = vmatpush3.bf16.msra.mxu0 %v3744_v34 }
 0x25e   : > { %v1743_v2 = vadd.f32 %v1650_v55, %v16591_v1  ;;  %13489 = vmatprep.subr.msk.bf16.mxu0 %vm21507_vm6, %v3938_v28  ;;  %v1847_v42 = vpop.f32.mrf.mxu0  ;;  %3378 = vmatprep.mubr.bf16.mxu1 %v21489_v0 }
 0x25f   : > { %v1652_v40 = vpop.f32.mrf.mxu1  ;;  %v16695_v38 = vadd.f32 %v1847_v42, %v1732_v33  ;;  %3573 = vmatprep.mubr.bf16.mxu0 %v21489_v0 }
 0x260   : > { %v1744_v32 = vadd.f32 %v1652_v40, %v16599_v47  ;;  %v1849_v11 = vpop.f32.mrf.mxu0 }
 0x261   : > { %v1654_v37 = vpop.f32.mrf.mxu1  ;;  %v16702_v41 = vadd.f32 %v1849_v11, %v1734_v63  ;;  %v15391_v63 = vld [vmem:[%s21433_s3 + $0x198] sm:$0xff]  }
 0x262   : > { %v1746_v1 = vadd.f32 %v1654_v37, %v16605_v15  ;;  %v1851_v46 = vpop.f32.mrf.mxu0 }
 0x263   : > { %v1656_v36 = vpop.f32.mrf.mxu1  ;;  %v16705_v49 = vadd.f32 %v1851_v46, %v1735_v27  ;;  %v3935_v27 = vpop.permute.xlu1 %3934  ;;  %v15394_v46 = vld [vmem:[%s21433_s3 + $0x1ac] sm:$0xff]  }
 0x264   : > { %v1747_v58 = vadd.f32 %v1656_v36, %v16611_v59  ;;  %v1855_v56 = vpop.f32.mrf.mxu0  ;;  %13451 = vmatmul.mubr.msk.bf16.gmra.mxu0 %vm558_vm11, %v15390_v22  ;;  %v3937_v36 = vsel %vm21482_vm13, %v16663_v39, %v16679_v61 }
 0x265   : > { %v1660_v47 = vpop.f32.mrf.mxu1  ;;  %v16709_v52 = vadd.f32 %v1855_v56, %v1737_v51  ;;  %13433 = vmatmul.mubr.msk.bf16.gmra.mxu1 %vm558_vm11, %v15388_v62  ;;  %3583 = vmatprep.mubr.bf16.mxu0 %v21489_v0 }
 0x266   : > { %v1749_v50 = vadd.f32 %v1660_v47, %v16615_v3  ;;  %v1857_v33 = vpop.f32.mrf.mxu0  ;;  %14514 = vmatprep.mubr.msk.bf16.mxu1 %vm558_vm11, %v15389_v21  ;;  %v3722_v3 = vsel %vm3721_vm12, %v16643_v30, %v16630_v17 }
 0x267   : > { %v1662_v15 = vpop.f32.mrf.mxu1  ;;  %v16715_v60 = vadd.f32 %v1857_v33, %v1738_v35  ;;  %v3939_v35 = vsel %vm21482_vm13, %v3933_v24, %v3935_v27  ;;  %vm21484_vm13 = vcmask 433152  }
 0x268   : > { %v1750_v59 = vadd.f32 %v1662_v15, %v16621_v6  ;;  %v1859_v57 = vpop.f32.mrf.mxu0  ;;  %v3738_v6 = vsel %vm21507_vm6, %v3722_v3, 0  ;;  %v15395_v15 = vld [vmem:[%s21433_s3 + $0x1b4] sm:$0xff]  }
 0x269   : > { %v1664_v4 = vpop.f32.mrf.mxu1  ;;  %v16721_v16 = vadd.f32 %v1859_v57, %v1740_v23 }
 0x26a   : > { %v1861_v62 = vpop.f32.mrf.mxu0 }
 0x26b   : > { %v1665_v5 = vpop.f32.mrf.mxu1  ;;  %v16726_v54 = vadd.f32 %v1861_v62, %v1741_v26 }
 0x26c   : > { %v1865_v51 = vpop.f32.mrf.mxu0  ;;  %13452 = vmatmul.mubr.msk.bf16.gmra.mxu0 %vm558_vm11, %v15391_v63 }
 0x26d   : > { %v16730_v13 = vadd.f32 %v1865_v51, %v1743_v2  ;;  %v14436_v19 = vpop.f32.mrf.mxu1  ;;  %14515 = vmatmul.mubr.msk.bf16.vlgmr.msra.gmra.mxu1 %vm558_vm11, %v15390_v22  ;;  %3593 = vmatprep.mubr.bf16.mxu0 %v21489_v0  ;;  %v4150_v2 = vpop.permute.xlu1 %4149 }
 0x26e   : > { %v1954_v17 = vadd.f32 %v14436_v19, %v16640_v25  ;;  %3761 = vmatpush1.bf16.msra.mxu1 %v3738_v6  ;;  %v1867_v30 = vpop.f32.mrf.mxu0  ;;  %14518 = vmatprep.mubr.msk.bf16.mxu1 %vm558_vm11, %v15391_v63  ;;  %v15393_v25 = vld [vmem:[%s21433_s3 + $0x1a4] sm:$0xff]  }
 0x26f   : > { %15136 = vmatprep.subr.msk.bf16.mxu1 %vm21507_vm6, %v3939_v35  ;;  %v16738_v45 = vadd.f32 %v1867_v30, %v1744_v32  ;;  %v1916_v21 = vpop.f32.mrf.mxu1 }
 0x270   : > { %v1948_v18 = vadd.f32 %v1916_v21, %v16650_v53  ;;  %v1869_v23 = vpop.f32.mrf.mxu0 }
 0x271   : > { %v16744_v29 = vadd.f32 %v1869_v23, %v1746_v1  ;;  %v14437_v24 = vpop.f32.mrf.mxu1  ;;  %v16769_v56 = vpop.permute.xlu1 %4145 }
 0x272   : > { %v1957_v34 = vadd.f32 %v14437_v24, %v16658_v44  ;;  %v1871_v26 = vpop.f32.mrf.mxu0 }
 0x273   : > { %v16750_v31 = vadd.f32 %v1871_v26, %v1747_v58  ;;  %v1919_v28 = vpop.f32.mrf.mxu1 }
 0x274   : > { %v1951_v53 = vadd.f32 %v1919_v28, %v16661_v8  ;;  %v1875_v55 = vpop.f32.mrf.mxu0  ;;  %13453 = vmatmul.mubr.msk.bf16.gmra.mxu0 %vm558_vm11, %v15392_v48  ;;  %v4148_v8 = vpop.permute.xlu0 %4147 }
 0x275   : > { %v16754_v42 = vadd.f32 %v1875_v55, %v1749_v50  ;;  %v14440_v40 = vpop.f32.mrf.mxu1  ;;  %14519 = vmatmul.mubr.msk.bf16.gmra.mxu1 %vm558_vm11, %v15392_v48  ;;  %14524 = vmatprep.mubr.msk.bf16.mxu0 %vm558_vm11, %v15393_v25  ;;  %v3953_v50 = vsel %vm21507_vm6, %v3937_v36, 0  ;;  %v4154_v39 = vsel %vm21483_vm10, %v4148_v8, %v4150_v2  ;;  %v16818_v55 = vpop.permute.xlu1 %4360 }
 0x276   : > { %v1966_v32 = vadd.f32 %v14440_v40, %v16667_v43  ;;  %v1877_v44 = vpop.f32.mrf.mxu0  ;;  %3778 = vmatprep.mubr.bf16.mxu1 %v21489_v0 }
 0x277   : > { %v16760_v11 = vadd.f32 %v1877_v44, %v1750_v59  ;;  %v1932_v22 = vpop.f32.mrf.mxu1  ;;  %v3959_v59 = vsel %vm21507_vm6, %v3939_v35, 0 }
 0x278   : > { %v1960_v37 = vadd.f32 %v1932_v22, %v16673_v10  ;;  %v1879_v1 = vpop.f32.mrf.mxu0  ;;  %v16782_v63 = vpop.permute.xlu0 %4143 }
 0x279   : > { %v14441_v58 = vpop.f32.mrf.mxu1 }
 0x27a   : > { %v1880_v43 = vpop.f32.mrf.mxu0 }
 0x27b   : > { %v1935_v47 = vpop.f32.mrf.mxu1 }
 0x27c   : > { %v1963_v33 = vadd.f32 %v1935_v47, %v16682_v9  ;;  %v14446_v10 = vpop.f32.mrf.mxu0  ;;  %14525 = vmatmul.mubr.msk.bf16.vlgmr.msra.gmra.mxu0 %vm558_vm11, %v15394_v46  ;;  %v4153_v9 = vsel %vm21483_vm10, %v16769_v56, %v4148_v8  ;;  %v4174_v8 = vsel %vm21507_vm6, %v4154_v39, 0 }
 0x27d   : > { %v2060_v61 = vpop.f32.mrf.mxu1  ;;  %v16779_v57 = vadd.f32 %v14446_v10, %v1954_v17  ;;  %13470 = vmatmul.mubr.msk.bf16.vlgmr.msra.gmra.mxu1 %vm558_vm11, %v15393_v25  ;;  %3976 = vmatpush1.bf16.msra.mxu0 %v3953_v50 }
 0x27e   : > { %v2161_v4 = vadd.f32 %v2060_v61, %v16689_v20  ;;  %14533 = vmatpush3.bf16.msra.mxu1 %v3959_v59  ;;  %15137 = vmatprep.subr.msk.bf16.mxu0 %vm21507_vm6, %v4154_v39  ;;  %v2131_v3 = vpop.f32.mrf.mxu0  ;;  %v15396_v20 = vld [vmem:[%s21433_s3 + $0x1bc] ss:$0 sps:$4 sm:$0xff]  }
 0x27f   : > { %13509 = vmatprep.subr.msk.bf16.mxu1 %vm21507_vm6, %v4153_v9  ;;  %v2062_v62 = vpop.f32.mrf.mxu1  ;;  %v16789_v27 = vadd.f32 %v2131_v3, %v1948_v18  ;;  %3788 = vmatprep.mubr.bf16.mxu1 %v21489_v0  ;;  %v16802_v18 = vpop.permute.xlu0 %4358 }
 0x280   : > { %v2162_v5 = vadd.f32 %v2062_v62, %v16695_v38  ;;  %v14447_v51 = vpop.f32.mrf.mxu0  ;;  %14528 = vmatprep.mubr.msk.bf16.mxu0 %vm558_vm11, %v15395_v15 }
 0x281   : > { %v2064_v6 = vpop.f32.mrf.mxu1  ;;  %v16797_v19 = vadd.f32 %v14447_v51, %v1957_v34 }
 0x282   : > { %v2164_v35 = vadd.f32 %v2064_v6, %v16702_v41  ;;  %v2134_v17 = vpop.f32.mrf.mxu0 }
 0x283   : > { %v2066_v30 = vpop.f32.mrf.mxu1  ;;  %v16800_v21 = vadd.f32 %v2134_v17, %v1951_v53  ;;  %v15397_v53 = vld [vmem:[%s21433_s3 + $0x1c0] sm:$0xff]   ;;  %v4363_v40 = vpop.permute.xlu0 %4362 }
 0x284   : > { %v2165_v38 = vadd.f32 %v2066_v30, %v16705_v49  ;;  %v14450_v23 = vpop.f32.mrf.mxu0  ;;  %14529 = vmatmul.mubr.msk.bf16.gmra.mxu0 %vm558_vm11, %v15396_v20  ;;  %v4368_v1 = vsel %vm21484_vm13, %v16818_v55, %v4363_v40 }
 0x285   : > { %v2070_v48 = vpop.f32.mrf.mxu1  ;;  %v16806_v24 = vadd.f32 %v14450_v23, %v1966_v32  ;;  %13471 = vmatmul.mubr.msk.bf16.gmra.mxu1 %vm558_vm11, %v15394_v46  ;;  %3993 = vmatprep.mubr.bf16.mxu0 %v21489_v0 }
 0x286   : > { %v2167_v41 = vadd.f32 %v2070_v48, %v16709_v52  ;;  %v2147_v25 = vpop.f32.mrf.mxu0  ;;  %3798 = vmatprep.mubr.bf16.mxu1 %v21489_v0 }
 0x287   : > { %v2072_v34 = vpop.f32.mrf.mxu1  ;;  %v16812_v26 = vadd.f32 %v2147_v25, %v1960_v37 }
 0x288   : > { %v2168_v49 = vadd.f32 %v2072_v34, %v16715_v60  ;;  %v14451_v28 = vpop.f32.mrf.mxu0 }
 0x289   : > { %v2074_v2 = vpop.f32.mrf.mxu1 }
 0x28a   : > { %v2170_v52 = vadd.f32 %v2074_v2, %v16721_v16  ;;  %v2150_v32 = vpop.f32.mrf.mxu0 }
 0x28b   : > { %v2076_v44 = vpop.f32.mrf.mxu1  ;;  %v16821_v22 = vadd.f32 %v2150_v32, %v1963_v33  ;;  %v15398_v33 = vld [vmem:[%s21433_s3 + $0x1c8] sm:$0xff]   ;;  %v15400_v32 = vld [vmem:[%s21433_s3 + $0x1d8] ss:$0 sps:$4 sm:$0xff]  }
 0x28c   : > { %v2171_v60 = vadd.f32 %v2076_v44, %v16726_v54  ;;  %v2275_v37 = vpop.f32.mrf.mxu0  ;;  %13490 = vmatmul.mubr.msk.bf16.vlgmr.msra.gmra.mxu0 %vm558_vm11, %v15397_v53 }
 0x28d   : > { %v2080_v46 = vpop.f32.mrf.mxu1  ;;  %v16828_v36 = vadd.f32 %v2275_v37, %v2161_v4  ;;  %13472 = vmatmul.mubr.msk.bf16.gmra.mxu1 %vm558_vm11, %v15395_v15  ;;  %14543 = vmatpush3.bf16.msra.mxu0 %v4174_v8 }
 0x28e   : > { %v2173_v16 = vadd.f32 %v2080_v46, %v16730_v13  ;;  %13529 = vmatprep.subr.msk.bf16.mxu0 %vm21507_vm6, %v4368_v1  ;;  %v2277_v58 = vpop.f32.mrf.mxu0  ;;  %3808 = vmatprep.mubr.bf16.mxu1 %v21489_v0 }
 0x28f   : > { %v2082_v54 = vpop.f32.mrf.mxu1  ;;  %v16834_v43 = vadd.f32 %v2277_v58, %v2162_v5  ;;  %4003 = vmatprep.mubr.bf16.mxu0 %v21489_v0 }
 0x290   : > { %v2174_v47 = vadd.f32 %v2082_v54, %v16738_v45  ;;  %v2279_v50 = vpop.f32.mrf.mxu0 }
 0x291   : > { %v2084_v10 = vpop.f32.mrf.mxu1  ;;  %v16841_v15 = vadd.f32 %v2279_v50, %v2164_v35  ;;  %v15399_v35 = vld [vmem:[%s21433_s3 + $0x1d0] sm:$0xff]  }
 0x292   : > { %v2176_v13 = vadd.f32 %v2084_v10, %v16744_v29  ;;  %v2281_v59 = vpop.f32.mrf.mxu0 }
 0x293   : > { %v2086_v39 = vpop.f32.mrf.mxu1  ;;  %v16844_v61 = vadd.f32 %v2281_v59, %v2165_v38  ;;  %v4365_v38 = vpop.permute.xlu1 %4364  ;;  %v15402_v59 = vld [vmem:[%s21433_s3 + $0x1e4] sm:$0xff]  }
 0x294   : > { %v2177_v9 = vadd.f32 %v2086_v39, %v16750_v31  ;;  %v2285_v4 = vpop.f32.mrf.mxu0  ;;  %13491 = vmatmul.mubr.msk.bf16.gmra.mxu0 %vm558_vm11, %v15398_v33  ;;  %v4367_v39 = vsel %vm21484_vm13, %v16802_v18, %v16818_v55 }
 0x295   : > { %v2090_v45 = vpop.f32.mrf.mxu1  ;;  %v16848_v3 = vadd.f32 %v2285_v4, %v2167_v41  ;;  %13473 = vmatmul.mubr.msk.bf16.gmra.mxu1 %vm558_vm11, %v15396_v20  ;;  %4013 = vmatprep.mubr.bf16.mxu0 %v21489_v0 }
 0x296   : > { %v2179_v62 = vadd.f32 %v2090_v45, %v16754_v42  ;;  %v2287_v5 = vpop.f32.mrf.mxu0  ;;  %14534 = vmatprep.mubr.msk.bf16.mxu1 %vm558_vm11, %v15397_v53  ;;  %v4152_v42 = vsel %vm21483_vm10, %v16782_v63, %v16769_v56  ;;  %vm21485_vm10 = vcmask 424960  }
 0x297   : > { %v2092_v29 = vpop.f32.mrf.mxu1  ;;  %v16854_v51 = vadd.f32 %v2287_v5, %v2168_v49  ;;  %v4369_v49 = vsel %vm21484_vm13, %v4363_v40, %v4365_v38  ;;  %vm21486_vm13 = vcmask 261120  }
 0x298   : > { %v2180_v31 = vadd.f32 %v2092_v29, %v16760_v11  ;;  %v2289_v6 = vpop.f32.mrf.mxu0  ;;  %v4168_v11 = vsel %vm21507_vm6, %v4152_v42, 0  ;;  %v15403_v29 = vld [vmem:[%s21433_s3 + $0x1ec] sm:$0xff]  }
 0x299   : > { %v2094_v17 = vpop.f32.mrf.mxu1  ;;  %v16860_v30 = vadd.f32 %v2289_v6, %v2170_v52 }
 0x29a   : > { %v2291_v20 = vpop.f32.mrf.mxu0 }
 0x29b   : > { %v2095_v23 = vpop.f32.mrf.mxu1  ;;  %v16865_v48 = vadd.f32 %v2291_v20, %v2171_v60 }
 0x29c   : > { %v2295_v41 = vpop.f32.mrf.mxu0  ;;  %13492 = vmatmul.mubr.msk.bf16.gmra.mxu0 %vm558_vm11, %v15399_v35 }
 0x29d   : > { %v16869_v25 = vadd.f32 %v2295_v41, %v2173_v16  ;;  %v14456_v34 = vpop.f32.mrf.mxu1  ;;  %14535 = vmatmul.mubr.msk.bf16.vlgmr.msra.gmra.mxu1 %vm558_vm11, %v15398_v33  ;;  %4023 = vmatprep.mubr.bf16.mxu0 %v21489_v0  ;;  %v4580_v16 = vpop.permute.xlu1 %4579 }
 0x29e   : > { %v2384_v56 = vadd.f32 %v14456_v34, %v16779_v57  ;;  %4191 = vmatpush1.bf16.msra.mxu1 %v4168_v11  ;;  %v2297_v63 = vpop.f32.mrf.mxu0  ;;  %14538 = vmatprep.mubr.msk.bf16.mxu1 %vm558_vm11, %v15399_v35  ;;  %v15401_v57 = vld [vmem:[%s21433_s3 + $0x1dc] sm:$0xff]  }
 0x29f   : > { %15138 = vmatprep.subr.msk.bf16.mxu1 %vm21507_vm6, %v4369_v49  ;;  %v16877_v28 = vadd.f32 %v2297_v63, %v2174_v47  ;;  %v2346_v53 = vpop.f32.mrf.mxu1 }
 0x2a0   : > { %v2378_v2 = vadd.f32 %v2346_v53, %v16789_v27  ;;  %v2299_v52 = vpop.f32.mrf.mxu0 }
 0x2a1   : > { %v16883_v44 = vadd.f32 %v2299_v52, %v2176_v13  ;;  %v14457_v40 = vpop.f32.mrf.mxu1  ;;  %v16908_v4 = vpop.permute.xlu1 %4575 }
 0x2a2   : > { %v2387_v8 = vadd.f32 %v14457_v40, %v16797_v19  ;;  %v2301_v60 = vpop.f32.mrf.mxu0 }
 0x2a3   : > { %v16889_v37 = vadd.f32 %v2301_v60, %v2177_v9  ;;  %v2349_v1 = vpop.f32.mrf.mxu1 }
 0x2a4   : > { %v2381_v27 = vadd.f32 %v2349_v1, %v16800_v21  ;;  %v2305_v46 = vpop.f32.mrf.mxu0  ;;  %13493 = vmatmul.mubr.msk.bf16.gmra.mxu0 %vm558_vm11, %v15400_v32  ;;  %v4578_v21 = vpop.permute.xlu0 %4577 }
 0x2a5   : > { %v16893_v58 = vadd.f32 %v2305_v46, %v2179_v62  ;;  %v14460_v54 = vpop.f32.mrf.mxu1  ;;  %14539 = vmatmul.mubr.msk.bf16.gmra.mxu1 %vm558_vm11, %v15400_v32  ;;  %14544 = vmatprep.mubr.msk.bf16.mxu0 %vm558_vm11, %v15401_v57  ;;  %v4383_v62 = vsel %vm21507_vm6, %v4367_v39, 0  ;;  %v4584_v18 = vsel %vm21485_vm10, %v4578_v21, %v4580_v16  ;;  %v16957_v46 = vpop.permute.xlu1 %4790 }
 0x2a6   : > { %v2396_v47 = vadd.f32 %v14460_v54, %v16806_v24  ;;  %v2307_v19 = vpop.f32.mrf.mxu0  ;;  %4208 = vmatprep.mubr.bf16.mxu1 %v21489_v0 }
 0x2a7   : > { %v16899_v50 = vadd.f32 %v2307_v19, %v2180_v31  ;;  %v2362_v33 = vpop.f32.mrf.mxu1  ;;  %v4389_v31 = vsel %vm21507_vm6, %v4369_v49, 0 }
 0x2a8   : > { %v2390_v10 = vadd.f32 %v2362_v33, %v16812_v26  ;;  %v2309_v13 = vpop.f32.mrf.mxu0  ;;  %v16921_v35 = vpop.permute.xlu0 %4573 }
 0x2a9   : > { %v14461_v9 = vpop.f32.mrf.mxu1 }
 0x2aa   : > { %v2310_v24 = vpop.f32.mrf.mxu0 }
 0x2ab   : > { %v2365_v45 = vpop.f32.mrf.mxu1 }
 0x2ac   : > { %v2393_v5 = vadd.f32 %v2365_v45, %v16821_v22  ;;  %v14466_v26 = vpop.f32.mrf.mxu0  ;;  %14545 = vmatmul.mubr.msk.bf16.vlgmr.msra.gmra.mxu0 %vm558_vm11, %v15402_v59  ;;  %v4583_v22 = vsel %vm21485_vm10, %v16908_v4, %v4578_v21  ;;  %v4604_v21 = vsel %vm21507_vm6, %v4584_v18, 0 }
 0x2ad   : > { %v2490_v55 = vpop.f32.mrf.mxu1  ;;  %v16918_v6 = vadd.f32 %v14466_v26, %v2384_v56  ;;  %13510 = vmatmul.mubr.msk.bf16.vlgmr.msra.gmra.mxu1 %vm558_vm11, %v15401_v57  ;;  %4406 = vmatpush1.bf16.msra.mxu0 %v4383_v62 }
 0x2ae   : > { %v2591_v17 = vadd.f32 %v2490_v55, %v16828_v36  ;;  %14553 = vmatpush3.bf16.msra.mxu1 %v4389_v31  ;;  %15139 = vmatprep.subr.msk.bf16.mxu0 %vm21507_vm6, %v4584_v18  ;;  %v2561_v42 = vpop.f32.mrf.mxu0  ;;  %v15404_v36 = vld [vmem:[%s21433_s3 + $0x1f4] ss:$0 sps:$4 sm:$0xff]  }
 0x2af   : > { %13549 = vmatprep.subr.msk.bf16.mxu1 %vm21507_vm6, %v4583_v22  ;;  %v2492_v20 = vpop.f32.mrf.mxu1  ;;  %v16928_v38 = vadd.f32 %v2561_v42, %v2378_v2  ;;  %4218 = vmatprep.mubr.bf16.mxu1 %v21489_v0  ;;  %v16941_v2 = vpop.permute.xlu0 %4788 }
 0x2b0   : > { %v2592_v23 = vadd.f32 %v2492_v20, %v16834_v43  ;;  %v14467_v41 = vpop.f32.mrf.mxu0  ;;  %14548 = vmatprep.mubr.msk.bf16.mxu0 %vm558_vm11, %v15403_v29 }
 0x2b1   : > { %v2494_v11 = vpop.f32.mrf.mxu1  ;;  %v16936_v34 = vadd.f32 %v14467_v41, %v2387_v8 }
 0x2b2   : > { %v2594_v49 = vadd.f32 %v2494_v11, %v16841_v15  ;;  %v2564_v56 = vpop.f32.mrf.mxu0 }
 0x2b3   : > { %v2496_v63 = vpop.f32.mrf.mxu1  ;;  %v16939_v53 = vadd.f32 %v2564_v56, %v2381_v27  ;;  %v15405_v27 = vld [vmem:[%s21433_s3 + $0x1f8] sm:$0xff]   ;;  %v4793_v54 = vpop.permute.xlu0 %4792 }
 0x2b4   : > { %v2595_v43 = vadd.f32 %v2496_v63, %v16844_v61  ;;  %v14470_v52 = vpop.f32.mrf.mxu0  ;;  %14549 = vmatmul.mubr.msk.bf16.gmra.mxu0 %vm558_vm11, %v15404_v36  ;;  %v4798_v13 = vsel %vm21486_vm13, %v16957_v46, %v4793_v54 }
 0x2b5   : > { %v2500_v32 = vpop.f32.mrf.mxu1  ;;  %v16945_v40 = vadd.f32 %v14470_v52, %v2396_v47  ;;  %13511 = vmatmul.mubr.msk.bf16.gmra.mxu1 %vm558_vm11, %v15402_v59  ;;  %4423 = vmatprep.mubr.bf16.mxu0 %v21489_v0 }
 0x2b6   : > { %v2597_v15 = vadd.f32 %v2500_v32, %v16848_v3  ;;  %v2577_v57 = vpop.f32.mrf.mxu0  ;;  %4228 = vmatprep.mubr.bf16.mxu1 %v21489_v0 }
 0x2b7   : > { %v2502_v8 = vpop.f32.mrf.mxu1  ;;  %v16951_v60 = vadd.f32 %v2577_v57, %v2390_v10 }
 0x2b8   : > { %v2598_v61 = vadd.f32 %v2502_v8, %v16854_v51  ;;  %v14471_v1 = vpop.f32.mrf.mxu0 }
 0x2b9   : > { %v2504_v16 = vpop.f32.mrf.mxu1 }
 0x2ba   : > { %v2600_v3 = vadd.f32 %v2504_v16, %v16860_v30  ;;  %v2580_v47 = vpop.f32.mrf.mxu0 }
 0x2bb   : > { %v2506_v19 = vpop.f32.mrf.mxu1  ;;  %v16960_v33 = vadd.f32 %v2580_v47, %v2393_v5  ;;  %v15406_v5 = vld [vmem:[%s21433_s3 + $0x200] sm:$0xff]   ;;  %v15408_v47 = vld [vmem:[%s21433_s3 + $0x210] ss:$0 sps:$4 sm:$0xff]  }
 0x2bc   : > { %v2601_v51 = vadd.f32 %v2506_v19, %v16865_v48  ;;  %v2705_v10 = vpop.f32.mrf.mxu0  ;;  %13530 = vmatmul.mubr.msk.bf16.vlgmr.msra.gmra.mxu0 %vm558_vm11, %v15405_v27 }
 0x2bd   : > { %v2510_v59 = vpop.f32.mrf.mxu1  ;;  %v16967_v39 = vadd.f32 %v2705_v10, %v2591_v17  ;;  %13512 = vmatmul.mubr.msk.bf16.gmra.mxu1 %vm558_vm11, %v15403_v29  ;;  %14563 = vmatpush3.bf16.msra.mxu0 %v4604_v21 }
 0x2be   : > { %v2603_v30 = vadd.f32 %v2510_v59, %v16869_v25  ;;  %13569 = vmatprep.subr.msk.bf16.mxu0 %vm21507_vm6, %v4798_v13  ;;  %v2707_v9 = vpop.f32.mrf.mxu0  ;;  %4238 = vmatprep.mubr.bf16.mxu1 %v21489_v0 }
 0x2bf   : > { %v2512_v48 = vpop.f32.mrf.mxu1  ;;  %v16973_v24 = vadd.f32 %v2707_v9, %v2592_v23  ;;  %4433 = vmatprep.mubr.bf16.mxu0 %v21489_v0 }
 0x2c0   : > { %v2604_v45 = vadd.f32 %v2512_v48, %v16877_v28  ;;  %v2709_v62 = vpop.f32.mrf.mxu0 }
 0x2c1   : > { %v2514_v26 = vpop.f32.mrf.mxu1  ;;  %v16980_v29 = vadd.f32 %v2709_v62, %v2594_v49  ;;  %v15407_v49 = vld [vmem:[%s21433_s3 + $0x208] sm:$0xff]  }
 0x2c2   : > { %v2606_v25 = vadd.f32 %v2514_v26, %v16883_v44  ;;  %v2711_v31 = vpop.f32.mrf.mxu0 }
 0x2c3   : > { %v2516_v18 = vpop.f32.mrf.mxu1  ;;  %v16983_v55 = vadd.f32 %v2711_v31, %v2595_v43  ;;  %v4795_v43 = vpop.permute.xlu1 %4794  ;;  %v15410_v31 = vld [vmem:[%s21433_s3 + $0x21c] sm:$0xff]  }
 0x2c4   : > { %v2607_v22 = vadd.f32 %v2516_v18, %v16889_v37  ;;  %v2715_v17 = vpop.f32.mrf.mxu0  ;;  %13531 = vmatmul.mubr.msk.bf16.gmra.mxu0 %vm558_vm11, %v15406_v5  ;;  %v4797_v18 = vsel %vm21486_vm13, %v16941_v2, %v16957_v46 }
 0x2c5   : > { %v2520_v28 = vpop.f32.mrf.mxu1  ;;  %v16987_v42 = vadd.f32 %v2715_v17, %v2597_v15  ;;  %13513 = vmatmul.mubr.msk.bf16.gmra.mxu1 %vm558_vm11, %v15404_v36  ;;  %4443 = vmatprep.mubr.bf16.mxu0 %v21489_v0 }
 0x2c6   : > { %v2609_v20 = vadd.f32 %v2520_v28, %v16893_v58  ;;  %v2717_v23 = vpop.f32.mrf.mxu0  ;;  %14554 = vmatprep.mubr.msk.bf16.mxu1 %vm558_vm11, %v15405_v27  ;;  %v4582_v58 = vsel %vm21485_vm10, %v16921_v35, %v16908_v4  ;;  %vm21487_vm10 = vcmask 252928  }
 0x2c7   : > { %v2522_v44 = vpop.f32.mrf.mxu1  ;;  %v16993_v41 = vadd.f32 %v2717_v23, %v2598_v61  ;;  %v4799_v61 = vsel %vm21486_vm13, %v4793_v54, %v4795_v43  ;;  %vm21488_vm13 = vcmask 244736  }
 0x2c8   : > { %v2610_v37 = vadd.f32 %v2522_v44, %v16899_v50  ;;  %v2719_v11 = vpop.f32.mrf.mxu0  ;;  %v4598_v50 = vsel %vm21507_vm6, %v4582_v58, 0  ;;  %v15411_v44 = vld [vmem:[%s21433_s3 + $0x224] sm:$0xff]  }
 0x2c9   : > { %v2524_v56 = vpop.f32.mrf.mxu1  ;;  %v16999_v63 = vadd.f32 %v2719_v11, %v2600_v3 }
 0x2ca   : > { %v2721_v36 = vpop.f32.mrf.mxu0 }
 0x2cb   : > { %v2525_v52 = vpop.f32.mrf.mxu1  ;;  %v17004_v32 = vadd.f32 %v2721_v36, %v2601_v51 }
 0x2cc   : > { %v2725_v15 = vpop.f32.mrf.mxu0  ;;  %13532 = vmatmul.mubr.msk.bf16.gmra.mxu0 %vm558_vm11, %v15407_v49 }
 0x2cd   : > { %v17008_v57 = vadd.f32 %v2725_v15, %v2603_v30  ;;  %v14476_v8 = vpop.f32.mrf.mxu1  ;;  %14555 = vmatmul.mubr.msk.bf16.vlgmr.msra.gmra.mxu1 %vm558_vm11, %v15406_v5  ;;  %4453 = vmatprep.mubr.bf16.mxu0 %v21489_v0  ;;  %v5010_v30 = vpop.permute.xlu1 %5009 }
 0x2ce   : > { %v2814_v4 = vadd.f32 %v14476_v8, %v16918_v6  ;;  %4621 = vmatpush1.bf16.msra.mxu1 %v4598_v50  ;;  %v2727_v35 = vpop.f32.mrf.mxu0  ;;  %14558 = vmatprep.mubr.msk.bf16.mxu1 %vm558_vm11, %v15407_v49  ;;  %v15409_v6 = vld [vmem:[%s21433_s3 + $0x214] sm:$0xff]  }
 0x2cf   : > { %15140 = vmatprep.subr.msk.bf16.mxu1 %vm21507_vm6, %v4799_v61  ;;  %v17016_v1 = vadd.f32 %v2727_v35, %v2604_v45  ;;  %v2776_v27 = vpop.f32.mrf.mxu1 }
 0x2d0   : > { %v2808_v16 = vadd.f32 %v2776_v27, %v16928_v38  ;;  %v2729_v3 = vpop.f32.mrf.mxu0 }
 0x2d1   : > { %v17022_v19 = vadd.f32 %v2729_v3, %v2606_v25  ;;  %v14477_v54 = vpop.f32.mrf.mxu1  ;;  %v17047_v17 = vpop.permute.xlu1 %5005 }
 0x2d2   : > { %v2817_v21 = vadd.f32 %v14477_v54, %v16936_v34  ;;  %v2731_v51 = vpop.f32.mrf.mxu0 }
 0x2d3   : > { %v17028_v10 = vadd.f32 %v2731_v51, %v2607_v22  ;;  %v2779_v13 = vpop.f32.mrf.mxu1 }
 0x2d4   : > { %v2811_v38 = vadd.f32 %v2779_v13, %v16939_v53  ;;  %v2735_v59 = vpop.f32.mrf.mxu0  ;;  %13533 = vmatmul.mubr.msk.bf16.gmra.mxu0 %vm558_vm11, %v15408_v47  ;;  %v5008_v53 = vpop.permute.xlu0 %5007 }
 0x2d5   : > { %v17032_v9 = vadd.f32 %v2735_v59, %v2609_v20  ;;  %v14480_v48 = vpop.f32.mrf.mxu1  ;;  %14559 = vmatmul.mubr.msk.bf16.gmra.mxu1 %vm558_vm11, %v15408_v47  ;;  %14564 = vmatprep.mubr.msk.bf16.mxu0 %vm558_vm11, %v15409_v6  ;;  %v4813_v20 = vsel %vm21507_vm6, %v4797_v18, 0  ;;  %v5014_v2 = vsel %vm21487_vm10, %v5008_v53, %v5010_v30  ;;  %v17096_v59 = vpop.permute.xlu1 %5220 }
 0x2d6   : > { %v2826_v45 = vadd.f32 %v14480_v48, %v16945_v40  ;;  %v2737_v34 = vpop.f32.mrf.mxu0  ;;  %4638 = vmatprep.mubr.bf16.mxu1 %v21489_v0 }
 0x2d7   : > { %v17038_v62 = vadd.f32 %v2737_v34, %v2610_v37  ;;  %v2792_v5 = vpop.f32.mrf.mxu1  ;;  %v4819_v37 = vsel %vm21507_vm6, %v4799_v61, 0 }
 0x2d8   : > { %v2820_v26 = vadd.f32 %v2792_v5, %v16951_v60  ;;  %v2739_v25 = vpop.f32.mrf.mxu0  ;;  %v17060_v49 = vpop.permute.xlu0 %5003 }
 0x2d9   : > { %v14481_v22 = vpop.f32.mrf.mxu1 }
 0x2da   : > { %v2740_v40 = vpop.f32.mrf.mxu0 }
 0x2db   : > { %v2795_v28 = vpop.f32.mrf.mxu1 }
 0x2dc   : > { %v2823_v23 = vadd.f32 %v2795_v28, %v16960_v33  ;;  %v14486_v60 = vpop.f32.mrf.mxu0  ;;  %14565 = vmatmul.mubr.msk.bf16.vlgmr.msra.gmra.mxu0 %vm558_vm11, %v15410_v31  ;;  %v5013_v33 = vsel %vm21487_vm10, %v17047_v17, %v5008_v53  ;;  %v5034_v53 = vsel %vm21507_vm6, %v5014_v2, 0 }
 0x2dd   : > { %v2920_v46 = vpop.f32.mrf.mxu1  ;;  %v17057_v11 = vadd.f32 %v14486_v60, %v2814_v4  ;;  %13550 = vmatmul.mubr.msk.bf16.vlgmr.msra.gmra.mxu1 %vm558_vm11, %v15409_v6  ;;  %4836 = vmatpush1.bf16.msra.mxu0 %v4813_v20 }
 0x2de   : > { %v3021_v56 = vadd.f32 %v2920_v46, %v16967_v39  ;;  %14573 = vmatpush3.bf16.msra.mxu1 %v4819_v37  ;;  %15141 = vmatprep.subr.msk.bf16.mxu0 %vm21507_vm6, %v5014_v2  ;;  %v2991_v58 = vpop.f32.mrf.mxu0  ;;  %v15412_v39 = vld [vmem:[%s21433_s3 + $0x22c] ss:$0 sps:$4 sm:$0xff]  }
 0x2df   : > { %13589 = vmatprep.subr.msk.bf16.mxu1 %vm21507_vm6, %v5013_v33  ;;  %v2922_v36 = vpop.f32.mrf.mxu1  ;;  %v17067_v43 = vadd.f32 %v2991_v58, %v2808_v16  ;;  %4648 = vmatprep.mubr.bf16.mxu1 %v21489_v0  ;;  %v17080_v16 = vpop.permute.xlu0 %5218 }
 0x2e0   : > { %v3022_v52 = vadd.f32 %v2922_v36, %v16973_v24  ;;  %v14487_v15 = vpop.f32.mrf.mxu0  ;;  %14568 = vmatprep.mubr.msk.bf16.mxu0 %vm558_vm11, %v15411_v44 }
 0x2e1   : > { %v2924_v50 = vpop.f32.mrf.mxu1  ;;  %v17075_v8 = vadd.f32 %v14487_v15, %v2817_v21 }
 0x2e2   : > { %v3024_v61 = vadd.f32 %v2924_v50, %v16980_v29  ;;  %v2994_v4 = vpop.f32.mrf.mxu0 }
 0x2e3   : > { %v2926_v35 = vpop.f32.mrf.mxu1  ;;  %v17078_v27 = vadd.f32 %v2994_v4, %v2811_v38  ;;  %v15413_v38 = vld [vmem:[%s21433_s3 + $0x230] sm:$0xff]   ;;  %v5223_v48 = vpop.permute.xlu0 %5222 }
 0x2e4   : > { %v3025_v24 = vadd.f32 %v2926_v35, %v16983_v55  ;;  %v14490_v3 = vpop.f32.mrf.mxu0  ;;  %14569 = vmatmul.mubr.msk.bf16.gmra.mxu0 %vm558_vm11, %v15412_v39  ;;  %v5228_v25 = vsel %vm21488_vm13, %v17096_v59, %v5223_v48 }
 0x2e5   : > { %v2930_v47 = vpop.f32.mrf.mxu1  ;;  %v17084_v54 = vadd.f32 %v14490_v3, %v2826_v45  ;;  %13551 = vmatmul.mubr.msk.bf16.gmra.mxu1 %vm558_vm11, %v15410_v31  ;;  %4853 = vmatprep.mubr.bf16.mxu0 %v21489_v0 }
 0x2e6   : > { %v3027_v29 = vadd.f32 %v2930_v47, %v16987_v42  ;;  %v3007_v6 = vpop.f32.mrf.mxu0  ;;  %4658 = vmatprep.mubr.bf16.mxu1 %v21489_v0 }
 0x2e7   : > { %v2932_v21 = vpop.f32.mrf.mxu1  ;;  %v17090_v51 = vadd.f32 %v3007_v6, %v2820_v26 }
 0x2e8   : > { %v3028_v55 = vadd.f32 %v2932_v21, %v16993_v41  ;;  %v14491_v13 = vpop.f32.mrf.mxu0 }
 0x2e9   : > { %v2934_v30 = vpop.f32.mrf.mxu1 }
 0x2ea   : > { %v3030_v42 = vadd.f32 %v2934_v30, %v16999_v63  ;;  %v3010_v45 = vpop.f32.mrf.mxu0 }
 0x2eb   : > { %v2936_v34 = vpop.f32.mrf.mxu1  ;;  %v17099_v5 = vadd.f32 %v3010_v45, %v2823_v23  ;;  %v15414_v23 = vld [vmem:[%s21433_s3 + $0x238] sm:$0xff]   ;;  %v15416_v45 = vld [vmem:[%s21433_s3 + $0x248] ss:$0 sps:$4 sm:$0xff]  }
 0x2ec   : > { %v3031_v41 = vadd.f32 %v2936_v34, %v17004_v32  ;;  %v3135_v26 = vpop.f32.mrf.mxu0  ;;  %13570 = vmatmul.mubr.msk.bf16.vlgmr.msra.gmra.mxu0 %vm558_vm11, %v15413_v38 }
 0x2ed   : > { %v2940_v31 = vpop.f32.mrf.mxu1  ;;  %v17106_v18 = vadd.f32 %v3135_v26, %v3021_v56  ;;  %13552 = vmatmul.mubr.msk.bf16.gmra.mxu1 %vm558_vm11, %v15411_v44  ;;  %14583 = vmatpush3.bf16.msra.mxu0 %v5034_v53 }
 0x2ee   : > { %v3033_v63 = vadd.f32 %v2940_v31, %v17008_v57  ;;  %13609 = vmatprep.subr.msk.bf16.mxu0 %vm21507_vm6, %v5228_v25  ;;  %v3137_v22 = vpop.f32.mrf.mxu0  ;;  %4668 = vmatprep.mubr.bf16.mxu1 %v21489_v0 }
 0x2ef   : > { %v2942_v32 = vpop.f32.mrf.mxu1  ;;  %v17112_v40 = vadd.f32 %v3137_v22, %v3022_v52  ;;  %4863 = vmatprep.mubr.bf16.mxu0 %v21489_v0 }
 0x2f0   : > { %v3034_v28 = vadd.f32 %v2942_v32, %v17016_v1  ;;  %v3139_v20 = vpop.f32.mrf.mxu0 }
 0x2f1   : > { %v2944_v60 = vpop.f32.mrf.mxu1  ;;  %v17119_v44 = vadd.f32 %v3139_v20, %v3024_v61  ;;  %v15415_v61 = vld [vmem:[%s21433_s3 + $0x240] sm:$0xff]  }
 0x2f2   : > { %v3036_v57 = vadd.f32 %v2944_v60, %v17022_v19  ;;  %v3141_v37 = vpop.f32.mrf.mxu0 }
 0x2f3   : > { %v2946_v2 = vpop.f32.mrf.mxu1  ;;  %v17122_v46 = vadd.f32 %v3141_v37, %v3025_v24  ;;  %v5225_v24 = vpop.permute.xlu1 %5224  ;;  %v15418_v37 = vld [vmem:[%s21433_s3 + $0x254] sm:$0xff]  }
 0x2f4   : > { %v3037_v33 = vadd.f32 %v2946_v2, %v17028_v10  ;;  %v3145_v56 = vpop.f32.mrf.mxu0  ;;  %13571 = vmatmul.mubr.msk.bf16.gmra.mxu0 %vm558_vm11, %v15414_v23  ;;  %v5227_v2 = vsel %vm21488_vm13, %v17080_v16, %v17096_v59  ;;  %v17201_v16 = vld [vmem:[%s21433_s3 + $0x25c] sm:$0xff]  }
 0x2f5   : > { %v2950_v1 = vpop.f32.mrf.mxu1  ;;  %v17126_v58 = vadd.f32 %v3145_v56, %v3027_v29  ;;  %13553 = vmatmul.mubr.msk.bf16.gmra.mxu1 %vm558_vm11, %v15412_v39  ;;  %4873 = vmatprep.mubr.bf16.mxu0 %v21489_v0 }
 0x2f6   : > { %v3039_v36 = vadd.f32 %v2950_v1, %v17032_v9  ;;  %v3147_v52 = vpop.f32.mrf.mxu0  ;;  %14574 = vmatprep.mubr.msk.bf16.mxu1 %vm558_vm11, %v15413_v38  ;;  %v5012_v9 = vsel %vm21487_vm10, %v17060_v49, %v17047_v17  ;;  %vm21501_vm10 = vcmask 236544  }
 0x2f7   : > { %v2952_v19 = vpop.f32.mrf.mxu1  ;;  %v17132_v15 = vadd.f32 %v3147_v52, %v3028_v55  ;;  %v5229_v55 = vsel %vm21488_vm13, %v5223_v48, %v5225_v24  ;;  %vm21500_vm13 = vcmask 228352  }
 0x2f8   : > { %v3040_v10 = vadd.f32 %v2952_v19, %v17038_v62  ;;  %v3149_v50 = vpop.f32.mrf.mxu0  ;;  %v5028_v62 = vsel %vm21507_vm6, %v5012_v9, 0  ;;  %v5249_v59 = vsel %vm21507_vm6, %v5229_v55, 0 }
 0x2f9   : > { %v2954_v4 = vpop.f32.mrf.mxu1  ;;  %v17138_v35 = vadd.f32 %v3149_v50, %v3030_v42 }
 0x2fa   : > { %v3151_v39 = vpop.f32.mrf.mxu0 }
 0x2fb   : > { %v2955_v3 = vpop.f32.mrf.mxu1  ;;  %v17143_v47 = vadd.f32 %v3151_v39, %v3031_v41 }
 0x2fc   : > { %v3155_v29 = vpop.f32.mrf.mxu0  ;;  %13572 = vmatmul.mubr.msk.bf16.gmra.mxu0 %vm558_vm11, %v15415_v61 }
 0x2fd   : > { %v17147_v6 = vadd.f32 %v3155_v29, %v3033_v63  ;;  %v14496_v21 = vpop.f32.mrf.mxu1  ;;  %14575 = vmatmul.mubr.msk.bf16.vlgmr.msra.gmra.mxu1 %vm558_vm11, %v15414_v23  ;;  %4883 = vmatprep.mubr.bf16.mxu0 %v21489_v0  ;;  %v5440_v63 = vpop.permute.xlu1 %5439 }
 0x2fe   : > { %v3244_v17 = vadd.f32 %v14496_v21, %v17057_v11  ;;  %5051 = vmatpush1.bf16.msra.mxu1 %v5028_v62  ;;  %v3157_v49 = vpop.f32.mrf.mxu0  ;;  %14578 = vmatprep.mubr.msk.bf16.mxu1 %vm558_vm11, %v15415_v61  ;;  %v15417_v11 = vld [vmem:[%s21433_s3 + $0x24c] sm:$0xff]  }
 0x2ff   : > { %15142 = vmatprep.subr.msk.bf16.mxu1 %vm21507_vm6, %v5229_v55  ;;  %v17155_v13 = vadd.f32 %v3157_v49, %v3034_v28  ;;  %v3206_v38 = vpop.f32.mrf.mxu1  ;;  %v5842_v55 = vld [vmem:[%s21434_s4 + $0x28] sm:$0xff] }
 0x300   : > { %v3238_v30 = vadd.f32 %v3206_v38, %v17067_v43  ;;  %v3159_v42 = vpop.f32.mrf.mxu0 }
 0x301   : > { %v17161_v34 = vadd.f32 %v3159_v42, %v3036_v57  ;;  %v14497_v48 = vpop.f32.mrf.mxu1  ;;  %v17188_v56 = vpop.permute.xlu1 %5435 }
 0x302   : > { %v3247_v53 = vadd.f32 %v14497_v48, %v17075_v8  ;;  %v3161_v41 = vpop.f32.mrf.mxu0 }
 0x303   : > { %v17167_v26 = vadd.f32 %v3161_v41, %v3037_v33  ;;  %v3209_v25 = vpop.f32.mrf.mxu1 }
 0x304   : > { %v3241_v43 = vadd.f32 %v3209_v25, %v17078_v27  ;;  %v3165_v31 = vpop.f32.mrf.mxu0  ;;  %13573 = vmatmul.mubr.msk.bf16.gmra.mxu0 %vm558_vm11, %v15416_v45  ;;  %v5438_v27 = vpop.permute.xlu0 %5437 }
 0x305   : > { %v17171_v22 = vadd.f32 %v3165_v31, %v3039_v36  ;;  %v14500_v32 = vpop.f32.mrf.mxu1  ;;  %14579 = vmatmul.mubr.msk.bf16.gmra.mxu1 %vm558_vm11, %v15416_v45  ;;  %14584 = vmatprep.mubr.msk.bf16.mxu0 %vm558_vm11, %v15417_v11  ;;  %v5243_v36 = vsel %vm21507_vm6, %v5227_v2, 0  ;;  %v5443_v9 = vsel %vm21501_vm10, %v17188_v56, %v5438_v27 }
 0x306   : > { %v3256_v28 = vadd.f32 %v14500_v32, %v17084_v54  ;;  %v3167_v8 = vpop.f32.mrf.mxu0  ;;  %5068 = vmatprep.mubr.bf16.mxu1 %v21489_v0 }
 0x307   : > { %v17177_v20 = vadd.f32 %v3167_v8, %v3040_v10  ;;  %v3222_v23 = vpop.f32.mrf.mxu1  ;;  %v5444_v10 = vsel %vm21501_vm10, %v5438_v27, %v5440_v63  ;;  %v17267_v27 = vpop.permute.xlu1 %5650 }
 0x308   : > { %v17180_v60 = vadd.f32 %v3222_v23, %v17090_v51  ;;  %v3169_v57 = vpop.f32.mrf.mxu0  ;;  %v5841_v51 = vld [vmem:[%s21434_s4 + $0x20] sm:$0xff]  ;;  %v17211_v4 = vpop.permute.xlu0 %5433  ;;  %v15421_v23 = vld [vmem:[%s21433_s3 + $0x268] sm:$0xff]  }
 0x309   : > { %v14501_v54 = vpop.f32.mrf.mxu1  ;;  %5866 = vperm.xlu1 %15326, %v5841_v51  }
 0x30a   : > { %v3170_v33 = vpop.f32.mrf.mxu0 }
 0x30b   : > { %v3225_v1 = vpop.f32.mrf.mxu1  ;;  %v5464_v33 = vsel %vm21507_vm6, %v5444_v10, 0 }
 0x30c   : > { %v17195_v52 = vadd.f32 %v3225_v1, %v17099_v5  ;;  %v14506_v19 = vpop.f32.mrf.mxu0  ;;  %14585 = vmatmul.mubr.msk.bf16.vlgmr.msra.gmra.mxu0 %vm558_vm11, %v15418_v37  ;;  %v5843_v5 = vld [vmem:[%s21434_s4 + $0x30] sm:$0xff]  ;;  %v17240_v48 = vpop.permute.xlu0 %5648 }
 0x30d   : > { %v3350_v50 = vpop.f32.mrf.mxu1  ;;  %v17205_v61 = vadd.f32 %v14506_v19, %v3244_v17  ;;  %13590 = vmatmul.mubr.msk.bf16.vlgmr.msra.gmra.mxu1 %vm558_vm11, %v15417_v11  ;;  %5266 = vmatpush1.bf16.msra.mxu0 %v5243_v36 }
 0x30e   : > { %v3451_v39 = vadd.f32 %v3350_v50, %v17106_v18  ;;  %14593 = vmatpush3.bf16.msra.mxu1 %v5249_v59  ;;  %15143 = vmatprep.subr.msk.bf16.mxu0 %vm21507_vm6, %v5444_v10  ;;  %v3421_v24 = vpop.f32.mrf.mxu0  ;;  %v17227_v18 = vld [vmem:[%s21433_s3 + $0x264] ss:$0 sps:$4 sm:$0xff]  }
 0x30f   : > { %13629 = vmatprep.subr.msk.bf16.mxu1 %vm21507_vm6, %v5443_v9  ;;  %v3352_v3 = vpop.f32.mrf.mxu1  ;;  %v17218_v29 = vadd.f32 %v3421_v24, %v3238_v30  ;;  %5078 = vmatprep.mubr.bf16.mxu1 %v21489_v0 }
 0x310   : > { %v3452_v62 = vadd.f32 %v3352_v3, %v17112_v40  ;;  %v14507_v21 = vpop.f32.mrf.mxu0  ;;  %14588 = vmatprep.mubr.msk.bf16.mxu0 %vm558_vm11, %v17201_v16  ;;  %5876 = vperm.xlu0 %15325, %v5843_v5   ;;  %v5839_v40 = vld [vmem:[%s21434_s4 + $0x10] sm:$0xff] }
 0x311   : > { %v3354_v17 = vpop.f32.mrf.mxu1  ;;  %v17232_v49 = vadd.f32 %v14507_v21, %v3247_v53  ;;  %5871 = vperm.xlu1 %15326, %v5842_v55   ;;  %v5840_v53 = vld [vmem:[%s21434_s4 + $0x18] sm:$0xff] }
 0x312   : > { %v3454_v38 = vadd.f32 %v3354_v17, %v17119_v44  ;;  %v3424_v30 = vpop.f32.mrf.mxu0  ;;  %v5837_v44 = vld [vmem:[%s21434_s4] sm:$0xff] }
 0x313   : > { %v3356_v42 = vpop.f32.mrf.mxu1  ;;  %v17238_v45 = vadd.f32 %v3424_v30, %v3241_v43 }
 0x314   : > { %v3455_v11 = vadd.f32 %v3356_v42, %v17122_v46  ;;  %v14510_v41 = vpop.f32.mrf.mxu0  ;;  %14589 = vmatmul.mubr.msk.bf16.gmra.mxu0 %vm558_vm11, %v17227_v18  ;;  %5856 = vperm.xlu0 %15325, %v5839_v40  }
 0x315   : > { %v3360_v25 = vpop.f32.mrf.mxu1  ;;  %v17248_v31 = vadd.f32 %v14510_v41, %v3256_v28  ;;  %13591 = vmatmul.mubr.msk.bf16.gmra.mxu1 %vm558_vm11, %v15418_v37  ;;  %5283 = vmatprep.mubr.bf16.mxu0 %v21489_v0  ;;  %v17269_v37 = vpop.permute.xlu0 %5652  ;;  %v15423_v41 = vld [vmem:[%s21433_s3 + $0x278] sm:$0xff]  }
 0x316   : > { %v3457_v46 = vadd.f32 %v3360_v25, %v17126_v58  ;;  %v3437_v43 = vpop.f32.mrf.mxu0  ;;  %5088 = vmatprep.mubr.bf16.mxu1 %v21489_v0  ;;  %5861 = vperm.xlu1 %15326, %v5840_v53   ;;  %v5838_v58 = vld [vmem:[%s21434_s4 + $0x8] sm:$0xff]  ;;  %v5658_v36 = vsel %vm21500_vm13, %v17267_v27, %v17269_v37  ;;  %v5442_v25 = vsel %vm21501_vm10, %v17211_v4, %v17188_v56 }
 0x317   : > { %v3362_v63 = vpop.f32.mrf.mxu1  ;;  %v17258_v32 = vadd.f32 %v3437_v43, %v17180_v60  ;;  %v5458_v56 = vsel %vm21507_vm6, %v5442_v25, 0 }
 0x318   : > { %v3458_v28 = vadd.f32 %v3362_v63, %v17132_v15  ;;  %v14511_v8 = vpop.f32.mrf.mxu0  ;;  %5846 = vperm.xlu0 %15325, %v5837_v44  }
 0x319   : > { %v3364_v57 = vpop.f32.mrf.mxu1  ;;  %v5985_v8 = vld [vmem:[%s21436_s6 + $0x20] sm:$0xf] }
 0x31a   : > { %v3460_v60 = vadd.f32 %v3364_v57, %v17138_v35  ;;  %v3440_v2 = vpop.f32.mrf.mxu0  ;;  %5851 = vperm.xlu1 %15326, %v5838_v58  }
 0x31b   : > { %v3366_v15 = vpop.f32.mrf.mxu1  ;;  %v17273_v54 = vadd.f32 %v3440_v2, %v17195_v52  ;;  %v5984_v2 = vld [vmem:[%s21436_s6 + $0x18] sm:$0xff] }
 0x31c   : > { %v3461_v1 = vadd.f32 %v3366_v15, %v17143_v47  ;;  %v3565_v51 = vpop.f32.mrf.mxu0  ;;  %13610 = vmatmul.mubr.msk.bf16.vlgmr.msra.gmra.mxu0 %vm558_vm11, %v15421_v23 }
 0x31d   : > { %v3370_v19 = vpop.f32.mrf.mxu1  ;;  %v17281_v59 = vadd.f32 %v3565_v51, %v3451_v39  ;;  %13592 = vmatmul.mubr.msk.bf16.gmra.mxu1 %vm558_vm11, %v17201_v16  ;;  %14603 = vmatpush3.bf16.msra.mxu0 %v5464_v33  ;;  %v15422_v16 = vld [vmem:[%s21433_s3 + $0x270] sm:$0xff]  }
 0x31e   : > { %v3463_v35 = vadd.f32 %v3370_v19, %v17147_v6  ;;  %13649 = vmatprep.subr.msk.bf16.mxu0 %vm21507_vm6, %v5658_v36  ;;  %v3567_v52 = vpop.f32.mrf.mxu0  ;;  %5098 = vmatprep.mubr.bf16.mxu1 %v21489_v0  ;;  %v15425_v19 = vld [vmem:[%s21433_s3 + $0x284] sm:$0xff]  }
 0x31f   : > { %v3372_v47 = vpop.f32.mrf.mxu1  ;;  %v17288_v10 = vadd.f32 %v3567_v52, %v3452_v62  ;;  %5293 = vmatprep.mubr.bf16.mxu0 %v21489_v0 }
 0x320   : > { %v3464_v50 = vadd.f32 %v3372_v47, %v17155_v13  ;;  %v3569_v5 = vpop.f32.mrf.mxu0  ;;  %v5981_v13 = vld [vmem:[%s21436_s6] sm:$0xff] }
 0x321   : > { %v3374_v9 = vpop.f32.mrf.mxu1  ;;  %v17295_v39 = vadd.f32 %v3569_v5, %v3454_v38  ;;  %5988 = vperm.xlu0 %15325, %v5981_v13   ;;  %v5657_v13 = vsel %vm21500_vm13, %v17240_v48, %v17267_v27 }
 0x322   : > { %v3466_v6 = vadd.f32 %v3374_v9, %v17161_v34  ;;  %v3571_v24 = vpop.f32.mrf.mxu0 }
 0x323   : > { %v3376_v3 = vpop.f32.mrf.mxu1  ;;  %v17298_v21 = vadd.f32 %v3571_v24, %v3455_v11 }
 0x324   : > { %v3467_v62 = vadd.f32 %v3376_v3, %v17167_v26  ;;  %v3575_v55 = vpop.f32.mrf.mxu0  ;;  %13611 = vmatmul.mubr.msk.bf16.gmra.mxu0 %vm558_vm11, %v15422_v16 }
 0x325   : > { %v3380_v17 = vpop.f32.mrf.mxu1  ;;  %v17305_v40 = vadd.f32 %v3575_v55, %v3457_v46  ;;  %13593 = vmatmul.mubr.msk.bf16.gmra.mxu1 %vm558_vm11, %v17227_v18  ;;  %5303 = vmatprep.mubr.bf16.mxu0 %v21489_v0  ;;  %v5983_v18 = vld [vmem:[%s21436_s6 + $0x10] sm:$0xff]  ;;  %v5655_v46 = vpop.permute.xlu1 %5654 }
 0x326   : > { %v3469_v34 = vadd.f32 %v3380_v17, %v17171_v22  ;;  %v3577_v38 = vpop.f32.mrf.mxu0  ;;  %14594 = vmatprep.mubr.msk.bf16.mxu1 %vm558_vm11, %v15421_v23  ;;  %5998 = vperm.xlu0 %15325, %v5983_v18   ;;  %v5659_v58 = vsel %vm21500_vm13, %v17269_v37, %v5655_v46  ;;  %v15426_v55 = vld [vmem:[%s21433_s3 + $0x28c] sm:$0xff]  }
 0x327   : > { %v3382_v26 = vpop.f32.mrf.mxu1  ;;  %v17312_v30 = vadd.f32 %v3577_v38, %v3458_v28  ;;  %v15427_v38 = vld [vmem:[%s21433_s3 + $0x294] sm:$0xff]  }
 0x328   : > { %v3470_v42 = vadd.f32 %v3382_v26, %v17177_v20  ;;  %v3579_v11 = vpop.f32.mrf.mxu0  ;;  %v5982_v20 = vld [vmem:[%s21436_s6 + $0x8] sm:$0xff]  ;;  %v5673_v26 = vsel %vm21507_vm6, %v5657_v13, 0 }
 0x329   : > { %v3384_v53 = vpop.f32.mrf.mxu1  ;;  %v17321_v22 = vadd.f32 %v3579_v11, %v3460_v60  ;;  %5993 = vperm.xlu1 %15326, %v5982_v20   ;;  %v5679_v11 = vsel %vm21507_vm6, %v5659_v58, 0  ;;  %v15428_v20 = vld [vmem:[%s21433_s3 + $0x29c] ss:$0 sps:$4 sm:$0xff]  }
 0x32a   : > { %v3581_v44 = vpop.f32.mrf.mxu0  ;;  %6008 = vperm.xlu0 %15325, %v5985_v8  }
 0x32b   : > { %v3385_v43 = vpop.f32.mrf.mxu1  ;;  %v17329_v63 = vadd.f32 %v3581_v44, %v3461_v1 }
 0x32c   : > { %v3585_v28 = vpop.f32.mrf.mxu0  ;;  %13612 = vmatmul.mubr.msk.bf16.gmra.mxu0 %vm558_vm11, %v15423_v41 }
 0x32d   : > { %v17336_v4 = vadd.f32 %v3585_v28, %v3463_v35  ;;  %v14516_v23 = vpop.f32.mrf.mxu1  ;;  %14595 = vmatmul.mubr.msk.bf16.vlgmr.msra.gmra.mxu1 %vm558_vm11, %v15422_v16  ;;  %5313 = vmatprep.mubr.bf16.mxu0 %v21489_v0 }
 0x32e   : > { %v3674_v57 = vadd.f32 %v14516_v23, %v17205_v61  ;;  %5481 = vmatpush1.bf16.msra.mxu1 %v5458_v56  ;;  %v3587_v60 = vpop.f32.mrf.mxu0  ;;  %14598 = vmatprep.mubr.msk.bf16.mxu1 %vm558_vm11, %v15423_v41  ;;  %v15424_v61 = vld [vmem:[%s21433_s3 + $0x280] ss:$0 sps:$4 sm:$0xff]  }
 0x32f   : > { %15144 = vmatprep.subr.msk.bf16.mxu1 %vm21507_vm6, %v5659_v58  ;;  %v17348_v15 = vadd.f32 %v3587_v60, %v3464_v50  ;;  %v3636_v33 = vpop.f32.mrf.mxu1  ;;  %6003 = vperm.xlu1 %15326, %v5984_v2  }
 0x330   : > { %v3668_v1 = vadd.f32 %v3636_v33, %v17218_v29  ;;  %v3589_v51 = vpop.f32.mrf.mxu0 }
 0x331   : > { %v17354_v37 = vadd.f32 %v3589_v51, %v3466_v6  ;;  %v14517_v36 = vpop.f32.mrf.mxu1  ;;  %v15429_v51 = vld [vmem:[%s21433_s3 + $0x2a0] sm:$0xff]  }
 0x332   : > { %v3677_v35 = vadd.f32 %v14517_v36, %v17232_v49  ;;  %v3591_v52 = vpop.f32.mrf.mxu0 }
 0x333   : > { %v17360_v47 = vadd.f32 %v3591_v52, %v3467_v62  ;;  %v3639_v50 = vpop.f32.mrf.mxu1 }
 0x334   : > { %v3671_v29 = vadd.f32 %v3639_v50, %v17238_v45  ;;  %v3595_v5 = vpop.f32.mrf.mxu0  ;;  %13613 = vmatmul.mubr.msk.bf16.gmra.mxu0 %vm558_vm11, %v15424_v61 }
 0x335   : > { %v17364_v16 = vadd.f32 %v3595_v5, %v3469_v34  ;;  %v14520_v9 = vpop.f32.mrf.mxu1  ;;  %14599 = vmatmul.mubr.msk.bf16.gmra.mxu1 %vm558_vm11, %v15424_v61  ;;  %14604 = vmatprep.mubr.msk.bf16.mxu0 %vm558_vm11, %v15425_v19 }
 0x336   : > { %v3686_v6 = vadd.f32 %v14520_v9, %v17248_v31  ;;  %v3597_v24 = vpop.f32.mrf.mxu0  ;;  %5498 = vmatprep.mubr.bf16.mxu1 %v21489_v0 }
 0x337   : > { %v17370_v49 = vadd.f32 %v3597_v24, %v3470_v42  ;;  %v3652_v3 = vpop.f32.mrf.mxu1 }
 0x338   : > { %v3680_v45 = vadd.f32 %v3652_v3, %v17258_v32  ;;  %v3599_v62 = vpop.f32.mrf.mxu0  ;;  %v15430_v3 = vld [vmem:[%s21433_s3 + $0x2a8] sm:$0xff]  }
 0x339   : > { %v14521_v17 = vpop.f32.mrf.mxu1 }
 0x33a   : > { %v3600_v34 = vpop.f32.mrf.mxu0 }
 0x33b   : > { %v3655_v31 = vpop.f32.mrf.mxu1 }
 0x33c   : > { %v3683_v32 = vadd.f32 %v3655_v31, %v17273_v54  ;;  %v14526_v42 = vpop.f32.mrf.mxu0  ;;  %14605 = vmatmul.mubr.msk.bf16.vlgmr.msra.gmra.mxu0 %vm558_vm11, %v15426_v55 }
 0x33d   : > { %v3780_v41 = vpop.f32.mrf.mxu1  ;;  %v17386_v18 = vadd.f32 %v14526_v42, %v3674_v57  ;;  %13630 = vmatmul.mubr.msk.bf16.vlgmr.msra.gmra.mxu1 %vm558_vm11, %v15425_v19  ;;  %5696 = vmatpush1.bf16.msra.mxu0 %v5673_v26 }
 0x33e   : > { %v3881_v48 = vadd.f32 %v3780_v41, %v17281_v59  ;;  %14613 = vmatpush3.bf16.msra.mxu1 %v5679_v11  ;;  %v3851_v27 = vpop.f32.mrf.mxu0  ;;  %5508 = vmatprep.mubr.bf16.mxu1 %v21489_v0  ;;  %v15431_v11 = vld [vmem:[%s21433_s3 + $0x2b0] sm:$0xff]  }
 0x33f   : > { %v3782_v53 = vpop.f32.mrf.mxu1  ;;  %v17391_v25 = vadd.f32 %v3851_v27, %v3668_v1  ;;  %14608 = vmatprep.mubr.msk.bf16.mxu0 %vm558_vm11, %v15427_v38 }
 0x340   : > { %v3882_v54 = vadd.f32 %v3782_v53, %v17288_v10  ;;  %v14527_v44 = vpop.f32.mrf.mxu0 }
 0x341   : > { %v3784_v46 = vpop.f32.mrf.mxu1  ;;  %v17398_v43 = vadd.f32 %v14527_v44, %v3677_v35 }
 0x342   : > { %v3884_v59 = vadd.f32 %v3784_v46, %v17295_v39  ;;  %v3854_v28 = vpop.f32.mrf.mxu0 }
 0x343   : > { %v3786_v8 = vpop.f32.mrf.mxu1  ;;  %v17401_v56 = vadd.f32 %v3854_v28, %v3671_v29 }
 0x344   : > { %v17404_v23 = vadd.f32 %v3786_v8, %v17298_v21  ;;  %v14530_v58 = vpop.f32.mrf.mxu0  ;;  %14609 = vmatmul.mubr.msk.bf16.gmra.mxu0 %vm558_vm11, %v15428_v20 }
 0x345   : > { %v3790_v10 = vpop.f32.mrf.mxu1  ;;  %v17407_v57 = vadd.f32 %v14530_v58, %v3686_v6  ;;  %13631 = vmatmul.mubr.msk.bf16.gmra.mxu1 %vm558_vm11, %v15426_v55  ;;  %5713 = vmatprep.mubr.bf16.mxu0 %v21489_v0  ;;  %v15432_v58 = vld [vmem:[%s21433_s3 + $0x2b8] ss:$0 sps:$4 sm:$0xff]  }
 0x346   : > { %v3887_v60 = vadd.f32 %v3790_v10, %v17305_v40  ;;  %v3867_v39 = vpop.f32.mrf.mxu0  ;;  %5518 = vmatprep.mubr.bf16.mxu1 %v21489_v0 }
 0x347   : > { %v3792_v2 = vpop.f32.mrf.mxu1  ;;  %v17413_v33 = vadd.f32 %v3867_v39, %v3680_v45 }
 0x348   : > { %v3888_v21 = vadd.f32 %v3792_v2, %v17312_v30  ;;  %v14531_v1 = vpop.f32.mrf.mxu0 }
 0x349   : > { %v3794_v61 = vpop.f32.mrf.mxu1 }
 0x34a   : > { %v3890_v36 = vadd.f32 %v3794_v61, %v17321_v22  ;;  %v3870_v19 = vpop.f32.mrf.mxu0 }
 0x34b   : > { %v3796_v35 = vpop.f32.mrf.mxu1  ;;  %v17420_v52 = vadd.f32 %v3870_v19, %v3683_v32 }
 0x34c   : > { %v17423_v40 = vadd.f32 %v3796_v35, %v17329_v63  ;;  %v3995_v50 = vpop.f32.mrf.mxu0  ;;  %13650 = vmatmul.mubr.msk.bf16.vlgmr.msra.gmra.mxu0 %vm558_vm11, %v15429_v51 }
 0x34d   : > { %v3800_v29 = vpop.f32.mrf.mxu1  ;;  %v17426_v30 = vadd.f32 %v3995_v50, %v3881_v48  ;;  %13632 = vmatmul.mubr.msk.bf16.gmra.mxu1 %vm558_vm11, %v15427_v38  ;;  %5723 = vmatprep.mubr.bf16.mxu0 %v21489_v0 }
 0x34e   : > { %v3893_v5 = vadd.f32 %v3800_v29, %v17336_v4  ;;  %v3997_v22 = vpop.f32.mrf.mxu0  ;;  %5528 = vmatprep.mubr.bf16.mxu1 %v21489_v0 }
 0x34f   : > { %v3802_v9 = vpop.f32.mrf.mxu1  ;;  %v17432_v6 = vadd.f32 %v3997_v22, %v3882_v54 }
 0x350   : > { %v3894_v63 = vadd.f32 %v3802_v9, %v17348_v15  ;;  %v3999_v24 = vpop.f32.mrf.mxu0 }
 0x351   : > { %v3804_v45 = vpop.f32.mrf.mxu1  ;;  %v17438_v62 = vadd.f32 %v3999_v24, %v3884_v59 }
 0x352   : > { %v3896_v55 = vadd.f32 %v3804_v45, %v17354_v37  ;;  %v17441_v13 = vpop.f32.mrf.mxu0 }
 0x353   : > { %v17443_v4 = vpop.f32.mrf.mxu1 }
 0x354   : > { %v4005_v17 = vpop.f32.mrf.mxu0  ;;  %13651 = vmatmul.mubr.msk.bf16.gmra.mxu0 %vm558_vm11, %v15430_v3 }
 0x355   : > { %v3810_v34 = vpop.f32.mrf.mxu1  ;;  %v17446_v31 = vadd.f32 %v4005_v17, %v3887_v60  ;;  %13633 = vmatmul.mubr.msk.bf16.gmra.mxu1 %vm558_vm11, %v15428_v20  ;;  %5733 = vmatprep.mubr.bf16.mxu0 %v21489_v0 }
 0x356   : > { %v3899_v15 = vadd.f32 %v3810_v34, %v17364_v16  ;;  %v4007_v38 = vpop.f32.mrf.mxu0  ;;  %14614 = vmatprep.mubr.msk.bf16.mxu1 %vm558_vm11, %v15429_v51 }
 0x357   : > { %v3812_v37 = vpop.f32.mrf.mxu1  ;;  %v17452_v26 = vadd.f32 %v4007_v38, %v3888_v21 }
 0x358   : > { %v3900_v32 = vadd.f32 %v3812_v37, %v17370_v49  ;;  %v4009_v42 = vpop.f32.mrf.mxu0 }
 0x359   : > { %v3814_v41 = vpop.f32.mrf.mxu1  ;;  %v17458_v48 = vadd.f32 %v4009_v42, %v3890_v36 }
 0x35a   : > { %v17460_v27 = vpop.f32.mrf.mxu0 }
 0x35b   : > { %v3815_v53 = vpop.f32.mrf.mxu1 }
 0x35c   : > { %v4015_v16 = vpop.f32.mrf.mxu0  ;;  %13652 = vmatmul.mubr.msk.bf16.gmra.mxu0 %vm558_vm11, %v15431_v11 }
 0x35d   : > { %v17463_v54 = vadd.f32 %v4015_v16, %v3893_v5  ;;  %v14536_v44 = vpop.f32.mrf.mxu1  ;;  %14615 = vmatmul.mubr.msk.bf16.vlgmr.msra.gmra.mxu1 %vm558_vm11, %v15430_v3  ;;  %5743 = vmatprep.mubr.bf16.mxu0 %v21489_v0 }
 0x35e   : > { %v4104_v49 = vadd.f32 %v14536_v44, %v17386_v18  ;;  %v4017_v20 = vpop.f32.mrf.mxu0  ;;  %14618 = vmatprep.mubr.msk.bf16.mxu1 %vm558_vm11, %v15431_v11 }
 0x35f   : > { %v17469_v46 = vadd.f32 %v4017_v20, %v3894_v63  ;;  %v4066_v59 = vpop.f32.mrf.mxu1 }
 0x360   : > { %v4098_v28 = vadd.f32 %v4066_v59, %v17391_v25  ;;  %v4019_v8 = vpop.f32.mrf.mxu0 }
 0x361   : > { %v17475_v10 = vadd.f32 %v4019_v8, %v3896_v55  ;;  %v14537_v60 = vpop.f32.mrf.mxu1 }
 0x362   : > { %v4107_v39 = vadd.f32 %v14537_v60, %v17398_v43  ;;  %v17478_v2 = vpop.f32.mrf.mxu0 }
 0x363   : > { %v4069_v18 = vpop.f32.mrf.mxu1 }
 0x364   : > { %v4025_v21 = vpop.f32.mrf.mxu0  ;;  %13653 = vmatmul.mubr.msk.bf16.gmra.mxu0 %vm558_vm11, %v15432_v58 }
 0x365   : > { %v17481_v1 = vadd.f32 %v4025_v21, %v3899_v15  ;;  %v14540_v51 = vpop.f32.mrf.mxu1  ;;  %14619 = vmatmul.mubr.msk.bf16.gmra.mxu1 %vm558_vm11, %v15432_v58  ;;  %vm15671_vm11 = vmmov 0  }
 0x366   : > { %v4116_v25 = vadd.f32 %v14540_v51, %v17407_v57  ;;  %v4027_v61 = vpop.f32.mrf.mxu0  ;;  %6076 = vmatprep.mubr.bf16.mxu1 %v21489_v0 }
 0x367   : > { %v17486_v36 = vadd.f32 %v4027_v61, %v3900_v32  ;;  %v4082_v19 = vpop.f32.mrf.mxu1 }
 0x368   : > { %v4110_v43 = vadd.f32 %v4082_v19, %v17413_v33  ;;  %v4029_v35 = vpop.f32.mrf.mxu0  ;;  %v4101_v33 = vadd.f32 %v4069_v18, %v17401_v56 }
 0x369   : > { %v14541_v50 = vpop.f32.mrf.mxu1 }
 0x36a   : > { %v4030_v29 = vpop.f32.mrf.mxu0 }
 0x36b   : > { %v4085_v5 = vpop.f32.mrf.mxu1 }
 0x36c   : > { %v4113_v22 = vadd.f32 %v4085_v5, %v17420_v52  ;;  %v14546_v9 = vpop.f32.mrf.mxu0  ;;  %v4100_v52 = vadd.f32 %v17441_v13, %v17404_v23 }
 0x36d   : > { %v4210_v63 = vpop.f32.mrf.mxu1  ;;  %v17490_v24 = vadd.f32 %v14546_v9, %v4104_v49 }
 0x36e   : > { %v4311_v57 = vadd.f32 %v4210_v63, %v17426_v30  ;;  %v4281_v3 = vpop.f32.mrf.mxu0 }
 0x36f   : > { %v4212_v45 = vpop.f32.mrf.mxu1  ;;  %v17493_v55 = vadd.f32 %v4281_v3, %v4098_v28 }
 0x370   : > { %v4312_v17 = vadd.f32 %v4212_v45, %v17432_v6  ;;  %v14547_v34 = vpop.f32.mrf.mxu0 }
 0x371   : > { %v4214_v15 = vpop.f32.mrf.mxu1  ;;  %v17497_v38 = vadd.f32 %v14547_v34, %v4107_v39 }
 0x372   : > { %v4314_v37 = vadd.f32 %v4214_v15, %v17438_v62  ;;  %v4284_v32 = vpop.f32.mrf.mxu0  ;;  %v4106_v62 = vadd.f32 %v17460_v27, %v17423_v40 }
 0x373   : > { %v4216_v42 = vpop.f32.mrf.mxu1  ;;  %v17502_v30 = vadd.f32 %v4284_v32, %v4101_v33 }
 0x374   : > { %v4315_v11 = vadd.f32 %v4216_v42, %v4100_v52  ;;  %v14550_v41 = vpop.f32.mrf.mxu0 }
 0x375   : > { %v4220_v53 = vpop.f32.mrf.mxu1  ;;  %v17504_v16 = vadd.f32 %v14550_v41, %v4116_v25 }
 0x376   : > { %v4317_v6 = vadd.f32 %v4220_v53, %v17446_v31  ;;  %v4297_v56 = vpop.f32.mrf.mxu0 }
 0x377   : > { %v4222_v44 = vpop.f32.mrf.mxu1  ;;  %v17507_v49 = vadd.f32 %v4297_v56, %v4110_v43 }
 0x378   : > { %v4318_v20 = vadd.f32 %v4222_v44, %v17452_v26  ;;  %v14551_v23 = vpop.f32.mrf.mxu0  ;;  %v3897_v26 = vadd.f32 %v17443_v4, %v17360_v47 }
 0x379   : > { %v4224_v13 = vpop.f32.mrf.mxu1 }
 0x37a   : > { %v4320_v59 = vadd.f32 %v4224_v13, %v17458_v48  ;;  %v4300_v28 = vpop.f32.mrf.mxu0  ;;  %v4112_v43 = vadd.f32 %v17478_v2, %v3897_v26 }
 0x37b   : > { %v4226_v8 = vpop.f32.mrf.mxu1  ;;  %v4328_v58 = vadd.f32 %v4300_v28, %v4113_v22 }
 0x37c   : > { %v4321_v60 = vadd.f32 %v4226_v8, %v4106_v62  ;;  %v4425_v39 = vpop.f32.mrf.mxu0 }
 0x37d   : > { %v4230_v18 = vpop.f32.mrf.mxu1  ;;  %v4526_v31 = vadd.f32 %v4425_v39, %v4311_v57 }
 0x37e   : > { %v4323_v21 = vadd.f32 %v4230_v18, %v17463_v54  ;;  %v4427_v51 = vpop.f32.mrf.mxu0 }
 0x37f   : > { %v4232_v25 = vpop.f32.mrf.mxu1  ;;  %v4527_v61 = vadd.f32 %v4427_v51, %v4312_v17 }
 0x380   : > { %v4324_v19 = vadd.f32 %v4232_v25, %v17469_v46  ;;  %v4429_v40 = vpop.f32.mrf.mxu0 }
 0x381   : > { %v4234_v27 = vpop.f32.mrf.mxu1  ;;  %v4529_v48 = vadd.f32 %v4429_v40, %v4314_v37 }
 0x382   : > { %v4326_v35 = vadd.f32 %v4234_v27, %v17475_v10  ;;  %v4431_v50 = vpop.f32.mrf.mxu0 }
 0x383   : > { %v4236_v29 = vpop.f32.mrf.mxu1  ;;  %v4530_v5 = vadd.f32 %v4431_v50, %v4315_v11 }
 0x384   : > { %v4327_v22 = vadd.f32 %v4236_v29, %v4112_v43  ;;  %v4435_v54 = vpop.f32.mrf.mxu0 }
 0x385   : > { %v4240_v9 = vpop.f32.mrf.mxu1  ;;  %v4532_v63 = vadd.f32 %v4435_v54, %v4317_v6 }
 0x386   : > { %v4329_v57 = vadd.f32 %v4240_v9, %v17481_v1  ;;  %v4437_v3 = vpop.f32.mrf.mxu0 }
 0x387   : > { %v4242_v47 = vpop.f32.mrf.mxu1  ;;  %v4533_v4 = vadd.f32 %v4437_v3, %v4318_v20 }
 0x388   : > { %v4330_v46 = vadd.f32 %v4242_v47, %v17486_v36  ;;  %v4439_v45 = vpop.f32.mrf.mxu0 }
 0x389   : > { %v4244_v17 = vpop.f32.mrf.mxu1  ;;  %v4535_v34 = vadd.f32 %v4439_v45, %v4320_v59 }
 0x38a   : > { %v4441_v2 = vpop.f32.mrf.mxu0 }
 0x38b   : > { %v4245_v33 = vpop.f32.mrf.mxu1  ;;  %v4536_v10 = vadd.f32 %v4441_v2, %v4321_v60 }
 0x38c   : > { %v4445_v15 = vpop.f32.mrf.mxu0 }
 0x38d   : > { %v4538_v52 = vadd.f32 %v4445_v15, %v4323_v21  ;;  %v14556_v37 = vpop.f32.mrf.mxu1 }
 0x38e   : > { %v4534_v32 = vadd.f32 %v14556_v37, %v17490_v24  ;;  %v4447_v42 = vpop.f32.mrf.mxu0 }
 0x38f   : > { %v4539_v11 = vadd.f32 %v4447_v42, %v4324_v19  ;;  %v4496_v41 = vpop.f32.mrf.mxu1 }
 0x390   : > { %v4528_v1 = vadd.f32 %v4496_v41, %v17493_v55  ;;  %v4449_v53 = vpop.f32.mrf.mxu0 }
 0x391   : > { %v17523_v6 = vadd.f32 %v4449_v53, %v4326_v35  ;;  %v14557_v36 = vpop.f32.mrf.mxu1 }
 0x392   : > { %v4537_v56 = vadd.f32 %v14557_v36, %v17497_v38  ;;  %v4451_v44 = vpop.f32.mrf.mxu0 }
 0x393   : > { %v17526_v20 = vadd.f32 %v4451_v44, %v4327_v22  ;;  %v4499_v23 = vpop.f32.mrf.mxu1 }
 0x394   : > { %v4531_v13 = vadd.f32 %v4499_v23, %v17502_v30  ;;  %v4455_v62 = vpop.f32.mrf.mxu0 }
 0x395   : > { %v17529_v59 = vadd.f32 %v4455_v62, %v4329_v57  ;;  %v14560_v24 = vpop.f32.mrf.mxu1 }
 0x396   : > { %v4546_v28 = vadd.f32 %v14560_v24, %v17504_v16  ;;  %v4457_v8 = vpop.f32.mrf.mxu0 }
 0x397   : > { %v17532_v55 = vadd.f32 %v4457_v8, %v4330_v46  ;;  %v4512_v60 = vpop.f32.mrf.mxu1 }
 0x398   : > { %v4540_v39 = vadd.f32 %v4512_v60, %v17507_v49  ;;  %v4459_v18 = vpop.f32.mrf.mxu0 }
 0x399   : > { %v14561_v38 = vpop.f32.mrf.mxu1 }
 0x39a   : > { %v4460_v21 = vpop.f32.mrf.mxu0 }
 0x39b   : > { %v4515_v51 = vpop.f32.mrf.mxu1 }
 0x39c   : > { %v4543_v25 = vadd.f32 %v4515_v51, %v4328_v58  ;;  %v14566_v26 = vpop.f32.mrf.mxu0 }
 0x39d   : > { %v4640_v19 = vpop.f32.mrf.mxu1  ;;  %v17535_v30 = vadd.f32 %v14566_v26, %v4534_v32 }
 0x39e   : > { %v4741_v40 = vadd.f32 %v4640_v19, %v4526_v31  ;;  %v4711_v27 = vpop.f32.mrf.mxu0 }
 0x39f   : > { %v4642_v43 = vpop.f32.mrf.mxu1  ;;  %v17537_v35 = vadd.f32 %v4711_v27, %v4528_v1 }
 0x3a0   : > { %v4742_v16 = vadd.f32 %v4642_v43, %v4527_v61  ;;  %v14567_v50 = vpop.f32.mrf.mxu0 }
 0x3a1   : > { %v4644_v29 = vpop.f32.mrf.mxu1  ;;  %v17539_v22 = vadd.f32 %v14567_v50, %v4537_v56 }
 0x3a2   : > { %v4744_v49 = vadd.f32 %v4644_v29, %v4529_v48  ;;  %v4714_v54 = vpop.f32.mrf.mxu0 }
 0x3a3   : > { %v4646_v9 = vpop.f32.mrf.mxu1  ;;  %v17541_v57 = vadd.f32 %v4714_v54, %v4531_v13 }
 0x3a4   : > { %v4745_v58 = vadd.f32 %v4646_v9, %v4530_v5  ;;  %v14570_v3 = vpop.f32.mrf.mxu0 }
 0x3a5   : > { %v4650_v47 = vpop.f32.mrf.mxu1  ;;  %v17543_v46 = vadd.f32 %v14570_v3, %v4546_v28 }
 0x3a6   : > { %v4747_v31 = vadd.f32 %v4650_v47, %v4532_v63  ;;  %v4727_v45 = vpop.f32.mrf.mxu0 }
 0x3a7   : > { %v4652_v17 = vpop.f32.mrf.mxu1  ;;  %v17545_v2 = vadd.f32 %v4727_v45, %v4540_v39 }
 0x3a8   : > { %v4748_v61 = vadd.f32 %v4652_v17, %v4533_v4  ;;  %v14571_v33 = vpop.f32.mrf.mxu0 }
 0x3a9   : > { %v4654_v15 = vpop.f32.mrf.mxu1 }
 0x3aa   : > { %v4750_v37 = vadd.f32 %v4654_v15, %v4535_v34  ;;  %v4730_v32 = vpop.f32.mrf.mxu0  ;;  %v21492_v34 = vmov 0.0  }
 0x3ab   : > { %v4656_v48 = vpop.f32.mrf.mxu1  ;;  %v17547_v42 = vadd.f32 %v4730_v32, %v4543_v25  ;;  %14622 = vmatprep.subr.bf16.mxu0 %v21492_v34  ;;  %14630 = vmatprep.mubr.msk.bf16.mxu0 %vm15671_vm11, %v21492_v34 }
 0x3ac   : > { %v4751_v41 = vadd.f32 %v4656_v48, %v4536_v10  ;;  %v4855_v1 = vpop.f32.mrf.mxu0 }
 0x3ad   : > { %v4660_v5 = vpop.f32.mrf.mxu1  ;;  %v17549_v53 = vadd.f32 %v4855_v1, %v4741_v40 }
 0x3ae   : > { %v4753_v36 = vadd.f32 %v4660_v5, %v4538_v52  ;;  %v4857_v56 = vpop.f32.mrf.mxu0 }
 0x3af   : > { %v4662_v63 = vpop.f32.mrf.mxu1  ;;  %v17551_v44 = vadd.f32 %v4857_v56, %v4742_v16 }
 0x3b0   : > { %v4754_v23 = vadd.f32 %v4662_v63, %v4539_v11  ;;  %v4859_v13 = vpop.f32.mrf.mxu0 }
 0x3b1   : > { %v4664_v4 = vpop.f32.mrf.mxu1  ;;  %v17553_v62 = vadd.f32 %v4859_v13, %v4744_v49 }
 0x3b2   : > { %v4756_v24 = vadd.f32 %v4664_v4, %v17523_v6  ;;  %v4861_v10 = vpop.f32.mrf.mxu0 }
 0x3b3   : > { %v4666_v28 = vpop.f32.mrf.mxu1  ;;  %v4960_v8 = vadd.f32 %v4861_v10, %v4745_v58 }
 0x3b4   : > { %v4757_v60 = vadd.f32 %v4666_v28, %v17526_v20  ;;  %v4865_v52 = vpop.f32.mrf.mxu0 }
 0x3b5   : > { %v4670_v39 = vpop.f32.mrf.mxu1  ;;  %v4962_v18 = vadd.f32 %v4865_v52, %v4747_v31 }
 0x3b6   : > { %v4759_v38 = vadd.f32 %v4670_v39, %v17529_v59  ;;  %v4867_v11 = vpop.f32.mrf.mxu0 }
 0x3b7   : > { %v4672_v21 = vpop.f32.mrf.mxu1  ;;  %v4963_v51 = vadd.f32 %v4867_v11, %v4748_v61 }
 0x3b8   : > { %v4760_v25 = vadd.f32 %v4672_v21, %v17532_v55  ;;  %v4869_v26 = vpop.f32.mrf.mxu0 }
 0x3b9   : > { %v4674_v19 = vpop.f32.mrf.mxu1  ;;  %v4965_v40 = vadd.f32 %v4869_v26, %v4750_v37 }
 0x3ba   : > { %v4871_v27 = vpop.f32.mrf.mxu0 }
 0x3bb   : > { %v4675_v6 = vpop.f32.mrf.mxu1  ;;  %v4966_v43 = vadd.f32 %v4871_v27, %v4751_v41 }
 0x3bc   : > { %v4875_v16 = vpop.f32.mrf.mxu0 }
 0x3bd   : > { %v17560_v50 = vadd.f32 %v4875_v16, %v4753_v36  ;;  %v14576_v20 = vpop.f32.mrf.mxu1 }
 0x3be   : > { %v4964_v29 = vadd.f32 %v14576_v20, %v17535_v30  ;;  %v4877_v49 = vpop.f32.mrf.mxu0 }
 0x3bf   : > { %v17563_v54 = vadd.f32 %v4877_v49, %v4754_v23  ;;  %v4926_v59 = vpop.f32.mrf.mxu1 }
 0x3c0   : > { %v4958_v9 = vadd.f32 %v4926_v59, %v17537_v35  ;;  %v4879_v58 = vpop.f32.mrf.mxu0 }
 0x3c1   : > { %v4971_v55 = vadd.f32 %v4879_v58, %v4756_v24  ;;  %v14577_v3 = vpop.f32.mrf.mxu1 }
 0x3c2   : > { %v4967_v47 = vadd.f32 %v14577_v3, %v17539_v22  ;;  %v4881_v31 = vpop.f32.mrf.mxu0 }
 0x3c3   : > { %v4972_v45 = vadd.f32 %v4881_v31, %v4757_v60  ;;  %v4929_v17 = vpop.f32.mrf.mxu1 }
 0x3c4   : > { %v4961_v30 = vadd.f32 %v4929_v17, %v17541_v57  ;;  %v4885_v61 = vpop.f32.mrf.mxu0 }
 0x3c5   : > { %v17570_v33 = vadd.f32 %v4885_v61, %v4759_v38  ;;  %v14580_v15 = vpop.f32.mrf.mxu1 }
 0x3c6   : > { %v4976_v35 = vadd.f32 %v14580_v15, %v17543_v46  ;;  %v4887_v37 = vpop.f32.mrf.mxu0 }
 0x3c7   : > { %v17573_v32 = vadd.f32 %v4887_v37, %v4760_v25  ;;  %v4942_v48 = vpop.f32.mrf.mxu1 }
 0x3c8   : > { %v4970_v41 = vadd.f32 %v4942_v48, %v17545_v2  ;;  %v4889_v1 = vpop.f32.mrf.mxu0 }
 0x3c9   : > { %v14581_v5 = vpop.f32.mrf.mxu1 }
 0x3ca   : > { %v4890_v22 = vpop.f32.mrf.mxu0 }
 0x3cb   : > { %v4945_v36 = vpop.f32.mrf.mxu1 }
 0x3cc   : > { %v4973_v56 = vadd.f32 %v4945_v36, %v17547_v42  ;;  %v14586_v63 = vpop.f32.mrf.mxu0 }
 0x3cd   : > { %v5070_v57 = vpop.f32.mrf.mxu1  ;;  %v17577_v23 = vadd.f32 %v14586_v63, %v4964_v29 }
 0x3ce   : > { %v5171_v13 = vadd.f32 %v5070_v57, %v17549_v53  ;;  %v5141_v4 = vpop.f32.mrf.mxu0 }
 0x3cf   : > { %v5072_v46 = vpop.f32.mrf.mxu1  ;;  %v5173_v24 = vadd.f32 %v5141_v4, %v4958_v9 }
 0x3d0   : > { %v5172_v10 = vadd.f32 %v5072_v46, %v17551_v44  ;;  %v14587_v28 = vpop.f32.mrf.mxu0 }
 0x3d1   : > { %v5074_v60 = vpop.f32.mrf.mxu1  ;;  %v17581_v2 = vadd.f32 %v14587_v28, %v4967_v47 }
 0x3d2   : > { %v5174_v52 = vadd.f32 %v5074_v60, %v17553_v62  ;;  %v5144_v39 = vpop.f32.mrf.mxu0 }
 0x3d3   : > { %v5076_v38 = vpop.f32.mrf.mxu1  ;;  %v17584_v42 = vadd.f32 %v5144_v39, %v4961_v30 }
 0x3d4   : > { %v5175_v11 = vadd.f32 %v5076_v38, %v4960_v8  ;;  %v14590_v21 = vpop.f32.mrf.mxu0 }
 0x3d5   : > { %v5080_v25 = vpop.f32.mrf.mxu1  ;;  %v17586_v26 = vadd.f32 %v14590_v21, %v4976_v35 }
 0x3d6   : > { %v5177_v53 = vadd.f32 %v5080_v25, %v4962_v18  ;;  %v5157_v19 = vpop.f32.mrf.mxu0 }
 0x3d7   : > { %v5082_v27 = vpop.f32.mrf.mxu1  ;;  %v17588_v6 = vadd.f32 %v5157_v19, %v4970_v41 }
 0x3d8   : > { %v5178_v44 = vadd.f32 %v5082_v27, %v4963_v51  ;;  %v14591_v16 = vpop.f32.mrf.mxu0 }
 0x3d9   : > { %v5084_v20 = vpop.f32.mrf.mxu1 }
 0x3da   : > { %v5180_v29 = vadd.f32 %v5084_v20, %v4965_v40  ;;  %v5160_v49 = vpop.f32.mrf.mxu0 }
 0x3db   : > { %v5086_v62 = vpop.f32.mrf.mxu1  ;;  %v17590_v59 = vadd.f32 %v5160_v49, %v4973_v56 }
 0x3dc   : > { %v5181_v9 = vadd.f32 %v5086_v62, %v4966_v43  ;;  %v5285_v58 = vpop.f32.mrf.mxu0  ;;  %v17620_v62 = vpop.permute.xlu1 %5866 }
 0x3dd   : > { %v5090_v8 = vpop.f32.mrf.mxu1  ;;  %v17592_v3 = vadd.f32 %v5285_v58, %v5171_v13  ;;  %v17622_v58 = vpop.permute.xlu0 %5876 }
 0x3de   : > { %v17595_v47 = vadd.f32 %v5090_v8, %v17560_v50  ;;  %v5287_v18 = vpop.f32.mrf.mxu0  ;;  %21595 = vst [vmem:[#allocation7_spill] sm:$0xff] %v17622_v58 }
 0x3df   : > { %v5092_v31 = vpop.f32.mrf.mxu1  ;;  %v17597_v17 = vadd.f32 %v5287_v18, %v5172_v10 }
 0x3e0   : > { %v17600_v51 = vadd.f32 %v5092_v31, %v17563_v54  ;;  %v5289_v40 = vpop.f32.mrf.mxu0 }
 0x3e1   : > { %v5094_v30 = vpop.f32.mrf.mxu1  ;;  %v17602_v61 = vadd.f32 %v5289_v40, %v5174_v52 }
 0x3e2   : > { %v17604_v15 = vadd.f32 %v5094_v30, %v4971_v55  ;;  %v5291_v43 = vpop.f32.mrf.mxu0  ;;  %v17626_v30 = vpop.permute.xlu1 %5871 }
 0x3e3   : > { %v5096_v35 = vpop.f32.mrf.mxu1  ;;  %v17606_v37 = vadd.f32 %v5291_v43, %v5175_v11  ;;  %21596 = vst [vmem:[#allocation8_spill] sm:$0xff] %v17626_v30 }
 0x3e4   : > { %v17608_v48 = vadd.f32 %v5096_v35, %v4972_v45  ;;  %v5295_v50 = vpop.f32.mrf.mxu0 }
 0x3e5   : > { %v5100_v41 = vpop.f32.mrf.mxu1  ;;  %v17610_v1 = vadd.f32 %v5295_v50, %v5177_v53  ;;  %v17630_v50 = vpop.permute.xlu0 %5856 }
 0x3e6   : > { %v5297_v5 = vpop.f32.mrf.mxu0 }
 0x3e7   : > { %v5102_v22 = vpop.f32.mrf.mxu1  ;;  %v17612_v54 = vadd.f32 %v5297_v5, %v5178_v44 }
 0x3e8   : > { %v5299_v36 = vpop.f32.mrf.mxu0  ;;  %v5190_v14 = vadd.f32 %v5102_v22, %v17573_v32 }
 0x3e9   : > { %v5104_v56 = vpop.f32.mrf.mxu1  ;;  %v17614_v63 = vadd.f32 %v5299_v36, %v5180_v29 }
 0x3ea   : > { %v5301_v55 = vpop.f32.mrf.mxu0 }
 0x3eb   : > { %v5105_v57 = vpop.f32.mrf.mxu1  ;;  %v17616_v13 = vadd.f32 %v5301_v55, %v5181_v9 }
 0x3ec   : > { %v5305_v4 = vpop.f32.mrf.mxu0  ;;  %v17634_v57 = vpop.permute.xlu1 %5861 }
 0x3ed   : > { %v14596_v46 = vpop.f32.mrf.mxu1  ;;  %v17649_v58 = vadd.f32 %v5305_v4, %v17595_v47 }
 0x3ee   : > { %v5307_v45 = vpop.f32.mrf.mxu0 }
 0x3ef   : > { %v5356_v10 = vpop.f32.mrf.mxu1  ;;  %v17653_v30 = vadd.f32 %v5307_v45, %v17600_v51 }
 0x3f0   : > { %v17618_v28 = vadd.f32 %v5356_v10, %v5173_v24  ;;  %v5309_v60 = vpop.f32.mrf.mxu0  ;;  %v17667_v51 = vpop.permute.xlu1 %5851 }
 0x3f1   : > { %v14597_v52 = vpop.f32.mrf.mxu1 }
 0x3f2   : > { %v5311_v39 = vpop.f32.mrf.mxu0  ;;  %v5397_v32 = vadd.f32 %v14597_v52, %v17581_v2 }
 0x3f3   : > { %v5359_v38 = vpop.f32.mrf.mxu1  ;;  %v17664_v47 = vadd.f32 %v5311_v39, %v17608_v48 }
 0x3f4   : > { %v5315_v11 = vpop.f32.mrf.mxu0 }
 0x3f5   : > { %v14600_v21 = vpop.f32.mrf.mxu1 }
 0x3f6   : > { %v5317_v25 = vpop.f32.mrf.mxu0 }
 0x3f7   : > { %v5372_v53 = vpop.f32.mrf.mxu1  ;;  %v17672_v4 = vadd.f32 %v5317_v25, %v5190_v14 }
 0x3f8   : > { %v5319_v19 = vpop.f32.mrf.mxu0 }
 0x3f9   : > { %v14601_v27 = vpop.f32.mrf.mxu1 }
 0x3fa   : > { %v5320_v44 = vpop.f32.mrf.mxu0 }
 0x3fb   : > { %v5375_v16 = vpop.f32.mrf.mxu1  ;;  %v17639_v44 = vpop.permute.xlu0 %5846 }
 0x3fc   : > { %v14606_v20 = vpop.f32.mrf.mxu0  ;;  %v5403_v2 = vadd.f32 %v5375_v16, %v17590_v59 }
 0x3fd   : > { %v5500_v29 = vpop.f32.mrf.mxu1 }
 0x3fe   : > { %v5571_v49 = vpop.f32.mrf.mxu0  ;;  %v5601_v10 = vadd.f32 %v5500_v29, %v17592_v3  ;;  %v5394_v3 = vadd.f32 %v14596_v46, %v17577_v23  ;;  %v5391_v23 = vadd.f32 %v5359_v38, %v17584_v42 }
 0x3ff   : > { %v5502_v9 = vpop.f32.mrf.mxu1  ;;  %v5603_v39 = vadd.f32 %v5571_v49, %v17618_v28 }
 0x400   : > { %v14607_v24 = vpop.f32.mrf.mxu0  ;;  %v5602_v0 = vadd.f32 %v5502_v9, %v17597_v17  ;;  %v5609_v52 = vadd.f32 %v14606_v20, %v5394_v3 }
 0x401   : > { %v5504_v8 = vpop.f32.mrf.mxu1  ;;  %v17682_v38 = vadd.f32 %v14607_v24, %v5397_v32 }
 0x402   : > { %v5574_v18 = vpop.f32.mrf.mxu0  ;;  %v5604_v17 = vadd.f32 %v5504_v8, %v17602_v61  ;;  %v5406_v61 = vadd.f32 %v14600_v21, %v17586_v26 }
 0x403   : > { %v5506_v31 = vpop.f32.mrf.mxu1  ;;  %v17686_v25 = vadd.f32 %v5574_v18, %v5391_v23 }
 0x404   : > { %v17624_v40 = vpop.f32.mrf.mxu0  ;;  %v5605_v48 = vadd.f32 %v5506_v31, %v17606_v37 }
 0x405   : > { %v5510_v43 = vpop.f32.mrf.mxu1 }
 0x406   : > { %v17628_v35 = vpop.f32.mrf.mxu0  ;;  %v5607_v45 = vadd.f32 %v5510_v43, %v17610_v1 }
 0x407   : > { %v5512_v5 = vpop.f32.mrf.mxu1 }
 0x408   : > { %v14611_v36 = vpop.f32.mrf.mxu0  ;;  %v5608_v37 = vadd.f32 %v5512_v5, %v17612_v54  ;;  %v17701_v5 = vadd.f32 %v17624_v40, %v5406_v61 }
 0x409   : > { %v5514_v56 = vpop.f32.mrf.mxu1  ;;  %v5189_v36 = vadd.f32 %v5100_v41, %v17570_v33  ;;  %v17660_v33 = vadd.f32 %v5309_v60, %v17604_v15  ;;  %v5400_v15 = vadd.f32 %v5372_v53, %v17588_v6 }
 0x40a   : > { %v17632_v55 = vpop.f32.mrf.mxu0  ;;  %v5610_v53 = vadd.f32 %v5514_v56, %v17614_v63 }
 0x40b   : > { %v17637_v19 = vpop.f32.mrf.mxu1  ;;  %v17669_v22 = vadd.f32 %v5315_v11, %v5189_v36  ;;  %v17704_v56 = vadd.f32 %v17628_v35, %v5400_v15 }
 0x40c   : > { %v5715_v27 = vpop.f32.mrf.mxu0 }
 0x40d   : > { %v17642_v34 = vpop.f32.mrf.mxu1  ;;  %v5816_v12 = vadd.f32 %v5715_v27, %v5601_v10 }
 0x40e   : > { %v5717_v29 = vpop.f32.mrf.mxu0  ;;  %v5613_v40 = vadd.f32 %v17642_v34, %v17649_v58 }
 0x40f   : > { %v17656_v9 = vpop.f32.mrf.mxu1  ;;  %v5879_v10 = vadd.f32 %v17639_v44, %v5816_v12  ;;  %v5817_v27 = vadd.f32 %v5717_v29, %v5602_v0 }
 0x410   : > { %v5719_v41 = vpop.f32.mrf.mxu0 }
 0x411   : > { %v5524_v0 = vpop.f32.mrf.mxu1  ;;  %v5819_v12 = vadd.f32 %v5719_v41, %v5604_v17  ;;  %v5922_v46 = vmul.f32 %v17644_v7, %v5879_v10  ;;  %vm5900_vm13 = vcmp.ge.f32.partialorder %v5879_v10, 0.0  ;;  %v5880_v60 = vadd.f32 %v17639_v44, %v5817_v27 }
 0x412   : > { %v5721_v42 = vpop.f32.mrf.mxu0  ;;  %v5611_v17 = vadd.f32 %v17637_v19, %v17616_v13  ;;  %v5614_v13 = vadd.f32 %v17656_v9, %v17653_v30 }
 0x413   : > { %v5882_v26 = vadd.f32 %v17667_v51, %v5819_v12  ;;  %v5526_v14 = vpop.f32.mrf.mxu1  ;;  %v5820_v6 = vadd.f32 %v5721_v42, %v5605_v48  ;;  %v17690_v16 = vsel %vm5900_vm13, %v5879_v10, %v5922_v46  ;;  %v5923_v49 = vmul.f32 %v17644_v7, %v5880_v60 }
 0x414   : > { %v5725_v59 = vpop.f32.mrf.mxu0  ;;  %vm5901_vm14 = vcmp.ge.f32.partialorder %v5880_v60, 0.0  ;;  %v17710_v10 = vadd.f32 %v17632_v55, %v5403_v2  ;;  %v5616_v2 = vadd.f32 %v5524_v0, %v17660_v33  ;;  %v5617_v34 = vadd.f32 %v5526_v14, %v17664_v47 }
 0x415   : > { %vm5903_vm10 = vcmp.ge.f32.partialorder %v5882_v26, 0.0  ;;  %v5925_v11 = vmul.f32 %v17644_v7, %v5882_v26  ;;  %v5530_v21 = vpop.f32.mrf.mxu1  ;;  %v5822_v1 = vadd.f32 %v5725_v59, %v5607_v45  ;;  %v5883_v28 = vadd.f32 %v17667_v51, %v5820_v6 }
 0x416   : > { %v5727_v20 = vpop.f32.mrf.mxu0  ;;  %v17719_v61 = vsel %vm5901_vm14, %v5880_v60, %v5923_v49  ;;  %v5619_v46 = vadd.f32 %v5530_v21, %v17669_v22  ;;  %v21597_v49 = vld [vmem:[#allocation8_spill] sm:$0xff] }
 0x417   : > { %v17694_v24 = vsel %vm5903_vm10, %v5882_v26, %v5925_v11  ;;  %v5885_v54 = vadd.f32 %v17630_v50, %v5822_v1  ;;  %v5532_v8 = vpop.f32.mrf.mxu1  ;;  %v5823_v31 = vadd.f32 %v5727_v20, %v5608_v37  ;;  %vm5904_vm15 = vcmp.ge.f32.partialorder %v5883_v28, 0.0 }
 0x418   : > { %v5926_v18 = vmul.f32 %v17644_v7, %v5883_v28  ;;  %v5729_v43 = vpop.f32.mrf.mxu0  ;;  %v5969_v63 = vpack.c.bf16 %v17694_v24, %v17690_v16  ;;  %v5620_v30 = vadd.f32 %v5532_v8, %v17672_v4  ;;  %v15435_v16 = vld [vmem:[%s21435_s5 + $0x10] ss:$0 sps:$4 sm:$0x33]   ;;  %v5989_v24 = vpop.permute.xlu0 %5988 }
 0x419   : > { %v5886_v36 = vadd.f32 %v17630_v50, %v5823_v31  ;;  %v5534_v3 = vpop.f32.mrf.mxu1  ;;  %v5825_v29 = vadd.f32 %v5729_v43, %v5610_v53  ;;  %v5928_v27 = vmul.f32 %v17644_v7, %v5885_v54  ;;  %vm5906_vm10 = vcmp.ge.f32.partialorder %v5885_v54, 0.0 }
 0x41a   : > { %v5731_v32 = vpop.f32.mrf.mxu0  ;;  %v17713_v23 = vsel %vm5904_vm15, %v5883_v28, %v5926_v18 }
 0x41b   : > { %v5888_v35 = vadd.f32 %v17634_v57, %v5825_v29  ;;  %v5535_v41 = vpop.f32.mrf.mxu1  ;;  %v5929_v55 = vmul.f32 %v17644_v7, %v5886_v36  ;;  %v5826_v19 = vadd.f32 %v5731_v32, %v5611_v17  ;;  %v5970_v15 = vpack.c.bf16 %v17713_v23, %v17719_v61  ;;  %v15434_v23 = vld [vmem:[%s21435_s5 + $0x8] sm:$0xff]  }
 0x41c   : > { %v5735_v12 = vpop.f32.mrf.mxu0  ;;  %vm5907_vm13 = vcmp.ge.f32.partialorder %v5886_v36, 0.0  ;;  %v17729_v42 = vsel %vm5906_vm10, %v5885_v54, %v5928_v27 }
 0x41d   : > { %v5828_v58 = vadd.f32 %v5735_v12, %v5613_v40  ;;  %v14616_v48 = vpop.f32.mrf.mxu1  ;;  %v5931_v60 = vmul.f32 %v17644_v7, %v5888_v35  ;;  %v17734_v26 = vadd.f32 %v17634_v57, %v5826_v19  ;;  %vm5909_vm14 = vcmp.ge.f32.partialorder %v5888_v35, 0.0 }
 0x41e   : > { %v5824_v9 = vadd.f32 %v14616_v48, %v5609_v52  ;;  %v5737_v45 = vpop.f32.mrf.mxu0  ;;  %v17739_v59 = vsel %vm5907_vm13, %v5886_v36, %v5929_v55 }
 0x41f   : > { %v5891_v33 = vadd.f32 %v17620_v62, %v5828_v58  ;;  %v5786_v0 = vpop.f32.mrf.mxu1  ;;  %v5829_v47 = vadd.f32 %v5737_v45, %v5614_v13  ;;  %v17750_v28 = vmul.f32 %v17644_v7, %v17734_v26  ;;  %vm5910_vm3 = vcmp.ge.f32.partialorder %v17734_v26, 0.0 }
 0x420   : > { %v5887_v14 = vadd.f32 %v17630_v50, %v5824_v9  ;;  %v5818_v6 = vadd.f32 %v5786_v0, %v5603_v39  ;;  %v5739_v22 = vpop.f32.mrf.mxu0  ;;  %v17746_v39 = vsel %vm5909_vm14, %v5888_v35, %v5931_v60 }
 0x421   : > { %vm5912_vm15 = vcmp.ge.f32.partialorder %v5891_v33, 0.0  ;;  %v5934_v4 = vmul.f32 %v17644_v7, %v5891_v33  ;;  %v5892_v52 = vadd.f32 %v17620_v62, %v5829_v47  ;;  %v5831_v37 = vadd.f32 %v5739_v22, %v5616_v2  ;;  %v14617_v11 = vpop.f32.mrf.mxu1 }
 0x422   : > { %vm5908_vm10 = vcmp.ge.f32.partialorder %v5887_v14, 0.0  ;;  %v5930_v21 = vmul.f32 %v17644_v7, %v5887_v14  ;;  %v5881_v1 = vadd.f32 %v17639_v44, %v5818_v6  ;;  %v5827_v53 = vadd.f32 %v14617_v11, %v17682_v38  ;;  %v5741_v50 = vpop.f32.mrf.mxu0 }
 0x423   : > { %v17752_v20 = vsel %vm5912_vm15, %v5891_v33, %v5934_v4  ;;  %v5894_v54 = vadd.f32 %v21597_v49, %v5831_v37  ;;  %v5789_v8 = vpop.f32.mrf.mxu1  ;;  %vm5913_vm7 = vcmp.ge.f32.partialorder %v5892_v52, 0.0  ;;  %v5935_v43 = vmul.f32 %v17644_v7, %v5892_v52 }
 0x424   : > { %vm5902_vm13 = vcmp.ge.f32.partialorder %v5881_v1, 0.0  ;;  %v5924_v31 = vmul.f32 %v17644_v7, %v5881_v1  ;;  %v5890_v44 = vadd.f32 %v17634_v57, %v5827_v53  ;;  %v5745_v18 = vpop.f32.mrf.mxu0  ;;  %v17759_v38 = vsel %vm5908_vm10, %v5887_v14, %v5930_v21 }
 0x425   : > { %v5821_v36 = vadd.f32 %v5789_v8, %v17686_v25  ;;  %v5832_v3 = vadd.f32 %v5741_v50, %v5617_v34  ;;  %v14620_v29 = vpop.f32.mrf.mxu1  ;;  %vm5915_vm14 = vcmp.ge.f32.partialorder %v5894_v54, 0.0  ;;  %v5937_v27 = vmul.f32 %v17644_v7, %v5894_v54  ;;  %v21598_v25 = vld [vmem:[#allocation7_spill] sm:$0xff] }
 0x426   : > { %v17763_v17 = vsel %vm5902_vm13, %v5881_v1, %v5924_v31  ;;  %v5834_v32 = vadd.f32 %v5745_v18, %v5619_v46  ;;  %v5747_v40 = vpop.f32.mrf.mxu0  ;;  %v5933_v57 = vmul.f32 %v17644_v7, %v5890_v44  ;;  %v5836_v13 = vadd.f32 %v14620_v29, %v17701_v5 }
 0x427   : > { %v5884_v35 = vadd.f32 %v17667_v51, %v5821_v36  ;;  %v5895_v41 = vadd.f32 %v21597_v49, %v5832_v3  ;;  %v5802_v55 = vpop.f32.mrf.mxu1  ;;  %vm5911_vm15 = vcmp.ge.f32.partialorder %v5890_v44, 0.0  ;;  %v5835_v2 = vadd.f32 %v5747_v40, %v5620_v30 }
 0x428   : > { %v5897_v19 = vadd.f32 %v21598_v25, %v5834_v32  ;;  %v5830_v12 = vadd.f32 %v5802_v55, %v17704_v56  ;;  %v5749_v34 = vpop.f32.mrf.mxu0  ;;  %v5899_v5 = vadd.f32 %v21598_v25, %v5836_v13  ;;  %v5958_v60 = vsel %vm5915_vm14, %v5894_v54, %v5937_v27  ;;  %v5994_v32 = vpop.permute.xlu1 %5993 }
 0x429   : > { %vm5905_vm10 = vcmp.ge.f32.partialorder %v5884_v35, 0.0  ;;  %v5927_v58 = vmul.f32 %v17644_v7, %v5884_v35  ;;  %vm5916_vm13 = vcmp.ge.f32.partialorder %v5895_v41, 0.0  ;;  %v5938_v48 = vmul.f32 %v17644_v7, %v5895_v41  ;;  %v14621_v46 = vpop.f32.mrf.mxu1 }
 0x42a   : > { %vm5918_vm0 = vcmp.ge.f32.partialorder %v5897_v19, 0.0  ;;  %v5940_v51 = vmul.f32 %v17644_v7, %v5897_v19  ;;  %v5893_v9 = vadd.f32 %v17620_v62, %v5830_v12  ;;  %v5750_v45 = vpop.f32.mrf.mxu0  ;;  %v5954_v56 = vsel %vm5911_vm15, %v5890_v44, %v5933_v57 }
 0x42b   : > { %v5898_v30 = vadd.f32 %v21598_v25, %v5835_v2  ;;  %v5805_v33 = vpop.f32.mrf.mxu1  ;;  %v5959_v0 = vsel %vm5916_vm13, %v5895_v41, %v5938_v48  ;;  %v5948_v47 = vsel %vm5905_vm10, %v5884_v35, %v5927_v58  ;;  %vm5920_vm6 = vcmp.ge.f32.partialorder %v5899_v5, 0.0  ;;  %v5999_v48 = vpop.permute.xlu0 %5998 }
 0x42c   : > { %v5942_v14 = vmul.f32 %v17644_v7, %v5899_v5  ;;  %v5956_v6 = vsel %vm5913_vm7, %v5892_v52, %v5935_v43  ;;  %v5833_v62 = vadd.f32 %v5805_v33, %v17710_v10  ;;  %v5961_v4 = vsel %vm5918_vm0, %v5897_v19, %v5940_v51 }
 0x42d   : > { %vm5919_vm2 = vcmp.ge.f32.partialorder %v5898_v30, 0.0  ;;  %v5941_v22 = vmul.f32 %v17644_v7, %v5898_v30  ;;  %v5936_v37 = vmul.f32 %v17644_v7, %v5893_v9  ;;  %v5978_v21 = vpack.c.bf16 %v5961_v4, %v5961_v4 }
 0x42e   : > { %v5963_v11 = vsel %vm5920_vm6, %v5899_v5, %v5942_v14  ;;  %v5976_v1 = vpack.c.bf16 %v5959_v0, %v5956_v6  ;;  %v5896_v50 = vadd.f32 %v21597_v49, %v5833_v62  ;;  %v5975_v8 = vpack.c.bf16 %v5958_v60, %v17752_v20 }
 0x42f   : > { %v5962_v53 = vsel %vm5919_vm2, %v5898_v30, %v5941_v22  ;;  %v5980_v54 = vpack.c.bf16 %v5963_v11, %v5963_v11  ;;  %vm5914_vm14 = vcmp.ge.f32.partialorder %v5893_v9, 0.0  ;;  %v5953_v10 = vsel %vm5910_vm3, %v17734_v26, %v17750_v28  ;;  %v6004_v22 = vpop.permute.xlu1 %6003 }
 0x430   : > { %v5979_v52 = vpack.c.bf16 %v5962_v53, %v5962_v53  ;;  %v5974_v31 = vpack.c.bf16 %v5954_v56, %v17759_v38  ;;  %vm5917_vm0 = vcmp.ge.f32.partialorder %v5896_v50, 0.0  ;;  %v5939_v44 = vmul.f32 %v17644_v7, %v5896_v50 }
 0x431   : > { %v6042_v18 = vsel %vm487_vm8, %v5980_v54, 0  ;;  %v5973_v43 = vpack.c.bf16 %v5953_v10, %v17739_v59  ;;  %v6036_v20 = vsel %vm487_vm8, %v5978_v21, 0  ;;  %v5972_v49 = vpack.c.bf16 %v17746_v39, %v17729_v42  ;;  %v15433_v42 = vld [vmem:[%s21435_s5] sm:$0xff]  }
 0x432   : > { %14623 = vmatpush3.bf16.msra.mxu0 %v6042_v18  ;;  %13661 = vmatprep.subr.msk.bf16.mxu1 %vm487_vm8, %v5979_v52  ;;  %v5971_v36 = vpack.c.bf16 %v5948_v47, %v17763_v17  ;;  %v5957_v26 = vsel %vm5914_vm14, %v5893_v9, %v5936_v37  ;;  %v5960_v28 = vsel %vm5917_vm0, %v5896_v50, %v5939_v44  ;;  %v21599_v38 = vmov 0.0   ;;  %v6009_v44 = vpop.permute.xlu0 %6008 }
 0x433   : > { %6053 = vmatpush1.bf16.msra.mxu1 %v6036_v20  ;;  %14624 = vmatprep.subr.bf16.mxu0 %v21599_v38  ;;  %v5977_v3 = vpack.c.bf16 %v5960_v28, %v5957_v26  ;;  %v21600_v59 = vmov 0  }
 0x434   : > { %6054 = vmatprep.subr.bf16.mxu1 %v5976_v1 }
 0x436   : > { %14625 = vmatpush3.bf16.msra.mxu0 %v5977_v3 }
 0x437   : > { %6055 = vmatpush1.bf16.msra.mxu1 %v5975_v8  ;;  %14626 = vmatprep.subr.bf16.mxu0 %v21599_v38 }
 0x438   : > { %6056 = vmatprep.subr.bf16.mxu1 %v5973_v43 }
 0x43a   : > { %14627 = vmatpush3.bf16.msra.mxu0 %v5974_v31 }
 0x43b   : > { %6057 = vmatpush1.bf16.msra.mxu1 %v5972_v49  ;;  %14628 = vmatprep.subr.bf16.mxu0 %v21599_v38 }
 0x43c   : > { %6058 = vmatprep.subr.bf16.mxu1 %v5970_v15 }
 0x43e   : > { %14629 = vmatpush3.bf16.msra.mxu0 %v5971_v36 }
 0x43f   : > { %6059 = vmatpush1.bf16.msra.mxu1 %v5969_v63 }
 0x441   : > { %14631 = vmatmul.mubr.msk.bf16.vlgmr.msra.gmra.mxu0 %vm3721_vm12, %v15433_v42 }
 0x442   : > { %13662 = vmatmul.mubr.msk.bf16.vlgmr.msra.gmra.mxu1 %vm3721_vm12, %v15433_v42  ;;  %14634 = vmatprep.mubr.msk.bf16.mxu0 %vm15671_vm11, %v21599_v38 }
 0x443   : > { %6086 = vmatprep.mubr.bf16.mxu1 %v21600_v59 }
 0x449   : > { %14635 = vmatmul.mubr.msk.bf16.gmra.mxu0 %vm3721_vm12, %v15434_v23 }
 0x44a   : > { %13663 = vmatmul.mubr.msk.bf16.gmra.mxu1 %vm3721_vm12, %v15434_v23  ;;  %14638 = vmatprep.mubr.msk.bf16.mxu0 %vm15671_vm11, %v21599_v38 }
 0x44b   : > { %6096 = vmatprep.mubr.bf16.mxu1 %v21600_v59 }
 0x451   : > { %14639 = vmatmul.mubr.msk.bf16.gmra.mxu0 %vm3721_vm12, %v15435_v16 }
 0x452   : > { %13664 = vmatmul.mubr.msk.bf16.gmra.mxu1 %vm3721_vm12, %v15435_v16 }
 0x501   : > { %v6139_v63 = vpop.f32.mrf.mxu0 }
 0x502   : > { %v6140_v61 = vadd.f32 %v6139_v63, %v5989_v24  ;;  %v6078_v15 = vpop.f32.mrf.mxu1 }
 0x503   : > { %v6079_v39 = vadd.f32 %v6078_v15, %v5989_v24  ;;  %v14632_v29 = vpop.f32.mrf.mxu0 }
 0x504   : > { %vm6163_vm6 = vcmp.ge.f32.partialorder %v6140_v61, 0.0  ;;  %v6178_v17 = vmul.f32 %v6140_v61, %v17644_v7  ;;  %v6080_v27 = vpop.f32.mrf.mxu1 }
 0x505   : > { %vm6161_vm2 = vcmp.ge.f32.partialorder %v6079_v39, 0.0  ;;  %v6176_v40 = vmul.f32 %v6079_v39, %v17644_v7  ;;  %v6081_v57 = vadd.f32 %v6080_v27, %v5989_v24  ;;  %v6142_v35 = vpop.f32.mrf.mxu0 }
 0x506   : > { %v17833_v41 = vsel %vm6163_vm6, %v6140_v61, %v6178_v17   ;;  %v6143_v13 = vadd.f32 %v6142_v35, %v5994_v32  ;;  %v6082_v55 = vpop.f32.mrf.mxu1 }
 0x507   : > { %v17835_v25 = vsel %vm6161_vm2, %v6079_v39, %v6176_v40   ;;  %vm6162_vm3 = vcmp.ge.f32.partialorder %v6081_v57, 0.0  ;;  %v6177_v19 = vmul.f32 %v6081_v57, %v17644_v7  ;;  %v6083_v12 = vadd.f32 %v6082_v55, %v5994_v32  ;;  %v14633_v2 = vpop.f32.mrf.mxu0 }
 0x508   : > { %vm6166_vm7 = vcmp.ge.f32.partialorder %v6143_v13, 0.0  ;;  %v6181_v34 = vmul.f32 %v6143_v13, %v17644_v7  ;;  %v6084_v58 = vpop.f32.mrf.mxu1 }
 0x509   : > { %v17839_v46 = vsel %vm6162_vm3, %v6081_v57, %v6177_v19   ;;  %vm6164_vm15 = vcmp.ge.f32.partialorder %v6083_v12, 0.0  ;;  %v6179_v51 = vmul.f32 %v6083_v12, %v17644_v7  ;;  %v6085_v5 = vadd.f32 %v6084_v58, %v5994_v32  ;;  %v6147_v9 = vpop.f32.mrf.mxu0 }
 0x50a   : > { %v17842_v45 = vsel %vm6166_vm7, %v6143_v13, %v6181_v34   ;;  %v6148_v60 = vadd.f32 %v6147_v9, %v5999_v48  ;;  %v6088_v56 = vpop.f32.mrf.mxu1 }
 0x50b   : > { %v17844_v30 = vsel %vm6164_vm15, %v6083_v12, %v6179_v51   ;;  %vm6165_vm10 = vcmp.ge.f32.partialorder %v6085_v5, 0.0  ;;  %v6180_v33 = vmul.f32 %v6085_v5, %v17644_v7  ;;  %v6089_v0 = vadd.f32 %v6088_v56, %v5999_v48  ;;  %v14636_v47 = vpop.f32.mrf.mxu0 }
 0x50c   : > { %vm6169_vm13 = vcmp.ge.f32.partialorder %v6148_v60, 0.0  ;;  %v6184_v14 = vmul.f32 %v6148_v60, %v17644_v7  ;;  %v6090_v6 = vpop.f32.mrf.mxu1 }
 0x50d   : > { %v6195_v62 = vsel %vm6165_vm10, %v6085_v5, %v6180_v33   ;;  %vm6167_vm14 = vcmp.ge.f32.partialorder %v6089_v0, 0.0  ;;  %v6182_v4 = vmul.f32 %v6089_v0, %v17644_v7  ;;  %v6091_v37 = vadd.f32 %v6090_v6, %v5999_v48  ;;  %v6150_v11 = vpop.f32.mrf.mxu0 }
 0x50e   : > { %v6199_v21 = vsel %vm6169_vm13, %v6148_v60, %v6184_v14   ;;  %v6151_v1 = vadd.f32 %v6150_v11, %v6004_v22  ;;  %v6092_v53 = vpop.f32.mrf.mxu1 }
 0x50f   : > { %v6197_v50 = vsel %vm6167_vm14, %v6089_v0, %v6182_v4   ;;  %vm6168_vm0 = vcmp.ge.f32.partialorder %v6091_v37, 0.0  ;;  %v6183_v54 = vmul.f32 %v6091_v37, %v17644_v7  ;;  %v6093_v8 = vadd.f32 %v6092_v53, %v6004_v22  ;;  %v14637_v52 = vpop.f32.mrf.mxu0 }
 0x510   : > { %vm6172_vm6 = vcmp.ge.f32.partialorder %v6151_v1, 0.0  ;;  %v6187_v10 = vmul.f32 %v6151_v1, %v17644_v7  ;;  %v6094_v31 = vpop.f32.mrf.mxu1 }
 0x511   : > { %v6198_v18 = vsel %vm6168_vm0, %v6091_v37, %v6183_v54   ;;  %vm6170_vm2 = vcmp.ge.f32.partialorder %v6093_v8, 0.0  ;;  %v6185_v43 = vmul.f32 %v6093_v8, %v17644_v7  ;;  %v6095_v20 = vadd.f32 %v6094_v31, %v6004_v22  ;;  %v6155_v49 = vpop.f32.mrf.mxu0 }
 0x512   : > { %v6202_v36 = vsel %vm6172_vm6, %v6151_v1, %v6187_v10   ;;  %v6156_v26 = vadd.f32 %v6155_v49, %v6009_v44  ;;  %v6098_v28 = vpop.f32.mrf.mxu1 }
 0x513   : > { %v6200_v38 = vsel %vm6170_vm2, %v6093_v8, %v6185_v43   ;;  %vm6171_vm3 = vcmp.ge.f32.partialorder %v6095_v20, 0.0  ;;  %v6186_v3 = vmul.f32 %v6095_v20, %v17644_v7  ;;  %v6099_v42 = vadd.f32 %v6098_v28, %v6009_v44  ;;  %v14640_v59 = vpop.f32.mrf.mxu0 }
 0x514   : > { %vm6175_vm7 = vcmp.ge.f32.partialorder %v6156_v26, 0.0  ;;  %v6190_v23 = vmul.f32 %v6156_v26, %v17644_v7  ;;  %v6100_v16 = vpop.f32.mrf.mxu1 }
 0x515   : > { %v6201_v24 = vsel %vm6171_vm3, %v6095_v20, %v6186_v3   ;;  %vm6173_vm15 = vcmp.ge.f32.partialorder %v6099_v42, 0.0  ;;  %v6188_v63 = vmul.f32 %v6099_v42, %v17644_v7  ;;  %v6101_v61 = vadd.f32 %v6100_v16, %v6009_v44  ;;  %v6158_v15 = vpop.f32.mrf.mxu0 }
 0x516   : > { %v6205_v39 = vsel %vm6175_vm7, %v6156_v26, %v6190_v23   ;;  %v6102_v29 = vpop.f32.mrf.mxu1 }
 0x517   : > { %v6203_v17 = vsel %vm6173_vm15, %v6099_v42, %v6188_v63   ;;  %vm6174_vm10 = vcmp.ge.f32.partialorder %v6101_v61, 0.0  ;;  %v6189_v27 = vmul.f32 %v6101_v61, %v17644_v7  ;;  %v14641_v32 = vpop.f32.mrf.mxu0 }
 0x518   : > { %v6103_v40 = vpop.f32.mrf.mxu1 }
 0x519   : > { %v6204_v57 = vsel %vm6174_vm10, %v6101_v61, %v6189_v27  }
 0x51a LB: >> { %v6228_v35 = vlaneseq  ;;  %v21601_v2 = vld [vmem:[#allocation6_spill] sm:$0xff]  ;;  %s15672_s15 = smov 50   ;;  %vm6356_vm13 = vcmask 1047556   ;;  %vm21602_vm1 = vcmask 1043856   ;;  %vm6359_vm0 = vcmask 408580   ;;  %s15673_s14 = smov 102   ;;  %s15642_s21 = sphi %s17891_s21, %s6211_s21   ;;  %v15638_v25 = vphi %v17835_v25, %v21730_v25   ;;  %v15634_v46 = vphi %v17839_v46, %v21729_v46   ;;  %v15630_v41 = vphi %v17833_v41, %v21728_v41   ;;  %v15626_v30 = vphi %v17844_v30, %v21727_v30   ;;  %v15622_v62 = vphi %v6195_v62, %v21726_v62   ;;  %v15618_v45 = vphi %v17842_v45, %v21725_v45   ;;  %v15614_v50 = vphi %v6197_v50, %v21724_v50   ;;  %v15610_v18 = vphi %v6198_v18, %v21723_v18   ;;  %v15606_v21 = vphi %v6199_v21, %v21722_v21   ;;  %v15602_v38 = vphi %v6200_v38, %v21721_v38   ;;  %v15598_v24 = vphi %v6201_v24, %v21720_v24   ;;  %v15594_v36 = vphi %v6202_v36, %v21719_v36   ;;  %v15590_v17 = vphi %v6203_v17, %v21718_v17   ;;  %v15586_v57 = vphi %v6204_v57, %v21717_v57   ;;  %v15582_v39 = vphi %v6205_v39, %v21716_v39  }
 0x51b   : >> { %vm17936_vm14 = vmor %vm6356_vm13, %vm21602_vm1  ;;  %s14039_s17 = smul.u32 180, %s15642_s21  ;;  %vm15675_vm2 = vmmov 0   ;;  %s15679_s16 = smov 79   ;;  %vm21610_vm3 = vcmask 834560   ;;  %vm21613_vm10 = vcmask 1041408  }
 0x51c   : >> { %v6229_v13 = vshrl.u32 %v6228_v35, 7  ;;  %vm17947_vm6 = vmor %vm6359_vm0, %vm487_vm8  ;;  %s15680_s20 = smov 78  }
 0x51d   : >> { %vm21611_vm7 = vmmov %vm21610_vm3 }
 0x51e   : >> { %v6230_v55 = vsub.s32 0, %v6229_v13  ;;  %v6234_v19 = vsub.s32 1, %v6229_v13  ;;  %v6238_v12 = vsub.s32 2, %v6229_v13  ;;  %vm21612_vm15 = vmmov %vm21610_vm3 }
 0x51f   : >> { %vm21614_vm13 = vmmov %vm21613_vm10 }
 0x520   : >> { %v17912_v34 = vrot.slane %v21601_v2, %v6230_v55  ;;  %v17915_v58 = vrot.slane %v21601_v2, %v6234_v19  ;;  %v17918_v48 = vrot.slane %v21601_v2, %v6238_v12  ;;  %vm21615_vm0 = vmmov %vm21613_vm10 }
 0x522   : >> { %v6249_v51 = vmul.f32 %v15614_v50, %v17912_v34  ;;  %v6250_v5 = vmul.f32 %v15610_v18, %v17915_v58  ;;  %v6255_v9 = vmul.f32 %v15590_v17, %v17912_v34  ;;  %v6256_v60 = vmul.f32 %v15586_v57, %v17915_v58 }
 0x523   : >> { %v6251_v56 = vmul.f32 %v15606_v21, %v17918_v48  ;;  %v6257_v33 = vmul.f32 %v15582_v39, %v17918_v48  ;;  %v6254_v14 = vmul.f32 %v15594_v36, %v17918_v48  ;;  %v6252_v6 = vmul.f32 %v15602_v38, %v17912_v34 }
 0x524   : >> { %v14033_v0 = vpack.c.bf16 %v6250_v5, %v6249_v51  ;;  %v14037_v47 = vpack.c.bf16 %v6256_v60, %v6255_v9  ;;  %v6253_v37 = vmul.f32 %v15598_v24, %v17915_v58  ;;  %v6245_v1 = vmul.f32 %v15630_v41, %v17918_v48 }
 0x525   : >> { %v14034_v22 = vpack.c.bf16 %v6251_v56, %v6251_v56  ;;  %v14038_v4 = vpack.c.bf16 %v6257_v33, %v6257_v33  ;;  %v14036_v11 = vpack.c.bf16 %v6254_v14, %v6254_v14  ;;  %v6243_v53 = vmul.f32 %v15638_v25, %v17912_v34 }
 0x526   : >> { %6309 = vrot.lane.b32.xlu1 %v14033_v0, %s15672_s15  ;;  %6317 = vrot.lane.b32.xlu0 %v14037_v47, %s15672_s15  ;;  %v14035_v21 = vpack.c.bf16 %v6253_v37, %v6252_v6  ;;  %v6244_v50 = vmul.f32 %v15634_v46, %v17915_v58  ;;  %v14030_v54 = vpack.c.bf16 %v6245_v1, %v6245_v1  ;;  %v15674_v5 = vmov 0.0  }
 0x527   : >> { %v6248_v8 = vmul.f32 %v15618_v45, %v17918_v48  ;;  %v6246_v10 = vmul.f32 %v15626_v30, %v17912_v34  ;;  %v6247_v31 = vmul.f32 %v15622_v62, %v17915_v58  ;;  %14642 = vmatprep.subr.bf16.mxu1 %v15674_v5  ;;  %14648 = vmatprep.mubr.msk.bf16.mxu1 %vm15675_vm2, %v15674_v5 }
 0x528   : >> { %v14029_v52 = vpack.c.bf16 %v6244_v50, %v6243_v53 }
 0x529   : >> { %v14032_v41 = vpack.c.bf16 %v6248_v8, %v6248_v8  ;;  %v14031_v44 = vpack.c.bf16 %v6247_v31, %v6246_v10 }
 0x52a   : >> { %6311 = vrot.lane.b32.xlu1 %v14034_v22, %s15672_s15  ;;  %6319 = vrot.lane.b32.xlu0 %v14038_v4, %s15672_s15 }
 0x52e   : >> { %6315 = vrot.lane.b32.xlu1 %v14036_v11, %s15672_s15  ;;  %6313 = vrot.lane.b32.xlu0 %v14035_v21, %s15672_s15 }
 0x532   : >> { %6303 = vrot.lane.b32.xlu1 %v14030_v54, %s15672_s15  ;;  %6301 = vrot.lane.b32.xlu0 %v14029_v52, %s15672_s15 }
 0x536   : >> { %6307 = vrot.lane.b32.xlu1 %v14032_v41, %s15672_s15  ;;  %6305 = vrot.lane.b32.xlu0 %v14031_v44, %s15672_s15  ;;  %s18007_s15 = scalar_lea.vmem %s21437_s7, %s14039_s17  ;;  %v15676_v44 = vmov 0   ;;  %s15677_s17 = smov 103  }
 0x537   : >> { %6543 = vmatprep.mubr.bf16.mxu0 %v15676_v44  ;;  %15436 = vset.pattern.permute.xlu0 %v15676_v44 }
 0x538   : >> { %15437 = vset.pattern.permute.xlu1 %v15676_v44 }
 0x598   : >> { %v6310_v25 = vpop.permute.xlu1 %6309  ;;  %v6318_v18 = vpop.permute.xlu0 %6317 }
 0x599   : >> { %v6325_v45 = vrot.slane %v6310_v25, 4  ;;  %v6329_v20 = vrot.slane %v6318_v18, 4 }
 0x59b   : >> { %v6337_v30 = vsel %vm485_vm4, %v6325_v45, %v6310_v25  ;;  %v6343_v62 = vsel %vm485_vm4, %v6329_v20, %v6318_v18 }
 0x59c   : >> { %6364 = vst.msk [vmem:[#allocation2 + $0x20] sm:$0xff] %vm17936_vm14, %v6337_v30  ;;  %v6312_v36 = vpop.permute.xlu1 %6311  ;;  %v6320_v26 = vpop.permute.xlu0 %6319 }
 0x59d   : >> { %6368 = vst.msk [vmem:[#allocation2 + $0x40] sm:$0x33] %vm15801_vm5, %v6343_v62  ;;  %v6326_v28 = vrot.slane %v6312_v36, 4  ;;  %v6330_v38 = vrot.slane %v6320_v26, 4 }
 0x59f   : >> { %v6338_v42 = vsel %vm487_vm8, %v6325_v45, %v6326_v28  ;;  %v6344_v59 = vsel %vm487_vm8, %v6329_v20, %v6330_v38 }
 0x5a0   : >> { %v6339_v23 = vsel %vm485_vm4, %v6338_v42, %v6312_v36  ;;  %v6345_v16 = vsel %vm485_vm4, %v6344_v59, %v6320_v26  ;;  %v6316_v24 = vpop.permute.xlu1 %6315  ;;  %v6314_v63 = vpop.permute.xlu0 %6313 }
 0x5a1   : >> { %6365 = vst.msk [vmem:[#allocation2 + $0x28] sm:$0xff] %vm17947_vm6, %v6339_v23  ;;  %v6328_v15 = vrot.slane %v6316_v24, 4  ;;  %v6327_v39 = vrot.slane %v6314_v63, 4 }
 0x5a2   : >> { %6369 = vst.msk [vmem:[#allocation2 + $0x48] sm:$0x33] %vm15809_vm9, %v6345_v16 }
 0x5a3   : >> { %v6340_v17 = vsel %vm485_vm4, %v6327_v39, %v6314_v63  ;;  %v6341_v27 = vsel %vm487_vm8, %v6327_v39, %v6328_v15  ;;  %v6383_v6 = vld [vmem:[#allocation2 + $0x20] sm:$0xff] }
 0x5a4   : >> { %v6387_v29 = vld [vmem:[#allocation2 + $0x40] sm:$0x33]  ;;  %v6342_v57 = vsel %vm485_vm4, %v6341_v27, %v6316_v24  ;;  %6366 = vst.msk [vmem:[#allocation2 + $0x30] sm:$0xff] %vm17936_vm14, %v6340_v17  ;;  %v6304_v35 = vpop.permute.xlu1 %6303  ;;  %v6302_v13 = vpop.permute.xlu0 %6301 }
 0x5a5   : >> { %v17961_v32 = vcombine.low %v6387_v29, %v6387_v29  ;;  %v17963_v40 = vcombine.high %v6387_v29, %v6387_v29  ;;  %6367 = vst.msk [vmem:[#allocation2 + $0x38] sm:$0xff] %vm17947_vm6, %v6342_v57  ;;  %v6322_v55 = vrot.slane %v6304_v35, 4  ;;  %v6321_v19 = vrot.slane %v6302_v13, 4 }
 0x5a7   : >> { %6471 = vrot.lane.b32.xlu1 %v17963_v40, %s15673_s14  ;;  %6469 = vrot.lane.b32.xlu0 %v17961_v32, %s15673_s14  ;;  %v6331_v12 = vsel %vm485_vm4, %v6321_v19, %v6302_v13  ;;  %v6332_v51 = vsel %vm487_vm8, %v6321_v19, %v6322_v55  ;;  %v15442_v13 = vld [vmem:[%s18007_s15 + $0x14] sm:$0xff]  }
 0x5a8   : >> { %v6333_v60 = vsel %vm485_vm4, %v6332_v51, %v6304_v35  ;;  %6358 = vst.msk [vmem:[#allocation2] sm:$0xff] %vm17936_vm14, %v6331_v12  ;;  %v6308_v56 = vpop.permute.xlu1 %6307  ;;  %v6306_v33 = vpop.permute.xlu0 %6305  ;;  %v6384_v11 = vld [vmem:[#allocation2 + $0x28] sm:$0xff] }
 0x5a9   : >> { %v6388_v9 = vld [vmem:[#allocation2 + $0x48] sm:$0x33]  ;;  %6361 = vst.msk [vmem:[#allocation2 + $0x8] sm:$0xff] %vm17947_vm6, %v6333_v60  ;;  %v6324_v47 = vrot.slane %v6308_v56, 4  ;;  %v6323_v14 = vrot.slane %v6306_v33, 4  ;;  %v15443_v60 = vld [vmem:[%s18007_s15 + $0x1c] sm:$0xff]  }
 0x5aa   : >> { %v17980_v0 = vcombine.high %v6388_v9, %v6388_v9  ;;  %v18002_v54 = vcombine.low %v6388_v9, %v6388_v9 }
 0x5ab   : >> { %v6385_v22 = vld [vmem:[#allocation2 + $0x30] sm:$0xff]  ;;  %v6334_v4 = vsel %vm485_vm4, %v6323_v14, %v6306_v33  ;;  %v6335_v37 = vsel %vm487_vm8, %v6323_v14, %v6324_v47 }
 0x5ac   : >> { %6475 = vrot.lane.b32.xlu1 %v17980_v0, %s15673_s14  ;;  %v6386_v1 = vld [vmem:[#allocation2 + $0x38] sm:$0xff]  ;;  %v17988_v21 = vcombine.high %v6383_v6, %v6385_v22  ;;  %v6336_v53 = vsel %vm485_vm4, %v6335_v37, %v6308_v56  ;;  %6362 = vst.msk [vmem:[#allocation2 + $0x10] sm:$0xff] %vm17936_vm14, %v6334_v4  ;;  %v18017_v31 = vcombine.low %v6383_v6, %v6385_v22 }
 0x5ad   : >> { %6363 = vst.msk [vmem:[#allocation2 + $0x18] sm:$0xff] %vm17947_vm6, %v6336_v53  ;;  %v17995_v50 = vcombine.low %v6384_v11, %v6386_v1  ;;  %v18009_v8 = vcombine.high %v6384_v11, %v6386_v1  ;;  %v15444_v53 = vld [vmem:[%s18007_s15 + $0x24] ss:$0 sps:$4 sm:$0x33]  }
 0x5ae   : >> { %6463 = vrot.lane.b32.xlu0 %v17988_v21, %s15673_s14 }
 0x5af   : >> { %v6379_v18 = vld [vmem:[#allocation2] sm:$0xff] }
 0x5b0   : >> { %6465 = vrot.lane.b32.xlu1 %v17995_v50, %s15673_s14  ;;  %v6380_v52 = vld [vmem:[#allocation2 + $0x8] sm:$0xff] }
 0x5b2   : >> { %6473 = vrot.lane.b32.xlu0 %v18002_v54, %s15673_s14 }
 0x5b3   : >> { %v6381_v10 = vld [vmem:[#allocation2 + $0x10] sm:$0xff] }
 0x5b4   : >> { %6467 = vrot.lane.b32.xlu1 %v18009_v8, %s15673_s14  ;;  %v6382_v41 = vld [vmem:[#allocation2 + $0x18] sm:$0xff]  ;;  %v18028_v46 = vcombine.high %v6379_v18, %v6381_v10  ;;  %v18036_v20 = vcombine.low %v6379_v18, %v6381_v10 }
 0x5b5   : >> { %v18021_v25 = vcombine.low %v6380_v52, %v6382_v41  ;;  %v18030_v45 = vcombine.high %v6380_v52, %v6382_v41 }
 0x5b6   : >> { %6461 = vrot.lane.b32.xlu0 %v18017_v31, %s15673_s14 }
 0x5b8   : >> { %6457 = vrot.lane.b32.xlu1 %v18021_v25, %s15673_s14 }
 0x5ba   : >> { %6455 = vrot.lane.b32.xlu0 %v18028_v46, %s15673_s14 }
 0x5bc   : >> { %6459 = vrot.lane.b32.xlu1 %v18030_v45, %s15673_s14 }
 0x5be   : >> { %6453 = vrot.lane.b32.xlu0 %v18036_v20, %s15673_s14  ;;  %s15678_s14 = smov 101  }
 0x5c0   : >> { %6659 = vrot.lane.b32.xlu1 %v17963_v40, %s15677_s17 }
 0x5c2   : >> { %6657 = vrot.lane.b32.xlu0 %v17961_v32, %s15677_s17 }
 0x5c4   : >> { %6663 = vrot.lane.b32.xlu1 %v17980_v0, %s15677_s17 }
 0x5c6   : >> { %6651 = vrot.lane.b32.xlu0 %v17988_v21, %s15677_s17 }
 0x5c8   : >> { %6653 = vrot.lane.b32.xlu1 %v17995_v50, %s15677_s17 }
 0x5ca   : >> { %6661 = vrot.lane.b32.xlu0 %v18002_v54, %s15677_s17 }
 0x5cc   : >> { %6655 = vrot.lane.b32.xlu1 %v18009_v8, %s15677_s17 }
 0x5ce   : >> { %6649 = vrot.lane.b32.xlu0 %v18017_v31, %s15677_s17 }
 0x5d0   : >> { %6645 = vrot.lane.b32.xlu1 %v18021_v25, %s15677_s17 }
 0x5d2   : >> { %6643 = vrot.lane.b32.xlu0 %v18028_v46, %s15677_s17 }
 0x5d4   : >> { %6647 = vrot.lane.b32.xlu1 %v18030_v45, %s15677_s17 }
 0x5d6   : >> { %6641 = vrot.lane.b32.xlu0 %v18036_v20, %s15677_s17  ;;  %s15681_s17 = smov 77  }
 0x5d8   : >> { %6855 = vrot.lane.b32.xlu1 %v17963_v40, %s15678_s14 }
 0x5da   : >> { %6853 = vrot.lane.b32.xlu0 %v17961_v32, %s15678_s14 }
 0x5dc   : >> { %6859 = vrot.lane.b32.xlu1 %v17980_v0, %s15678_s14 }
 0x5de   : >> { %6847 = vrot.lane.b32.xlu0 %v17988_v21, %s15678_s14 }
 0x5e0   : >> { %6849 = vrot.lane.b32.xlu1 %v17995_v50, %s15678_s14 }
 0x5e2   : >> { %6857 = vrot.lane.b32.xlu0 %v18002_v54, %s15678_s14 }
 0x5e4   : >> { %6851 = vrot.lane.b32.xlu1 %v18009_v8, %s15678_s14 }
 0x5e6   : >> { %6845 = vrot.lane.b32.xlu0 %v18017_v31, %s15678_s14 }
 0x5e8   : >> { %6841 = vrot.lane.b32.xlu1 %v18021_v25, %s15678_s14 }
 0x5ea   : >> { %6839 = vrot.lane.b32.xlu0 %v18028_v46, %s15678_s14 }
 0x5ec   : >> { %6843 = vrot.lane.b32.xlu1 %v18030_v45, %s15678_s14 }
 0x5ee   : >> { %6837 = vrot.lane.b32.xlu0 %v18036_v20, %s15678_s14  ;;  %s15682_s14 = smov 55  }
 0x5f0   : >> { %7066 = vrot.lane.b32.xlu1 %v17963_v40, %s15679_s16 }
 0x5f2   : >> { %7064 = vrot.lane.b32.xlu0 %v17961_v32, %s15679_s16 }
 0x5f4   : >> { %7070 = vrot.lane.b32.xlu1 %v17980_v0, %s15679_s16 }
 0x5f6   : >> { %7058 = vrot.lane.b32.xlu0 %v17988_v21, %s15679_s16 }
 0x5f8   : >> { %7060 = vrot.lane.b32.xlu1 %v17995_v50, %s15679_s16 }
 0x5fa   : >> { %7068 = vrot.lane.b32.xlu0 %v18002_v54, %s15679_s16 }
 0x5fc   : >> { %7062 = vrot.lane.b32.xlu1 %v18009_v8, %s15679_s16 }
 0x5fe   : >> { %7056 = vrot.lane.b32.xlu0 %v18017_v31, %s15679_s16 }
 0x600   : >> { %7052 = vrot.lane.b32.xlu1 %v18021_v25, %s15679_s16 }
 0x602   : >> { %7050 = vrot.lane.b32.xlu0 %v18028_v46, %s15679_s16 }
 0x604   : >> { %7054 = vrot.lane.b32.xlu1 %v18030_v45, %s15679_s16 }
 0x606   : >> { %7048 = vrot.lane.b32.xlu0 %v18036_v20, %s15679_s16  ;;  %s15683_s16 = smov 54  }
 0x608   : >> { %7277 = vrot.lane.b32.xlu1 %v17963_v40, %s15680_s20 }
 0x60a   : >> { %7275 = vrot.lane.b32.xlu0 %v17961_v32, %s15680_s20 }
 0x60c   : >> { %7281 = vrot.lane.b32.xlu1 %v17980_v0, %s15680_s20 }
 0x60e   : >> { %7269 = vrot.lane.b32.xlu0 %v17988_v21, %s15680_s20 }
 0x610   : >> { %7271 = vrot.lane.b32.xlu1 %v17995_v50, %s15680_s20 }
 0x612   : >> { %7279 = vrot.lane.b32.xlu0 %v18002_v54, %s15680_s20 }
 0x614   : >> { %7273 = vrot.lane.b32.xlu1 %v18009_v8, %s15680_s20 }
 0x616   : >> { %7267 = vrot.lane.b32.xlu0 %v18017_v31, %s15680_s20 }
 0x618   : >> { %7263 = vrot.lane.b32.xlu1 %v18021_v25, %s15680_s20 }
 0x619   : >> { %v6472_v30 = vpop.permute.xlu1 %6471  ;;  %v6470_v62 = vpop.permute.xlu0 %6469 }
 0x61a   : >> { %7261 = vrot.lane.b32.xlu0 %v18028_v46, %s15680_s20  ;;  %v6483_v28 = vsel %vm21610_vm3, %v6470_v62, %v6472_v30 }
 0x61b   : >> { %v6503_v16 = vsel %vm21614_vm13, %v6483_v28, 0  ;;  %vm21619_vm13 = vmmov %vm21610_vm3 }
 0x61c   : >> { %7265 = vrot.lane.b32.xlu1 %v18030_v45, %s15680_s20 }
 0x61e   : >> { %v6476_v49 = vpop.permute.xlu1 %6475  ;;  %7259 = vrot.lane.b32.xlu0 %v18036_v20, %s15680_s20  ;;  %s15684_s20 = smov 53  }
 0x620   : >> { %7488 = vrot.lane.b32.xlu1 %v17963_v40, %s15681_s17  ;;  %v6464_v36 = vpop.permute.xlu0 %6463 }
 0x622   : >> { %v6466_v26 = vpop.permute.xlu1 %6465  ;;  %7486 = vrot.lane.b32.xlu0 %v17961_v32, %s15681_s17 }
 0x623   : >> { %v6481_v63 = vsel %vm21610_vm3, %v6464_v36, %v6466_v26 }
 0x624   : >> { %7492 = vrot.lane.b32.xlu1 %v17980_v0, %s15681_s17  ;;  %v6474_v38 = vpop.permute.xlu0 %6473 }
 0x625   : >> { %v6484_v59 = vsel %vm21611_vm7, %v6472_v30, %v6474_v38  ;;  %v6485_v23 = vsel %vm21612_vm15, %v6474_v38, %v6476_v49  ;;  %vm21616_vm7 = vmmov %vm21610_vm3 }
 0x626   : >> { %v6468_v42 = vpop.permute.xlu1 %6467  ;;  %7490 = vrot.lane.b32.xlu0 %v18002_v54, %s15681_s17  ;;  %13701 = vmatprep.subr.msk.bf16.mxu0 %vm21613_vm10, %v6484_v59  ;;  %v6509_v24 = vsel %vm21615_vm0, %v6485_v23, 0  ;;  %vm21617_vm15 = vmmov %vm21610_vm3  ;;  %vm6492_vm0 = vcmask 293888  }
 0x627   : >> { %6522 = vmatpush1.bf16.msra.mxu0 %v6503_v16  ;;  %14643 = vmatpush3.bf16.msra.mxu1 %v6509_v24  ;;  %v6482_v29 = vsel %vm21617_vm15, %v6466_v26, %v6468_v42  ;;  %vm21618_vm10 = vmmov %vm21610_vm3  ;;  %v15445_v26 = vld [vmem:[%s18007_s15] sm:$0xff]   ;;  %v15446_v16 = vld [vmem:[%s18007_s15 + $0x8] sm:$0xff]  }
 0x628   : >> { %7482 = vrot.lane.b32.xlu1 %v17995_v50, %s15681_s17  ;;  %6523 = vmatprep.subr.bf16.mxu0 %v6481_v63  ;;  %v6462_v61 = vpop.permute.xlu0 %6461 }
 0x629   : >> { %14644 = vmatprep.subr.bf16.mxu1 %v15674_v5  ;;  %v6480_v39 = vsel %vm21616_vm7, %v6462_v61, %v6464_v36  ;;  %vm21620_vm7 = vcmask 842752  }
 0x62a   : >> { %v6458_v15 = vpop.permute.xlu1 %6457  ;;  %7480 = vrot.lane.b32.xlu0 %v17988_v21, %s15681_s17  ;;  %vm21621_vm15 = vmmov %vm21620_vm7 }
 0x62b   : >> { %6524 = vmatpush1.bf16.msra.mxu0 %v6480_v39  ;;  %14645 = vmatpush3.bf16.msra.mxu1 %v6482_v29 }
 0x62c   : >> { %7484 = vrot.lane.b32.xlu1 %v18009_v8, %s15681_s17  ;;  %v6456_v17 = vpop.permute.xlu0 %6455  ;;  %14646 = vmatprep.subr.bf16.mxu1 %v15674_v5 }
 0x62d   : >> { %v6478_v57 = vsel %vm21618_vm10, %v6456_v17, %v6458_v15  ;;  %vm21622_vm10 = vmmov %vm21620_vm7 }
 0x62e   : >> { %v6460_v27 = vpop.permute.xlu1 %6459  ;;  %7478 = vrot.lane.b32.xlu0 %v18017_v31, %s15681_s17  ;;  %6525 = vmatprep.subr.bf16.mxu0 %v6478_v57  ;;  %vm21626_vm1 = vmmov %vm21622_vm10 }
 0x62f   : >> { %v6479_v35 = vsel %vm21619_vm13, %v6458_v15, %v6460_v27  ;;  %vm21623_vm13 = vcmask 1041408  }
 0x630   : >> { %7474 = vrot.lane.b32.xlu1 %v18021_v25, %s15681_s17  ;;  %14647 = vmatpush3.bf16.msra.mxu1 %v6479_v35  ;;  %v6454_v55 = vpop.permute.xlu0 %6453 }
 0x631   : >> { %v6477_v12 = vsel %vm21610_vm3, %v6454_v55, %v6456_v17  ;;  %14660 = vmatprep.subr.bf16.mxu1 %v15674_v5  ;;  %vm21624_vm3 = vmmov %vm21623_vm13 }
 0x632   : >> { %v6660_v19 = vpop.permute.xlu1 %6659  ;;  %7472 = vrot.lane.b32.xlu0 %v18028_v46, %s15681_s17  ;;  %6526 = vmatpush1.bf16.msra.mxu0 %v6477_v12 }
 0x633   : >> { %14649 = vmatmul.mubr.msk.bf16.vlgmr.msra.gmra.mxu1 %vm6492_vm0, %v15442_v13 }
 0x634   : >> { %7476 = vrot.lane.b32.xlu1 %v18030_v45, %s15681_s17  ;;  %v6658_v51 = vpop.permute.xlu0 %6657  ;;  %14652 = vmatprep.mubr.msk.bf16.mxu1 %vm15675_vm2, %v15674_v5 }
 0x635   : >> { %13702 = vmatmul.mubr.msk.bf16.vlgmr.msra.gmra.mxu0 %vm6492_vm0, %v15442_v13  ;;  %v6671_v47 = vsel %vm21620_vm7, %v6658_v51, %v6660_v19  ;;  %vm21625_vm7 = vmmov %vm21624_vm3  ;;  %v15447_v13 = vld [vmem:[%s18007_s15 + $0x10] ss:$0 sps:$4 sm:$0x33]  }
 0x636   : >> { %v6664_v9 = vpop.permute.xlu1 %6663  ;;  %7470 = vrot.lane.b32.xlu0 %v18036_v20, %s15681_s17  ;;  %6553 = vmatprep.mubr.bf16.mxu0 %v15676_v44  ;;  %v6690_v37 = vsel %vm21623_vm13, %v6671_v47, 0  ;;  %vm21629_vm13 = vmmov %vm21626_vm1  ;;  %v15448_v47 = vld [vmem:[%s18007_s15 + $0x28] sm:$0xff]   ;;  %s8292_s17 = smul.u32 40, %s15642_s21  ;;  %s6211_s21 = sadd.s32 1, %s15642_s21  }
 0x637   : >> { %p18577_p4 = scmp.ge.s32.totalorder %s6211_s21, 8  }
 0x638   : >> { %7699 = vrot.lane.b32.xlu1 %v17963_v40, %s15682_s14  ;;  %v6652_v56 = vpop.permute.xlu0 %6651  ;;  %s21738_s28 = smov (%p18577_p4), 102   ;;  %s21739_s2 = smov (%p18577_p4), 101  }
 0x639   : > { %s22045_s21 = smov (%p18577_p4), 53  }
 0x63a   : >> { %v6654_v33 = vpop.permute.xlu1 %6653  ;;  %7697 = vrot.lane.b32.xlu0 %v17961_v32, %s15682_s14 }
 0x63b   : >> { %14653 = vmatmul.mubr.msk.bf16.gmra.mxu1 %vm6492_vm0, %v15443_v60  ;;  %v6669_v1 = vsel %vm21626_vm1, %v6652_v56, %v6654_v33 }
 0x63c   : >> { %7703 = vrot.lane.b32.xlu1 %v17980_v0, %s15682_s14  ;;  %v6662_v14 = vpop.permute.xlu0 %6661  ;;  %14656 = vmatprep.mubr.msk.bf16.mxu1 %vm15675_vm2, %v15674_v5 }
 0x63d   : >> { %v6673_v6 = vsel %vm21621_vm15, %v6662_v14, %v6664_v9  ;;  %13703 = vmatmul.mubr.msk.bf16.gmra.mxu0 %vm6492_vm0, %v15443_v60  ;;  %v6672_v4 = vsel %vm21622_vm10, %v6660_v19, %v6662_v14  ;;  %vm21627_vm15 = vmmov %vm21626_vm1 }
 0x63e   : >> { %v6656_v22 = vpop.permute.xlu1 %6655  ;;  %v6696_v11 = vsel %vm21624_vm3, %v6673_v6, 0  ;;  %7701 = vrot.lane.b32.xlu0 %v18002_v54, %s15682_s14  ;;  %13711 = vmatprep.subr.msk.bf16.mxu0 %vm21625_vm7, %v6672_v4  ;;  %vm21628_vm10 = vmmov %vm21626_vm1  ;;  %vm21631_vm7 = vcmask 826368  }
 0x63f   : >> { %6709 = vmatpush1.bf16.msra.mxu0 %v6690_v37  ;;  %14661 = vmatpush3.bf16.msra.mxu1 %v6696_v11  ;;  %v6670_v18 = vsel %vm21628_vm10, %v6654_v33, %v6656_v22  ;;  %vm21630_vm3 = vmmov %vm21626_vm1  ;;  %v15449_v11 = vld [vmem:[%s18007_s15 + $0x30] sm:$0xff]  }
 0x640   : >> { %7693 = vrot.lane.b32.xlu1 %v17995_v50, %s15682_s14  ;;  %6710 = vmatprep.subr.bf16.mxu0 %v6669_v1  ;;  %v6650_v52 = vpop.permute.xlu0 %6649  ;;  %vm21633_vm10 = vmmov %vm21631_vm7 }
 0x641   : >> { %v6668_v10 = vsel %vm21627_vm15, %v6650_v52, %v6652_v56  ;;  %14662 = vmatprep.subr.bf16.mxu1 %v15674_v5  ;;  %6563 = vmatprep.mubr.bf16.mxu0 %v15676_v44  ;;  %vm21632_vm15 = vmmov %vm21631_vm7 }
 0x642   : >> { %v6646_v41 = vpop.permute.xlu1 %6645  ;;  %7691 = vrot.lane.b32.xlu0 %v17988_v21, %s15682_s14 }
 0x643   : >> { %14657 = vmatmul.mubr.msk.bf16.gmra.mxu1 %vm6492_vm0, %v15444_v53  ;;  %6711 = vmatpush1.bf16.msra.mxu0 %v6668_v10 }
 0x644   : >> { %7695 = vrot.lane.b32.xlu1 %v18009_v8, %s15682_s14  ;;  %14663 = vmatpush3.bf16.msra.mxu1 %v6670_v18  ;;  %v6644_v30 = vpop.permute.xlu0 %6643 }
 0x645   : >> { %13704 = vmatmul.mubr.msk.bf16.gmra.mxu0 %vm6492_vm0, %v15444_v53  ;;  %v6666_v49 = vsel %vm21626_vm1, %v6644_v30, %v6646_v41  ;;  %14664 = vmatprep.subr.bf16.mxu1 %v15674_v5  ;;  %vm21634_vm1 = vcmask 1041408  }
 0x646   : >> { %v6648_v62 = vpop.permute.xlu1 %6647  ;;  %7689 = vrot.lane.b32.xlu0 %v18017_v31, %s15682_s14  ;;  %6712 = vmatprep.subr.bf16.mxu0 %v6666_v49 }
 0x647   : >> { %v6667_v36 = vsel %vm21629_vm13, %v6646_v41, %v6648_v62  ;;  %14666 = vmatprep.mubr.msk.bf16.mxu1 %vm15675_vm2, %v15674_v5  ;;  %6730 = vmatprep.mubr.bf16.mxu0 %v15676_v44  ;;  %vm21635_vm13 = vmmov %vm21634_vm1  ;;  %v15450_v62 = vld [vmem:[%s18007_s15 + $0x38] ss:$0 sps:$4 sm:$0x33]  }
 0x648   : >> { %7685 = vrot.lane.b32.xlu1 %v18021_v25, %s15682_s14  ;;  %14665 = vmatpush3.bf16.msra.mxu1 %v6667_v36  ;;  %v6642_v28 = vpop.permute.xlu0 %6641 }
 0x649   : >> { %v6665_v38 = vsel %vm21630_vm3, %v6642_v28, %v6644_v30  ;;  %14678 = vmatprep.subr.bf16.mxu1 %v15674_v5  ;;  %vm21636_vm3 = vmmov %vm21634_vm1 }
 0x64a   : >> { %v6856_v42 = vpop.permute.xlu1 %6855  ;;  %7683 = vrot.lane.b32.xlu0 %v18028_v46, %s15682_s14  ;;  %6713 = vmatpush1.bf16.msra.mxu0 %v6665_v38 }
 0x64b   : >> { %14667 = vmatmul.mubr.msk.bf16.vlgmr.msra.gmra.mxu1 %vm6492_vm0, %v15445_v26 }
 0x64c   : >> { %7687 = vrot.lane.b32.xlu1 %v18030_v45, %s15682_s14  ;;  %v6854_v59 = vpop.permute.xlu0 %6853  ;;  %14670 = vmatprep.mubr.msk.bf16.mxu1 %vm15675_vm2, %v15674_v5 }
 0x64d   : >> { %13712 = vmatmul.mubr.msk.bf16.vlgmr.msra.gmra.mxu0 %vm6492_vm0, %v15445_v26  ;;  %v6867_v61 = vsel %vm21631_vm7, %v6854_v59, %v6856_v42 }
 0x64e   : >> { %v6860_v23 = vpop.permute.xlu1 %6859  ;;  %7681 = vrot.lane.b32.xlu0 %v18036_v20, %s15682_s14  ;;  %6740 = vmatprep.mubr.bf16.mxu0 %v15676_v44  ;;  %v6886_v27 = vsel %vm21634_vm1, %v6867_v61, 0  ;;  %vm21639_vm1 = vmmov %vm21631_vm7  ;;  %s22197_s14 = smov (%p18577_p4), 31  }
 0x650   : >> { %7910 = vrot.lane.b32.xlu1 %v17963_v40, %s15683_s16  ;;  %v6848_v24 = vpop.permute.xlu0 %6847 }
 0x652   : >> { %v6850_v63 = vpop.permute.xlu1 %6849  ;;  %7908 = vrot.lane.b32.xlu0 %v17961_v32, %s15683_s16 }
 0x653   : >> { %14671 = vmatmul.mubr.msk.bf16.gmra.mxu1 %vm6492_vm0, %v15446_v16  ;;  %v6865_v35 = vsel %vm21631_vm7, %v6848_v24, %v6850_v63 }
 0x654   : >> { %7914 = vrot.lane.b32.xlu1 %v17980_v0, %s15683_s16  ;;  %v6858_v15 = vpop.permute.xlu0 %6857  ;;  %14674 = vmatprep.mubr.msk.bf16.mxu1 %vm15675_vm2, %v15674_v5 }
 0x655   : >> { %v6869_v39 = vsel %vm21632_vm15, %v6858_v15, %v6860_v23  ;;  %13713 = vmatmul.mubr.msk.bf16.gmra.mxu0 %vm6492_vm0, %v15446_v16  ;;  %v6868_v17 = vsel %vm21633_vm10, %v6856_v42, %v6858_v15  ;;  %vm21637_vm15 = vmmov %vm21631_vm7  ;;  %v15452_v16 = vld [vmem:[%s18007_s15 + $0x44] sm:$0xff]  }
 0x656   : >> { %v6852_v29 = vpop.permute.xlu1 %6851  ;;  %v6892_v57 = vsel %vm21635_vm13, %v6869_v39, 0  ;;  %7912 = vrot.lane.b32.xlu0 %v18002_v54, %s15683_s16  ;;  %13727 = vmatprep.subr.msk.bf16.mxu0 %vm21636_vm3, %v6868_v17  ;;  %vm21638_vm10 = vmmov %vm21631_vm7  ;;  %vm21642_vm7 = vcmask 646144  }
 0x657   : >> { %6905 = vmatpush1.bf16.msra.mxu0 %v6886_v27  ;;  %14679 = vmatpush3.bf16.msra.mxu1 %v6892_v57  ;;  %v6866_v51 = vsel %vm21638_vm10, %v6850_v63, %v6852_v29  ;;  %vm21640_vm13 = vmmov %vm21639_vm1  ;;  %v15453_v27 = vld [vmem:[%s18007_s15 + $0x4c] ss:$0 sps:$4 sm:$0x33]  }
 0x658   : >> { %7904 = vrot.lane.b32.xlu1 %v17995_v50, %s15683_s16  ;;  %6906 = vmatprep.subr.bf16.mxu0 %v6865_v35  ;;  %v6846_v55 = vpop.permute.xlu0 %6845  ;;  %vm21641_vm3 = vmmov %vm21639_vm1 }
 0x659   : >> { %v6864_v19 = vsel %vm21637_vm15, %v6846_v55, %v6848_v24  ;;  %14680 = vmatprep.subr.bf16.mxu1 %v15674_v5  ;;  %6750 = vmatprep.mubr.bf16.mxu0 %v15676_v44  ;;  %vm21643_vm15 = vmmov %vm21642_vm7 }
 0x65a   : >> { %v6842_v12 = vpop.permute.xlu1 %6841  ;;  %7902 = vrot.lane.b32.xlu0 %v17988_v21, %s15683_s16  ;;  %vm21644_vm10 = vmmov %vm21642_vm7 }
 0x65b   : >> { %14675 = vmatmul.mubr.msk.bf16.gmra.mxu1 %vm6492_vm0, %v15447_v13  ;;  %6907 = vmatpush1.bf16.msra.mxu0 %v6864_v19 }
 0x65c   : >> { %7906 = vrot.lane.b32.xlu1 %v18009_v8, %s15683_s16  ;;  %14681 = vmatpush3.bf16.msra.mxu1 %v6866_v51  ;;  %v6840_v9 = vpop.permute.xlu0 %6839 }
 0x65d   : >> { %13714 = vmatmul.mubr.msk.bf16.gmra.mxu0 %vm6492_vm0, %v15447_v13  ;;  %v6862_v56 = vsel %vm21639_vm1, %v6840_v9, %v6842_v12  ;;  %14682 = vmatprep.subr.bf16.mxu1 %v15674_v5  ;;  %vm21645_vm1 = vcmask 1041408  }
 0x65e   : >> { %v6844_v60 = vpop.permute.xlu1 %6843  ;;  %7900 = vrot.lane.b32.xlu0 %v18017_v31, %s15683_s16  ;;  %6908 = vmatprep.subr.bf16.mxu0 %v6862_v56 }
 0x65f   : >> { %v6863_v33 = vsel %vm21640_vm13, %v6842_v12, %v6844_v60  ;;  %14684 = vmatprep.mubr.msk.bf16.mxu1 %vm15675_vm2, %v15674_v5  ;;  %6926 = vmatprep.mubr.bf16.mxu0 %v15676_v44  ;;  %vm21646_vm13 = vmmov %vm21645_vm1  ;;  %v15454_v60 = vld [vmem:[%s18007_s15 + $0x50] sm:$0xff]  }
 0x660   : >> { %7896 = vrot.lane.b32.xlu1 %v18021_v25, %s15683_s16  ;;  %14683 = vmatpush3.bf16.msra.mxu1 %v6863_v33  ;;  %v6838_v14 = vpop.permute.xlu0 %6837 }
 0x661   : >> { %v6861_v6 = vsel %vm21641_vm3, %v6838_v14, %v6840_v9  ;;  %14696 = vmatprep.subr.bf16.mxu1 %v15674_v5  ;;  %vm21647_vm3 = vmmov %vm21645_vm1 }
 0x662   : >> { %v7067_v22 = vpop.permute.xlu1 %7066  ;;  %7894 = vrot.lane.b32.xlu0 %v18028_v46, %s15683_s16  ;;  %6909 = vmatpush1.bf16.msra.mxu0 %v6861_v6 }
 0x663   : >> { %14685 = vmatmul.mubr.msk.bf16.vlgmr.msra.gmra.mxu1 %vm6492_vm0, %v15448_v47 }
 0x664   : >> { %7898 = vrot.lane.b32.xlu1 %v18030_v45, %s15683_s16  ;;  %v7065_v4 = vpop.permute.xlu0 %7064  ;;  %14688 = vmatprep.mubr.msk.bf16.mxu1 %vm15675_vm2, %v15674_v5 }
 0x665   : >> { %13728 = vmatmul.mubr.msk.bf16.vlgmr.msra.gmra.mxu0 %vm6492_vm0, %v15448_v47  ;;  %v7078_v52 = vsel %vm21642_vm7, %v7065_v4, %v7067_v22  ;;  %v15455_v4 = vld [vmem:[%s18007_s15 + $0x58] sm:$0xff]  }
 0x666   : >> { %v7071_v37 = vpop.permute.xlu1 %7070  ;;  %7892 = vrot.lane.b32.xlu0 %v18036_v20, %s15683_s16  ;;  %6936 = vmatprep.mubr.bf16.mxu0 %v15676_v44  ;;  %s21874_s16 = smov (%p18577_p4), 56  }
 0x668   : >> { %8121 = vrot.lane.b32.xlu1 %v17963_v40, %s15684_s20  ;;  %v7059_v1 = vpop.permute.xlu0 %7058 }
 0x66a   : >> { %v7061_v53 = vpop.permute.xlu1 %7060  ;;  %8119 = vrot.lane.b32.xlu0 %v17961_v32, %s15684_s20  ;;  %v7097_v32 = vsel %vm21645_vm1, %v7078_v52, 0  ;;  %vm21650_vm1 = vmmov %vm21642_vm7 }
 0x66b   : >> { %14689 = vmatmul.mubr.msk.bf16.gmra.mxu1 %vm6492_vm0, %v15449_v11 }
 0x66c   : >> { %8125 = vrot.lane.b32.xlu1 %v17980_v0, %s15684_s20  ;;  %v7069_v10 = vpop.permute.xlu0 %7068  ;;  %14692 = vmatprep.mubr.msk.bf16.mxu1 %vm15675_vm2, %v15674_v5  ;;  %v7076_v0 = vsel %vm21642_vm7, %v7059_v1, %v7061_v53 }
 0x66d   : >> { %v7080_v40 = vsel %vm21643_vm15, %v7069_v10, %v7071_v37  ;;  %13729 = vmatmul.mubr.msk.bf16.gmra.mxu0 %vm6492_vm0, %v15449_v11  ;;  %v7079_v18 = vsel %vm21644_vm10, %v7067_v22, %v7069_v10  ;;  %vm21648_vm15 = vmmov %vm21642_vm7 }
 0x66e   : >> { %v7063_v41 = vpop.permute.xlu1 %7062  ;;  %v7103_v30 = vsel %vm21646_vm13, %v7080_v40, 0  ;;  %8123 = vrot.lane.b32.xlu0 %v18002_v54, %s15684_s20  ;;  %13743 = vmatprep.subr.msk.bf16.mxu0 %vm21647_vm3, %v7079_v18  ;;  %vm21649_vm10 = vmmov %vm21642_vm7  ;;  %vm21653_vm7 = vcmask 637952  }
 0x66f   : >> { %7116 = vmatpush1.bf16.msra.mxu0 %v7097_v32  ;;  %14697 = vmatpush3.bf16.msra.mxu1 %v7103_v30  ;;  %vm21651_vm13 = vmmov %vm21650_vm1  ;;  %v15456_v30 = vld [vmem:[%s18007_s15 + $0x60] ss:$0 sps:$4 sm:$0x33]  }
 0x670   : >> { %8115 = vrot.lane.b32.xlu1 %v17995_v50, %s15684_s20  ;;  %7117 = vmatprep.subr.bf16.mxu0 %v7076_v0  ;;  %v7057_v49 = vpop.permute.xlu0 %7056  ;;  %v7077_v50 = vsel %vm21649_vm10, %v7061_v53, %v7063_v41  ;;  %vm21652_vm3 = vmmov %vm21650_vm1 }
 0x671   : >> { %v7075_v36 = vsel %vm21648_vm15, %v7057_v49, %v7059_v1  ;;  %14698 = vmatprep.subr.bf16.mxu1 %v15674_v5  ;;  %6946 = vmatprep.mubr.bf16.mxu0 %v15676_v44  ;;  %vm21654_vm15 = vmmov %vm21653_vm7 }
 0x672   : >> { %v7053_v26 = vpop.permute.xlu1 %7052  ;;  %8113 = vrot.lane.b32.xlu0 %v17988_v21, %s15684_s20  ;;  %vm21655_vm10 = vmmov %vm21653_vm7 }
 0x673   : >> { %14693 = vmatmul.mubr.msk.bf16.gmra.mxu1 %vm6492_vm0, %v15450_v62  ;;  %7118 = vmatpush1.bf16.msra.mxu0 %v7075_v36 }
 0x674   : >> { %8117 = vrot.lane.b32.xlu1 %v18009_v8, %s15684_s20  ;;  %14699 = vmatpush3.bf16.msra.mxu1 %v7077_v50  ;;  %v7051_v54 = vpop.permute.xlu0 %7050  ;;  %v15451_v8 = vld [vmem:[%s18007_s15 + $0x3c] sm:$0xff]  }
 0x675   : >> { %13730 = vmatmul.mubr.msk.bf16.gmra.mxu0 %vm6492_vm0, %v15450_v62  ;;  %v7073_v38 = vsel %vm21650_vm1, %v7051_v54, %v7053_v26  ;;  %14700 = vmatprep.subr.bf16.mxu1 %v15674_v5  ;;  %vm21656_vm1 = vcmask 1041408  }
 0x676   : >> { %v7055_v28 = vpop.permute.xlu1 %7054  ;;  %8111 = vrot.lane.b32.xlu0 %v18017_v31, %s15684_s20  ;;  %7119 = vmatprep.subr.bf16.mxu0 %v7073_v38 }
 0x677   : >> { %v7074_v21 = vsel %vm21651_vm13, %v7053_v26, %v7055_v28  ;;  %14702 = vmatprep.mubr.msk.bf16.mxu1 %vm15675_vm2, %v15674_v5  ;;  %7137 = vmatprep.mubr.bf16.mxu0 %v15676_v44  ;;  %vm21657_vm13 = vmmov %vm21656_vm1  ;;  %v15457_v28 = vld [vmem:[%s18007_s15 + $0x64] sm:$0xff]  }
 0x678   : >> { %8107 = vrot.lane.b32.xlu1 %v18021_v25, %s15684_s20  ;;  %14701 = vmatpush3.bf16.msra.mxu1 %v7074_v21  ;;  %v7049_v42 = vpop.permute.xlu0 %7048 }
 0x679   : >> { %v7072_v59 = vsel %vm21652_vm3, %v7049_v42, %v7051_v54  ;;  %14714 = vmatprep.subr.bf16.mxu1 %v15674_v5  ;;  %vm21658_vm3 = vmmov %vm21656_vm1 }
 0x67a   : >> { %v7278_v23 = vpop.permute.xlu1 %7277  ;;  %8105 = vrot.lane.b32.xlu0 %v18028_v46, %s15684_s20  ;;  %7120 = vmatpush1.bf16.msra.mxu0 %v7072_v59 }
 0x67b   : >> { %14703 = vmatmul.mubr.msk.bf16.vlgmr.msra.gmra.mxu1 %vm6492_vm0, %v15451_v8 }
 0x67c   : >> { %8109 = vrot.lane.b32.xlu1 %v18030_v45, %s15684_s20  ;;  %v7276_v31 = vpop.permute.xlu0 %7275  ;;  %14706 = vmatprep.mubr.msk.bf16.mxu1 %vm15675_vm2, %v15674_v5 }
 0x67d   : >> { %13744 = vmatmul.mubr.msk.bf16.vlgmr.msra.gmra.mxu0 %vm6492_vm0, %v15451_v8  ;;  %v7289_v63 = vsel %vm21653_vm7, %v7276_v31, %v7278_v23  ;;  %v15458_v31 = vld [vmem:[%s18007_s15 + $0x6c] sm:$0xff]  }
 0x67e   : >> { %v7282_v25 = vpop.permute.xlu1 %7281  ;;  %8103 = vrot.lane.b32.xlu0 %v18036_v20, %s15684_s20  ;;  %7147 = vmatprep.mubr.bf16.mxu0 %v15676_v44  ;;  %v7308_v39 = vsel %vm21656_vm1, %v7289_v63, 0  ;;  %vm21661_vm1 = vmmov %vm21653_vm7  ;;  %s18390_s20 = scalar_lea.vmem %s21438_s8, %s8292_s17  ;;  %s21774_s17 = smov (%p18577_p4), 79  }
 0x680   : >> { %v7270_v46 = vpop.permute.xlu0 %7269 }
 0x682   : >> { %v7272_v24 = vpop.permute.xlu1 %7271 }
 0x683   : >> { %14707 = vmatmul.mubr.msk.bf16.gmra.mxu1 %vm6492_vm0, %v15452_v16  ;;  %v7287_v17 = vsel %vm21653_vm7, %v7270_v46, %v7272_v24 }
 0x684   : >> { %v7280_v45 = vpop.permute.xlu0 %7279  ;;  %14710 = vmatprep.mubr.msk.bf16.mxu1 %vm15675_vm2, %v15674_v5 }
 0x685   : >> { %v7291_v61 = vsel %vm21654_vm15, %v7280_v45, %v7282_v25  ;;  %13745 = vmatmul.mubr.msk.bf16.gmra.mxu0 %vm6492_vm0, %v15452_v16  ;;  %v7290_v20 = vsel %vm21655_vm10, %v7278_v23, %v7280_v45  ;;  %vm21659_vm15 = vmmov %vm21653_vm7 }
 0x686   : >> { %v7274_v15 = vpop.permute.xlu1 %7273  ;;  %v7314_v29 = vsel %vm21657_vm13, %v7291_v61, 0  ;;  %13759 = vmatprep.subr.msk.bf16.mxu0 %vm21658_vm3, %v7290_v20  ;;  %7157 = vmatprep.mubr.bf16.mxu0 %v15676_v44  ;;  %vm21660_vm10 = vmmov %vm21653_vm7  ;;  %vm21664_vm7 = vcmask 629760  }
 0x687   : >> { %7327 = vmatpush1.bf16.msra.mxu0 %v7308_v39  ;;  %14715 = vmatpush3.bf16.msra.mxu1 %v7314_v29  ;;  %v7288_v55 = vsel %vm21660_vm10, %v7272_v24, %v7274_v15  ;;  %vm21662_vm13 = vmmov %vm21661_vm1  ;;  %v15459_v29 = vld [vmem:[%s18007_s15 + $0x74] ss:$0 sps:$4 sm:$0x33]  }
 0x688   : >> { %7328 = vmatprep.subr.bf16.mxu0 %v7287_v17  ;;  %v7268_v57 = vpop.permute.xlu0 %7267  ;;  %14716 = vmatprep.subr.bf16.mxu1 %v15674_v5  ;;  %vm21663_vm3 = vmmov %vm21661_vm1 }
 0x689   : >> { %v7286_v35 = vsel %vm21659_vm15, %v7268_v57, %v7270_v46  ;;  %vm21665_vm15 = vmmov %vm21664_vm7 }
 0x68a   : >> { %v7264_v13 = vpop.permute.xlu1 %7263  ;;  %vm21666_vm10 = vmmov %vm21664_vm7 }
 0x68b   : >> { %14711 = vmatmul.mubr.msk.bf16.gmra.mxu1 %vm6492_vm0, %v15453_v27  ;;  %7329 = vmatpush1.bf16.msra.mxu0 %v7286_v35  ;;  %v8294_v35 = vld [vmem:[%s18390_s20] sm:$0xff] }
 0x68c   : >> { %14717 = vmatpush3.bf16.msra.mxu1 %v7288_v55  ;;  %v7262_v19 = vpop.permute.xlu0 %7261  ;;  %14720 = vmatprep.mubr.msk.bf16.mxu1 %vm15675_vm2, %v15674_v5 }
 0x68d   : >> { %13746 = vmatmul.mubr.msk.bf16.gmra.mxu0 %vm6492_vm0, %v15453_v27  ;;  %v7284_v51 = vsel %vm21661_vm1, %v7262_v19, %v7264_v13  ;;  %14718 = vmatprep.subr.bf16.mxu1 %v15674_v5  ;;  %vm21667_vm1 = vcmask 1041408  }
 0x68e   : >> { %v7266_v12 = vpop.permute.xlu1 %7265  ;;  %7330 = vmatprep.subr.bf16.mxu0 %v7284_v51  ;;  %7348 = vmatprep.mubr.bf16.mxu0 %v15676_v44 }
 0x68f   : >> { %v7285_v9 = vsel %vm21662_vm13, %v7264_v13, %v7266_v12  ;;  %vm21668_vm13 = vmmov %vm21667_vm1  ;;  %8301 = vperm.xlu0 %15436, %v8294_v35   ;;  %v8295_v12 = vld [vmem:[%s18390_s20 + $0x8] sm:$0xff] }
 0x690   : >> { %14719 = vmatpush3.bf16.msra.mxu1 %v7285_v9  ;;  %v7260_v56 = vpop.permute.xlu0 %7259  ;;  %v15460_v9 = vld [vmem:[%s18007_s15 + $0x78] sm:$0xff]   ;;  %8306 = vperm.xlu1 %15437, %v8295_v12  }
 0x691   : >> { %v7283_v33 = vsel %vm21663_vm3, %v7260_v56, %v7262_v19  ;;  %14732 = vmatprep.subr.bf16.mxu1 %v15674_v5  ;;  %vm21669_vm3 = vmmov %vm21667_vm1 }
 0x692   : >> { %v7489_v47 = vpop.permute.xlu1 %7488  ;;  %7331 = vmatpush1.bf16.msra.mxu0 %v7283_v33 }
 0x693   : >> { %14721 = vmatmul.mubr.msk.bf16.vlgmr.msra.gmra.mxu1 %vm6492_vm0, %v15454_v60 }
 0x694   : >> { %v7487_v14 = vpop.permute.xlu0 %7486  ;;  %14724 = vmatprep.mubr.msk.bf16.mxu1 %vm15675_vm2, %v15674_v5 }
 0x695   : >> { %13760 = vmatmul.mubr.msk.bf16.vlgmr.msra.gmra.mxu0 %vm6492_vm0, %v15454_v60  ;;  %v7500_v22 = vsel %vm21664_vm7, %v7487_v14, %v7489_v47 }
 0x696   : >> { %v7493_v6 = vpop.permute.xlu1 %7492  ;;  %7358 = vmatprep.mubr.bf16.mxu0 %v15676_v44  ;;  %v7519_v52 = vsel %vm21667_vm1, %v7500_v22, 0  ;;  %vm21672_vm1 = vmmov %vm21664_vm7  ;;  %v8297_v22 = vld [vmem:[%s18390_s20 + $0x18] sm:$0xff] }
 0x697   : >> { %8316 = vperm.xlu0 %15436, %v8297_v22  }
 0x698   : >> { %v7491_v37 = vpop.permute.xlu0 %7490 }
 0x699   : >> { %v7502_v11 = vsel %vm21665_vm15, %v7491_v37, %v7493_v6  ;;  %v7501_v53 = vsel %vm21666_vm10, %v7489_v47, %v7491_v37  ;;  %vm21670_vm15 = vmmov %vm21664_vm7  ;;  %v8296_v47 = vld [vmem:[%s18390_s20 + $0x10] sm:$0xff] }
 0x69a   : >> { %v7483_v1 = vpop.permute.xlu1 %7482  ;;  %v7525_v10 = vsel %vm21668_vm13, %v7502_v11, 0  ;;  %13775 = vmatprep.subr.msk.bf16.mxu0 %vm21669_vm3, %v7501_v53  ;;  %vm21671_vm10 = vmmov %vm21664_vm7  ;;  %8311 = vperm.xlu1 %15437, %v8296_v47   ;;  %v15461_v11 = vld [vmem:[%s18007_s15 + $0x80] sm:$0xff]  }
 0x69b   : >> { %14725 = vmatmul.mubr.msk.bf16.gmra.mxu1 %vm6492_vm0, %v15455_v4  ;;  %7538 = vmatpush1.bf16.msra.mxu0 %v7519_v52  ;;  %vm21673_vm13 = vmmov %vm21672_vm1 }
 0x69c   : >> { %14733 = vmatpush3.bf16.msra.mxu1 %v7525_v10  ;;  %v7481_v40 = vpop.permute.xlu0 %7480  ;;  %14728 = vmatprep.mubr.msk.bf16.mxu1 %vm15675_vm2, %v15674_v5  ;;  %vm21674_vm3 = vmmov %vm21672_vm1 }
 0x69d   : >> { %13761 = vmatmul.mubr.msk.bf16.gmra.mxu0 %vm6492_vm0, %v15455_v4  ;;  %v7498_v18 = vsel %vm21664_vm7, %v7481_v40, %v7483_v1  ;;  %14734 = vmatprep.subr.bf16.mxu1 %v15674_v5  ;;  %vm21675_vm7 = vcmask 449536   ;;  %v8298_v4 = vld [vmem:[%s18390_s20 + $0x20] sm:$0xf]  ;;  %s21740_s20 = smov (%p18577_p4), 100  }
 0x69e   : >> { %v7485_v41 = vpop.permute.xlu1 %7484  ;;  %7539 = vmatprep.subr.bf16.mxu0 %v7498_v18  ;;  %7368 = vmatprep.mubr.bf16.mxu0 %v15676_v44 }
 0x69f   : >> { %v7499_v32 = vsel %vm21670_vm15, %v7483_v1, %v7485_v41  ;;  %vm21676_vm15 = vmmov %vm21675_vm7  ;;  %8321 = vperm.xlu1 %15437, %v8298_v4   ;;  %v15467_v4 = vld [vmem:[%s18007_s15 + $0xa8] sm:$0xff]  }
 0x6a0   : >> { %14735 = vmatpush3.bf16.msra.mxu1 %v7499_v32  ;;  %v7479_v0 = vpop.permute.xlu0 %7478 }
 0x6a1   : >> { %v7497_v62 = vsel %vm21671_vm10, %v7479_v0, %v7481_v40  ;;  %14736 = vmatprep.subr.bf16.mxu1 %v15674_v5  ;;  %vm21677_vm10 = vmmov %vm21675_vm7 }
 0x6a2   : >> { %v7475_v49 = vpop.permute.xlu1 %7474  ;;  %7540 = vmatpush1.bf16.msra.mxu0 %v7497_v62  ;;  %v15462_v62 = vld [vmem:[%s18007_s15 + $0x88] ss:$0 sps:$4 sm:$0x33]  }
 0x6a3   : >> { %14729 = vmatmul.mubr.msk.bf16.gmra.mxu1 %vm6492_vm0, %v15456_v30 }
 0x6a4   : >> { %v7473_v36 = vpop.permute.xlu0 %7472  ;;  %14738 = vmatprep.mubr.msk.bf16.mxu1 %vm15675_vm2, %v15674_v5 }
 0x6a5   : >> { %13762 = vmatmul.mubr.msk.bf16.gmra.mxu0 %vm6492_vm0, %v15456_v30  ;;  %v7495_v50 = vsel %vm21672_vm1, %v7473_v36, %v7475_v49  ;;  %vm21678_vm1 = vcmask 1041408  }
 0x6a6   : >> { %v7477_v26 = vpop.permute.xlu1 %7476  ;;  %7541 = vmatprep.subr.bf16.mxu0 %v7495_v50  ;;  %7559 = vmatprep.mubr.bf16.mxu0 %v15676_v44 }
 0x6a7   : >> { %v7496_v54 = vsel %vm21673_vm13, %v7475_v49, %v7477_v26  ;;  %vm21679_vm13 = vmmov %vm21678_vm1 }
 0x6a8   : >> { %14737 = vmatpush3.bf16.msra.mxu1 %v7496_v54  ;;  %v7471_v38 = vpop.permute.xlu0 %7470 }
 0x6a9   : >> { %14750 = vmatprep.subr.bf16.mxu1 %v15674_v5  ;;  %v7494_v21 = vsel %vm21674_vm3, %v7471_v38, %v7473_v36  ;;  %vm21680_vm3 = vmmov %vm21678_vm1 }
 0x6aa   : >> { %v7700_v8 = vpop.permute.xlu1 %7699  ;;  %7542 = vmatpush1.bf16.msra.mxu0 %v7494_v21  ;;  %v15463_v21 = vld [vmem:[%s18007_s15 + $0x8c] sm:$0xff]  }
 0x6ab   : >> { %14739 = vmatmul.mubr.msk.bf16.vlgmr.msra.gmra.mxu1 %vm6492_vm0, %v15457_v28 }
 0x6ac   : >> { %v7698_v42 = vpop.permute.xlu0 %7697  ;;  %14742 = vmatprep.mubr.msk.bf16.mxu1 %vm15675_vm2, %v15674_v5 }
 0x6ad   : >> { %13776 = vmatmul.mubr.msk.bf16.vlgmr.msra.gmra.mxu0 %vm6492_vm0, %v15457_v28  ;;  %v7711_v23 = vsel %vm21675_vm7, %v7698_v42, %v7700_v8 }
 0x6ae   : >> { %v7704_v59 = vpop.permute.xlu1 %7703  ;;  %7569 = vmatprep.mubr.bf16.mxu0 %v15676_v44  ;;  %v7730_v63 = vsel %vm21678_vm1, %v7711_v23, 0  ;;  %vm21683_vm1 = vmmov %vm21675_vm7 }
 0x6b0   : >> { %v7702_v25 = vpop.permute.xlu0 %7701 }
 0x6b1   : >> { %v7713_v16 = vsel %vm21676_vm15, %v7702_v25, %v7704_v59  ;;  %v7712_v24 = vsel %vm21677_vm10, %v7700_v8, %v7702_v25  ;;  %vm21681_vm15 = vmmov %vm21675_vm7 }
 0x6b2   : >> { %v7694_v46 = vpop.permute.xlu1 %7693  ;;  %v7736_v45 = vsel %vm21679_vm13, %v7713_v16, 0  ;;  %13791 = vmatprep.subr.msk.bf16.mxu0 %vm21680_vm3, %v7712_v24  ;;  %vm21682_vm10 = vmmov %vm21675_vm7  ;;  %v15464_v16 = vld [vmem:[%s18007_s15 + $0x94] sm:$0xff]  }
 0x6b3   : >> { %14743 = vmatmul.mubr.msk.bf16.gmra.mxu1 %vm6492_vm0, %v15458_v31  ;;  %7749 = vmatpush1.bf16.msra.mxu0 %v7730_v63  ;;  %vm21684_vm13 = vmmov %vm21683_vm1 }
 0x6b4   : >> { %14751 = vmatpush3.bf16.msra.mxu1 %v7736_v45  ;;  %v7692_v61 = vpop.permute.xlu0 %7691  ;;  %14746 = vmatprep.mubr.msk.bf16.mxu1 %vm15675_vm2, %v15674_v5  ;;  %vm21685_vm3 = vmmov %vm21683_vm1 }
 0x6b5   : >> { %13777 = vmatmul.mubr.msk.bf16.gmra.mxu0 %vm6492_vm0, %v15458_v31  ;;  %v7709_v20 = vsel %vm21675_vm7, %v7692_v61, %v7694_v46  ;;  %14752 = vmatprep.subr.bf16.mxu1 %v15674_v5  ;;  %vm21686_vm7 = vcmask 441344  }
 0x6b6   : >> { %v7696_v15 = vpop.permute.xlu1 %7695  ;;  %7750 = vmatprep.subr.bf16.mxu0 %v7709_v20  ;;  %7579 = vmatprep.mubr.bf16.mxu0 %v15676_v44 }
 0x6b7   : >> { %v7710_v39 = vsel %vm21681_vm15, %v7694_v46, %v7696_v15  ;;  %vm21687_vm15 = vmmov %vm21686_vm7 }
 0x6b8   : >> { %14753 = vmatpush3.bf16.msra.mxu1 %v7710_v39  ;;  %v7690_v17 = vpop.permute.xlu0 %7689 }
 0x6b9   : >> { %v7708_v27 = vsel %vm21682_vm10, %v7690_v17, %v7692_v61  ;;  %14754 = vmatprep.subr.bf16.mxu1 %v15674_v5  ;;  %vm21688_vm10 = vmmov %vm21686_vm7 }
 0x6ba   : >> { %v7686_v57 = vpop.permute.xlu1 %7685  ;;  %7751 = vmatpush1.bf16.msra.mxu0 %v7708_v27  ;;  %v15465_v27 = vld [vmem:[%s18007_s15 + $0x9c] ss:$0 sps:$4 sm:$0x33]  }
 0x6bb   : >> { %14747 = vmatmul.mubr.msk.bf16.gmra.mxu1 %vm6492_vm0, %v15459_v29 }
 0x6bc   : >> { %v7684_v13 = vpop.permute.xlu0 %7683  ;;  %14756 = vmatprep.mubr.msk.bf16.mxu1 %vm15675_vm2, %v15674_v5 }
 0x6bd   : >> { %13778 = vmatmul.mubr.msk.bf16.gmra.mxu0 %vm6492_vm0, %v15459_v29  ;;  %v7706_v19 = vsel %vm21683_vm1, %v7684_v13, %v7686_v57  ;;  %vm21689_vm1 = vcmask 1041408  }
 0x6be   : >> { %v7688_v55 = vpop.permute.xlu1 %7687  ;;  %7752 = vmatprep.subr.bf16.mxu0 %v7706_v19  ;;  %7770 = vmatprep.mubr.bf16.mxu0 %v15676_v44 }
 0x6bf   : >> { %v7707_v51 = vsel %vm21684_vm13, %v7686_v57, %v7688_v55  ;;  %vm21690_vm13 = vmmov %vm21689_vm1 }
 0x6c0   : >> { %14755 = vmatpush3.bf16.msra.mxu1 %v7707_v51  ;;  %v7682_v60 = vpop.permute.xlu0 %7681 }
 0x6c1   : >> { %14768 = vmatprep.subr.bf16.mxu1 %v15674_v5  ;;  %v7705_v56 = vsel %vm21685_vm3, %v7682_v60, %v7684_v13  ;;  %vm21691_vm3 = vmmov %vm21689_vm1 }
 0x6c2   : >> { %v7911_v33 = vpop.permute.xlu1 %7910  ;;  %7753 = vmatpush1.bf16.msra.mxu0 %v7705_v56 }
 0x6c3   : >> { %14757 = vmatmul.mubr.msk.bf16.vlgmr.msra.gmra.mxu1 %vm6492_vm0, %v15460_v9 }
 0x6c4   : >> { %v7909_v14 = vpop.permute.xlu0 %7908  ;;  %14760 = vmatprep.mubr.msk.bf16.mxu1 %vm15675_vm2, %v15674_v5 }
 0x6c5   : >> { %13792 = vmatmul.mubr.msk.bf16.vlgmr.msra.gmra.mxu0 %vm6492_vm0, %v15460_v9  ;;  %v7922_v37 = vsel %vm21686_vm7, %v7909_v14, %v7911_v33  ;;  %v15466_v9 = vld [vmem:[%s18007_s15 + $0xa0] sm:$0xff]  }
 0x6c6   : >> { %v7915_v6 = vpop.permute.xlu1 %7914  ;;  %7780 = vmatprep.mubr.bf16.mxu0 %v15676_v44  ;;  %v7941_v40 = vsel %vm21689_vm1, %v7922_v37, 0  ;;  %vm21694_vm1 = vmmov %vm21686_vm7 }
 0x6c8   : >> { %v7913_v1 = vpop.permute.xlu0 %7912 }
 0x6c9   : >> { %v7924_v53 = vsel %vm21687_vm15, %v7913_v1, %v7915_v6  ;;  %v7923_v10 = vsel %vm21688_vm10, %v7911_v33, %v7913_v1  ;;  %vm21692_vm15 = vmmov %vm21686_vm7 }
 0x6ca   : >> { %v7905_v52 = vpop.permute.xlu1 %7904  ;;  %v7947_v41 = vsel %vm21690_vm13, %v7924_v53, 0  ;;  %13807 = vmatprep.subr.msk.bf16.mxu0 %vm21691_vm3, %v7923_v10  ;;  %vm21693_vm10 = vmmov %vm21686_vm7 }
 0x6cb   : >> { %14761 = vmatmul.mubr.msk.bf16.gmra.mxu1 %vm6492_vm0, %v15461_v11  ;;  %7960 = vmatpush1.bf16.msra.mxu0 %v7941_v40  ;;  %vm21695_vm13 = vmmov %vm21694_vm1 }
 0x6cc   : >> { %14769 = vmatpush3.bf16.msra.mxu1 %v7947_v41  ;;  %v7903_v18 = vpop.permute.xlu0 %7902  ;;  %14764 = vmatprep.mubr.msk.bf16.mxu1 %vm15675_vm2, %v15674_v5  ;;  %vm21696_vm3 = vmmov %vm21694_vm1 }
 0x6cd   : >> { %13793 = vmatmul.mubr.msk.bf16.gmra.mxu0 %vm6492_vm0, %v15461_v11  ;;  %v7920_v30 = vsel %vm21686_vm7, %v7903_v18, %v7905_v52  ;;  %14770 = vmatprep.subr.bf16.mxu1 %v15674_v5  ;;  %vm21697_vm7 = vcmask 433152  }
 0x6ce   : >> { %v7907_v32 = vpop.permute.xlu1 %7906  ;;  %7961 = vmatprep.subr.bf16.mxu0 %v7920_v30  ;;  %7790 = vmatprep.mubr.bf16.mxu0 %v15676_v44 }
 0x6cf   : >> { %v7921_v0 = vsel %vm21692_vm15, %v7905_v52, %v7907_v32  ;;  %vm21698_vm15 = vmmov %vm21697_vm7 }
 0x6d0   : >> { %14771 = vmatpush3.bf16.msra.mxu1 %v7921_v0  ;;  %v7901_v49 = vpop.permute.xlu0 %7900 }
 0x6d1   : >> { %v7919_v36 = vsel %vm21693_vm10, %v7901_v49, %v7903_v18  ;;  %14772 = vmatprep.subr.bf16.mxu1 %v15674_v5  ;;  %vm21699_vm10 = vmmov %vm21697_vm7  ;;  %v15468_v18 = vld [vmem:[%s18007_s15 + $0xb0] ss:$0 sps:$4 sm:$0x33]   ;;  %s21741_s15 = smov (%p18577_p4), 80  }
 0x6d2   : >> { %v7897_v26 = vpop.permute.xlu1 %7896  ;;  %7962 = vmatpush1.bf16.msra.mxu0 %v7919_v36 }
 0x6d3   : >> { %14765 = vmatmul.mubr.msk.bf16.gmra.mxu1 %vm6492_vm0, %v15462_v62 }
 0x6d4   : >> { %v7895_v50 = vpop.permute.xlu0 %7894  ;;  %14774 = vmatprep.mubr.msk.bf16.mxu1 %vm15675_vm2, %v15674_v5 }
 0x6d5   : >> { %13794 = vmatmul.mubr.msk.bf16.gmra.mxu0 %vm6492_vm0, %v15462_v62  ;;  %v7917_v28 = vsel %vm21694_vm1, %v7895_v50, %v7897_v26  ;;  %vm21700_vm1 = vcmask 1041408  }
 0x6d6   : >> { %v7899_v54 = vpop.permute.xlu1 %7898  ;;  %7963 = vmatprep.subr.bf16.mxu0 %v7917_v28  ;;  %7981 = vmatprep.mubr.bf16.mxu0 %v15676_v44 }
 0x6d7   : >> { %v7918_v38 = vsel %vm21695_vm13, %v7897_v26, %v7899_v54  ;;  %vm21701_vm13 = vmmov %vm21700_vm1 }
 0x6d8   : >> { %14773 = vmatpush3.bf16.msra.mxu1 %v7918_v38  ;;  %v7893_v8 = vpop.permute.xlu0 %7892 }
 0x6d9   : >> { %14786 = vmatprep.subr.bf16.mxu1 %v15674_v5  ;;  %v7916_v42 = vsel %vm21696_vm3, %v7893_v8, %v7895_v50  ;;  %vm21702_vm3 = vmmov %vm21700_vm1 }
 0x6da   : >> { %v8122_v59 = vpop.permute.xlu1 %8121  ;;  %7964 = vmatpush1.bf16.msra.mxu0 %v7916_v42 }
 0x6db   : >> { %14775 = vmatmul.mubr.msk.bf16.vlgmr.msra.gmra.mxu1 %vm6492_vm0, %v15463_v21 }
 0x6dc   : >> { %v8120_v23 = vpop.permute.xlu0 %8119  ;;  %14778 = vmatprep.mubr.msk.bf16.mxu1 %vm15675_vm2, %v15674_v5 }
 0x6dd   : >> { %13808 = vmatmul.mubr.msk.bf16.vlgmr.msra.gmra.mxu0 %vm6492_vm0, %v15463_v21  ;;  %v8133_v25 = vsel %vm21697_vm7, %v8120_v23, %v8122_v59 }
 0x6de   : >> { %v8126_v31 = vpop.permute.xlu1 %8125  ;;  %7991 = vmatprep.mubr.bf16.mxu0 %v15676_v44  ;;  %v8152_v61 = vsel %vm21700_vm1, %v8133_v25, 0  ;;  %vm21705_vm1 = vmmov %vm21697_vm7 }
 0x6e0   : >> { %v8124_v46 = vpop.permute.xlu0 %8123 }
 0x6e1   : >> { %v8135_v24 = vsel %vm21698_vm15, %v8124_v46, %v8126_v31  ;;  %v8134_v45 = vsel %vm21699_vm10, %v8122_v59, %v8124_v46  ;;  %vm21703_vm15 = vmmov %vm21697_vm7 }
 0x6e2   : >> { %v8116_v63 = vpop.permute.xlu1 %8115  ;;  %v8158_v15 = vsel %vm21701_vm13, %v8135_v24, 0  ;;  %13823 = vmatprep.subr.msk.bf16.mxu0 %vm21702_vm3, %v8134_v45  ;;  %vm21704_vm10 = vmmov %vm21697_vm7 }
 0x6e3   : >> { %14779 = vmatmul.mubr.msk.bf16.gmra.mxu1 %vm6492_vm0, %v15464_v16  ;;  %8171 = vmatpush1.bf16.msra.mxu0 %v8152_v61  ;;  %vm21706_vm13 = vmmov %vm21705_vm1 }
 0x6e4   : >> { %14787 = vmatpush3.bf16.msra.mxu1 %v8158_v15  ;;  %v8114_v20 = vpop.permute.xlu0 %8113  ;;  %14782 = vmatprep.mubr.msk.bf16.mxu1 %vm15675_vm2, %v15674_v5  ;;  %vm21707_vm3 = vmmov %vm21705_vm1 }
 0x6e5   : >> { %13809 = vmatmul.mubr.msk.bf16.gmra.mxu0 %vm6492_vm0, %v15464_v16  ;;  %v8131_v29 = vsel %vm21697_vm7, %v8114_v20, %v8116_v63  ;;  %14788 = vmatprep.subr.bf16.mxu1 %v15674_v5 }
 0x6e6   : >> { %v8118_v39 = vpop.permute.xlu1 %8117  ;;  %8172 = vmatprep.subr.bf16.mxu0 %v8131_v29  ;;  %8001 = vmatprep.mubr.bf16.mxu0 %v15676_v44 }
 0x6e7   : >> { %v8132_v17 = vsel %vm21703_vm15, %v8116_v63, %v8118_v39 }
 0x6e8   : >> { %14789 = vmatpush3.bf16.msra.mxu1 %v8132_v17  ;;  %v8112_v57 = vpop.permute.xlu0 %8111 }
 0x6e9   : >> { %v8130_v35 = vsel %vm21704_vm10, %v8112_v57, %v8114_v20  ;;  %14790 = vmatprep.subr.bf16.mxu1 %v15674_v5 }
 0x6ea   : >> { %v8108_v13 = vpop.permute.xlu1 %8107  ;;  %8173 = vmatpush1.bf16.msra.mxu0 %v8130_v35 }
 0x6eb   : >> { %14783 = vmatmul.mubr.msk.bf16.gmra.mxu1 %vm6492_vm0, %v15465_v27 }
 0x6ec   : >> { %v8106_v55 = vpop.permute.xlu0 %8105  ;;  %14792 = vmatprep.mubr.msk.bf16.mxu1 %vm15675_vm2, %v15674_v5 }
 0x6ed   : >> { %13810 = vmatmul.mubr.msk.bf16.gmra.mxu0 %vm6492_vm0, %v15465_v27  ;;  %v8128_v12 = vsel %vm21705_vm1, %v8106_v55, %v8108_v13 }
 0x6ee   : >> { %v8110_v19 = vpop.permute.xlu1 %8109  ;;  %8174 = vmatprep.subr.bf16.mxu0 %v8128_v12  ;;  %8192 = vmatprep.mubr.bf16.mxu0 %v15676_v44 }
 0x6ef   : >> { %v8129_v51 = vsel %vm21706_vm13, %v8108_v13, %v8110_v19 }
 0x6f0   : >> { %14791 = vmatpush3.bf16.msra.mxu1 %v8129_v51  ;;  %v8104_v60 = vpop.permute.xlu0 %8103 }
 0x6f1   : >> { %v8127_v56 = vsel %vm21707_vm3, %v8104_v60, %v8106_v55 }
 0x6f2   : >> { %8175 = vmatpush1.bf16.msra.mxu0 %v8127_v56 }
 0x6f3   : >> { %v6606_v33 = vpop.f32.mrf.mxu1  ;;  %14793 = vmatmul.mubr.msk.bf16.vlgmr.msra.gmra.mxu1 %vm6492_vm0, %v15466_v9 }
 0x6f4   : >> { %14796 = vmatprep.mubr.msk.bf16.mxu1 %vm15675_vm2, %v15674_v5 }
 0x6f5   : >> { %v14650_v47 = vpop.f32.mrf.mxu1  ;;  %v6545_v14 = vpop.f32.mrf.mxu0  ;;  %13824 = vmatmul.mubr.msk.bf16.vlgmr.msra.gmra.mxu0 %vm6492_vm0, %v15466_v9 }
 0x6f6   : >> { %8202 = vmatprep.mubr.bf16.mxu0 %v15676_v44 }
 0x6f7   : >> { %v6609_v6 = vpop.f32.mrf.mxu1  ;;  %v6547_v22 = vpop.f32.mrf.mxu0 }
 0x6f9   : >> { %v14651_v37 = vpop.f32.mrf.mxu1  ;;  %v6549_v11 = vpop.f32.mrf.mxu0 }
 0x6fb   : >> { %v6614_v1 = vpop.f32.mrf.mxu1  ;;  %14797 = vmatmul.mubr.msk.bf16.gmra.mxu1 %vm6492_vm0, %v15467_v4  ;;  %v6551_v53 = vpop.f32.mrf.mxu0 }
 0x6fc   : >> { %14800 = vmatprep.mubr.msk.bf16.mxu1 %vm15675_vm2, %v15674_v5 }
 0x6fd   : >> { %v14654_v52 = vpop.f32.mrf.mxu1  ;;  %v6555_v10 = vpop.f32.mrf.mxu0  ;;  %13825 = vmatmul.mubr.msk.bf16.gmra.mxu0 %vm6492_vm0, %v15467_v4 }
 0x6fe   : >> { %8212 = vmatprep.mubr.bf16.mxu0 %v15676_v44 }
 0x6ff   : >> { %v6617_v40 = vpop.f32.mrf.mxu1  ;;  %v6557_v41 = vpop.f32.mrf.mxu0 }
 0x701   : >> { %v14655_v32 = vpop.f32.mrf.mxu1  ;;  %v6559_v30 = vpop.f32.mrf.mxu0 }
 0x703   : >> { %v6622_v0 = vpop.f32.mrf.mxu1  ;;  %14801 = vmatmul.mubr.msk.bf16.gmra.mxu1 %vm6492_vm0, %v15468_v18  ;;  %v6561_v62 = vpop.f32.mrf.mxu0 }
 0x705   : >> { %v14658_v49 = vpop.f32.mrf.mxu1  ;;  %v6565_v36 = vpop.f32.mrf.mxu0  ;;  %13826 = vmatmul.mubr.msk.bf16.gmra.mxu0 %vm6492_vm0, %v15468_v18 }
 0x707   : >> { %v6625_v5 = vpop.f32.mrf.mxu1  ;;  %v6567_v26 = vpop.f32.mrf.mxu0 }
 0x709   : >> { %v14659_v50 = vpop.f32.mrf.mxu1  ;;  %v6569_v54 = vpop.f32.mrf.mxu0 }
 0x70b   : >> { %v6793_v28 = vpop.f32.mrf.mxu1  ;;  %v6570_v38 = vpop.f32.mrf.mxu0 }
 0x70c   : >> { %v6794_v44 = vadd.f32 %v6793_v28, %v6606_v33 }
 0x70d   : >> { %v14668_v21 = vpop.f32.mrf.mxu1  ;;  %v6732_v8 = vpop.f32.mrf.mxu0 }
 0x70e   : >> { %v6733_v42 = vadd.f32 %v6732_v8, %v6545_v14 }
 0x70f   : >> { %v6796_v59 = vpop.f32.mrf.mxu1  ;;  %v6734_v23 = vpop.f32.mrf.mxu0 }
 0x710   : >> { %v6797_v31 = vadd.f32 %v6796_v59, %v6609_v6  ;;  %v6735_v25 = vadd.f32 %v6734_v23, %v6547_v22 }
 0x711   : >> { %v14669_v16 = vpop.f32.mrf.mxu1  ;;  %v6736_v46 = vpop.f32.mrf.mxu0 }
 0x712   : >> { %v6737_v24 = vadd.f32 %v6736_v46, %v6549_v11 }
 0x713   : >> { %v6801_v63 = vpop.f32.mrf.mxu1  ;;  %v6738_v45 = vpop.f32.mrf.mxu0 }
 0x714   : >> { %v6802_v61 = vadd.f32 %v6801_v63, %v6614_v1  ;;  %v6739_v15 = vadd.f32 %v6738_v45, %v6551_v53 }
 0x715   : >> { %v14672_v20 = vpop.f32.mrf.mxu1  ;;  %v6742_v39 = vpop.f32.mrf.mxu0 }
 0x716   : >> { %v6743_v29 = vadd.f32 %v6742_v39, %v6555_v10 }
 0x717   : >> { %v6804_v17 = vpop.f32.mrf.mxu1  ;;  %v6744_v27 = vpop.f32.mrf.mxu0 }
 0x718   : >> { %v6805_v57 = vadd.f32 %v6804_v17, %v6617_v40  ;;  %v6745_v35 = vadd.f32 %v6744_v27, %v6557_v41 }
 0x719   : >> { %v14673_v13 = vpop.f32.mrf.mxu1  ;;  %v6746_v55 = vpop.f32.mrf.mxu0 }
 0x71a   : >> { %v6747_v19 = vadd.f32 %v6746_v55, %v6559_v30 }
 0x71b   : >> { %v6809_v12 = vpop.f32.mrf.mxu1  ;;  %v6748_v51 = vpop.f32.mrf.mxu0 }
 0x71c   : >> { %v6810_v9 = vadd.f32 %v6809_v12, %v6622_v0  ;;  %v6749_v60 = vadd.f32 %v6748_v51, %v6561_v62 }
 0x71d   : >> { %v14676_v56 = vpop.f32.mrf.mxu1  ;;  %v6752_v33 = vpop.f32.mrf.mxu0 }
 0x71e   : >> { %v6753_v47 = vadd.f32 %v6752_v33, %v6565_v36 }
 0x71f   : >> { %v6812_v14 = vpop.f32.mrf.mxu1  ;;  %v6754_v6 = vpop.f32.mrf.mxu0 }
 0x720   : >> { %v6755_v22 = vadd.f32 %v6754_v6, %v6567_v26 }
 0x721   : >> { %v14677_v4 = vpop.f32.mrf.mxu1  ;;  %v6756_v37 = vpop.f32.mrf.mxu0 }
 0x723   : >> { %v6989_v11 = vpop.f32.mrf.mxu1  ;;  %v6757_v1 = vpop.f32.mrf.mxu0 }
 0x724   : >> { %v7013_v53 = vadd.f32 %v6989_v11, %v6794_v44 }
 0x725   : >> { %v14686_v52 = vpop.f32.mrf.mxu1  ;;  %v6928_v10 = vpop.f32.mrf.mxu0 }
 0x726   : >> { %v7011_v40 = vadd.f32 %v6928_v10, %v6733_v42 }
 0x727   : >> { %v6992_v41 = vpop.f32.mrf.mxu1  ;;  %v6930_v18 = vpop.f32.mrf.mxu0 }
 0x728   : >> { %v7016_v32 = vadd.f32 %v6992_v41, %v6797_v31  ;;  %v7012_v30 = vadd.f32 %v6930_v18, %v6735_v25 }
 0x729   : >> { %v14687_v0 = vpop.f32.mrf.mxu1  ;;  %v6932_v62 = vpop.f32.mrf.mxu0 }
 0x72a   : >> { %v7014_v49 = vadd.f32 %v6932_v62, %v6737_v24 }
 0x72b   : >> { %v6997_v5 = vpop.f32.mrf.mxu1  ;;  %v6934_v36 = vpop.f32.mrf.mxu0 }
 0x72c   : >> { %v7019_v50 = vadd.f32 %v6997_v5, %v6802_v61  ;;  %v7015_v54 = vadd.f32 %v6934_v36, %v6739_v15 }
 0x72d   : >> { %v14690_v26 = vpop.f32.mrf.mxu1  ;;  %v6938_v28 = vpop.f32.mrf.mxu0 }
 0x72e   : >> { %v7017_v38 = vadd.f32 %v6938_v28, %v6743_v29 }
 0x72f   : >> { %v7000_v21 = vpop.f32.mrf.mxu1  ;;  %v6940_v8 = vpop.f32.mrf.mxu0 }
 0x730   : >> { %v7022_v44 = vadd.f32 %v7000_v21, %v6805_v57  ;;  %v7018_v59 = vadd.f32 %v6940_v8, %v6745_v35 }
 0x731   : >> { %v14691_v23 = vpop.f32.mrf.mxu1  ;;  %v6942_v42 = vpop.f32.mrf.mxu0 }
 0x732   : >> { %v7020_v16 = vadd.f32 %v6942_v42, %v6747_v19 }
 0x733   : >> { %v7005_v46 = vpop.f32.mrf.mxu1  ;;  %v6944_v31 = vpop.f32.mrf.mxu0 }
 0x734   : >> { %v7025_v25 = vadd.f32 %v7005_v46, %v6810_v9  ;;  %v7021_v63 = vadd.f32 %v6944_v31, %v6749_v60 }
 0x735   : >> { %v14694_v45 = vpop.f32.mrf.mxu1  ;;  %v6948_v24 = vpop.f32.mrf.mxu0 }
 0x736   : >> { %v7023_v20 = vadd.f32 %v6948_v24, %v6753_v47 }
 0x737   : >> { %v7008_v39 = vpop.f32.mrf.mxu1  ;;  %v6950_v61 = vpop.f32.mrf.mxu0 }
 0x738   : >> { %v7024_v15 = vadd.f32 %v6950_v61, %v6755_v22 }
 0x739   : >> { %v14695_v17 = vpop.f32.mrf.mxu1  ;;  %v6952_v27 = vpop.f32.mrf.mxu0 }
 0x73b   : >> { %v7200_v29 = vpop.f32.mrf.mxu1  ;;  %v6953_v13 = vpop.f32.mrf.mxu0 }
 0x73c   : >> { %v7224_v55 = vadd.f32 %v7200_v29, %v7013_v53 }
 0x73d   : >> { %v14704_v57 = vpop.f32.mrf.mxu1  ;;  %v7139_v35 = vpop.f32.mrf.mxu0 }
 0x73e   : >> { %v7222_v12 = vadd.f32 %v7139_v35, %v7011_v40 }
 0x73f   : >> { %v7203_v51 = vpop.f32.mrf.mxu1  ;;  %v7141_v19 = vpop.f32.mrf.mxu0 }
 0x740   : >> { %v7227_v56 = vadd.f32 %v7203_v51, %v7016_v32  ;;  %v7223_v33 = vadd.f32 %v7141_v19, %v7012_v30 }
 0x741   : >> { %v14705_v9 = vpop.f32.mrf.mxu1  ;;  %v7143_v60 = vpop.f32.mrf.mxu0 }
 0x742   : >> { %v7225_v14 = vadd.f32 %v7143_v60, %v7014_v49 }
 0x743   : >> { %v7208_v6 = vpop.f32.mrf.mxu1  ;;  %v7145_v47 = vpop.f32.mrf.mxu0 }
 0x744   : >> { %v7230_v4 = vadd.f32 %v7208_v6, %v7019_v50  ;;  %v7226_v37 = vadd.f32 %v7145_v47, %v7015_v54 }
 0x745   : >> { %v14708_v22 = vpop.f32.mrf.mxu1  ;;  %v7149_v11 = vpop.f32.mrf.mxu0 }
 0x746   : >> { %v7228_v1 = vadd.f32 %v7149_v11, %v7017_v38 }
 0x747   : >> { %v7211_v52 = vpop.f32.mrf.mxu1  ;;  %v7151_v10 = vpop.f32.mrf.mxu0 }
 0x748   : >> { %v7233_v53 = vadd.f32 %v7211_v52, %v7022_v44  ;;  %v7229_v41 = vadd.f32 %v7151_v10, %v7018_v59 }
 0x749   : >> { %v14709_v18 = vpop.f32.mrf.mxu1  ;;  %v7153_v40 = vpop.f32.mrf.mxu0 }
 0x74a   : >> { %v7231_v0 = vadd.f32 %v7153_v40, %v7020_v16 }
 0x74b   : >> { %v7216_v62 = vpop.f32.mrf.mxu1  ;;  %v7155_v32 = vpop.f32.mrf.mxu0 }
 0x74c   : >> { %v7236_v30 = vadd.f32 %v7216_v62, %v7025_v25  ;;  %v7232_v5 = vadd.f32 %v7155_v32, %v7021_v63 }
 0x74d   : >> { %v14712_v36 = vpop.f32.mrf.mxu1  ;;  %v7159_v49 = vpop.f32.mrf.mxu0 }
 0x74e   : >> { %v7234_v26 = vadd.f32 %v7159_v49, %v7023_v20 }
 0x74f   : >> { %v7219_v28 = vpop.f32.mrf.mxu1  ;;  %v7161_v50 = vpop.f32.mrf.mxu0 }
 0x750   : >> { %v7235_v54 = vadd.f32 %v7161_v50, %v7024_v15 }
 0x751   : >> { %v14713_v21 = vpop.f32.mrf.mxu1  ;;  %v7163_v8 = vpop.f32.mrf.mxu0 }
 0x753   : >> { %v7411_v38 = vpop.f32.mrf.mxu1  ;;  %v7164_v23 = vpop.f32.mrf.mxu0 }
 0x754   : >> { %v7435_v42 = vadd.f32 %v7411_v38, %v7224_v55 }
 0x755   : >> { %v14722_v44 = vpop.f32.mrf.mxu1  ;;  %v7350_v59 = vpop.f32.mrf.mxu0 }
 0x756   : >> { %v7433_v46 = vadd.f32 %v7350_v59, %v7222_v12 }
 0x757   : >> { %v7414_v31 = vpop.f32.mrf.mxu1  ;;  %v7352_v16 = vpop.f32.mrf.mxu0 }
 0x758   : >> { %v7438_v45 = vadd.f32 %v7414_v31, %v7227_v56  ;;  %v7434_v24 = vadd.f32 %v7352_v16, %v7223_v33 }
 0x759   : >> { %v14723_v25 = vpop.f32.mrf.mxu1  ;;  %v7354_v63 = vpop.f32.mrf.mxu0 }
 0x75a   : >> { %v7436_v39 = vadd.f32 %v7354_v63, %v7225_v14 }
 0x75b   : >> { %v7419_v61 = vpop.f32.mrf.mxu1  ;;  %v7356_v20 = vpop.f32.mrf.mxu0 }
 0x75c   : >> { %v7441_v17 = vadd.f32 %v7419_v61, %v7230_v4  ;;  %v7437_v27 = vadd.f32 %v7356_v20, %v7226_v37 }
 0x75d   : >> { %v14726_v15 = vpop.f32.mrf.mxu1  ;;  %v7360_v29 = vpop.f32.mrf.mxu0 }
 0x75e   : >> { %v7439_v13 = vadd.f32 %v7360_v29, %v7228_v1 }
 0x75f   : >> { %v7422_v57 = vpop.f32.mrf.mxu1  ;;  %v7362_v35 = vpop.f32.mrf.mxu0 }
 0x760   : >> { %v7444_v55 = vadd.f32 %v7422_v57, %v7233_v53  ;;  %v7440_v51 = vadd.f32 %v7362_v35, %v7229_v41 }
 0x761   : >> { %v14727_v19 = vpop.f32.mrf.mxu1  ;;  %v7364_v12 = vpop.f32.mrf.mxu0 }
 0x762   : >> { %v7442_v9 = vadd.f32 %v7364_v12, %v7231_v0 }
 0x763   : >> { %v7427_v60 = vpop.f32.mrf.mxu1  ;;  %v7366_v56 = vpop.f32.mrf.mxu0 }
 0x764   : >> { %v7447_v33 = vadd.f32 %v7427_v60, %v7236_v30  ;;  %v7443_v6 = vadd.f32 %v7366_v56, %v7232_v5 }
 0x765   : >> { %v14730_v47 = vpop.f32.mrf.mxu1  ;;  %v7370_v14 = vpop.f32.mrf.mxu0 }
 0x766   : >> { %v7445_v22 = vadd.f32 %v7370_v14, %v7234_v26 }
 0x767   : >> { %v7430_v11 = vpop.f32.mrf.mxu1  ;;  %v7372_v4 = vpop.f32.mrf.mxu0 }
 0x768   : >> { %v7446_v37 = vadd.f32 %v7372_v4, %v7235_v54 }
 0x769   : >> { %v14731_v52 = vpop.f32.mrf.mxu1  ;;  %v7374_v10 = vpop.f32.mrf.mxu0 }
 0x76b   : >> { %v7622_v1 = vpop.f32.mrf.mxu1  ;;  %v7375_v18 = vpop.f32.mrf.mxu0 }
 0x76c   : >> { %v7646_v40 = vadd.f32 %v7622_v1, %v7435_v42 }
 0x76d   : >> { %v14740_v53 = vpop.f32.mrf.mxu1  ;;  %v7561_v41 = vpop.f32.mrf.mxu0 }
 0x76e   : >> { %v18488_v62 = vadd.f32 %v7561_v41, %v7433_v46 }
 0x76f   : >> { %v7625_v0 = vpop.f32.mrf.mxu1  ;;  %v7563_v32 = vpop.f32.mrf.mxu0 }
 0x770   : >> { %v18490_v36 = vadd.f32 %v7625_v0, %v7438_v45  ;;  %v18492_v30 = vadd.f32 %v7563_v32, %v7434_v24 }
 0x771   : >> { %v14741_v5 = vpop.f32.mrf.mxu1  ;;  %v7565_v49 = vpop.f32.mrf.mxu0 }
 0x772   : >> { %v18494_v26 = vadd.f32 %v7565_v49, %v7436_v39 }
 0x773   : >> { %v7630_v28 = vpop.f32.mrf.mxu1  ;;  %v7567_v50 = vpop.f32.mrf.mxu0 }
 0x774   : >> { %v18496_v54 = vadd.f32 %v7630_v28, %v7441_v17  ;;  %v18498_v21 = vadd.f32 %v7567_v50, %v7437_v27 }
 0x775   : >> { %v14744_v8 = vpop.f32.mrf.mxu1  ;;  %v7571_v38 = vpop.f32.mrf.mxu0 }
 0x776   : >> { %v18500_v23 = vadd.f32 %v7571_v38, %v7439_v13 }
 0x777   : >> { %v7633_v42 = vpop.f32.mrf.mxu1  ;;  %v7573_v44 = vpop.f32.mrf.mxu0 }
 0x778   : >> { %v18502_v59 = vadd.f32 %v7633_v42, %v7444_v55  ;;  %v18504_v46 = vadd.f32 %v7573_v44, %v7440_v51 }
 0x779   : >> { %v14745_v31 = vpop.f32.mrf.mxu1  ;;  %v7575_v16 = vpop.f32.mrf.mxu0 }
 0x77a   : >> { %v18506_v45 = vadd.f32 %v7575_v16, %v7442_v9 }
 0x77b   : >> { %v7638_v24 = vpop.f32.mrf.mxu1  ;;  %v7577_v25 = vpop.f32.mrf.mxu0 }
 0x77c   : >> { %v18508_v63 = vadd.f32 %v7638_v24, %v7447_v33  ;;  %v18510_v39 = vadd.f32 %v7577_v25, %v7443_v6 }
 0x77d   : >> { %v14748_v61 = vpop.f32.mrf.mxu1  ;;  %v7581_v20 = vpop.f32.mrf.mxu0 }
 0x77e   : >> { %v18512_v17 = vadd.f32 %v7581_v20, %v7445_v22 }
 0x77f   : >> { %v7641_v27 = vpop.f32.mrf.mxu1  ;;  %v7583_v15 = vpop.f32.mrf.mxu0 }
 0x780   : >> { %v18514_v29 = vadd.f32 %v7583_v15, %v7446_v37 }
 0x781   : >> { %v14749_v13 = vpop.f32.mrf.mxu1  ;;  %v7585_v57 = vpop.f32.mrf.mxu0 }
 0x783   : >> { %v7833_v35 = vpop.f32.mrf.mxu1  ;;  %v7586_v55 = vpop.f32.mrf.mxu0 }
 0x784   : >> { %v7857_v51 = vadd.f32 %v7833_v35, %v7646_v40 }
 0x785   : >> { %v14758_v19 = vpop.f32.mrf.mxu1  ;;  %v7772_v12 = vpop.f32.mrf.mxu0 }
 0x787   : >> { %v7836_v9 = vpop.f32.mrf.mxu1  ;;  %v7774_v60 = vpop.f32.mrf.mxu0 }
 0x789   : >> { %v14759_v56 = vpop.f32.mrf.mxu1  ;;  %v7776_v33 = vpop.f32.mrf.mxu0 }
 0x78b   : >> { %v7841_v6 = vpop.f32.mrf.mxu1  ;;  %v7778_v47 = vpop.f32.mrf.mxu0 }
 0x78d   : >> { %v14762_v14 = vpop.f32.mrf.mxu1  ;;  %v7782_v22 = vpop.f32.mrf.mxu0 }
 0x78f   : >> { %v7844_v11 = vpop.f32.mrf.mxu1  ;;  %v7784_v4 = vpop.f32.mrf.mxu0 }
 0x791   : >> { %v14763_v52 = vpop.f32.mrf.mxu1  ;;  %v7786_v37 = vpop.f32.mrf.mxu0 }
 0x793   : >> { %v7849_v10 = vpop.f32.mrf.mxu1  ;;  %v7788_v1 = vpop.f32.mrf.mxu0 }
 0x795   : >> { %v14766_v18 = vpop.f32.mrf.mxu1  ;;  %v7792_v53 = vpop.f32.mrf.mxu0 }
 0x796   : >> { %v7855_v18 = vadd.f32 %v7772_v12, %v18488_v62  ;;  %v7862_v62 = vadd.f32 %v7784_v4, %v18504_v46 }
 0x797   : >> { %v7852_v41 = vpop.f32.mrf.mxu1  ;;  %v7794_v40 = vpop.f32.mrf.mxu0 }
 0x798   : >> { %v7860_v41 = vadd.f32 %v7836_v9, %v18490_v36  ;;  %v8307_v9 = vpop.permute.xlu1 %8306 }
 0x799   : >> { %v14767_v0 = vpop.f32.mrf.mxu1  ;;  %v7796_v32 = vpop.f32.mrf.mxu0 }
 0x79a   : >> { %v7856_v0 = vadd.f32 %v7774_v60, %v18492_v30  ;;  %v7864_v30 = vadd.f32 %v7786_v37, %v18506_v45  ;;  %v18538_v60 = vadd.f32 %v7794_v40, %v18514_v29 }
 0x79b   : >> { %v8044_v5 = vpop.f32.mrf.mxu1  ;;  %v7797_v49 = vpop.f32.mrf.mxu0 }
 0x79c   : >> { %v8068_v32 = vadd.f32 %v8044_v5, %v7857_v51  ;;  %v8302_v49 = vpop.permute.xlu0 %8301  ;;  %v7869_v51 = vadd.f32 %v7849_v10, %v18508_v63 }
 0x79d   : >> { %v14776_v28 = vpop.f32.mrf.mxu1  ;;  %v7983_v50 = vpop.f32.mrf.mxu0 }
 0x79e   : >> { %v7858_v28 = vadd.f32 %v7776_v33, %v18494_v26  ;;  %v8066_v12 = vadd.f32 %v7983_v50, %v7855_v18  ;;  %v7865_v26 = vadd.f32 %v7788_v1, %v18510_v39 }
 0x79f   : >> { %v8047_v8 = vpop.f32.mrf.mxu1  ;;  %v7985_v38 = vpop.f32.mrf.mxu0 }
 0x7a1   : >> { %v14777_v42 = vpop.f32.mrf.mxu1  ;;  %v7987_v44 = vpop.f32.mrf.mxu0 }
 0x7a2   : >> { %v7863_v42 = vadd.f32 %v7841_v6, %v18496_v54  ;;  %v18535_v54 = vadd.f32 %v7792_v53, %v18512_v17  ;;  %v8067_v6 = vadd.f32 %v7985_v38, %v7856_v0  ;;  %v8312_v38 = vpop.permute.xlu1 %8311 }
 0x7a3   : >> { %v8052_v31 = vpop.f32.mrf.mxu1  ;;  %v7989_v16 = vpop.f32.mrf.mxu0 }
 0x7a5   : >> { %v14780_v24 = vpop.f32.mrf.mxu1  ;;  %v7993_v25 = vpop.f32.mrf.mxu0 }
 0x7a6   : >> { %v7859_v24 = vadd.f32 %v7778_v47, %v18498_v21  ;;  %v8069_v47 = vadd.f32 %v7987_v44, %v7858_v28 }
 0x7a7   : >> { %v8055_v61 = vpop.f32.mrf.mxu1  ;;  %v7995_v20 = vpop.f32.mrf.mxu0 }
 0x7a8   : >> { %v8073_v1 = vadd.f32 %v7995_v20, %v7862_v62 }
 0x7a9   : >> { %v14781_v27 = vpop.f32.mrf.mxu1  ;;  %v7997_v15 = vpop.f32.mrf.mxu0 }
 0x7aa   : >> { %v7861_v27 = vadd.f32 %v7782_v22, %v18500_v23  ;;  %v8074_v22 = vadd.f32 %v8052_v31, %v7863_v42  ;;  %v8075_v44 = vadd.f32 %v7997_v15, %v7864_v30 }
 0x7ab   : >> { %v8060_v13 = vpop.f32.mrf.mxu1  ;;  %v18516_v57 = vpop.f32.mrf.mxu0 }
 0x7ac   : >> { %v8072_v37 = vadd.f32 %v7993_v25, %v7861_v27  ;;  %v8080_v31 = vadd.f32 %v8060_v13, %v7869_v51  ;;  %v8076_v15 = vadd.f32 %v18516_v57, %v7865_v26 }
 0x7ad   : >> { %v14784_v35 = vpop.f32.mrf.mxu1  ;;  %v18518_v55 = vpop.f32.mrf.mxu0 }
 0x7af   : >> { %v8063_v19 = vpop.f32.mrf.mxu1  ;;  %v18520_v56 = vpop.f32.mrf.mxu0 }
 0x7b1   : >> { %v14785_v14 = vpop.f32.mrf.mxu1  ;;  %v8007_v52 = vpop.f32.mrf.mxu0 }
 0x7b2   : >> { %v7866_v14 = vadd.f32 %v7844_v11, %v18502_v59  ;;  %v8071_v59 = vadd.f32 %v8047_v8, %v7860_v41  ;;  %v8070_v11 = vadd.f32 %v7989_v16, %v7859_v24 }
 0x7b3   : >> { %v8255_v35 = vpop.f32.mrf.mxu1  ;;  %v8008_v19 = vpop.f32.mrf.mxu0 }
 0x7b4   : >> { %v8279_v36 = vadd.f32 %v8255_v35, %v8068_v32  ;;  %v8077_v10 = vadd.f32 %v8055_v61, %v7866_v14  ;;  %v8317_v19 = vpop.permute.xlu0 %8316 }
 0x7b5   : >> { %v14794_v21 = vpop.f32.mrf.mxu1  ;;  %v8194_v23 = vpop.f32.mrf.mxu0 }
 0x7b6   : >> { %v8326_v33 = vadd.f32 %v8302_v49, %v8279_v36  ;;  %v8277_v46 = vadd.f32 %v8194_v23, %v8066_v12 }
 0x7b7   : >> { %v8258_v45 = vpop.f32.mrf.mxu1  ;;  %v8196_v4 = vpop.f32.mrf.mxu0 }
 0x7b8   : >> { %vm8341_vm2 = vcmp.ge.f32.partialorder %v8326_v33, 0.0  ;;  %v8356_v63 = vmul.f32 %v8326_v33, %v17644_v7  ;;  %v8324_v39 = vadd.f32 %v8302_v49, %v8277_v46  ;;  %v8282_v17 = vadd.f32 %v8258_v45, %v8071_v59 }
 0x7b9   : >> { %v8278_v53 = vadd.f32 %v8196_v4, %v8067_v6  ;;  %v14795_v29 = vpop.f32.mrf.mxu1  ;;  %v8198_v40 = vpop.f32.mrf.mxu0 }
 0x7ba   : >> { %v18541_v41 = vsel %vm8341_vm2, %v8326_v33, %v8356_v63   ;;  %vm8339_vm7 = vcmp.ge.f32.partialorder %v8324_v39, 0.0  ;;  %v8354_v50 = vmul.f32 %v8324_v39, %v17644_v7  ;;  %v8329_v8 = vadd.f32 %v8307_v9, %v8282_v17 }
 0x7bb   : >> { %v21708_v5 = vmov %v18541_v41  ;;  %v8325_v16 = vadd.f32 %v8302_v49, %v8278_v53  ;;  %v8280_v52 = vadd.f32 %v8198_v40, %v8069_v47  ;;  %v8263_v18 = vpop.f32.mrf.mxu1  ;;  %v8200_v0 = vpop.f32.mrf.mxu0 }
 0x7bc   : >> { %v18544_v25 = vsel %vm8339_vm7, %v8324_v39, %v8354_v50   ;;  %vm8344_vm15 = vcmp.ge.f32.partialorder %v8329_v8, 0.0  ;;  %v8359_v61 = vmul.f32 %v8329_v8, %v17644_v7  ;;  %v8285_v20 = vadd.f32 %v8263_v18, %v8074_v22 }
 0x7bd   : >> { %v21709_v32 = vmov %v18544_v25  ;;  %vm8340_vm10 = vcmp.ge.f32.partialorder %v8325_v16, 0.0  ;;  %v8355_v41 = vmul.f32 %v8325_v16, %v17644_v7  ;;  %v8327_v28 = vadd.f32 %v8307_v9, %v8280_v52  ;;  %v14798_v24 = vpop.f32.mrf.mxu1  ;;  %v8204_v27 = vpop.f32.mrf.mxu0 }
 0x7be   : >> { %v8281_v42 = vadd.f32 %v8200_v0, %v8070_v11  ;;  %v18549_v45 = vsel %vm8344_vm15, %v8329_v8, %v8359_v61   ;;  %v8332_v49 = vadd.f32 %v8312_v38, %v8285_v20  ;;  %v8283_v35 = vadd.f32 %v8204_v27, %v8072_v37 }
 0x7bf   : >> { %v21710_v13 = vmov %v18549_v45  ;;  %v18551_v46 = vsel %vm8340_vm10, %v8325_v16, %v8355_v41   ;;  %vm8342_vm1 = vcmp.ge.f32.partialorder %v8327_v28, 0.0  ;;  %v8357_v25 = vmul.f32 %v8327_v28, %v17644_v7  ;;  %v8266_v12 = vpop.f32.mrf.mxu1  ;;  %v8206_v36 = vpop.f32.mrf.mxu0 }
 0x7c0   : >> { %v21711_v14 = vmov %v18551_v46  ;;  %v8328_v62 = vadd.f32 %v8307_v9, %v8281_v42  ;;  %vm8347_vm13 = vcmp.ge.f32.partialorder %v8332_v49, 0.0  ;;  %v8362_v30 = vmul.f32 %v8332_v49, %v17644_v7 }
 0x7c1   : >> { %v8330_v51 = vadd.f32 %v8312_v38, %v8283_v35  ;;  %v8288_v21 = vadd.f32 %v8266_v12, %v8077_v10  ;;  %v18555_v23 = vsel %vm8342_vm1, %v8327_v28, %v8357_v25   ;;  %v8284_v26 = vadd.f32 %v8206_v36, %v8073_v1  ;;  %v14799_v59 = vpop.f32.mrf.mxu1  ;;  %v8208_v33 = vpop.f32.mrf.mxu0 }
 0x7c2   : >> { %vm8343_vm3 = vcmp.ge.f32.partialorder %v8328_v62, 0.0  ;;  %v8358_v57 = vmul.f32 %v8328_v62, %v17644_v7  ;;  %v18558_v46 = vsel %vm8347_vm13, %v8332_v49, %v8362_v30   ;;  %v8078_v22 = vadd.f32 %v18518_v55, %v18535_v54  ;;  %v8322_v1 = vpop.permute.xlu1 %8321 }
 0x7c3   : >> { %v21712_v6 = vmov %v18558_v46  ;;  %vm8345_vm2 = vcmp.ge.f32.partialorder %v8330_v51, 0.0  ;;  %v8360_v9 = vmul.f32 %v8330_v51, %v17644_v7  ;;  %v8335_v47 = vadd.f32 %v8317_v19, %v8288_v21  ;;  %v8271_v63 = vpop.f32.mrf.mxu1  ;;  %v8210_v39 = vpop.f32.mrf.mxu0 }
 0x7c4   : >> { %v18563_v62 = vsel %vm8343_vm3, %v8328_v62, %v8358_v57   ;;  %v8331_v45 = vadd.f32 %v8312_v38, %v8284_v26  ;;  %v8286_v4 = vadd.f32 %v8208_v33, %v8075_v44  ;;  %v8291_v10 = vadd.f32 %v8271_v63, %v8080_v31  ;;  %v15474_v63 = vld [vmem:[%s21439_s9 + $0x18] ss:$0 sps:$4 sm:$0xff] (%p18577_p4)  }
 0x7c5   : >> { %v21713_v11 = vmov %v18563_v62  ;;  %v18565_v50 = vsel %vm8345_vm2, %v8330_v51, %v8360_v9   ;;  %vm8350_vm7 = vcmp.ge.f32.partialorder %v8335_v47, 0.0  ;;  %v8365_v17 = vmul.f32 %v8335_v47, %v17644_v7  ;;  %v8214_v8 = vpop.f32.mrf.mxu0  ;;  %v14802_v55 = vpop.f32.mrf.mxu1 }
 0x7c6   : >> { %v21714_v37 = vmov %v18565_v50  ;;  %vm8346_vm15 = vcmp.ge.f32.partialorder %v8331_v45, 0.0  ;;  %v8361_v53 = vmul.f32 %v8331_v45, %v17644_v7  ;;  %v8333_v29 = vadd.f32 %v8317_v19, %v8286_v4 }
 0x7c7   : >> { %v8287_v40 = vadd.f32 %v8210_v39, %v8076_v15  ;;  %v8079_v54 = vadd.f32 %v18520_v56, %v18538_v60  ;;  %v8380_v44 = vsel %vm8350_vm7, %v8335_v47, %v8365_v17   ;;  %v8338_v38 = vadd.f32 %v8322_v1, %v8291_v10  ;;  %v8216_v31 = vpop.f32.mrf.mxu0  ;;  %v8274_v0 = vpop.f32.mrf.mxu1 }
 0x7c8   : >> { %v8289_v16 = vadd.f32 %v8214_v8, %v8078_v22  ;;  %v8376_v52 = vsel %vm8346_vm15, %v8331_v45, %v8361_v53   ;;  %vm8348_vm10 = vcmp.ge.f32.partialorder %v8333_v29, 0.0  ;;  %v8363_v50 = vmul.f32 %v8333_v29, %v17644_v7  ;;  %v15471_v22 = vld [vmem:[%s21439_s9] sm:$0xff] (%p18577_p4)  }
 0x7c9   : >> { %v8334_v18 = vadd.f32 %v8317_v19, %v8287_v40  ;;  %vm8353_vm1 = vcmp.ge.f32.partialorder %v8338_v38, 0.0  ;;  %v8368_v61 = vmul.f32 %v8338_v38, %v17644_v7  ;;  %v8290_v41 = vadd.f32 %v8216_v31, %v8079_v54  ;;  %v8218_v56 = vpop.f32.mrf.mxu0  ;;  %v14803_v60 = vpop.f32.mrf.mxu1  ;;  %14810 = vmatprep.mubr.msk.bf16.mxu1 (%p18577_p4), %vm6492_vm0, %v15471_v22 }
 0x7ca   : >> { %v8336_v20 = vadd.f32 %v8322_v1, %v8289_v16  ;;  %v8378_v28 = vsel %vm8348_vm10, %v8333_v29, %v8363_v50   ;;  %v21719_v36 = vmov %v8380_v44  ;;  %v21722_v21 = vmov %v21712_v6 }
 0x7cb   : >> { %vm8349_vm13 = vcmp.ge.f32.partialorder %v8334_v18, 0.0  ;;  %v8364_v42 = vmul.f32 %v8334_v18, %v17644_v7  ;;  %v8383_v27 = vsel %vm8353_vm1, %v8338_v38, %v8368_v61   ;;  %v8337_v15 = vadd.f32 %v8322_v1, %v8290_v41  ;;  %v8219_v35 = vpop.f32.mrf.mxu0  ;;  %v8400_v21 = vld [vmem:[%s21440_s10] sm:$0xff] (%p18577_p4) }
 0x7cc   : >> { %vm8351_vm3 = vcmp.ge.f32.partialorder %v8336_v20, 0.0  ;;  %v8366_v24 = vmul.f32 %v8336_v20, %v17644_v7  ;;  %v21716_v39 = vmov %v8383_v27  ;;  %v21721_v38 = vmov %v8378_v28  ;;  %6210 = sbr.rel (!%p18577_p4) target bundleno = 1306 (0x51a), region = 167 }
 0x7cd   : >> { %v8379_v49 = vsel %vm8349_vm13, %v8334_v18, %v8364_v42   ;;  %vm8352_vm2 = vcmp.ge.f32.partialorder %v8337_v15, 0.0  ;;  %v8367_v25 = vmul.f32 %v8337_v15, %v17644_v7  ;;  %v21723_v18 = vmov %v8376_v52 }
 0x7ce   : >> { %v8381_v19 = vsel %vm8351_vm3, %v8336_v20, %v8366_v24   ;;  %v21720_v24 = vmov %v8379_v49  ;;  %v21724_v50 = vmov %v21714_v37  ;;  %v21725_v45 = vmov %v21710_v13 }
 0x7cf   : >> { %v8382_v12 = vsel %vm8352_vm2, %v8337_v15, %v8367_v25   ;;  %v21718_v17 = vmov %v8381_v19  ;;  %v21726_v62 = vmov %v21713_v11  ;;  %v21727_v30 = vmov %v18555_v23 }
 0x7d0   : >> { %v21717_v57 = vmov %v8382_v12  ;;  %v21728_v41 = vmov %v21708_v5  ;;  %v21729_v46 = vmov %v21711_v14  ;;  %v21730_v25 = vmov %v21709_v32 }
 0x7d1   : > { %v8398_v51 = vpack.c.bf16 %v8382_v12, %v8382_v12  ;;  %v8399_v26 = vpack.c.bf16 %v8383_v27, %v8383_v27  ;;  %v8397_v59 = vpack.c.bf16 %v8381_v19, %v8381_v19  ;;  %v8395_v33 = vpack.c.bf16 %v8379_v49, %v8376_v52  ;;  %v8401_v57 = vld [vmem:[%s21440_s10 + $0x8] sm:$0xff]  ;;  %v8404_v46 = vld [vmem:[%s21440_s10 + $0x20] sm:$0xff] }
 0x7d2   : > { %v21731_v9 = vmov 0   ;;  %v8396_v47 = vpack.c.bf16 %v8380_v44, %v21712_v6  ;;  %vm21732_vm7 = vcmask 1041408   ;;  %v8394_v62 = vpack.c.bf16 %v8378_v28, %v21714_v37  ;;  %v8403_v6 = vld [vmem:[%s21440_s10 + $0x18] sm:$0xff] }
 0x7d3   : > { %8514 = vmatprep.mubr.bf16.mxu0 %v21731_v9  ;;  %15469 = vset.pattern.permute.xlu0 %v21731_v9  ;;  %vm21733_vm15 = vmmov %vm21732_vm7  ;;  %v8392_v36 = vpack.c.bf16 %v21713_v11, %v21711_v14  ;;  %v8393_v30 = vpack.c.bf16 %v21710_v13, %v21708_v5  ;;  %v8402_v14 = vld [vmem:[%s21440_s10 + $0x10] sm:$0xff]  ;;  %v8391_v5 = vpack.c.bf16 %v18555_v23, %v21709_v32  ;;  %v15472_v13 = vld [vmem:[%s21439_s9 + $0x8] sm:$0xff]   ;;  %v21736_v45 = vmov 0.0  }
 0x7d4   : > { %13834 = vmatprep.subr.msk.bf16.mxu0 %vm21732_vm7, %v8398_v51  ;;  %15145 = vmatprep.subr.msk.bf16.mxu1 %vm21733_vm15, %v8399_v26  ;;  %vm21734_vm10 = vmmov %vm21732_vm7  ;;  %v15473_v11 = vld [vmem:[%s21439_s9 + $0x10] sm:$0xff]   ;;  %v8405_v23 = vld [vmem:[%s21440_s10 + $0x28] sm:$0xff] }
 0x7d5   : > { %v8474_v4 = vsel %vm21734_vm10, %v8397_v59, 0  ;;  %vm21735_vm5 = vmmov %vm21732_vm7  ;;  %8409 = vperm.xlu0 %15469, %v8400_v21   ;;  %15470 = vset.pattern.permute.xlu1 %v21731_v9  ;;  %v8406_v32 = vld [vmem:[%s21440_s10 + $0x30] sm:$0xff] }
 0x7d6   : > { %v8480_v2 = vsel %vm21735_vm5, %v8399_v26, 0  ;;  %8493 = vmatpush1.bf16.msra.mxu0 %v8474_v4  ;;  %8419 = vperm.xlu1 %15470, %v8402_v14  }
 0x7d7   : > { %14805 = vmatpush3.bf16.msra.mxu1 %v8480_v2  ;;  %8494 = vmatprep.subr.bf16.mxu0 %v8395_v33 }
 0x7d8   : > { %14806 = vmatprep.subr.bf16.mxu1 %v8396_v47 }
 0x7d9   : > { %8414 = vperm.xlu0 %15469, %v8401_v57  }
 0x7da   : > { %8495 = vmatpush1.bf16.msra.mxu0 %v8394_v62  ;;  %8424 = vperm.xlu1 %15470, %v8403_v6  }
 0x7db   : > { %14807 = vmatpush3.bf16.msra.mxu1 %v8396_v47  ;;  %8496 = vmatprep.subr.bf16.mxu0 %v8392_v36 }
 0x7dc   : > { %14808 = vmatprep.subr.bf16.mxu1 %v8393_v30 }
 0x7dd   : > { %8429 = vperm.xlu0 %15469, %v8404_v46  }
 0x7de   : > { %8497 = vmatpush1.bf16.msra.mxu0 %v8391_v5  ;;  %8434 = vperm.xlu1 %15470, %v8405_v23  }
 0x7df   : > { %14809 = vmatpush3.bf16.msra.mxu1 %v8393_v30  ;;  %14818 = vmatprep.subr.bf16.mxu0 %v21736_v45 }
 0x7e1   : > { %13835 = vmatmul.mubr.msk.bf16.vlgmr.msra.gmra.mxu0 %vm6492_vm0, %v15471_v22  ;;  %8439 = vperm.xlu0 %15469, %v8406_v32  }
 0x7e2   : > { %14811 = vmatmul.mubr.msk.bf16.vlgmr.msra.gmra.mxu1 %vm6492_vm0, %v15472_v13  ;;  %8524 = vmatprep.mubr.bf16.mxu0 %v21731_v9 }
 0x7e3   : > { %14814 = vmatprep.mubr.msk.bf16.mxu1 %vm6492_vm0, %v15473_v11 }
 0x7e9   : > { %13836 = vmatmul.mubr.msk.bf16.gmra.mxu0 %vm6492_vm0, %v15472_v13 }
 0x7ea   : > { %14815 = vmatmul.mubr.msk.bf16.gmra.mxu1 %vm6492_vm0, %v15474_v63  ;;  %8534 = vmatprep.mubr.bf16.mxu0 %v21731_v9 }
 0x7eb   : > { %9057 = vmatprep.mubr.bf16.mxu1 %v21731_v9 }
 0x7f1   : > { %13837 = vmatmul.mubr.msk.bf16.gmra.mxu0 %vm6492_vm0, %v15473_v11 }
 0x7f2   : > { %8544 = vmatprep.mubr.bf16.mxu0 %v21731_v9 }
 0x7f9   : > { %13838 = vmatmul.mubr.msk.bf16.gmra.mxu0 %vm6492_vm0, %v15474_v63 }
 0x7fa   : > { %14826 = vmatprep.mubr.msk.bf16.mxu0 %vm15671_vm11, %v21736_v45 }
 0x850   : > { %v8410_v39 = vpop.permute.xlu0 %8409 }
 0x851   : > { %v8420_v17 = vpop.permute.xlu1 %8419 }
 0x854   : > { %v8415_v37 = vpop.permute.xlu0 %8414 }
 0x855   : > { %v18688_v8 = vpop.permute.xlu1 %8424 }
 0x858   : > { %v18686_v53 = vpop.permute.xlu0 %8429 }
 0x85c   : > { %v18698_v60 = vpop.permute.xlu0 %8439 }
 0x8a1   : > { %v8516_v10 = vpop.f32.mrf.mxu0 }
 0x8a2   : > { %v14812_v1 = vpop.f32.mrf.mxu1  ;;  %v8517_v29 = vadd.f32 %v8516_v10, %v8410_v39 }
 0x8a3   : > { %v8596_v40 = vadd.f32 %v14812_v1, %v8420_v17  ;;  %v8518_v55 = vpop.f32.mrf.mxu0 }
 0x8a4   : > { %v8587_v54 = vpop.f32.mrf.mxu1  ;;  %vm8617_vm9 = vcmp.ge.f32.partialorder %v8517_v29, 0.0  ;;  %v8638_v44 = vmul.f32 %v8517_v29, %v17644_v7  ;;  %v8519_v16 = vadd.f32 %v8518_v55, %v8410_v39 }
 0x8a5   : > { %v8646_v38 = vmul.f32 %v8596_v40, %v17644_v7  ;;  %v8588_v52 = vadd.f32 %v8587_v54, %v8410_v39  ;;  %v8520_v50 = vpop.f32.mrf.mxu0  ;;  %vm8625_vm0 = vcmp.ge.f32.partialorder %v8596_v40, 0.0 }
 0x8a6   : > { %v14813_v18 = vpop.f32.mrf.mxu1  ;;  %vm8618_vm1 = vcmp.ge.f32.partialorder %v8519_v16, 0.0  ;;  %v8639_v31 = vmul.f32 %v8519_v16, %v17644_v7  ;;  %v8521_v0 = vadd.f32 %v8520_v50, %v8415_v37  ;;  %v8659_v56 = vsel %vm8617_vm9, %v8517_v29, %v8638_v44 }
 0x8a7   : > { %v18694_v61 = vadd.f32 %v14813_v18, %v18688_v8  ;;  %v8640_v20 = vmul.f32 %v8588_v52, %v17644_v7  ;;  %v8522_v41 = vpop.f32.mrf.mxu0  ;;  %v8667_v42 = vsel %vm8625_vm0, %v8596_v40, %v8646_v38  ;;  %vm8619_vm13 = vcmp.ge.f32.partialorder %v8588_v52, 0.0 }
 0x8a8   : > { %v8590_v28 = vpop.f32.mrf.mxu1  ;;  %vm8620_vm3 = vcmp.ge.f32.partialorder %v8521_v0, 0.0  ;;  %v8641_v27 = vmul.f32 %v8521_v0, %v17644_v7  ;;  %v8523_v24 = vadd.f32 %v8522_v41, %v8415_v37  ;;  %v8704_v19 = vmul.f32 %v8667_v42, %v17918_v48  ;;  %v8435_v41 = vpop.permute.xlu1 %8434 }
 0x8a9   : > { %v8591_v15 = vadd.f32 %v8590_v28, %v8415_v37  ;;  %v8526_v49 = vpop.f32.mrf.mxu0  ;;  %v8660_v25 = vsel %vm8618_vm1, %v8519_v16, %v8639_v31  ;;  %v8696_v12 = vmul.f32 %v8659_v56, %v17912_v34  ;;  %v8661_v51 = vsel %vm8619_vm13, %v8588_v52, %v8640_v20 }
 0x8aa   : > { %v14816_v35 = vpop.f32.mrf.mxu1  ;;  %v8642_v26 = vmul.f32 %v8523_v24, %v17644_v7  ;;  %v8527_v33 = vadd.f32 %v8526_v49, %v8420_v17  ;;  %v14045_v22 = vpack.c.bf16 %v8704_v19, %v8704_v19  ;;  %v8697_v62 = vmul.f32 %v8660_v25, %v17915_v58 }
 0x8ab   : > { %v8643_v59 = vmul.f32 %v8591_v15, %v17644_v7  ;;  %v18707_v47 = vadd.f32 %v14816_v35, %v18698_v60  ;;  %v8528_v4 = vpop.f32.mrf.mxu0  ;;  %v8698_v36 = vmul.f32 %v8661_v51, %v17918_v48  ;;  %vm8621_vm2 = vcmp.ge.f32.partialorder %v8523_v24, 0.0 }
 0x8ac   : > { %v8603_v2 = vpop.f32.mrf.mxu1  ;;  %vm8623_vm7 = vcmp.ge.f32.partialorder %v8527_v33, 0.0  ;;  %v8644_v30 = vmul.f32 %v8527_v33, %v17644_v7  ;;  %v8529_v57 = vadd.f32 %v8528_v4, %v8420_v17  ;;  %8786 = vrot.lane.b32.xlu0 %v14045_v22, %s15645_s19  ;;  %v14040_v13 = vpack.c.bf16 %v8697_v62, %v8696_v12 }
 0x8ad   : > { %v18714_v21 = vmul.f32 %v18707_v47, %v17644_v7  ;;  %v18718_v14 = vadd.f32 %v8603_v2, %v18686_v53  ;;  %v8530_v5 = vpop.f32.mrf.mxu0  ;;  %v14041_v46 = vpack.c.bf16 %v8698_v36, %v8698_v36  ;;  %v8662_v6 = vsel %vm8620_vm3, %v8521_v0, %v8641_v27 }
 0x8ae   : > { %v14817_v11 = vpop.f32.mrf.mxu1  ;;  %vm8624_vm15 = vcmp.ge.f32.partialorder %v8529_v57, 0.0  ;;  %v8645_v32 = vmul.f32 %v8529_v57, %v17644_v7  ;;  %v8531_v23 = vadd.f32 %v8530_v5, %v18688_v8  ;;  %v8663_v63 = vsel %vm8621_vm2, %v8523_v24, %v8642_v26  ;;  %8776 = vrot.lane.b32.xlu1 %v14040_v13, %s15645_s19 }
 0x8af   : > { %v18725_v39 = vmul.f32 %v18718_v14, %v17644_v7  ;;  %v8532_v37 = vpop.f32.mrf.mxu0  ;;  %v8699_v17 = vmul.f32 %v8662_v6, %v17912_v34  ;;  %v8700_v10 = vmul.f32 %v8663_v63, %v17915_v58  ;;  %vm8628_vm10 = vcmp.ge.f32.partialorder %v18694_v61, 0.0 }
 0x8b0   : > { %vm8626_vm5 = vcmp.ge.f32.partialorder %v8531_v23, 0.0  ;;  %v8647_v1 = vmul.f32 %v8531_v23, %v17644_v7  ;;  %v8533_v29 = vadd.f32 %v8532_v37, %v18688_v8  ;;  %v8649_v40 = vmul.f32 %v18694_v61, %v17644_v7  ;;  %8778 = vrot.lane.b32.xlu0 %v14041_v46, %s15645_s19  ;;  %v8606_v8 = vpop.f32.mrf.mxu1 }
 0x8b1   : > { %v8536_v55 = vpop.f32.mrf.mxu0  ;;  %v14042_v54 = vpack.c.bf16 %v8700_v10, %v8699_v17  ;;  %v8665_v44 = vsel %vm8623_vm7, %v8527_v33, %v8644_v30  ;;  %v8666_v38 = vsel %vm8624_vm15, %v8529_v57, %v8645_v32  ;;  %vm8622_vm9 = vcmp.ge.f32.partialorder %v8591_v15, 0.0 }
 0x8b2   : > { %vm8627_vm0 = vcmp.ge.f32.partialorder %v8533_v29, 0.0  ;;  %v8648_v16 = vmul.f32 %v8533_v29, %v17644_v7  ;;  %v8537_v52 = vadd.f32 %v8536_v55, %v18686_v53  ;;  %v8670_v50 = vsel %vm8628_vm10, %v18694_v61, %v8649_v40 }
 0x8b3   : > { %8780 = vrot.lane.b32.xlu1 %v14042_v54, %s15645_s19  ;;  %v8707_v18 = vmul.f32 %v8670_v50, %v17918_v48  ;;  %v8538_v31 = vpop.f32.mrf.mxu0  ;;  %v8702_v0 = vmul.f32 %v8665_v44, %v17912_v34  ;;  %v8703_v20 = vmul.f32 %v8666_v38, %v17915_v58  ;;  %v8664_v28 = vsel %vm8622_vm9, %v8591_v15, %v8643_v59 }
 0x8b4   : > { %vm8629_vm1 = vcmp.ge.f32.partialorder %v8537_v52, 0.0  ;;  %v8650_v42 = vmul.f32 %v8537_v52, %v17644_v7  ;;  %v8539_v56 = vadd.f32 %v8538_v31, %v18686_v53  ;;  %v8701_v27 = vmul.f32 %v8664_v28, %v17918_v48 }
 0x8b5   : > { %v14047_v61 = vpack.c.bf16 %v8707_v18, %v8707_v18  ;;  %v8540_v24 = vpop.f32.mrf.mxu0  ;;  %v14044_v49 = vpack.c.bf16 %v8703_v20, %v8702_v0  ;;  %v8607_v35 = vadd.f32 %v8606_v8, %v8435_v41  ;;  %v8668_v19 = vsel %vm8626_vm5, %v8531_v23, %v8647_v1 }
 0x8b6   : > { %vm8630_vm13 = vcmp.ge.f32.partialorder %v8539_v56, 0.0  ;;  %v8651_v25 = vmul.f32 %v8539_v56, %v17644_v7  ;;  %v8541_v12 = vadd.f32 %v8540_v24, %v8435_v41  ;;  %v14043_v51 = vpack.c.bf16 %v8701_v27, %v8701_v27 }
 0x8b7   : > { %8790 = vrot.lane.b32.xlu0 %v14047_v61, %s15645_s19  ;;  %8784 = vrot.lane.b32.xlu1 %v14044_v49, %s15645_s19  ;;  %v8542_v15 = vpop.f32.mrf.mxu0  ;;  %v8655_v53 = vmul.f32 %v8607_v35, %v17644_v7  ;;  %v8669_v26 = vsel %vm8627_vm0, %v8533_v29, %v8648_v16  ;;  %v8705_v59 = vmul.f32 %v8668_v19, %v17912_v34  ;;  %vm8637_vm3 = vcmp.ge.f32.partialorder %v18707_v47, 0.0 }
 0x8b8   : > { %v8543_v33 = vadd.f32 %v8542_v15, %v8435_v41  ;;  %v8706_v22 = vmul.f32 %v8669_v26, %v17915_v58  ;;  %v8679_v4 = vsel %vm8637_vm3, %v18707_v47, %v18714_v21  ;;  %v8671_v2 = vsel %vm8629_vm1, %v8537_v52, %v8650_v42 }
 0x8b9   : > { %v8546_v62 = vpop.f32.mrf.mxu0  ;;  %v8716_v36 = vmul.f32 %v8679_v4, %v17918_v48  ;;  %v8672_v30 = vsel %vm8630_vm13, %v8539_v56, %v8651_v25  ;;  %v8708_v57 = vmul.f32 %v8671_v2, %v17912_v34  ;;  %vm8631_vm2 = vcmp.ge.f32.partialorder %v18718_v14, 0.0 }
 0x8ba   : > { %vm8633_vm7 = vcmp.ge.f32.partialorder %v8543_v33, 0.0  ;;  %v8654_v5 = vmul.f32 %v8543_v33, %v17644_v7  ;;  %v8547_v13 = vadd.f32 %v8546_v62, %v18698_v60  ;;  %v14046_v46 = vpack.c.bf16 %v8706_v22, %v8705_v59 }
 0x8bb   : > { %8782 = vrot.lane.b32.xlu0 %v14043_v51, %s15645_s19  ;;  %v14053_v47 = vpack.c.bf16 %v8716_v36, %v8716_v36  ;;  %v8548_v21 = vpop.f32.mrf.mxu0  ;;  %v8709_v6 = vmul.f32 %v8672_v30, %v17915_v58  ;;  %v8673_v11 = vsel %vm8631_vm2, %v18718_v14, %v18725_v39  ;;  %vm8632_vm15 = vcmp.ge.f32.partialorder %v8541_v12, 0.0 }
 0x8bc   : > { %vm8635_vm10 = vcmp.ge.f32.partialorder %v8547_v13, 0.0  ;;  %v8656_v32 = vmul.f32 %v8547_v13, %v17644_v7  ;;  %8788 = vrot.lane.b32.xlu1 %v14046_v46, %s15645_s19  ;;  %v8549_v23 = vadd.f32 %v8548_v21, %v18698_v60  ;;  %v8710_v63 = vmul.f32 %v8673_v11, %v17918_v48 }
 0x8bd   : > { %v14048_v37 = vpack.c.bf16 %v8709_v6, %v8708_v57  ;;  %v8653_v17 = vmul.f32 %v8541_v12, %v17644_v7  ;;  %v8675_v10 = vsel %vm8633_vm7, %v8543_v33, %v8654_v5  ;;  %vm8634_vm5 = vcmp.ge.f32.partialorder %v8607_v35, 0.0  ;;  %v8550_v1 = vpop.f32.mrf.mxu0 }
 0x8be   : > { %vm8636_vm9 = vcmp.ge.f32.partialorder %v8549_v23, 0.0  ;;  %v8657_v14 = vmul.f32 %v8549_v23, %v17644_v7  ;;  %v8712_v39 = vmul.f32 %v8675_v10, %v17915_v58  ;;  %v8676_v40 = vsel %vm8634_vm5, %v8607_v35, %v8655_v53 }
 0x8bf   : > { %8802 = vrot.lane.b32.xlu0 %v14053_v47, %s15645_s19  ;;  %v8674_v29 = vsel %vm8632_vm15, %v8541_v12, %v8653_v17  ;;  %v8677_v60 = vsel %vm8635_vm10, %v8547_v13, %v8656_v32  ;;  %v8551_v55 = vpop.f32.mrf.mxu0  ;;  %v8713_v44 = vmul.f32 %v8676_v40, %v17918_v48  ;;  %v14049_v16 = vpack.c.bf16 %v8710_v63, %v8710_v63 }
 0x8c0   : > { %8792 = vrot.lane.b32.xlu1 %v14048_v37, %s15645_s19  ;;  %v8711_v54 = vmul.f32 %v8674_v29, %v17912_v34  ;;  %v8678_v38 = vsel %vm8636_vm9, %v8549_v23, %v8657_v14  ;;  %v8714_v50 = vmul.f32 %v8677_v60, %v17912_v34  ;;  %vm21864_vm9 = vcmask 1031168  }
 0x8c1   : > { %v8715_v52 = vmul.f32 %v8678_v38, %v17915_v58  ;;  %v14051_v8 = vpack.c.bf16 %v8713_v44, %v8713_v44 }
 0x8c2   : > { %v14050_v7 = vpack.c.bf16 %v8712_v39, %v8711_v54 }
 0x8c3   : > { %8794 = vrot.lane.b32.xlu0 %v14049_v16, %s15645_s19  ;;  %v14052_v18 = vpack.c.bf16 %v8715_v52, %v8714_v50 }
 0x8c4   : > { %8796 = vrot.lane.b32.xlu1 %v14050_v7, %s15645_s19 }
 0x8c7   : > { %8798 = vrot.lane.b32.xlu0 %v14051_v8, %s15645_s19 }
 0x8c8   : > { %8800 = vrot.lane.b32.xlu1 %v14052_v18, %s15645_s19  ;;  %s21737_s19 = smov 103  }
 0x91e   : > { %v8787_v31 = vpop.permute.xlu0 %8786 }
 0x91f   : > { %v8809_v27 = vrot.slane %v8787_v31, 4 }
 0x920   : > { %v8777_v0 = vpop.permute.xlu1 %8776 }
 0x921   : > { %v8804_v48 = vrot.slane %v8777_v0, 4 }
 0x922   : > { %v8779_v20 = vpop.permute.xlu0 %8778 }
 0x923   : > { %v8818_v41 = vsel %vm485_vm4, %v8804_v48, %v8777_v0  ;;  %v8805_v58 = vrot.slane %v8779_v20, 4 }
 0x924   : > { %8855 = vst.msk [vmem:[#allocation2] sm:$0xff] %vm17936_vm14, %v8818_v41 }
 0x925   : > { %v8781_v34 = vpop.permute.xlu1 %8780  ;;  %v8819_v28 = vsel %vm487_vm8, %v8804_v48, %v8805_v58 }
 0x926   : > { %v8806_v42 = vrot.slane %v8781_v34, 4  ;;  %v8820_v56 = vsel %vm485_vm4, %v8819_v28, %v8779_v20 }
 0x927   : > { %8858 = vst.msk [vmem:[#allocation2 + $0x8] sm:$0xff] %vm17947_vm6, %v8820_v56 }
 0x928   : > { %v8821_v61 = vsel %vm485_vm4, %v8806_v42, %v8781_v34 }
 0x929   : > { %8859 = vst.msk [vmem:[#allocation2 + $0x10] sm:$0xff] %vm17936_vm14, %v8821_v61  ;;  %v8791_v24 = vpop.permute.xlu0 %8790  ;;  %v8785_v49 = vpop.permute.xlu1 %8784 }
 0x92a   : > { %v8808_v35 = vrot.slane %v8785_v49, 4  ;;  %v8811_v15 = vrot.slane %v8791_v24, 4 }
 0x92b   : > { %v8873_v33 = vld [vmem:[#allocation2] sm:$0xff] }
 0x92c   : > { %v8824_v19 = vsel %vm485_vm4, %v8808_v35, %v8785_v49  ;;  %v8825_v25 = vsel %vm487_vm8, %v8808_v35, %v8809_v27 }
 0x92d   : > { %v8826_v12 = vsel %vm485_vm4, %v8825_v25, %v8787_v31  ;;  %8861 = vst.msk [vmem:[#allocation2 + $0x20] sm:$0xff] %vm17936_vm14, %v8824_v19  ;;  %v8783_v51 = vpop.permute.xlu0 %8782 }
 0x92e   : > { %8862 = vst.msk [vmem:[#allocation2 + $0x28] sm:$0xff] %vm17947_vm6, %v8826_v12  ;;  %v8807_v53 = vrot.slane %v8783_v51, 4  ;;  %v8789_v26 = vpop.permute.xlu1 %8788  ;;  %v8890_v3 = vld [vmem:[#allocation2 + $0x8] sm:$0xff] }
 0x92f   : > { %v8810_v59 = vrot.slane %v8789_v26, 4 }
 0x930   : > { %v8875_v22 = vld [vmem:[#allocation2 + $0x10] sm:$0xff]  ;;  %v8822_v4 = vsel %vm487_vm8, %v8806_v42, %v8807_v53 }
 0x931   : > { %v18807_v2 = vcombine.low %v8873_v33, %v8875_v22  ;;  %v18809_v62 = vcombine.high %v8873_v33, %v8875_v22  ;;  %v8823_v36 = vsel %vm485_vm4, %v8822_v4, %v8783_v51  ;;  %v8827_v30 = vsel %vm485_vm4, %v8810_v59, %v8789_v26  ;;  %v8803_v57 = vpop.permute.xlu0 %8802 }
 0x932   : > { %8860 = vst.msk [vmem:[#allocation2 + $0x18] sm:$0xff] %vm17947_vm6, %v8823_v36  ;;  %v8828_v5 = vsel %vm487_vm8, %v8810_v59, %v8811_v15  ;;  %v8793_v13 = vpop.permute.xlu1 %8792  ;;  %v8817_v14 = vrot.slane %v8803_v57, 4 }
 0x933   : > { %8863 = vst.msk [vmem:[#allocation2 + $0x30] sm:$0xff] %vm17936_vm14, %v8827_v30  ;;  %v8829_v46 = vsel %vm485_vm4, %v8828_v5, %v8791_v24  ;;  %v8812_v47 = vrot.slane %v8793_v13, 4  ;;  %8962 = vrot.lane.b32.xlu0 %v18809_v62, %s15646_s22  ;;  %8960 = vrot.lane.b32.xlu1 %v18807_v2, %s15646_s22 }
 0x934   : > { %8864 = vst.msk [vmem:[#allocation2 + $0x38] sm:$0xff] %vm17947_vm6, %v8829_v46  ;;  %v8877_v52 = vld [vmem:[#allocation2 + $0x20] sm:$0xff] }
 0x935   : > { %v8830_v21 = vsel %vm485_vm4, %v8812_v47, %v8793_v13  ;;  %v8795_v6 = vpop.permute.xlu0 %8794  ;;  %v8892_v0 = vld [vmem:[#allocation2 + $0x28] sm:$0xff] }
 0x936   : > { %8865 = vst.msk [vmem:[#allocation2 + $0x40] sm:$0xff] %vm17936_vm14, %v8830_v21  ;;  %v8813_v11 = vrot.slane %v8795_v6, 4  ;;  %v8797_v32 = vpop.permute.xlu1 %8796 }
 0x937   : > { %v8814_v23 = vrot.slane %v8797_v32, 4  ;;  %9247 = vrot.lane.b32.xlu0 %v18809_v62, %s15647_s23  ;;  %9245 = vrot.lane.b32.xlu1 %v18807_v2, %s15647_s23 }
 0x938   : > { %v8831_v63 = vsel %vm487_vm8, %v8812_v47, %v8813_v11 }
 0x939   : > { %v8832_v37 = vsel %vm485_vm4, %v8831_v63, %v8795_v6  ;;  %v8833_v17 = vsel %vm485_vm4, %v8814_v23, %v8797_v32  ;;  %v8799_v10 = vpop.permute.xlu0 %8798  ;;  %v8891_v43 = vld [vmem:[#allocation2 + $0x18] sm:$0xff] }
 0x93a   : > { %8866 = vst.msk [vmem:[#allocation2 + $0x48] sm:$0xff] %vm17947_vm6, %v8832_v37  ;;  %v8801_v1 = vpop.permute.xlu1 %8800  ;;  %v8815_v39 = vrot.slane %v8799_v10, 4  ;;  %v18878_v38 = vcombine.high %v8890_v3, %v8891_v43  ;;  %v18888_v16 = vcombine.low %v8890_v3, %v8891_v43  ;;  %v8879_v7 = vld [vmem:[#allocation2 + $0x30] sm:$0xff] }
 0x93b   : > { %8867 = vst.msk [vmem:[#allocation2 + $0x50] sm:$0xff] %vm17936_vm14, %v8833_v17  ;;  %v8816_v29 = vrot.slane %v8801_v1, 4  ;;  %9410 = vrot.lane.b32.xlu0 %v18809_v62, %s15648_s24  ;;  %9408 = vrot.lane.b32.xlu1 %v18807_v2, %s15648_s24  ;;  %v18926_v50 = vcombine.high %v8877_v52, %v8879_v7  ;;  %v18928_v8 = vcombine.low %v8877_v52, %v8879_v7  ;;  %v8893_v48 = vld [vmem:[#allocation2 + $0x38] sm:$0xff] }
 0x93c   : > { %v8834_v40 = vsel %vm487_vm8, %v8814_v23, %v8815_v39  ;;  %v18974_v20 = vcombine.high %v8892_v0, %v8893_v48  ;;  %v18980_v34 = vcombine.low %v8892_v0, %v8893_v48 }
 0x93d   : > { %v8836_v60 = vsel %vm485_vm4, %v8816_v29, %v8801_v1  ;;  %v8837_v55 = vsel %vm487_vm8, %v8816_v29, %v8817_v14  ;;  %v8835_v54 = vsel %vm485_vm4, %v8834_v40, %v8799_v10  ;;  %v8881_v36 = vld [vmem:[#allocation2 + $0x40] sm:$0xff] }
 0x93e   : > { %v8838_v44 = vsel %vm485_vm4, %v8837_v55, %v8803_v57  ;;  %8869 = vst.msk [vmem:[#allocation2 + $0x60] sm:$0xff] %vm17936_vm14, %v8836_v60  ;;  %vm21851_vm4 = vcmask 1039360  }
 0x93f   : > { %8868 = vst.msk [vmem:[#allocation2 + $0x58] sm:$0xff] %vm17947_vm6, %v8835_v54  ;;  %8870 = vst.msk [vmem:[#allocation2 + $0x68] sm:$0xff] %vm17947_vm6, %v8838_v44  ;;  %9573 = vrot.lane.b32.xlu0 %v18809_v62, %s15649_s25  ;;  %9571 = vrot.lane.b32.xlu1 %v18807_v2, %s15649_s25 }
 0x940   : > { %vm21852_vm14 = vmmov %vm21851_vm4 }
 0x941   : > { %v8894_v44 = vld [vmem:[#allocation2 + $0x48] sm:$0xff]  ;;  %vm21853_vm6 = vmmov %vm21851_vm4 }
 0x942   : > { %v8883_v22 = vld [vmem:[#allocation2 + $0x50] sm:$0xff]  ;;  %vm21854_vm0 = vmmov %vm21851_vm4 }
 0x943   : > { %9736 = vrot.lane.b32.xlu0 %v18809_v62, %s15650_s26  ;;  %9734 = vrot.lane.b32.xlu1 %v18807_v2, %s15650_s26  ;;  %v19058_v30 = vcombine.high %v8881_v36, %v8883_v22  ;;  %v19062_v5 = vcombine.low %v8881_v36, %v8883_v22  ;;  %vm21855_vm1 = vmmov %vm21854_vm0 }
 0x944   : > { %vm21856_vm13 = vmmov %vm21854_vm0 }
 0x945   : > { %vm21857_vm3 = vmmov %vm21854_vm0 }
 0x946   : > { %v8895_v55 = vld [vmem:[#allocation2 + $0x58] sm:$0xff]  ;;  %vm21858_vm2 = vmmov %vm21854_vm0 }
 0x947   : > { %9899 = vrot.lane.b32.xlu0 %v18809_v62, %s21737_s19  ;;  %9897 = vrot.lane.b32.xlu1 %v18807_v2, %s21737_s19  ;;  %v19142_v43 = vcombine.high %v8894_v44, %v8895_v55  ;;  %v19154_v0 = vcombine.low %v8894_v44, %v8895_v55  ;;  %vm21859_vm7 = vmmov %vm21854_vm0 }
 0x948   : > { %vm21860_vm15 = vmmov %vm21854_vm0 }
 0x949   : > { %vm21862_vm10 = vmmov %vm21854_vm0 }
 0x94a   : > { %vm21863_vm5 = vmmov %vm21854_vm0 }
 0x94b   : > { %10062 = vrot.lane.b32.xlu0 %v18809_v62, %s21738_s28  ;;  %10060 = vrot.lane.b32.xlu1 %v18807_v2, %s21738_s28 }
 0x94f   : > { %10225 = vrot.lane.b32.xlu0 %v18809_v62, %s21739_s2  ;;  %10223 = vrot.lane.b32.xlu1 %v18807_v2, %s21739_s2 }
 0x953   : > { %10388 = vrot.lane.b32.xlu0 %v18809_v62, %s21740_s20  ;;  %10386 = vrot.lane.b32.xlu1 %v18807_v2, %s21740_s20 }
 0x957   : > { %8966 = vrot.lane.b32.xlu0 %v18878_v38, %s15646_s22  ;;  %10551 = vrot.lane.b32.xlu1 %v18809_v62, %s21741_s15 }
 0x95b   : > { %9251 = vrot.lane.b32.xlu0 %v18878_v38, %s15647_s23  ;;  %10549 = vrot.lane.b32.xlu1 %v18807_v2, %s21741_s15 }
 0x95f   : > { %9414 = vrot.lane.b32.xlu0 %v18878_v38, %s15648_s24  ;;  %8964 = vrot.lane.b32.xlu1 %v18888_v16, %s15646_s22 }
 0x963   : > { %9577 = vrot.lane.b32.xlu0 %v18878_v38, %s15649_s25  ;;  %9249 = vrot.lane.b32.xlu1 %v18888_v16, %s15647_s23 }
 0x967   : > { %9740 = vrot.lane.b32.xlu0 %v18878_v38, %s15650_s26  ;;  %9412 = vrot.lane.b32.xlu1 %v18888_v16, %s15648_s24 }
 0x96b   : > { %9903 = vrot.lane.b32.xlu0 %v18878_v38, %s21737_s19  ;;  %9575 = vrot.lane.b32.xlu1 %v18888_v16, %s15649_s25 }
 0x96f   : > { %10066 = vrot.lane.b32.xlu0 %v18878_v38, %s21738_s28  ;;  %9738 = vrot.lane.b32.xlu1 %v18888_v16, %s15650_s26 }
 0x973   : > { %10229 = vrot.lane.b32.xlu0 %v18878_v38, %s21739_s2  ;;  %9901 = vrot.lane.b32.xlu1 %v18888_v16, %s21737_s19 }
 0x977   : > { %10392 = vrot.lane.b32.xlu0 %v18878_v38, %s21740_s20  ;;  %10064 = vrot.lane.b32.xlu1 %v18888_v16, %s21738_s28 }
 0x97b   : > { %10553 = vrot.lane.b32.xlu0 %v18888_v16, %s21741_s15  ;;  %10227 = vrot.lane.b32.xlu1 %v18888_v16, %s21739_s2 }
 0x97f   : > { %10555 = vrot.lane.b32.xlu0 %v18878_v38, %s21741_s15  ;;  %10390 = vrot.lane.b32.xlu1 %v18888_v16, %s21740_s20 }
 0x983   : > { %8970 = vrot.lane.b32.xlu0 %v18926_v50, %s15646_s22  ;;  %8968 = vrot.lane.b32.xlu1 %v18928_v8, %s15646_s22 }
 0x987   : > { %9255 = vrot.lane.b32.xlu0 %v18926_v50, %s15647_s23  ;;  %9253 = vrot.lane.b32.xlu1 %v18928_v8, %s15647_s23 }
 0x98b   : > { %9418 = vrot.lane.b32.xlu0 %v18926_v50, %s15648_s24  ;;  %9416 = vrot.lane.b32.xlu1 %v18928_v8, %s15648_s24 }
 0x98f   : > { %9581 = vrot.lane.b32.xlu0 %v18926_v50, %s15649_s25  ;;  %9579 = vrot.lane.b32.xlu1 %v18928_v8, %s15649_s25 }
 0x993   : > { %9744 = vrot.lane.b32.xlu0 %v18926_v50, %s15650_s26  ;;  %9742 = vrot.lane.b32.xlu1 %v18928_v8, %s15650_s26 }
 0x997   : > { %9907 = vrot.lane.b32.xlu0 %v18926_v50, %s21737_s19  ;;  %9905 = vrot.lane.b32.xlu1 %v18928_v8, %s21737_s19 }
 0x99b   : > { %10070 = vrot.lane.b32.xlu0 %v18926_v50, %s21738_s28  ;;  %10068 = vrot.lane.b32.xlu1 %v18928_v8, %s21738_s28 }
 0x99f   : > { %10233 = vrot.lane.b32.xlu0 %v18926_v50, %s21739_s2  ;;  %10231 = vrot.lane.b32.xlu1 %v18928_v8, %s21739_s2 }
 0x9a3   : > { %10396 = vrot.lane.b32.xlu0 %v18926_v50, %s21740_s20  ;;  %10559 = vrot.lane.b32.xlu1 %v18926_v50, %s21741_s15 }
 0x9a5   : > { %v18966_v18 = vpop.permute.xlu0 %8962  ;;  %v18968_v31 = vpop.permute.xlu1 %8960 }
 0x9a7   : > { %10394 = vrot.lane.b32.xlu0 %v18928_v8, %s21740_s20  ;;  %10557 = vrot.lane.b32.xlu1 %v18928_v8, %s21741_s15 }
 0x9a9   : > { %v18976_v41 = vpop.permute.xlu0 %9247  ;;  %v18978_v58 = vpop.permute.xlu1 %9245 }
 0x9ab   : > { %8974 = vrot.lane.b32.xlu0 %v18974_v20, %s15646_s22  ;;  %8972 = vrot.lane.b32.xlu1 %v18980_v34, %s15646_s22 }
 0x9ad   : > { %v18986_v28 = vpop.permute.xlu0 %9410  ;;  %v18988_v42 = vpop.permute.xlu1 %9408 }
 0x9ae   : > { %21742 = vst [vmem:[#allocation8_spill] sm:$0xff] %v18986_v28  ;;  %21743 = vst [vmem:[#allocation7_spill] sm:$0xff] %v18988_v42 }
 0x9af   : > { %9259 = vrot.lane.b32.xlu0 %v18974_v20, %s15647_s23  ;;  %9257 = vrot.lane.b32.xlu1 %v18980_v34, %s15647_s23 }
 0x9b1   : > { %v18994_v56 = vpop.permute.xlu0 %9573  ;;  %v18996_v27 = vpop.permute.xlu1 %9571 }
 0x9b2   : > { %21744 = vst [vmem:[#allocation4_spill] sm:$0xff] %v18994_v56  ;;  %21745 = vst [vmem:[#allocation5_spill] sm:$0xff] %v18996_v27 }
 0x9b3   : > { %9422 = vrot.lane.b32.xlu0 %v18974_v20, %s15648_s24  ;;  %9420 = vrot.lane.b32.xlu1 %v18980_v34, %s15648_s24 }
 0x9b5   : > { %v19002_v61 = vpop.permute.xlu0 %9736  ;;  %v19004_v24 = vpop.permute.xlu1 %9734 }
 0x9b6   : > { %21746 = vst [vmem:[#allocation6_spill] sm:$0xff] %v19002_v61  ;;  %21747 = vst [vmem:[#allocation9_spill] sm:$0xff] %v19004_v24 }
 0x9b7   : > { %9585 = vrot.lane.b32.xlu0 %v18974_v20, %s15649_s25  ;;  %9583 = vrot.lane.b32.xlu1 %v18980_v34, %s15649_s25 }
 0x9b9   : > { %v19010_v49 = vpop.permute.xlu0 %9899  ;;  %v19012_v35 = vpop.permute.xlu1 %9897 }
 0x9ba   : > { %21748 = vst [vmem:[#allocation10_spill] sm:$0xff] %v19010_v49  ;;  %21749 = vst [vmem:[#allocation11_spill] sm:$0xff] %v19012_v35 }
 0x9bb   : > { %9748 = vrot.lane.b32.xlu0 %v18974_v20, %s15650_s26  ;;  %9746 = vrot.lane.b32.xlu1 %v18980_v34, %s15650_s26 }
 0x9bd   : > { %v19018_v19 = vpop.permute.xlu0 %10062  ;;  %v19020_v25 = vpop.permute.xlu1 %10060 }
 0x9be   : > { %21750 = vst [vmem:[#allocation12_spill] sm:$0xff] %v19018_v19  ;;  %21751 = vst [vmem:[#allocation13_spill] sm:$0xff] %v19020_v25 }
 0x9bf   : > { %9911 = vrot.lane.b32.xlu0 %v18974_v20, %s21737_s19  ;;  %9909 = vrot.lane.b32.xlu1 %v18980_v34, %s21737_s19 }
 0x9c1   : > { %v19026_v12 = vpop.permute.xlu0 %10225  ;;  %v19028_v51 = vpop.permute.xlu1 %10223 }
 0x9c2   : > { %21752 = vst [vmem:[#allocation14_spill] sm:$0xff] %v19026_v12  ;;  %21753 = vst [vmem:[#allocation15_spill] sm:$0xff] %v19028_v51 }
 0x9c3   : > { %10074 = vrot.lane.b32.xlu0 %v18974_v20, %s21738_s28  ;;  %10072 = vrot.lane.b32.xlu1 %v18980_v34, %s21738_s28 }
 0x9c5   : > { %v19034_v15 = vpop.permute.xlu0 %10388  ;;  %v19036_v53 = vpop.permute.xlu1 %10386 }
 0x9c6   : > { %21754 = vst [vmem:[#allocation16_spill] sm:$0xff] %v19034_v15  ;;  %21755 = vst [vmem:[#allocation17_spill] sm:$0xff] %v19036_v53 }
 0x9c7   : > { %10237 = vrot.lane.b32.xlu0 %v18974_v20, %s21739_s2  ;;  %10235 = vrot.lane.b32.xlu1 %v18980_v34, %s21739_s2 }
 0x9c9   : > { %v19042_v26 = vpop.permute.xlu0 %8966  ;;  %v19044_v59 = vpop.permute.xlu1 %10551 }
 0x9ca   : > { %21756 = vst [vmem:[#allocation18_spill] sm:$0xff] %v19044_v59 }
 0x9cb   : > { %10561 = vrot.lane.b32.xlu0 %v18980_v34, %s21741_s15  ;;  %10398 = vrot.lane.b32.xlu1 %v18980_v34, %s21740_s20 }
 0x9cd   : > { %v19050_v33 = vpop.permute.xlu0 %9251  ;;  %v19052_v4 = vpop.permute.xlu1 %10549 }
 0x9ce   : > { %21757 = vst [vmem:[#allocation19_spill] sm:$0xff] %v19052_v4 }
 0x9cf   : > { %10563 = vrot.lane.b32.xlu0 %v18974_v20, %s21741_s15  ;;  %10400 = vrot.lane.b32.xlu1 %v18974_v20, %s21740_s20 }
 0x9d1   : > { %v19060_v57 = vpop.permute.xlu0 %9414  ;;  %v19064_v13 = vpop.permute.xlu1 %8964 }
 0x9d2   : > { %21758 = vst [vmem:[#allocation20_spill] sm:$0xff] %v19060_v57 }
 0x9d3   : > { %8978 = vrot.lane.b32.xlu0 %v19058_v30, %s15646_s22  ;;  %8976 = vrot.lane.b32.xlu1 %v19062_v5, %s15646_s22 }
 0x9d5   : > { %v19070_v46 = vpop.permute.xlu0 %9577  ;;  %v19072_v47 = vpop.permute.xlu1 %9249 }
 0x9d6   : > { %21759 = vst [vmem:[#allocation21_spill] sm:$0xff] %v19070_v46 }
 0x9d7   : > { %9263 = vrot.lane.b32.xlu0 %v19058_v30, %s15647_s23  ;;  %9261 = vrot.lane.b32.xlu1 %v19062_v5, %s15647_s23 }
 0x9d9   : > { %v19078_v21 = vpop.permute.xlu0 %9740  ;;  %v19080_v6 = vpop.permute.xlu1 %9412 }
 0x9da   : > { %21760 = vst [vmem:[#allocation22_spill] sm:$0xff] %v19078_v21  ;;  %21761 = vst [vmem:[#allocation23_spill] sm:$0xff] %v19080_v6 }
 0x9db   : > { %9426 = vrot.lane.b32.xlu0 %v19058_v30, %s15648_s24  ;;  %9424 = vrot.lane.b32.xlu1 %v19062_v5, %s15648_s24 }
 0x9dd   : > { %v19086_v11 = vpop.permute.xlu0 %9903  ;;  %v19088_v32 = vpop.permute.xlu1 %9575 }
 0x9de   : > { %21762 = vst [vmem:[#allocation24_spill] sm:$0xff] %v19086_v11  ;;  %21763 = vst [vmem:[#allocation25_spill] sm:$0xff] %v19088_v32 }
 0x9df   : > { %9589 = vrot.lane.b32.xlu0 %v19058_v30, %s15649_s25  ;;  %9587 = vrot.lane.b32.xlu1 %v19062_v5, %s15649_s25 }
 0x9e1   : > { %v19094_v23 = vpop.permute.xlu0 %10066  ;;  %v19096_v63 = vpop.permute.xlu1 %9738 }
 0x9e2   : > { %21764 = vst [vmem:[#allocation26_spill] sm:$0xff] %v19094_v23  ;;  %21765 = vst [vmem:[#allocation27_spill] sm:$0xff] %v19096_v63 }
 0x9e3   : > { %9752 = vrot.lane.b32.xlu0 %v19058_v30, %s15650_s26  ;;  %9750 = vrot.lane.b32.xlu1 %v19062_v5, %s15650_s26 }
 0x9e5   : > { %v19102_v37 = vpop.permute.xlu0 %10229  ;;  %v19104_v17 = vpop.permute.xlu1 %9901 }
 0x9e6   : > { %21766 = vst [vmem:[#allocation28_spill] sm:$0xff] %v19102_v37  ;;  %21767 = vst [vmem:[#allocation29_spill] sm:$0xff] %v19104_v17 }
 0x9e7   : > { %9915 = vrot.lane.b32.xlu0 %v19058_v30, %s21737_s19  ;;  %9913 = vrot.lane.b32.xlu1 %v19062_v5, %s21737_s19 }
 0x9e9   : > { %v19110_v10 = vpop.permute.xlu0 %10392  ;;  %v19112_v1 = vpop.permute.xlu1 %10064 }
 0x9ea   : > { %21768 = vst [vmem:[#allocation30_spill] sm:$0xff] %v19110_v10  ;;  %21769 = vst [vmem:[#allocation31_spill] sm:$0xff] %v19112_v1 }
 0x9eb   : > { %10078 = vrot.lane.b32.xlu0 %v19058_v30, %s21738_s28  ;;  %10076 = vrot.lane.b32.xlu1 %v19062_v5, %s21738_s28 }
 0x9ed   : > { %v19118_v14 = vpop.permute.xlu0 %10553  ;;  %v19120_v39 = vpop.permute.xlu1 %10227 }
 0x9ee   : > { %21770 = vst [vmem:[#allocation32_spill] sm:$0xff] %v19118_v14  ;;  %21771 = vst [vmem:[#allocation33_spill] sm:$0xff] %v19120_v39 }
 0x9ef   : > { %10241 = vrot.lane.b32.xlu0 %v19058_v30, %s21739_s2  ;;  %10239 = vrot.lane.b32.xlu1 %v19062_v5, %s21739_s2 }
 0x9f1   : > { %v19126_v29 = vpop.permute.xlu0 %10555  ;;  %v19128_v40 = vpop.permute.xlu1 %10390 }
 0x9f2   : > { %21772 = vst [vmem:[#allocation34_spill] sm:$0xff] %v19126_v29  ;;  %21773 = vst [vmem:[#allocation35_spill] sm:$0xff] %v19128_v40 }
 0x9f3   : > { %10404 = vrot.lane.b32.xlu0 %v19058_v30, %s21740_s20  ;;  %10567 = vrot.lane.b32.xlu1 %v19058_v30, %s21741_s15 }
 0x9f5   : > { %v19134_v60 = vpop.permute.xlu0 %8970  ;;  %v19136_v54 = vpop.permute.xlu1 %8968 }
 0x9f7   : > { %10402 = vrot.lane.b32.xlu0 %v19062_v5, %s21740_s20  ;;  %10565 = vrot.lane.b32.xlu1 %v19062_v5, %s21741_s15 }
 0x9f9   : > { %v19144_v3 = vpop.permute.xlu0 %9255  ;;  %v19146_v52 = vpop.permute.xlu1 %9253 }
 0x9fb   : > { %8982 = vrot.lane.b32.xlu0 %v19142_v43, %s15646_s22  ;;  %10730 = vrot.lane.b32.xlu1 %v19058_v30, %s21774_s17 }
 0x9fd   : > { %v19152_v7 = vpop.permute.xlu0 %9418  ;;  %v19156_v48 = vpop.permute.xlu1 %9416 }
 0x9ff   : > { %9267 = vrot.lane.b32.xlu0 %v19142_v43, %s15647_s23  ;;  %8980 = vrot.lane.b32.xlu1 %v19154_v0, %s15646_s22 }
 0xa01   : > { %v19162_v22 = vpop.permute.xlu0 %9581  ;;  %v19164_v36 = vpop.permute.xlu1 %9579 }
 0xa02   : > { %21775 = vst [vmem:[#allocation36_spill] sm:$0xff] %v19162_v22  ;;  %21776 = vst [vmem:[#allocation37_spill] sm:$0xff] %v19164_v36 }
 0xa03   : > { %9430 = vrot.lane.b32.xlu0 %v19142_v43, %s15648_s24  ;;  %9265 = vrot.lane.b32.xlu1 %v19154_v0, %s15647_s23 }
 0xa05   : > { %v19170_v55 = vpop.permute.xlu0 %9744  ;;  %v19172_v44 = vpop.permute.xlu1 %9742 }
 0xa06   : > { %21777 = vst [vmem:[#allocation38_spill] sm:$0xff] %v19170_v55  ;;  %21778 = vst [vmem:[#allocation39_spill] sm:$0xff] %v19172_v44 }
 0xa07   : > { %9593 = vrot.lane.b32.xlu0 %v19142_v43, %s15649_s25  ;;  %9428 = vrot.lane.b32.xlu1 %v19154_v0, %s15648_s24 }
 0xa09   : > { %v19178_v29 = vpop.permute.xlu0 %9907  ;;  %v19180_v4 = vpop.permute.xlu1 %9905 }
 0xa0a   : > { %21779 = vst [vmem:[#allocation40_spill] sm:$0xff] %v19178_v29  ;;  %21780 = vst [vmem:[#allocation41_spill] sm:$0xff] %v19180_v4 }
 0xa0b   : > { %9756 = vrot.lane.b32.xlu0 %v19142_v43, %s15650_s26  ;;  %9591 = vrot.lane.b32.xlu1 %v19154_v0, %s15649_s25 }
 0xa0d   : > { %v19186_v59 = vpop.permute.xlu0 %10070  ;;  %v19188_v14 = vpop.permute.xlu1 %10068 }
 0xa0e   : > { %21781 = vst [vmem:[#allocation42_spill] sm:$0xff] %v19186_v59  ;;  %21782 = vst [vmem:[#allocation43_spill] sm:$0xff] %v19188_v14 }
 0xa0f   : > { %9919 = vrot.lane.b32.xlu0 %v19142_v43, %s21737_s19  ;;  %9754 = vrot.lane.b32.xlu1 %v19154_v0, %s15650_s26 }
 0xa11   : > { %v19194_v10 = vpop.permute.xlu0 %10233  ;;  %v19196_v53 = vpop.permute.xlu1 %10231 }
 0xa12   : > { %21783 = vst [vmem:[#allocation44_spill] sm:$0xff] %v19194_v10  ;;  %21784 = vst [vmem:[#allocation45_spill] sm:$0xff] %v19196_v53 }
 0xa13   : > { %10082 = vrot.lane.b32.xlu0 %v19142_v43, %s21738_s28  ;;  %9917 = vrot.lane.b32.xlu1 %v19154_v0, %s21737_s19 }
 0xa15   : > { %v19202_v15 = vpop.permute.xlu0 %10396  ;;  %v19204_v40 = vpop.permute.xlu1 %10559 }
 0xa16   : > { %21785 = vst [vmem:[#allocation46_spill] sm:$0xff] %v19202_v15  ;;  %21786 = vst [vmem:[#allocation47_spill] sm:$0xff] %v19204_v40  ;;  %v8885_v15 = vld [vmem:[#allocation2 + $0x60] sm:$0xff] }
 0xa17   : > { %10245 = vrot.lane.b32.xlu0 %v19142_v43, %s21739_s2  ;;  %10080 = vrot.lane.b32.xlu1 %v19154_v0, %s21738_s28  ;;  %v19238_v10 = vcombine.low %v8885_v15, %v8885_v15 }
 0xa19   : > { %v19210_v37 = vpop.permute.xlu0 %10394  ;;  %v19212_v51 = vpop.permute.xlu1 %10557 }
 0xa1a   : > { %21787 = vst [vmem:[#allocation48_spill] sm:$0xff] %v19210_v37  ;;  %21788 = vst [vmem:[#allocation49_spill] sm:$0xff] %v19212_v51  ;;  %v19226_v37 = vcombine.high %v8885_v15, %v8885_v15 }
 0xa1b   : > { %10569 = vrot.lane.b32.xlu0 %v19154_v0, %s21741_s15  ;;  %10243 = vrot.lane.b32.xlu1 %v19154_v0, %s21739_s2 }
 0xa1d   : > { %v19218_v12 = vpop.permute.xlu0 %8974  ;;  %v19220_v40 = vpop.permute.xlu1 %8972 }
 0xa1f   : > { %10571 = vrot.lane.b32.xlu0 %v19142_v43, %s21741_s15  ;;  %10406 = vrot.lane.b32.xlu1 %v19154_v0, %s21740_s20 }
 0xa21   : > { %v19228_v51 = vpop.permute.xlu0 %9259  ;;  %v19230_v39 = vpop.permute.xlu1 %9257 }
 0xa23   : > { %8986 = vrot.lane.b32.xlu0 %v19226_v37, %s15646_s22  ;;  %10408 = vrot.lane.b32.xlu1 %v19142_v43, %s21740_s20 }
 0xa25   : > { %v19236_v53 = vpop.permute.xlu0 %9422  ;;  %v19240_v23 = vpop.permute.xlu1 %9420 }
 0xa26   : > { %21789 = vst [vmem:[#allocation50_spill] sm:$0xff] %v19236_v53 }
 0xa27   : > { %9271 = vrot.lane.b32.xlu0 %v19226_v37, %s15647_s23  ;;  %8984 = vrot.lane.b32.xlu1 %v19238_v10, %s15646_s22 }
 0xa29   : > { %v19246_v25 = vpop.permute.xlu0 %9585  ;;  %v19248_v19 = vpop.permute.xlu1 %9583 }
 0xa2a   : > { %21790 = vst [vmem:[#allocation51_spill] sm:$0xff] %v19246_v25  ;;  %21791 = vst [vmem:[#allocation52_spill] sm:$0xff] %v19248_v19 }
 0xa2b   : > { %9434 = vrot.lane.b32.xlu0 %v19226_v37, %s15648_s24  ;;  %9269 = vrot.lane.b32.xlu1 %v19238_v10, %s15647_s23 }
 0xa2d   : > { %v19254_v15 = vpop.permute.xlu0 %9748  ;;  %v19256_v1 = vpop.permute.xlu1 %9746 }
 0xa2e   : > { %21792 = vst [vmem:[#allocation53_spill] sm:$0xff] %v19254_v15  ;;  %21793 = vst [vmem:[#allocation54_spill] sm:$0xff] %v19256_v1 }
 0xa2f   : > { %9597 = vrot.lane.b32.xlu0 %v19226_v37, %s15649_s25  ;;  %9432 = vrot.lane.b32.xlu1 %v19238_v10, %s15648_s24 }
 0xa31   : > { %v19262_v14 = vpop.permute.xlu0 %9911  ;;  %v19264_v59 = vpop.permute.xlu1 %9909 }
 0xa32   : > { %21794 = vst [vmem:[#allocation55_spill] sm:$0xff] %v19262_v14  ;;  %21795 = vst [vmem:[#allocation56_spill] sm:$0xff] %v19264_v59 }
 0xa33   : > { %9760 = vrot.lane.b32.xlu0 %v19226_v37, %s15650_s26  ;;  %9595 = vrot.lane.b32.xlu1 %v19238_v10, %s15649_s25 }
 0xa35   : > { %v19270_v11 = vpop.permute.xlu0 %10074  ;;  %v19272_v35 = vpop.permute.xlu1 %10072 }
 0xa36   : > { %21796 = vst [vmem:[#allocation57_spill] sm:$0xff] %v19270_v11  ;;  %21797 = vst [vmem:[#allocation58_spill] sm:$0xff] %v19272_v35 }
 0xa37   : > { %9923 = vrot.lane.b32.xlu0 %v19226_v37, %s21737_s19  ;;  %9758 = vrot.lane.b32.xlu1 %v19238_v10, %s15650_s26 }
 0xa39   : > { %v19278_v49 = vpop.permute.xlu0 %10237  ;;  %v19280_v17 = vpop.permute.xlu1 %10235 }
 0xa3a   : > { %21798 = vst [vmem:[#allocation59_spill] sm:$0xff] %v19278_v49  ;;  %21799 = vst [vmem:[#allocation60_spill] sm:$0xff] %v19280_v17 }
 0xa3b   : > { %10086 = vrot.lane.b32.xlu0 %v19226_v37, %s21738_s28  ;;  %9921 = vrot.lane.b32.xlu1 %v19238_v10, %s21737_s19 }
 0xa3d   : > { %v19286_v14 = vpop.permute.xlu0 %10561  ;;  %v19288_v11 = vpop.permute.xlu1 %10398 }
 0xa3e   : > { %21800 = vst [vmem:[#allocation61_spill] sm:$0xff] %v19286_v14  ;;  %21801 = vst [vmem:[#allocation62_spill] sm:$0xff] %v19288_v11 }
 0xa3f   : > { %10247 = vrot.lane.b32.xlu0 %v19238_v10, %s21739_s2  ;;  %10084 = vrot.lane.b32.xlu1 %v19238_v10, %s21738_s28 }
 0xa41   : > { %v19294_v35 = vpop.permute.xlu0 %10563  ;;  %v19296_v49 = vpop.permute.xlu1 %10400 }
 0xa42   : > { %21802 = vst [vmem:[#allocation63_spill] sm:$0xff] %v19294_v35  ;;  %21803 = vst [vmem:[#allocation64_spill] sm:$0xff] %v19296_v49  ;;  %v8896_v35 = vld [vmem:[#allocation2 + $0x68] sm:$0xff] }
 0xa43   : > { %10410 = vrot.lane.b32.xlu0 %v19238_v10, %s21740_s20  ;;  %10249 = vrot.lane.b32.xlu1 %v19226_v37, %s21739_s2  ;;  %v19318_v4 = vcombine.high %v8896_v35, %v8896_v35  ;;  %v19330_v24 = vcombine.low %v8896_v35, %v8896_v35 }
 0xa45   : > { %v19302_v17 = vpop.permute.xlu0 %8978  ;;  %v19304_v14 = vpop.permute.xlu1 %8976 }
 0xa47   : > { %10575 = vrot.lane.b32.xlu0 %v19226_v37, %s21741_s15  ;;  %10412 = vrot.lane.b32.xlu1 %v19226_v37, %s21740_s20 }
 0xa49   : > { %v19310_v11 = vpop.permute.xlu0 %9263  ;;  %v19312_v49 = vpop.permute.xlu1 %9261 }
 0xa4b   : > { %10738 = vrot.lane.b32.xlu0 %v19226_v37, %s21774_s17  ;;  %10573 = vrot.lane.b32.xlu1 %v19238_v10, %s21741_s15 }
 0xa4d   : > { %v19320_v29 = vpop.permute.xlu0 %9426  ;;  %v19322_v59 = vpop.permute.xlu1 %9424 }
 0xa4f   : > { %8990 = vrot.lane.b32.xlu0 %v19318_v4, %s15646_s22  ;;  %10736 = vrot.lane.b32.xlu1 %v19238_v10, %s21774_s17 }
 0xa51   : > { %v19328_v21 = vpop.permute.xlu0 %9589  ;;  %v19332_v61 = vpop.permute.xlu1 %9587 }
 0xa52   : > { %21804 = vst [vmem:[#allocation65_spill] sm:$0xff] %v19328_v21  ;;  %21805 = vst [vmem:[#allocation66_spill] sm:$0xff] %v19332_v61 }
 0xa53   : > { %9275 = vrot.lane.b32.xlu0 %v19318_v4, %s15647_s23  ;;  %8988 = vrot.lane.b32.xlu1 %v19330_v24, %s15646_s22  ;;  %s21832_s22 = smov 78  }
 0xa55   : > { %v19338_v63 = vpop.permute.xlu0 %9752  ;;  %v19340_v15 = vpop.permute.xlu1 %9750 }
 0xa56   : > { %21806 = vst [vmem:[#allocation67_spill] sm:$0xff] %v19338_v63  ;;  %21807 = vst [vmem:[#allocation68_spill] sm:$0xff] %v19340_v15 }
 0xa57   : > { %9438 = vrot.lane.b32.xlu0 %v19318_v4, %s15648_s24  ;;  %9273 = vrot.lane.b32.xlu1 %v19330_v24, %s15647_s23  ;;  %s21843_s23 = smov 77  }
 0xa59   : > { %v19346_v35 = vpop.permute.xlu0 %9915  ;;  %v19348_v44 = vpop.permute.xlu1 %9913 }
 0xa5a   : > { %21808 = vst [vmem:[#allocation69_spill] sm:$0xff] %v19346_v35  ;;  %21809 = vst [vmem:[#allocation70_spill] sm:$0xff] %v19348_v44 }
 0xa5b   : > { %9601 = vrot.lane.b32.xlu0 %v19318_v4, %s15649_s25  ;;  %9436 = vrot.lane.b32.xlu1 %v19330_v24, %s15648_s24  ;;  %s21861_s24 = smov 76  }
 0xa5d   : > { %v19354_v55 = vpop.permute.xlu0 %10078  ;;  %v19356_v1 = vpop.permute.xlu1 %10076 }
 0xa5e   : > { %21810 = vst [vmem:[#allocation71_spill] sm:$0xff] %v19354_v55  ;;  %21811 = vst [vmem:[#allocation72_spill] sm:$0xff] %v19356_v1 }
 0xa5f   : > { %9764 = vrot.lane.b32.xlu0 %v19318_v4, %s15650_s26  ;;  %9599 = vrot.lane.b32.xlu1 %v19330_v24, %s15649_s25 }
 0xa61   : > { %v19362_v15 = vpop.permute.xlu0 %10241  ;;  %v19364_v35 = vpop.permute.xlu1 %10239 }
 0xa62   : > { %21812 = vst [vmem:[#allocation73_spill] sm:$0xff] %v19362_v15  ;;  %21813 = vst [vmem:[#allocation74_spill] sm:$0xff] %v19364_v35 }
 0xa63   : > { %9927 = vrot.lane.b32.xlu0 %v19318_v4, %s21737_s19  ;;  %9762 = vrot.lane.b32.xlu1 %v19330_v24, %s15650_s26  ;;  %s22272_s26 = smov 28  }
 0xa65   : > { %v19370_v44 = vpop.permute.xlu0 %10404  ;;  %v19372_v55 = vpop.permute.xlu1 %10567 }
 0xa66   : > { %21814 = vst [vmem:[#allocation75_spill] sm:$0xff] %v19370_v44  ;;  %21815 = vst [vmem:[#allocation76_spill] sm:$0xff] %v19372_v55 }
 0xa67   : > { %10090 = vrot.lane.b32.xlu0 %v19318_v4, %s21738_s28  ;;  %9925 = vrot.lane.b32.xlu1 %v19330_v24, %s21737_s19  ;;  %s22219_s19 = smov 30  }
 0xa69   : > { %v19378_v1 = vpop.permute.xlu0 %10402  ;;  %v19380_v15 = vpop.permute.xlu1 %10565 }
 0xa6a   : > { %21816 = vst [vmem:[#allocation77_spill] sm:$0xff] %v19378_v1  ;;  %21817 = vst [vmem:[#allocation78_spill] sm:$0xff] %v19380_v15 }
 0xa6b   : > { %10251 = vrot.lane.b32.xlu0 %v19330_v24, %s21739_s2  ;;  %10088 = vrot.lane.b32.xlu1 %v19330_v24, %s21738_s28  ;;  %s22109_s28 = smov 52  }
 0xa6d   : > { %v19386_v35 = vpop.permute.xlu0 %8982  ;;  %v19388_v44 = vpop.permute.xlu1 %10730 }
 0xa6e   : > { %21818 = vst [vmem:[#allocation79_spill] sm:$0xff] %v19388_v44 }
 0xa6f   : > { %10414 = vrot.lane.b32.xlu0 %v19330_v24, %s21740_s20  ;;  %10253 = vrot.lane.b32.xlu1 %v19318_v4, %s21739_s2  ;;  %s21916_s2 = smov 55  }
 0xa71   : > { %v19394_v55 = vpop.permute.xlu0 %9267  ;;  %v19396_v1 = vpop.permute.xlu1 %8980 }
 0xa73   : > { %10579 = vrot.lane.b32.xlu0 %v19318_v4, %s21741_s15  ;;  %10416 = vrot.lane.b32.xlu1 %v19318_v4, %s21740_s20 }
 0xa75   : > { %v19402_v15 = vpop.permute.xlu0 %9430  ;;  %v19404_v63 = vpop.permute.xlu1 %9265 }
 0xa77   : > { %10742 = vrot.lane.b32.xlu0 %v19318_v4, %s21774_s17  ;;  %10577 = vrot.lane.b32.xlu1 %v19330_v24, %s21741_s15 }
 0xa79   : > { %v19410_v44 = vpop.permute.xlu0 %9593  ;;  %v19412_v46 = vpop.permute.xlu1 %9428 }
 0xa7a   : > { %21819 = vst [vmem:[#allocation80_spill] sm:$0xff] %v19410_v44 }
 0xa7b   : > { %10732 = vrot.lane.b32.xlu0 %v19154_v0, %s21774_s17  ;;  %10740 = vrot.lane.b32.xlu1 %v19330_v24, %s21774_s17 }
 0xa7d   : > { %v19418_v27 = vpop.permute.xlu0 %9756  ;;  %v19420_v56 = vpop.permute.xlu1 %9591 }
 0xa7e   : > { %21820 = vst [vmem:[#allocation81_spill] sm:$0xff] %v19418_v27  ;;  %21821 = vst [vmem:[#allocation82_spill] sm:$0xff] %v19420_v56 }
 0xa7f   : > { %10734 = vrot.lane.b32.xlu0 %v19142_v43, %s21774_s17  ;;  %10728 = vrot.lane.b32.xlu1 %v19062_v5, %s21774_s17 }
 0xa81   : > { %v19426_v32 = vpop.permute.xlu0 %9919  ;;  %v19428_v25 = vpop.permute.xlu1 %9754 }
 0xa82   : > { %21822 = vst [vmem:[#allocation83_spill] sm:$0xff] %v19426_v32  ;;  %21823 = vst [vmem:[#allocation84_spill] sm:$0xff] %v19428_v25 }
 0xa83   : > { %10724 = vrot.lane.b32.xlu0 %v18980_v34, %s21774_s17  ;;  %10722 = vrot.lane.b32.xlu1 %v18926_v50, %s21774_s17 }
 0xa85   : > { %v19434_v36 = vpop.permute.xlu0 %10082  ;;  %v19436_v27 = vpop.permute.xlu1 %9917 }
 0xa86   : > { %21824 = vst [vmem:[#allocation85_spill] sm:$0xff] %v19434_v36  ;;  %21825 = vst [vmem:[#allocation86_spill] sm:$0xff] %v19436_v27 }
 0xa87   : > { %10726 = vrot.lane.b32.xlu0 %v18974_v20, %s21774_s17  ;;  %10720 = vrot.lane.b32.xlu1 %v18928_v8, %s21774_s17 }
 0xa89   : > { %v19442_v22 = vpop.permute.xlu0 %10245  ;;  %v19444_v32 = vpop.permute.xlu1 %10080 }
 0xa8a   : > { %21826 = vst [vmem:[#allocation87_spill] sm:$0xff] %v19442_v22  ;;  %21827 = vst [vmem:[#allocation88_spill] sm:$0xff] %v19444_v32 }
 0xa8b   : > { %10716 = vrot.lane.b32.xlu0 %v18888_v16, %s21774_s17  ;;  %10714 = vrot.lane.b32.xlu1 %v18809_v62, %s21774_s17 }
 0xa8d   : > { %v19450_v25 = vpop.permute.xlu0 %10569  ;;  %v19452_v36 = vpop.permute.xlu1 %10243 }
 0xa8e   : > { %21828 = vst [vmem:[#allocation89_spill] sm:$0xff] %v19450_v25  ;;  %21829 = vst [vmem:[#allocation90_spill] sm:$0xff] %v19452_v36 }
 0xa8f   : > { %10718 = vrot.lane.b32.xlu0 %v18878_v38, %s21774_s17  ;;  %10712 = vrot.lane.b32.xlu1 %v18807_v2, %s21774_s17  ;;  %s22251_s17 = smov 29  }
 0xa91   : > { %v19458_v27 = vpop.permute.xlu0 %10571  ;;  %v19460_v22 = vpop.permute.xlu1 %10406 }
 0xa92   : > { %21830 = vst [vmem:[#allocation91_spill] sm:$0xff] %v19458_v27  ;;  %21831 = vst [vmem:[#allocation92_spill] sm:$0xff] %v19460_v22 }
 0xa93   : > { %10901 = vrot.lane.b32.xlu0 %v19226_v37, %s21832_s22  ;;  %10899 = vrot.lane.b32.xlu1 %v19238_v10, %s21832_s22 }
 0xa95   : > { %v8987_v32 = vpop.permute.xlu0 %8986  ;;  %v19466_v25 = vpop.permute.xlu1 %10408 }
 0xa96   : > { %21833 = vst [vmem:[#allocation93_spill] sm:$0xff] %v19466_v25 }
 0xa97   : > { %10905 = vrot.lane.b32.xlu0 %v19318_v4, %s21832_s22  ;;  %10903 = vrot.lane.b32.xlu1 %v19330_v24, %s21832_s22 }
 0xa99   : > { %v19472_v36 = vpop.permute.xlu0 %9271  ;;  %v8985_v27 = vpop.permute.xlu1 %8984 }
 0xa9b   : > { %10895 = vrot.lane.b32.xlu0 %v19154_v0, %s21832_s22  ;;  %10893 = vrot.lane.b32.xlu1 %v19058_v30, %s21832_s22 }
 0xa9d   : > { %v19478_v22 = vpop.permute.xlu0 %9434  ;;  %v19480_v19 = vpop.permute.xlu1 %9269 }
 0xa9f   : > { %10897 = vrot.lane.b32.xlu0 %v19142_v43, %s21832_s22  ;;  %10891 = vrot.lane.b32.xlu1 %v19062_v5, %s21832_s22 }
 0xaa1   : > { %v19486_v25 = vpop.permute.xlu0 %9597  ;;  %v19488_v44 = vpop.permute.xlu1 %9432 }
 0xaa2   : > { %21834 = vst [vmem:[#allocation94_spill] sm:$0xff] %v19486_v25 }
 0xaa3   : > { %10887 = vrot.lane.b32.xlu0 %v18980_v34, %s21832_s22  ;;  %10885 = vrot.lane.b32.xlu1 %v18926_v50, %s21832_s22 }
 0xaa5   : > { %v19494_v61 = vpop.permute.xlu0 %9760  ;;  %v19496_v21 = vpop.permute.xlu1 %9595 }
 0xaa6   : > { %21835 = vst [vmem:[#allocation95_spill] sm:$0xff] %v19494_v61  ;;  %21836 = vst [vmem:[#allocation96_spill] sm:$0xff] %v19496_v21 }
 0xaa7   : > { %10889 = vrot.lane.b32.xlu0 %v18974_v20, %s21832_s22  ;;  %10883 = vrot.lane.b32.xlu1 %v18928_v8, %s21832_s22 }
 0xaa9   : > { %v19502_v56 = vpop.permute.xlu0 %9923  ;;  %v19504_v57 = vpop.permute.xlu1 %9758 }
 0xaaa   : > { %21837 = vst [vmem:[#allocation97_spill] sm:$0xff] %v19502_v56  ;;  %21838 = vst [vmem:[#allocation98_spill] sm:$0xff] %v19504_v57 }
 0xaab   : > { %10879 = vrot.lane.b32.xlu0 %v18888_v16, %s21832_s22  ;;  %10877 = vrot.lane.b32.xlu1 %v18809_v62, %s21832_s22 }
 0xaad   : > { %v19510_v25 = vpop.permute.xlu0 %10086  ;;  %v19512_v61 = vpop.permute.xlu1 %9921 }
 0xaae   : > { %21839 = vst [vmem:[#allocation99_spill] sm:$0xff] %v19510_v25  ;;  %21840 = vst [vmem:[#allocation100_spill] sm:$0xff] %v19512_v61 }
 0xaaf   : > { %10881 = vrot.lane.b32.xlu0 %v18878_v38, %s21832_s22  ;;  %10875 = vrot.lane.b32.xlu1 %v18807_v2, %s21832_s22  ;;  %s22142_s22 = smov 32  }
 0xab1   : > { %v19518_v21 = vpop.permute.xlu0 %10247  ;;  %v19520_v56 = vpop.permute.xlu1 %10084 }
 0xab2   : > { %21841 = vst [vmem:[#allocation101_spill] sm:$0xff] %v19518_v21  ;;  %21842 = vst [vmem:[#allocation102_spill] sm:$0xff] %v19520_v56 }
 0xab3   : > { %11064 = vrot.lane.b32.xlu0 %v19226_v37, %s21843_s23  ;;  %11062 = vrot.lane.b32.xlu1 %v19238_v10, %s21843_s23 }
 0xab5   : > { %v19526_v57 = vpop.permute.xlu0 %10410  ;;  %v19528_v25 = vpop.permute.xlu1 %10249 }
 0xab6   : > { %21844 = vst [vmem:[#allocation103_spill] sm:$0xff] %v19526_v57  ;;  %21845 = vst [vmem:[#allocation104_spill] sm:$0xff] %v19528_v25 }
 0xab7   : > { %11068 = vrot.lane.b32.xlu0 %v19318_v4, %s21843_s23  ;;  %11066 = vrot.lane.b32.xlu1 %v19330_v24, %s21843_s23 }
 0xab9   : > { %v19534_v61 = vpop.permute.xlu0 %10575  ;;  %v19536_v21 = vpop.permute.xlu1 %10412 }
 0xaba   : > { %21846 = vst [vmem:[#allocation105_spill] sm:$0xff] %v19534_v61  ;;  %21847 = vst [vmem:[#allocation106_spill] sm:$0xff] %v19536_v21  ;;  %v9001_v21 = vsel %vm21851_vm4, %v8985_v27, %v8987_v32 }
 0xabb   : > { %11058 = vrot.lane.b32.xlu0 %v19154_v0, %s21843_s23  ;;  %11056 = vrot.lane.b32.xlu1 %v19058_v30, %s21843_s23  ;;  %vm21865_vm4 = vmmov %vm21864_vm9 }
 0xabd   : > { %v19542_v56 = vpop.permute.xlu0 %10738  ;;  %v19544_v57 = vpop.permute.xlu1 %10573 }
 0xabe   : > { %21848 = vst [vmem:[#allocation107_spill] sm:$0xff] %v19542_v56  ;;  %21849 = vst [vmem:[#allocation108_spill] sm:$0xff] %v19544_v57 }
 0xabf   : > { %11060 = vrot.lane.b32.xlu0 %v19142_v43, %s21843_s23  ;;  %11054 = vrot.lane.b32.xlu1 %v19062_v5, %s21843_s23 }
 0xac1   : > { %v8991_v25 = vpop.permute.xlu0 %8990  ;;  %v19550_v61 = vpop.permute.xlu1 %10736 }
 0xac2   : > { %21850 = vst [vmem:[#allocation109_spill] sm:$0xff] %v19550_v61  ;;  %v9017_v61 = vsel %vm487_vm8, %v9001_v21, 0 }
 0xac3   : > { %11050 = vrot.lane.b32.xlu0 %v18980_v34, %s21843_s23  ;;  %11048 = vrot.lane.b32.xlu1 %v18926_v50, %s21843_s23 }
 0xac5   : > { %v19557_v56 = vpop.permute.xlu0 %9275  ;;  %v8989_v57 = vpop.permute.xlu1 %8988 }
 0xac6   : > { %v9003_v42 = vsel %vm21852_vm14, %v8989_v57, %v8991_v25  ;;  %v9002_v28 = vsel %vm21853_vm6, %v8987_v32, %v8989_v57  ;;  %v8999_v25 = vsel %vm21854_vm0, %v19302_v17, %v19396_v1  ;;  %v8996_v57 = vsel %vm21857_vm3, %v19134_v60, %v19220_v40  ;;  %vm21866_vm14 = vmmov %vm21865_vm4 }
 0xac7   : > { %11052 = vrot.lane.b32.xlu0 %v18974_v20, %s21843_s23  ;;  %11046 = vrot.lane.b32.xlu1 %v18928_v8, %s21843_s23  ;;  %v9023_v6 = vsel %vm487_vm8, %v9003_v42, 0  ;;  %v9000_v42 = vsel %vm21856_vm13, %v19396_v1, %v19386_v35  ;;  %v8997_v32 = vsel %vm21859_vm7, %v19220_v40, %v19218_v12  ;;  %v8993_v1 = vsel %vm21860_vm15, %v18966_v18, %v19064_v13  ;;  %v15480_v35 = vld [vmem:[#allocation2 + $0x68] ss:$0 sps:$4 sm:$0xff]   ;;  %vm21867_vm6 = vmmov %vm21865_vm4 }
 0xac8   : > { %13876 = vmatprep.subr.msk.bf16.mxu1 %vm487_vm8, %v9002_v28  ;;  %14819 = vmatpush3.bf16.msra.mxu0 %v9023_v6  ;;  %v8998_v28 = vsel %vm21855_vm1, %v19304_v14, %v19302_v17  ;;  %v8995_v6 = vsel %vm21858_vm2, %v19136_v54, %v19134_v60  ;;  %v8992_v12 = vsel %vm21862_vm10, %v18968_v31, %v18966_v18  ;;  %v15479_v60 = vld [vmem:[%s21441_s11 + $0x8] sm:$0xff]   ;;  %v9145_v31 = vsel %vm487_vm8, %v19238_v10, 0  ;;  %vm21868_vm0 = vmmov %vm21865_vm4 }
 0xac9   : > { %9034 = vmatpush1.bf16.msra.mxu1 %v9017_v61  ;;  %v19568_v27 = vpop.permute.xlu0 %9438  ;;  %v19573_v53 = vpop.permute.xlu1 %9273  ;;  %14820 = vmatprep.subr.bf16.mxu0 %v21736_v45  ;;  %v8994_v40 = vsel %vm21863_vm5, %v19064_v13, %v19042_v26  ;;  %v9151_v26 = vsel %vm487_vm8, %v15480_v35, 0  ;;  %vm21869_vm1 = vmmov %vm21868_vm0  ;;  %vm21876_vm10 = vcmask 1022976  }
 0xaca   : > { %9035 = vmatprep.subr.bf16.mxu1 %v8999_v25  ;;  %vm21870_vm13 = vmmov %vm21868_vm0 }
 0xacb   : > { %11042 = vrot.lane.b32.xlu0 %v18888_v16, %s21843_s23  ;;  %11040 = vrot.lane.b32.xlu1 %v18809_v62, %s21843_s23  ;;  %vm21871_vm3 = vmmov %vm21868_vm0 }
 0xacc   : > { %14821 = vmatpush3.bf16.msra.mxu0 %v9000_v42  ;;  %vm21872_vm2 = vmmov %vm21868_vm0 }
 0xacd   : > { %9036 = vmatpush1.bf16.msra.mxu1 %v8998_v28  ;;  %v19586_v61 = vpop.permute.xlu0 %9601  ;;  %v19591_v21 = vpop.permute.xlu1 %9436  ;;  %14822 = vmatprep.subr.bf16.mxu0 %v21736_v45  ;;  %v15481_v28 = vld [vmem:[#allocation2 + $0x48] ss:$16 sps:$4 sm:$0xff]   ;;  %vm21873_vm7 = vmmov %vm21868_vm0 }
 0xace   : > { %9037 = vmatprep.subr.bf16.mxu1 %v8996_v57  ;;  %vm21875_vm15 = vmmov %vm21868_vm0 }
 0xacf   : > { %11044 = vrot.lane.b32.xlu0 %v18878_v38, %s21843_s23  ;;  %11038 = vrot.lane.b32.xlu1 %v18807_v2, %s21843_s23  ;;  %vm21877_vm5 = vmmov %vm21868_vm0  ;;  %s21980_s23 = smov 54  }
 0xad0   : > { %14823 = vmatpush3.bf16.msra.mxu0 %v8997_v32 }
 0xad1   : > { %9038 = vmatpush1.bf16.msra.mxu1 %v8995_v6  ;;  %v19604_v17 = vpop.permute.xlu0 %9764  ;;  %v19609_v14 = vpop.permute.xlu1 %9599  ;;  %14824 = vmatprep.subr.bf16.mxu0 %v21736_v45  ;;  %v15482_v6 = vld [vmem:[#allocation2 + $0x28] ss:$16 sps:$4 sm:$0xff]  }
 0xad2   : > { %9039 = vmatprep.subr.bf16.mxu1 %v8993_v1 }
 0xad3   : > { %11227 = vrot.lane.b32.xlu0 %v19226_v37, %s21861_s24  ;;  %11225 = vrot.lane.b32.xlu1 %v19238_v10, %s21861_s24 }
 0xad4   : > { %14825 = vmatpush3.bf16.msra.mxu0 %v8994_v40  ;;  %v15484_v40 = vld [vmem:[%s21441_s11] sm:$0xff]  }
 0xad5   : > { %9040 = vmatpush1.bf16.msra.mxu1 %v8992_v12  ;;  %v19625_v54 = vpop.permute.xlu0 %9927  ;;  %v19629_v18 = vpop.permute.xlu1 %9762  ;;  %14830 = vmatprep.subr.bf16.mxu0 %v21736_v45  ;;  %v15483_v12 = vld [vmem:[#allocation2 + $0x8] ss:$16 sps:$4 sm:$0xff]  }
 0xad6   : > { %13884 = vmatprep.subr.msk.bf16.mxu1 %vm487_vm8, %v19226_v37 }
 0xad7   : > { %11231 = vrot.lane.b32.xlu0 %v19318_v4, %s21861_s24  ;;  %11229 = vrot.lane.b32.xlu1 %v19330_v24, %s21861_s24 }
 0xad8   : > { %13877 = vmatmul.mubr.msk.bf16.vlgmr.msra.gmra.mxu1 %vm3721_vm12, %v15479_v60  ;;  %14827 = vmatmul.mubr.msk.bf16.vlgmr.msra.gmra.mxu0 %vm3721_vm12, %v15479_v60  ;;  %v9286_v60 = vsel %vm21864_vm9, %v19480_v19, %v19472_v36  ;;  %vm21878_vm9 = vmmov %vm21876_vm10 }
 0xad9   : > { %9162 = vmatpush1.bf16.msra.mxu1 %v9145_v31  ;;  %v19641_v13 = vpop.permute.xlu0 %10090  ;;  %14831 = vmatpush3.bf16.msra.mxu0 %v9151_v26  ;;  %v19644_v25 = vpop.permute.xlu1 %9925  ;;  %v9287_v31 = vsel %vm21865_vm4, %v19472_v36, %v19573_v53  ;;  %v9288_v26 = vsel %vm21866_vm14, %v19573_v53, %v19557_v56  ;;  %v9302_v19 = vsel %vm487_vm8, %v9286_v60, 0  ;;  %v9284_v36 = vsel %vm21867_vm6, %v19310_v11, %v19404_v63  ;;  %vm21879_vm4 = vmmov %vm21878_vm9 }
 0xada   : > { %9163 = vmatprep.subr.bf16.mxu1 %v19058_v30  ;;  %14832 = vmatprep.subr.bf16.mxu0 %v21736_v45  ;;  %v9308_v56 = vsel %vm487_vm8, %v9288_v26, 0  ;;  %v9278_v26 = vsel %vm21873_vm7, %v18976_v41, %v19072_v47  ;;  %vm21880_vm14 = vmmov %vm21879_vm4 }
 0xadb   : > { %11221 = vrot.lane.b32.xlu0 %v19154_v0, %s21861_s24  ;;  %11219 = vrot.lane.b32.xlu1 %v19058_v30, %s21861_s24  ;;  %vm21881_vm6 = vmmov %vm21879_vm4 }
 0xadc   : > { %9185 = vmatprep.mubr.bf16.mxu1 %v21731_v9  ;;  %14838 = vmatprep.mubr.msk.bf16.mxu0 %vm15671_vm11, %v21736_v45 }
 0xadd   : > { %9164 = vmatpush1.bf16.msra.mxu1 %v19062_v5  ;;  %v19653_v42 = vpop.permute.xlu0 %10251  ;;  %14833 = vmatpush3.bf16.msra.mxu0 %v15481_v28  ;;  %v19658_v57 = vpop.permute.xlu1 %10088 }
 0xade   : > { %9165 = vmatprep.subr.bf16.mxu1 %v18926_v50  ;;  %14834 = vmatprep.subr.bf16.mxu0 %v21736_v45 }
 0xadf   : > { %11223 = vrot.lane.b32.xlu0 %v19142_v43, %s21861_s24  ;;  %11217 = vrot.lane.b32.xlu1 %v19062_v5, %s21861_s24 }
 0xae1   : > { %9166 = vmatpush1.bf16.msra.mxu1 %v18928_v8  ;;  %v19666_v32 = vpop.permute.xlu0 %10414  ;;  %14835 = vmatpush3.bf16.msra.mxu0 %v15482_v6  ;;  %v19669_v1 = vpop.permute.xlu1 %10253 }
 0xae2   : > { %9167 = vmatprep.subr.bf16.mxu1 %v18809_v62  ;;  %14836 = vmatprep.subr.bf16.mxu0 %v21736_v45 }
 0xae3   : > { %11213 = vrot.lane.b32.xlu0 %v18980_v34, %s21861_s24  ;;  %11211 = vrot.lane.b32.xlu1 %v18926_v50, %s21861_s24 }
 0xae5   : > { %9168 = vmatpush1.bf16.msra.mxu1 %v18807_v2  ;;  %v19683_v35 = vpop.permute.xlu0 %10579  ;;  %14837 = vmatpush3.bf16.msra.mxu0 %v15483_v12  ;;  %v19692_v28 = vpop.permute.xlu1 %10416  ;;  %v9283_v12 = vsel %vm21868_vm0, %v19312_v49, %v19310_v11  ;;  %v9280_v11 = vsel %vm21871_vm3, %v19146_v52, %v19144_v3  ;;  %v9279_v52 = vsel %vm21877_vm5, %v19072_v47, %v19050_v33  ;;  %vm21882_vm0 = vmmov %vm21879_vm4 }
 0xae6   : > { %13890 = vmatprep.subr.msk.bf16.mxu1 %vm487_vm8, %v9287_v31  ;;  %14842 = vmatprep.subr.bf16.mxu0 %v21736_v45  ;;  %v9281_v31 = vsel %vm21870_vm13, %v19144_v3, %v19230_v39  ;;  %v9277_v3 = vsel %vm21875_vm15, %v18978_v58, %v18976_v41  ;;  %v9450_v41 = vsel %vm21878_vm9, %v19478_v22, %v19591_v21  ;;  %vm21884_vm13 = vmmov %vm21882_vm0  ;;  %vm21894_vm15 = vcmask 1014784  }
 0xae7   : > { %11215 = vrot.lane.b32.xlu0 %v18974_v20, %s21861_s24  ;;  %11209 = vrot.lane.b32.xlu1 %v18928_v8, %s21861_s24  ;;  %v9451_v58 = vsel %vm21879_vm4, %v19591_v21, %v19568_v27  ;;  %v9446_v21 = vsel %vm21881_vm6, %v19322_v59, %v19320_v29  ;;  %vm21886_vm3 = vmmov %vm21882_vm0 }
 0xae8   : > { %13885 = vmatmul.mubr.msk.bf16.vlgmr.msra.gmra.mxu1 %vm3721_vm12, %v15484_v40  ;;  %14839 = vmatmul.mubr.msk.bf16.vlgmr.msra.gmra.mxu0 %vm3721_vm12, %v15484_v40  ;;  %v9285_v40 = vsel %vm21869_vm1, %v19404_v63, %v19394_v55  ;;  %v9282_v63 = vsel %vm21872_vm2, %v19230_v39, %v19228_v51  ;;  %v15485_v51 = vld [vmem:[%s21441_s11 + $0x10] sm:$0xff]   ;;  %v9449_v39 = vsel %vm21876_vm10, %v19488_v44, %v19478_v22  ;;  %v9471_v47 = vsel %vm487_vm8, %v9451_v58, 0  ;;  %vm21883_vm1 = vmmov %vm21882_vm0  ;;  %v21895_v58 = vld [vmem:[#allocation20_spill] sm:$0xff] }
 0xae9   : > { %9319 = vmatpush1.bf16.msra.mxu1 %v9302_v19  ;;  %v19703_v53 = vpop.permute.xlu0 %10742  ;;  %14843 = vmatpush3.bf16.msra.mxu0 %v9308_v56  ;;  %v19708_v6 = vpop.permute.xlu1 %10577  ;;  %v9465_v33 = vsel %vm487_vm8, %v9449_v39, 0  ;;  %v9447_v44 = vsel %vm21880_vm14, %v19320_v29, %v19412_v46  ;;  %v21885_v29 = vld [vmem:[#allocation50_spill] sm:$0xff]  ;;  %vm21889_vm2 = vmmov %vm21882_vm0 }
 0xaea   : > { %9320 = vmatprep.subr.bf16.mxu1 %v9284_v36  ;;  %14844 = vmatprep.subr.bf16.mxu0 %v21736_v45  ;;  %vm21891_vm7 = vmmov %vm21882_vm0  ;;  %v21892_v39 = vld [vmem:[#allocation94_spill] sm:$0xff] }
 0xaeb   : > { %11205 = vrot.lane.b32.xlu0 %v18888_v16, %s21861_s24  ;;  %11203 = vrot.lane.b32.xlu1 %v18809_v62, %s21861_s24  ;;  %vm21896_vm10 = vmmov %vm21882_vm0 }
 0xaec   : > { %9342 = vmatprep.mubr.bf16.mxu1 %v21731_v9  ;;  %14850 = vmatprep.mubr.msk.bf16.mxu0 %vm15671_vm11, %v21736_v45  ;;  %vm21897_vm5 = vmmov %vm21894_vm15 }
 0xaed   : > { %9321 = vmatpush1.bf16.msra.mxu1 %v9283_v12  ;;  %v19722_v60 = vpop.permute.xlu0 %10732  ;;  %14845 = vmatpush3.bf16.msra.mxu0 %v9285_v40  ;;  %v19729_v49 = vpop.permute.xlu1 %10740  ;;  %v9448_v12 = vsel %vm21882_vm0, %v19412_v46, %v19402_v15  ;;  %v9443_v46 = vsel %vm21884_vm13, %v19156_v48, %v19152_v7  ;;  %v9445_v15 = vsel %vm21886_vm3, %v19240_v23, %v21885_v29  ;;  %vm21898_vm9 = vmmov %vm21897_vm5  ;;  %v21900_v29 = vld [vmem:[#allocation65_spill] sm:$0xff] }
 0xaee   : > { %9322 = vmatprep.subr.bf16.mxu1 %v9281_v31  ;;  %14846 = vmatprep.subr.bf16.mxu0 %v21736_v45  ;;  %v9444_v31 = vsel %vm21883_vm1, %v19152_v7, %v19240_v23  ;;  %v21890_v7 = vld [vmem:[#allocation7_spill] sm:$0xff]  ;;  %vm21901_vm4 = vmmov %vm21897_vm5 }
 0xaef   : > { %11207 = vrot.lane.b32.xlu0 %v18878_v38, %s21861_s24  ;;  %11201 = vrot.lane.b32.xlu1 %v18807_v2, %s21861_s24  ;;  %v15486_v23 = vld [vmem:[%s21441_s11 + $0x18] sm:$0xff]   ;;  %vm21903_vm14 = vmmov %vm21901_vm4 }
 0xaf0   : > { %vm21905_vm6 = vmmov %vm21901_vm4 }
 0xaf1   : > { %9323 = vmatpush1.bf16.msra.mxu1 %v9280_v11  ;;  %v19742_v55 = vpop.permute.xlu0 %10734  ;;  %14847 = vmatpush3.bf16.msra.mxu0 %v9282_v63  ;;  %v19747_v19 = vpop.permute.xlu1 %10728  ;;  %v21887_v63 = vld [vmem:[#allocation23_spill] sm:$0xff]  ;;  %vm21908_vm0 = vmmov %vm21901_vm4 }
 0xaf2   : > { %9324 = vmatprep.subr.bf16.mxu1 %v9278_v26  ;;  %14848 = vmatprep.subr.bf16.mxu0 %v21736_v45  ;;  %v21888_v26 = vld [vmem:[#allocation8_spill] sm:$0xff]  ;;  %vm21910_vm1 = vmmov %vm21908_vm0 }
 0xaf3   : > { %11390 = vrot.lane.b32.xlu0 %v19226_v37, %s21874_s16  ;;  %11388 = vrot.lane.b32.xlu1 %v19238_v10, %s21874_s16  ;;  %v9440_v48 = vsel %vm21891_vm7, %v21890_v7, %v21888_v26  ;;  %v21904_v7 = vld [vmem:[#allocation80_spill] sm:$0xff]  ;;  %vm21912_vm13 = vmmov %vm21908_vm0  ;;  %vm21921_vm7 = vcmask 850944  }
 0xaf4   : > { %vm21915_vm3 = vmmov %vm21908_vm0 }
 0xaf5   : > { %9325 = vmatpush1.bf16.msra.mxu1 %v9277_v3  ;;  %v19766_v56 = vpop.permute.xlu0 %10724  ;;  %14849 = vmatpush3.bf16.msra.mxu0 %v9279_v52  ;;  %v19775_v36 = vpop.permute.xlu1 %10722  ;;  %v9441_v3 = vsel %vm21889_vm2, %v21888_v26, %v21887_v63  ;;  %v21893_v52 = vld [vmem:[#allocation96_spill] sm:$0xff]  ;;  %v21902_v26 = vld [vmem:[#allocation66_spill] sm:$0xff]  ;;  %vm21918_vm2 = vmmov %vm21908_vm0 }
 0xaf6   : > { %13896 = vmatprep.subr.msk.bf16.mxu1 %vm487_vm8, %v9450_v41  ;;  %14854 = vmatprep.subr.bf16.mxu0 %v21736_v45  ;;  %v9612_v41 = vsel %vm21894_vm15, %v21893_v52, %v21892_v39  ;;  %v21907_v52 = vld [vmem:[#allocation36_spill] sm:$0xff]  ;;  %vm21923_vm15 = vmmov %vm21908_vm0 }
 0xaf7   : > { %11394 = vrot.lane.b32.xlu0 %v19318_v4, %s21874_s16  ;;  %11392 = vrot.lane.b32.xlu1 %v19330_v24, %s21874_s16 }
 0xaf8   : > { %13891 = vmatmul.mubr.msk.bf16.vlgmr.msra.gmra.mxu1 %vm3721_vm12, %v15485_v51  ;;  %14851 = vmatmul.mubr.msk.bf16.vlgmr.msra.gmra.mxu0 %vm3721_vm12, %v15485_v51 }
 0xaf9   : > { %9482 = vmatpush1.bf16.msra.mxu1 %v9465_v33  ;;  %v19786_v22 = vpop.permute.xlu0 %10726  ;;  %14855 = vmatpush3.bf16.msra.mxu0 %v9471_v47  ;;  %v19791_v27 = vpop.permute.xlu1 %10720  ;;  %v9442_v33 = vsel %vm21896_vm10, %v21887_v63, %v21895_v58  ;;  %vm21924_vm10 = vmmov %vm21921_vm7 }
 0xafa   : > { %9483 = vmatprep.subr.bf16.mxu1 %v9447_v44  ;;  %14856 = vmatprep.subr.bf16.mxu0 %v21736_v45  ;;  %v9613_v44 = vsel %vm21897_vm5, %v21892_v39, %v19609_v14  ;;  %v21906_v39 = vld [vmem:[#allocation52_spill] sm:$0xff]  ;;  %vm21925_vm5 = vmmov %vm21921_vm7 }
 0xafb   : > { %11384 = vrot.lane.b32.xlu0 %v19154_v0, %s21874_s16  ;;  %11382 = vrot.lane.b32.xlu1 %v19058_v30, %s21874_s16 }
 0xafc   : > { %9505 = vmatprep.mubr.bf16.mxu1 %v21731_v9  ;;  %14862 = vmatprep.mubr.msk.bf16.mxu0 %vm15671_vm11, %v21736_v45 }
 0xafd   : > { %9484 = vmatpush1.bf16.msra.mxu1 %v9446_v21  ;;  %v19805_v40 = vpop.permute.xlu0 %10716  ;;  %14857 = vmatpush3.bf16.msra.mxu0 %v9448_v12  ;;  %v19812_v59 = vpop.permute.xlu1 %10714  ;;  %v9614_v21 = vsel %vm21898_vm9, %v19609_v14, %v19586_v61  ;;  %vm21929_vm9 = vmmov %vm21925_vm5 }
 0xafe   : > { %9485 = vmatprep.subr.bf16.mxu1 %v9444_v31  ;;  %14858 = vmatprep.subr.bf16.mxu0 %v21736_v45  ;;  %v9628_v31 = vsel %vm487_vm8, %v9612_v41, 0  ;;  %v9634_v61 = vsel %vm487_vm8, %v9614_v21, 0  ;;  %v9607_v41 = vsel %vm21908_vm0, %v21907_v52, %v21906_v39  ;;  %v21911_v21 = vld [vmem:[#allocation51_spill] sm:$0xff] }
 0xaff   : > { %11386 = vrot.lane.b32.xlu0 %v19142_v43, %s21874_s16  ;;  %11380 = vrot.lane.b32.xlu1 %v19062_v5, %s21874_s16 }
 0xb01   : > { %9486 = vmatpush1.bf16.msra.mxu1 %v9443_v46  ;;  %v19825_v11 = vpop.permute.xlu0 %10718  ;;  %14859 = vmatpush3.bf16.msra.mxu0 %v9445_v15  ;;  %v19830_v51 = vpop.permute.xlu1 %10712  ;;  %v21899_v46 = vld [vmem:[#allocation82_spill] sm:$0xff] }
 0xb02   : > { %9487 = vmatprep.subr.bf16.mxu1 %v9441_v3  ;;  %14860 = vmatprep.subr.bf16.mxu0 %v21736_v45  ;;  %v9610_v15 = vsel %vm21901_vm4, %v21900_v29, %v21899_v46  ;;  %v9609_v3 = vsel %vm21903_vm14, %v21902_v26, %v21900_v29  ;;  %v21914_v29 = vld [vmem:[#allocation4_spill] sm:$0xff]  ;;  %vm21931_vm4 = vmmov %vm21925_vm5 }
 0xb03   : > { %11376 = vrot.lane.b32.xlu0 %v18980_v34, %s21874_s16  ;;  %11374 = vrot.lane.b32.xlu1 %v18926_v50, %s21874_s16  ;;  %vm21933_vm14 = vmmov %vm21931_vm4 }
 0xb04   : > { %vm21940_vm0 = vmmov %vm21931_vm4 }
 0xb05   : > { %9488 = vmatpush1.bf16.msra.mxu1 %v9440_v48  ;;  %v19849_v47 = vpop.permute.xlu0 %10901  ;;  %14861 = vmatpush3.bf16.msra.mxu0 %v9442_v33  ;;  %v19858_v12 = vpop.permute.xlu1 %10899  ;;  %v9611_v48 = vsel %vm21905_vm6, %v21899_v46, %v21904_v7  ;;  %v21909_v33 = vld [vmem:[#allocation37_spill] sm:$0xff]  ;;  %vm21937_vm6 = vmmov %vm21931_vm4 }
 0xb06   : > { %13902 = vmatprep.subr.msk.bf16.mxu1 %vm487_vm8, %v9613_v44  ;;  %14866 = vmatprep.subr.bf16.mxu0 %v21736_v45  ;;  %v9606_v44 = vsel %vm21910_vm1, %v21909_v33, %v21907_v52  ;;  %v21913_v46 = vld [vmem:[#allocation25_spill] sm:$0xff]  ;;  %v21920_v52 = vld [vmem:[#allocation98_spill] sm:$0xff]  ;;  %vm21942_vm1 = vmmov %vm21940_vm0 }
 0xb07   : > { %11378 = vrot.lane.b32.xlu0 %v18974_v20, %s21874_s16  ;;  %11372 = vrot.lane.b32.xlu1 %v18928_v8, %s21874_s16  ;;  %v21922_v33 = vld [vmem:[#allocation21_spill] sm:$0xff] }
 0xb08   : > { %13897 = vmatmul.mubr.msk.bf16.vlgmr.msra.gmra.mxu1 %vm3721_vm12, %v15486_v23  ;;  %14863 = vmatmul.mubr.msk.bf16.vlgmr.msra.gmra.mxu0 %vm3721_vm12, %v15486_v23 }
 0xb09   : > { %9645 = vmatpush1.bf16.msra.mxu1 %v9628_v31  ;;  %v19869_v14 = vpop.permute.xlu0 %10905  ;;  %14867 = vmatpush3.bf16.msra.mxu0 %v9634_v61  ;;  %v19874_v63 = vpop.permute.xlu1 %10903  ;;  %v9608_v31 = vsel %vm21912_vm13, %v21906_v39, %v21911_v21  ;;  %v21919_v39 = vld [vmem:[#allocation95_spill] sm:$0xff]  ;;  %vm21946_vm13 = vmmov %vm21940_vm0 }
 0xb0a   : > { %9646 = vmatprep.subr.bf16.mxu1 %v9610_v15  ;;  %14868 = vmatprep.subr.bf16.mxu0 %v21736_v45  ;;  %v9604_v15 = vsel %vm21915_vm3, %v21914_v29, %v21913_v46  ;;  %vm21949_vm3 = vmmov %vm21940_vm0 }
 0xb0b   : > { %11368 = vrot.lane.b32.xlu0 %v18888_v16, %s21874_s16  ;;  %11366 = vrot.lane.b32.xlu1 %v18809_v62, %s21874_s16 }
 0xb0c   : > { %9668 = vmatprep.mubr.bf16.mxu1 %v21731_v9  ;;  %14874 = vmatprep.mubr.msk.bf16.mxu0 %vm15671_vm11, %v21736_v45 }
 0xb0d   : > { %9647 = vmatpush1.bf16.msra.mxu1 %v9609_v3  ;;  %v19888_v23 = vpop.permute.xlu0 %10895  ;;  %14869 = vmatpush3.bf16.msra.mxu0 %v9611_v48  ;;  %v19895_v58 = vpop.permute.xlu1 %10893  ;;  %v21917_v3 = vld [vmem:[#allocation5_spill] sm:$0xff]  ;;  %v15487_v48 = vld [vmem:[%s21441_s11 + $0x20] sm:$0xff]  }
 0xb0e   : > { %9648 = vmatprep.subr.bf16.mxu1 %v9607_v41  ;;  %14870 = vmatprep.subr.bf16.mxu0 %v21736_v45  ;;  %v9603_v7 = vsel %vm21918_vm2, %v21917_v3, %v21914_v29  ;;  %v9775_v41 = vsel %vm21921_vm7, %v21920_v52, %v21919_v39  ;;  %v9777_v29 = vsel %vm21925_vm5, %v19629_v18, %v19604_v17  ;;  %v21927_v3 = vld [vmem:[#allocation84_spill] sm:$0xff]  ;;  %vm21952_vm2 = vcmask 842752   ;;  %vm21954_vm7 = vmmov %vm21940_vm0 }
 0xb0f   : > { %11370 = vrot.lane.b32.xlu0 %v18878_v38, %s21874_s16  ;;  %11364 = vrot.lane.b32.xlu1 %v18807_v2, %s21874_s16  ;;  %v9797_v17 = vsel %vm487_vm8, %v9777_v29, 0  ;;  %v21935_v29 = vld [vmem:[#allocation54_spill] sm:$0xff]  ;;  %vm21960_vm5 = vmmov %vm21952_vm2 }
 0xb11   : > { %9649 = vmatpush1.bf16.msra.mxu1 %v9606_v44  ;;  %v19908_v61 = vpop.permute.xlu0 %10897  ;;  %14871 = vmatpush3.bf16.msra.mxu0 %v9608_v31  ;;  %v19913_v26 = vpop.permute.xlu1 %10891  ;;  %v9605_v44 = vsel %vm21923_vm15, %v21913_v46, %v21922_v33  ;;  %v9776_v31 = vsel %vm21924_vm10, %v21919_v39, %v19629_v18  ;;  %v9791_v46 = vsel %vm487_vm8, %v9775_v41, 0  ;;  %v21932_v33 = vld [vmem:[#allocation81_spill] sm:$0xff]  ;;  %vm21955_vm15 = vmmov %vm21952_vm2 }
 0xb12   : > { %9650 = vmatprep.subr.bf16.mxu1 %v9604_v15  ;;  %14872 = vmatprep.subr.bf16.mxu0 %v21736_v45  ;;  %vm21956_vm10 = vmmov %vm21952_vm2 }
 0xb13   : > { %11553 = vrot.lane.b32.xlu0 %v19226_v37, %s21916_s2  ;;  %11551 = vrot.lane.b32.xlu1 %v19238_v10, %s21916_s2 }
 0xb15   : > { %9651 = vmatpush1.bf16.msra.mxu1 %v9603_v7  ;;  %v19932_v21 = vpop.permute.xlu0 %10887  ;;  %14873 = vmatpush3.bf16.msra.mxu0 %v9605_v44  ;;  %v19941_v15 = vpop.permute.xlu1 %10885  ;;  %v21928_v7 = vld [vmem:[#allocation67_spill] sm:$0xff]  ;;  %v9774_v44 = vsel %vm21933_vm14, %v21927_v3, %v21932_v33  ;;  %vm21969_vm14 = vmmov %vm21952_vm2 }
 0xb16   : > { %13908 = vmatprep.subr.msk.bf16.mxu1 %vm487_vm8, %v9776_v31  ;;  %14878 = vmatprep.subr.bf16.mxu0 %v21736_v45  ;;  %v9773_v39 = vsel %vm21929_vm9, %v21928_v7, %v21927_v3  ;;  %v21939_v3 = vld [vmem:[#allocation39_spill] sm:$0xff]  ;;  %vm21963_vm9 = vmmov %vm21952_vm2 }
 0xb17   : > { %11557 = vrot.lane.b32.xlu0 %v19318_v4, %s21916_s2  ;;  %11555 = vrot.lane.b32.xlu1 %v19330_v24, %s21916_s2 }
 0xb18   : > { %13903 = vmatmul.mubr.msk.bf16.vlgmr.msra.gmra.mxu1 %vm3721_vm12, %v15487_v48  ;;  %14875 = vmatmul.mubr.msk.bf16.vlgmr.msra.gmra.mxu0 %vm3721_vm12, %v15487_v48  ;;  %v21930_v48 = vld [vmem:[#allocation68_spill] sm:$0xff] }
 0xb19   : > { %9808 = vmatpush1.bf16.msra.mxu1 %v9791_v46  ;;  %v19952_v18 = vpop.permute.xlu0 %10889  ;;  %14879 = vmatpush3.bf16.msra.mxu0 %v9797_v17  ;;  %v19957_v52 = vpop.permute.xlu1 %10883  ;;  %v9772_v41 = vsel %vm21931_vm4, %v21930_v48, %v21928_v7  ;;  %v21936_v46 = vld [vmem:[#allocation38_spill] sm:$0xff]  ;;  %v21941_v48 = vld [vmem:[#allocation53_spill] sm:$0xff]  ;;  %vm21965_vm4 = vmmov %vm21952_vm2 }
 0xb1a   : > { %21926 = vst [vmem:[#allocation50_spill] sm:$0xff] %v19952_v18  ;;  %9809 = vmatprep.subr.bf16.mxu1 %v9773_v39  ;;  %14880 = vmatprep.subr.bf16.mxu0 %v21736_v45  ;;  %v9770_v17 = vsel %vm21937_vm6, %v21936_v46, %v21935_v29  ;;  %v9769_v39 = vsel %vm21940_vm0, %v21939_v3, %v21936_v46  ;;  %v21948_v46 = vld [vmem:[#allocation9_spill] sm:$0xff]  ;;  %vm21972_vm6 = vmmov %vm21952_vm2 }
 0xb1b   : > { %11547 = vrot.lane.b32.xlu0 %v19154_v0, %s21916_s2  ;;  %11545 = vrot.lane.b32.xlu1 %v19058_v30, %s21916_s2  ;;  %vm21974_vm0 = vmmov %vm21952_vm2 }
 0xb1c   : > { %9831 = vmatprep.mubr.bf16.mxu1 %v21731_v9  ;;  %14886 = vmatprep.mubr.msk.bf16.mxu0 %vm15671_vm11, %v21736_v45 }
 0xb1d   : > { %9810 = vmatpush1.bf16.msra.mxu1 %v9772_v41  ;;  %v19971_v31 = vpop.permute.xlu0 %10879  ;;  %14881 = vmatpush3.bf16.msra.mxu0 %v9774_v44  ;;  %v19978_v7 = vpop.permute.xlu1 %10877  ;;  %v9771_v41 = vsel %vm21942_vm1, %v21935_v29, %v21941_v48  ;;  %v21944_v44 = vld [vmem:[#allocation27_spill] sm:$0xff]  ;;  %v15488_v29 = vld [vmem:[%s21441_s11 + $0x28] sm:$0xff]   ;;  %vm21978_vm1 = vmmov %vm21974_vm0 }
 0xb1e   : > { %21934 = vst [vmem:[#allocation23_spill] sm:$0xff] %v19971_v31  ;;  %9811 = vmatprep.subr.bf16.mxu1 %v9770_v17  ;;  %21938 = vst [vmem:[#allocation8_spill] sm:$0xff] %v19978_v7  ;;  %14882 = vmatprep.subr.bf16.mxu0 %v21736_v45  ;;  %v21945_v17 = vld [vmem:[#allocation6_spill] sm:$0xff] }
 0xb1f   : > { %11549 = vrot.lane.b32.xlu0 %v19142_v43, %s21916_s2  ;;  %11543 = vrot.lane.b32.xlu1 %v19062_v5, %s21916_s2  ;;  %v9767_v7 = vsel %vm21946_vm13, %v21945_v17, %v21944_v44  ;;  %v9766_v3 = vsel %vm21949_vm3, %v21948_v46, %v21945_v17  ;;  %v9940_v46 = vsel %vm21956_vm10, %v19644_v25, %v19625_v54  ;;  %vm21982_vm13 = vmmov %vm21974_vm0  ;;  %vm21985_vm3 = vcmask 834560  }
 0xb20   : > { %v9960_v54 = vsel %vm487_vm8, %v9940_v46, 0  ;;  %vm21993_vm10 = vmmov %vm21985_vm3 }
 0xb21   : > { %9812 = vmatpush1.bf16.msra.mxu1 %v9769_v39  ;;  %v19991_v33 = vpop.permute.xlu0 %10881  ;;  %14883 = vmatpush3.bf16.msra.mxu0 %v9771_v41  ;;  %v19996_v31 = vpop.permute.xlu1 %10875  ;;  %v21950_v39 = vld [vmem:[#allocation97_spill] sm:$0xff]  ;;  %v21953_v41 = vld [vmem:[#allocation22_spill] sm:$0xff] }
 0xb22   : > { %21943 = vst [vmem:[#allocation7_spill] sm:$0xff] %v19991_v33  ;;  %9813 = vmatprep.subr.bf16.mxu1 %v9767_v7  ;;  %21947 = vst [vmem:[#allocation94_spill] sm:$0xff] %v19996_v31  ;;  %14884 = vmatprep.subr.bf16.mxu0 %v21736_v45  ;;  %v21951_v7 = vld [vmem:[#allocation100_spill] sm:$0xff]  ;;  %v9768_v33 = vsel %vm21954_vm7, %v21944_v44, %v21953_v41  ;;  %v9939_v17 = vsel %vm21955_vm15, %v21950_v39, %v19644_v25  ;;  %v21964_v41 = vld [vmem:[#allocation83_spill] sm:$0xff] }
 0xb23   : > { %11539 = vrot.lane.b32.xlu0 %v18980_v34, %s21916_s2  ;;  %11537 = vrot.lane.b32.xlu1 %v18926_v50, %s21916_s2  ;;  %v9938_v48 = vsel %vm21952_vm2, %v21951_v7, %v21950_v39  ;;  %vm21987_vm2 = vmmov %vm21974_vm0 }
 0xb24   : > { %v9954_v44 = vsel %vm487_vm8, %v9938_v48, 0  ;;  %vm21988_vm7 = vmmov %vm21985_vm3 }
 0xb25   : > { %9814 = vmatpush1.bf16.msra.mxu1 %v9766_v3  ;;  %v20015_v31 = vpop.permute.xlu0 %11064  ;;  %14885 = vmatpush3.bf16.msra.mxu0 %v9768_v33  ;;  %v20024_v18 = vpop.permute.xlu1 %11062  ;;  %v21958_v33 = vld [vmem:[#allocation86_spill] sm:$0xff]  ;;  %v21959_v3 = vld [vmem:[#allocation69_spill] sm:$0xff]  ;;  %vm21989_vm15 = vmmov %vm21985_vm3 }
 0xb26   : > { %13914 = vmatprep.subr.msk.bf16.mxu1 %vm487_vm8, %v9939_v17  ;;  %14890 = vmatprep.subr.bf16.mxu0 %v21736_v45  ;;  %v9936_v39 = vsel %vm21960_vm5, %v21959_v3, %v21958_v33  ;;  %v9937_v17 = vsel %vm21965_vm4, %v21958_v33, %v21964_v41  ;;  %v21971_v33 = vld [vmem:[#allocation41_spill] sm:$0xff]  ;;  %vm21996_vm5 = vmmov %vm21985_vm3 }
 0xb27   : > { %11541 = vrot.lane.b32.xlu0 %v18974_v20, %s21916_s2  ;;  %11535 = vrot.lane.b32.xlu1 %v18928_v8, %s21916_s2  ;;  %vm22002_vm4 = vmmov %vm21985_vm3 }
 0xb28   : > { %13909 = vmatmul.mubr.msk.bf16.vlgmr.msra.gmra.mxu1 %vm3721_vm12, %v15488_v29  ;;  %14887 = vmatmul.mubr.msk.bf16.vlgmr.msra.gmra.mxu0 %vm3721_vm12, %v15488_v29  ;;  %v21962_v29 = vld [vmem:[#allocation70_spill] sm:$0xff] }
 0xb29   : > { %9971 = vmatpush1.bf16.msra.mxu1 %v9954_v44  ;;  %v20035_v25 = vpop.permute.xlu0 %11068  ;;  %14891 = vmatpush3.bf16.msra.mxu0 %v9960_v54  ;;  %v20040_v7 = vpop.permute.xlu1 %11066  ;;  %v9935_v48 = vsel %vm21963_vm9, %v21962_v29, %v21959_v3  ;;  %v21967_v44 = vld [vmem:[#allocation56_spill] sm:$0xff]  ;;  %vm21998_vm9 = vmmov %vm21985_vm3 }
 0xb2a   : > { %21957 = vst [vmem:[#allocation96_spill] sm:$0xff] %v20035_v25  ;;  %9972 = vmatprep.subr.bf16.mxu1 %v9936_v39  ;;  %21961 = vst [vmem:[#allocation20_spill] sm:$0xff] %v20040_v7  ;;  %14892 = vmatprep.subr.bf16.mxu0 %v21736_v45  ;;  %v21968_v54 = vld [vmem:[#allocation40_spill] sm:$0xff] }
 0xb2b   : > { %11531 = vrot.lane.b32.xlu0 %v18888_v16, %s21916_s2  ;;  %11529 = vrot.lane.b32.xlu1 %v18809_v62, %s21916_s2  ;;  %v9933_v39 = vsel %vm21969_vm14, %v21968_v54, %v21967_v44  ;;  %v9932_v29 = vsel %vm21972_vm6, %v21971_v33, %v21968_v54  ;;  %v21981_v54 = vld [vmem:[#allocation11_spill] sm:$0xff]  ;;  %vm22005_vm14 = vmmov %vm21985_vm3 }
 0xb2c   : > { %9994 = vmatprep.mubr.bf16.mxu1 %v21731_v9  ;;  %14898 = vmatprep.mubr.msk.bf16.mxu0 %vm15671_vm11, %v21736_v45  ;;  %vm22007_vm6 = vmmov %vm21985_vm3 }
 0xb2d   : > { %9973 = vmatpush1.bf16.msra.mxu1 %v9935_v48  ;;  %v20054_v46 = vpop.permute.xlu0 %11058  ;;  %14893 = vmatpush3.bf16.msra.mxu0 %v9937_v17  ;;  %v20061_v3 = vpop.permute.xlu1 %11056  ;;  %v21973_v48 = vld [vmem:[#allocation55_spill] sm:$0xff] }
 0xb2e   : > { %21966 = vst [vmem:[#allocation82_spill] sm:$0xff] %v20054_v46  ;;  %9974 = vmatprep.subr.bf16.mxu1 %v9933_v39  ;;  %21970 = vst [vmem:[#allocation65_spill] sm:$0xff] %v20061_v3  ;;  %14894 = vmatprep.subr.bf16.mxu0 %v21736_v45  ;;  %v9934_v41 = vsel %vm21974_vm0, %v21967_v44, %v21973_v48  ;;  %v21976_v39 = vld [vmem:[#allocation29_spill] sm:$0xff]  ;;  %v21977_v3 = vld [vmem:[#allocation10_spill] sm:$0xff] }
 0xb2f   : > { %11533 = vrot.lane.b32.xlu0 %v18878_v38, %s21916_s2  ;;  %11527 = vrot.lane.b32.xlu1 %v18807_v2, %s21916_s2  ;;  %v9930_v46 = vsel %vm21978_vm1, %v21977_v3, %v21976_v39  ;;  %v9929_v33 = vsel %vm21982_vm13, %v21981_v54, %v21977_v3  ;;  %v15489_v44 = vld [vmem:[%s21441_s11 + $0x30] sm:$0xff]   ;;  %v10103_v54 = vsel %vm21989_vm15, %v19658_v57, %v19641_v13  ;;  %vm22011_vm0 = vmmov %vm21985_vm3  ;;  %vm22017_vm13 = vcmask 826368  }
 0xb30   : > { %v10123_v13 = vsel %vm487_vm8, %v10103_v54, 0  ;;  %vm22014_vm1 = vmmov %vm22011_vm0 }
 0xb31   : > { %9975 = vmatpush1.bf16.msra.mxu1 %v9932_v29  ;;  %v20074_v17 = vpop.permute.xlu0 %11060  ;;  %14895 = vmatpush3.bf16.msra.mxu0 %v9934_v41  ;;  %v20079_v25 = vpop.permute.xlu1 %11054  ;;  %v21983_v29 = vld [vmem:[#allocation99_spill] sm:$0xff]  ;;  %v21986_v41 = vld [vmem:[#allocation24_spill] sm:$0xff] }
 0xb32   : > { %21975 = vst [vmem:[#allocation66_spill] sm:$0xff] %v20074_v17  ;;  %9976 = vmatprep.subr.bf16.mxu1 %v9930_v46  ;;  %21979 = vst [vmem:[#allocation80_spill] sm:$0xff] %v20079_v25  ;;  %14896 = vmatprep.subr.bf16.mxu0 %v21736_v45  ;;  %v21984_v46 = vld [vmem:[#allocation102_spill] sm:$0xff]  ;;  %v9931_v17 = vsel %vm21987_vm2, %v21976_v39, %v21986_v41  ;;  %v10102_v3 = vsel %vm21988_vm7, %v21983_v29, %v19658_v57  ;;  %v21997_v41 = vld [vmem:[#allocation85_spill] sm:$0xff] }
 0xb33   : > { %11716 = vrot.lane.b32.xlu0 %v19226_v37, %s21980_s23  ;;  %11714 = vrot.lane.b32.xlu1 %v19238_v10, %s21980_s23  ;;  %v10101_v48 = vsel %vm21985_vm3, %v21984_v46, %v21983_v29  ;;  %vm22019_vm3 = vmmov %vm22011_vm0 }
 0xb34   : > { %v10117_v39 = vsel %vm487_vm8, %v10101_v48, 0  ;;  %vm22020_vm2 = vmmov %vm22017_vm13 }
 0xb35   : > { %9977 = vmatpush1.bf16.msra.mxu1 %v9929_v33  ;;  %v20098_v25 = vpop.permute.xlu0 %11050  ;;  %14897 = vmatpush3.bf16.msra.mxu0 %v9931_v17  ;;  %v20107_v7 = vpop.permute.xlu1 %11048  ;;  %v21991_v17 = vld [vmem:[#allocation88_spill] sm:$0xff]  ;;  %v21992_v33 = vld [vmem:[#allocation71_spill] sm:$0xff]  ;;  %vm22021_vm7 = vmmov %vm22020_vm2 }
 0xb36   : > { %13920 = vmatprep.subr.msk.bf16.mxu1 %vm487_vm8, %v10102_v3  ;;  %14902 = vmatprep.subr.bf16.mxu0 %v21736_v45  ;;  %v10099_v29 = vsel %vm21993_vm10, %v21992_v33, %v21991_v17  ;;  %v10100_v3 = vsel %vm21998_vm9, %v21991_v17, %v21997_v41  ;;  %v22004_v17 = vld [vmem:[#allocation43_spill] sm:$0xff]  ;;  %vm22025_vm15 = vmmov %vm22020_vm2 }
 0xb37   : > { %11720 = vrot.lane.b32.xlu0 %v19318_v4, %s21980_s23  ;;  %11718 = vrot.lane.b32.xlu1 %v19330_v24, %s21980_s23  ;;  %vm22028_vm10 = vmmov %vm22020_vm2 }
 0xb38   : > { %13915 = vmatmul.mubr.msk.bf16.vlgmr.msra.gmra.mxu1 %vm3721_vm12, %v15489_v44  ;;  %14899 = vmatmul.mubr.msk.bf16.vlgmr.msra.gmra.mxu0 %vm3721_vm12, %v15489_v44  ;;  %v21995_v44 = vld [vmem:[#allocation72_spill] sm:$0xff]  ;;  %vm22034_vm9 = vmmov %vm22020_vm2 }
 0xb39   : > { %10134 = vmatpush1.bf16.msra.mxu1 %v10117_v39  ;;  %v20118_v57 = vpop.permute.xlu0 %11052  ;;  %14903 = vmatpush3.bf16.msra.mxu0 %v10123_v13  ;;  %v20123_v46 = vpop.permute.xlu1 %11046  ;;  %v10098_v48 = vsel %vm21996_vm5, %v21995_v44, %v21992_v33  ;;  %v22000_v39 = vld [vmem:[#allocation58_spill] sm:$0xff]  ;;  %vm22030_vm5 = vmmov %vm22020_vm2 }
 0xb3a   : > { %21990 = vst [vmem:[#allocation52_spill] sm:$0xff] %v20118_v57  ;;  %10135 = vmatprep.subr.bf16.mxu1 %v10099_v29  ;;  %21994 = vst [vmem:[#allocation36_spill] sm:$0xff] %v20123_v46  ;;  %14904 = vmatprep.subr.bf16.mxu0 %v21736_v45  ;;  %v22001_v13 = vld [vmem:[#allocation42_spill] sm:$0xff] }
 0xb3b   : > { %11710 = vrot.lane.b32.xlu0 %v19154_v0, %s21980_s23  ;;  %11708 = vrot.lane.b32.xlu1 %v19058_v30, %s21980_s23  ;;  %v10096_v29 = vsel %vm22002_vm4, %v22001_v13, %v22000_v39  ;;  %v10095_v44 = vsel %vm22005_vm14, %v22004_v17, %v22001_v13  ;;  %v22013_v13 = vld [vmem:[#allocation13_spill] sm:$0xff]  ;;  %vm22037_vm4 = vmmov %vm22020_vm2 }
 0xb3c   : > { %10157 = vmatprep.mubr.bf16.mxu1 %v21731_v9  ;;  %14910 = vmatprep.mubr.msk.bf16.mxu0 %vm15671_vm11, %v21736_v45  ;;  %vm22039_vm14 = vmmov %vm22020_vm2 }
 0xb3d   : > { %10136 = vmatpush1.bf16.msra.mxu1 %v10098_v48  ;;  %v20137_v54 = vpop.permute.xlu0 %11042  ;;  %14905 = vmatpush3.bf16.msra.mxu0 %v10100_v3  ;;  %v20144_v33 = vpop.permute.xlu1 %11040  ;;  %v22006_v48 = vld [vmem:[#allocation57_spill] sm:$0xff] }
 0xb3e   : > { %21999 = vst [vmem:[#allocation37_spill] sm:$0xff] %v20137_v54  ;;  %10137 = vmatprep.subr.bf16.mxu1 %v10096_v29  ;;  %22003 = vst [vmem:[#allocation51_spill] sm:$0xff] %v20144_v33  ;;  %14906 = vmatprep.subr.bf16.mxu0 %v21736_v45  ;;  %v10097_v41 = vsel %vm22007_vm6, %v22000_v39, %v22006_v48  ;;  %v22009_v29 = vld [vmem:[#allocation31_spill] sm:$0xff]  ;;  %v22010_v33 = vld [vmem:[#allocation12_spill] sm:$0xff] }
 0xb3f   : > { %11712 = vrot.lane.b32.xlu0 %v19142_v43, %s21980_s23  ;;  %11706 = vrot.lane.b32.xlu1 %v19062_v5, %s21980_s23  ;;  %v10093_v54 = vsel %vm22011_vm0, %v22010_v33, %v22009_v29  ;;  %v10092_v17 = vsel %vm22014_vm1, %v22013_v13, %v22010_v33  ;;  %v15490_v39 = vld [vmem:[%s21441_s11 + $0x38] sm:$0xff]   ;;  %v10266_v13 = vsel %vm22021_vm7, %v19653_v42, %v19669_v1  ;;  %v22023_v1 = vld [vmem:[#allocation90_spill] sm:$0xff]  ;;  %vm22043_vm6 = vmmov %vm22020_vm2  ;;  %vm22050_vm1 = vcmask 818176  }
 0xb40   : > { %vm22047_vm0 = vmmov %vm22020_vm2 }
 0xb41   : > { %10138 = vmatpush1.bf16.msra.mxu1 %v10095_v44  ;;  %v20157_v3 = vpop.permute.xlu0 %11044  ;;  %14907 = vmatpush3.bf16.msra.mxu0 %v10097_v41  ;;  %v20162_v57 = vpop.permute.xlu1 %11038  ;;  %v22015_v44 = vld [vmem:[#allocation104_spill] sm:$0xff]  ;;  %v22018_v41 = vld [vmem:[#allocation26_spill] sm:$0xff]  ;;  %vm22058_vm7 = vmmov %vm22050_vm1 }
 0xb42   : > { %22008 = vst [vmem:[#allocation25_spill] sm:$0xff] %v20157_v3  ;;  %10139 = vmatprep.subr.bf16.mxu1 %v10093_v54  ;;  %22012 = vst [vmem:[#allocation4_spill] sm:$0xff] %v20162_v57  ;;  %14908 = vmatprep.subr.bf16.mxu0 %v21736_v45  ;;  %v22016_v54 = vld [vmem:[#allocation101_spill] sm:$0xff]  ;;  %v10094_v3 = vsel %vm22019_vm3, %v22009_v29, %v22018_v41  ;;  %v10265_v33 = vsel %vm22020_vm2, %v22015_v44, %v19653_v42  ;;  %v22029_v41 = vld [vmem:[#allocation87_spill] sm:$0xff] }
 0xb43   : > { %11702 = vrot.lane.b32.xlu0 %v18980_v34, %s21980_s23  ;;  %11700 = vrot.lane.b32.xlu1 %v18926_v50, %s21980_s23  ;;  %v10264_v48 = vsel %vm22017_vm13, %v22016_v54, %v22015_v44  ;;  %vm22052_vm13 = vmmov %vm22047_vm0 }
 0xb44   : > { %v10280_v29 = vsel %vm487_vm8, %v10264_v48, 0  ;;  %v22027_v48 = vld [vmem:[#allocation74_spill] sm:$0xff]  ;;  %vm22053_vm3 = vmmov %vm22050_vm1 }
 0xb45   : > { %10140 = vmatpush1.bf16.msra.mxu1 %v10092_v17  ;;  %v20181_v57 = vpop.permute.xlu0 %11227  ;;  %14909 = vmatpush3.bf16.msra.mxu0 %v10094_v3  ;;  %v20190_v46 = vpop.permute.xlu1 %11225  ;;  %v10286_v17 = vsel %vm487_vm8, %v10266_v13, 0  ;;  %v22024_v3 = vld [vmem:[#allocation73_spill] sm:$0xff]  ;;  %vm22054_vm2 = vmmov %vm22050_vm1 }
 0xb46   : > { %13926 = vmatprep.subr.msk.bf16.mxu1 %vm487_vm8, %v10265_v33  ;;  %14914 = vmatprep.subr.bf16.mxu0 %v21736_v45  ;;  %v10262_v44 = vsel %vm22025_vm15, %v22024_v3, %v22023_v1  ;;  %v10263_v33 = vsel %vm22030_vm5, %v22023_v1, %v22029_v41  ;;  %v22036_v1 = vld [vmem:[#allocation45_spill] sm:$0xff]  ;;  %vm22061_vm15 = vmmov %vm22050_vm1 }
 0xb47   : > { %11704 = vrot.lane.b32.xlu0 %v18974_v20, %s21980_s23  ;;  %11698 = vrot.lane.b32.xlu1 %v18928_v8, %s21980_s23  ;;  %vm22067_vm5 = vmmov %vm22050_vm1 }
 0xb48   : > { %13921 = vmatmul.mubr.msk.bf16.vlgmr.msra.gmra.mxu1 %vm3721_vm12, %v15490_v39  ;;  %14911 = vmatmul.mubr.msk.bf16.vlgmr.msra.gmra.mxu0 %vm3721_vm12, %v15490_v39  ;;  %v10261_v39 = vsel %vm22028_vm10, %v22027_v48, %v22024_v3  ;;  %vm22063_vm10 = vmmov %vm22050_vm1 }
 0xb49   : > { %10297 = vmatpush1.bf16.msra.mxu1 %v10280_v29  ;;  %v20201_v42 = vpop.permute.xlu0 %11231  ;;  %14915 = vmatpush3.bf16.msra.mxu0 %v10286_v17  ;;  %v20206_v54 = vpop.permute.xlu1 %11229  ;;  %v22032_v29 = vld [vmem:[#allocation60_spill] sm:$0xff] }
 0xb4a   : > { %22022 = vst [vmem:[#allocation5_spill] sm:$0xff] %v20201_v42  ;;  %10298 = vmatprep.subr.bf16.mxu1 %v10262_v44  ;;  %22026 = vst [vmem:[#allocation95_spill] sm:$0xff] %v20206_v54  ;;  %14916 = vmatprep.subr.bf16.mxu0 %v21736_v45  ;;  %v22033_v17 = vld [vmem:[#allocation44_spill] sm:$0xff] }
 0xb4b   : > { %11694 = vrot.lane.b32.xlu0 %v18888_v16, %s21980_s23  ;;  %11692 = vrot.lane.b32.xlu1 %v18809_v62, %s21980_s23  ;;  %v10259_v44 = vsel %vm22034_vm9, %v22033_v17, %v22032_v29  ;;  %v10258_v48 = vsel %vm22037_vm4, %v22036_v1, %v22033_v17  ;;  %v22046_v17 = vld [vmem:[#allocation15_spill] sm:$0xff]  ;;  %vm22070_vm9 = vmmov %vm22050_vm1 }
 0xb4c   : > { %10320 = vmatprep.mubr.bf16.mxu1 %v21731_v9  ;;  %14922 = vmatprep.mubr.msk.bf16.mxu0 %vm15671_vm11, %v21736_v45  ;;  %vm22072_vm4 = vmmov %vm22050_vm1 }
 0xb4d   : > { %10299 = vmatpush1.bf16.msra.mxu1 %v10261_v39  ;;  %v20220_v13 = vpop.permute.xlu0 %11221  ;;  %14917 = vmatpush3.bf16.msra.mxu0 %v10263_v33  ;;  %v20227_v3 = vpop.permute.xlu1 %11219  ;;  %v22038_v39 = vld [vmem:[#allocation59_spill] sm:$0xff] }
 0xb4e   : > { %22031 = vst [vmem:[#allocation98_spill] sm:$0xff] %v20220_v13  ;;  %10300 = vmatprep.subr.bf16.mxu1 %v10259_v44  ;;  %22035 = vst [vmem:[#allocation21_spill] sm:$0xff] %v20227_v3  ;;  %14918 = vmatprep.subr.bf16.mxu0 %v21736_v45  ;;  %v10260_v41 = vsel %vm22039_vm14, %v22032_v29, %v22038_v39  ;;  %v22041_v44 = vld [vmem:[#allocation33_spill] sm:$0xff]  ;;  %v22042_v3 = vld [vmem:[#allocation14_spill] sm:$0xff] }
 0xb4f   : > { %11696 = vrot.lane.b32.xlu0 %v18878_v38, %s21980_s23  ;;  %11690 = vrot.lane.b32.xlu1 %v18807_v2, %s21980_s23  ;;  %v10256_v13 = vsel %vm22043_vm6, %v22042_v3, %v22041_v44  ;;  %v10255_v1 = vsel %vm22047_vm0, %v22046_v17, %v22042_v3  ;;  %v15491_v29 = vld [vmem:[%s21441_s11 + $0x40] sm:$0xff]   ;;  %v10429_v17 = vsel %vm22054_vm2, %v19666_v32, %v19692_v28  ;;  %vm22076_vm14 = vmmov %vm22050_vm1  ;;  %vm22082_vm0 = vcmask 654336  }
 0xb50   : > { %v22056_v28 = vld [vmem:[#allocation92_spill] sm:$0xff]  ;;  %vm22079_vm6 = vmmov %vm22050_vm1 }
 0xb51   : > { %10301 = vmatpush1.bf16.msra.mxu1 %v10258_v48  ;;  %v20240_v33 = vpop.permute.xlu0 %11223  ;;  %14919 = vmatpush3.bf16.msra.mxu0 %v10260_v41  ;;  %v20245_v42 = vpop.permute.xlu1 %11217  ;;  %v22048_v48 = vld [vmem:[#allocation106_spill] sm:$0xff]  ;;  %v22051_v41 = vld [vmem:[#allocation28_spill] sm:$0xff]  ;;  %vm22089_vm2 = vmmov %vm22082_vm0 }
 0xb52   : > { %22040 = vst [vmem:[#allocation84_spill] sm:$0xff] %v20240_v33  ;;  %10302 = vmatprep.subr.bf16.mxu1 %v10256_v13  ;;  %22044 = vst [vmem:[#allocation67_spill] sm:$0xff] %v20245_v42  ;;  %14920 = vmatprep.subr.bf16.mxu0 %v21736_v45  ;;  %v22049_v13 = vld [vmem:[#allocation103_spill] sm:$0xff]  ;;  %v10257_v33 = vsel %vm22052_vm13, %v22041_v44, %v22051_v41  ;;  %v10428_v3 = vsel %vm22053_vm3, %v22048_v48, %v19666_v32  ;;  %v22062_v41 = vld [vmem:[#allocation93_spill] sm:$0xff] }
 0xb53   : > { %11879 = vrot.lane.b32.xlu0 %v19226_v37, %s22045_s21  ;;  %11877 = vrot.lane.b32.xlu1 %v19238_v10, %s22045_s21  ;;  %v10427_v39 = vsel %vm22050_vm1, %v22049_v13, %v22048_v48  ;;  %vm22084_vm13 = vmmov %vm22082_vm0 }
 0xb54   : > { %v10443_v44 = vsel %vm487_vm8, %v10427_v39, 0  ;;  %v22060_v39 = vld [vmem:[#allocation77_spill] sm:$0xff]  ;;  %vm22085_vm3 = vmmov %vm22082_vm0 }
 0xb55   : > { %10303 = vmatpush1.bf16.msra.mxu1 %v10255_v1  ;;  %v20264_v42 = vpop.permute.xlu0 %11213  ;;  %14921 = vmatpush3.bf16.msra.mxu0 %v10257_v33  ;;  %v20273_v54 = vpop.permute.xlu1 %11211  ;;  %v10449_v1 = vsel %vm487_vm8, %v10429_v17, 0  ;;  %v22057_v33 = vld [vmem:[#allocation75_spill] sm:$0xff] }
 0xb56   : > { %13932 = vmatprep.subr.msk.bf16.mxu1 %vm487_vm8, %v10428_v3  ;;  %14926 = vmatprep.subr.bf16.mxu0 %v21736_v45  ;;  %v10425_v48 = vsel %vm22058_vm7, %v22057_v33, %v22056_v28  ;;  %v10426_v3 = vsel %vm22063_vm10, %v22056_v28, %v22062_v41  ;;  %v22069_v28 = vld [vmem:[#allocation48_spill] sm:$0xff]  ;;  %vm22092_vm7 = vmmov %vm22082_vm0 }
 0xb57   : > { %11883 = vrot.lane.b32.xlu0 %v19318_v4, %s22045_s21  ;;  %11881 = vrot.lane.b32.xlu1 %v19330_v24, %s22045_s21  ;;  %vm22098_vm10 = vmmov %vm22082_vm0 }
 0xb58   : > { %13927 = vmatmul.mubr.msk.bf16.vlgmr.msra.gmra.mxu1 %vm3721_vm12, %v15491_v29  ;;  %14923 = vmatmul.mubr.msk.bf16.vlgmr.msra.gmra.mxu0 %vm3721_vm12, %v15491_v29  ;;  %v10424_v29 = vsel %vm22061_vm15, %v22060_v39, %v22057_v33  ;;  %vm22094_vm15 = vmmov %vm22082_vm0 }
 0xb59   : > { %10460 = vmatpush1.bf16.msra.mxu1 %v10443_v44  ;;  %v20284_v32 = vpop.permute.xlu0 %11215  ;;  %14927 = vmatpush3.bf16.msra.mxu0 %v10449_v1  ;;  %v20289_v13 = vpop.permute.xlu1 %11209  ;;  %v22065_v44 = vld [vmem:[#allocation62_spill] sm:$0xff] }
 0xb5a   : > { %22055 = vst [vmem:[#allocation68_spill] sm:$0xff] %v20284_v32  ;;  %10461 = vmatprep.subr.bf16.mxu1 %v10425_v48  ;;  %22059 = vst [vmem:[#allocation81_spill] sm:$0xff] %v20289_v13  ;;  %14928 = vmatprep.subr.bf16.mxu0 %v21736_v45  ;;  %v22066_v1 = vld [vmem:[#allocation46_spill] sm:$0xff] }
 0xb5b   : > { %11873 = vrot.lane.b32.xlu0 %v19154_v0, %s22045_s21  ;;  %11871 = vrot.lane.b32.xlu1 %v19058_v30, %s22045_s21  ;;  %v10422_v48 = vsel %vm22067_vm5, %v22066_v1, %v22065_v44  ;;  %v10421_v39 = vsel %vm22070_vm9, %v22069_v28, %v22066_v1  ;;  %v22078_v1 = vld [vmem:[#allocation17_spill] sm:$0xff]  ;;  %vm22101_vm5 = vmmov %vm22082_vm0 }
 0xb5c   : > { %10483 = vmatprep.mubr.bf16.mxu1 %v21731_v9  ;;  %14934 = vmatprep.mubr.msk.bf16.mxu0 %vm15671_vm11, %v21736_v45  ;;  %v15492_v28 = vld [vmem:[%s21441_s11 + $0x48] sm:$0xff]   ;;  %vm22103_vm9 = vmmov %vm22082_vm0 }
 0xb5d   : > { %10462 = vmatpush1.bf16.msra.mxu1 %v10424_v29  ;;  %v20303_v17 = vpop.permute.xlu0 %11205  ;;  %14929 = vmatpush3.bf16.msra.mxu0 %v10426_v3  ;;  %v20310_v33 = vpop.permute.xlu1 %11203  ;;  %v22071_v29 = vld [vmem:[#allocation64_spill] sm:$0xff] }
 0xb5e   : > { %22064 = vst [vmem:[#allocation54_spill] sm:$0xff] %v20303_v17  ;;  %10463 = vmatprep.subr.bf16.mxu1 %v10422_v48  ;;  %22068 = vst [vmem:[#allocation38_spill] sm:$0xff] %v20310_v33  ;;  %14930 = vmatprep.subr.bf16.mxu0 %v21736_v45  ;;  %v10423_v41 = vsel %vm22072_vm4, %v22065_v44, %v22071_v29  ;;  %v22074_v48 = vld [vmem:[#allocation35_spill] sm:$0xff]  ;;  %v22075_v33 = vld [vmem:[#allocation16_spill] sm:$0xff] }
 0xb5f   : > { %11875 = vrot.lane.b32.xlu0 %v19142_v43, %s22045_s21  ;;  %11869 = vrot.lane.b32.xlu1 %v19062_v5, %s22045_s21  ;;  %v10419_v17 = vsel %vm22076_vm14, %v22075_v33, %v22074_v48  ;;  %v10418_v44 = vsel %vm22079_vm6, %v22078_v1, %v22075_v33  ;;  %v10592_v1 = vsel %vm22085_vm3, %v19708_v6, %v19683_v35  ;;  %vm22107_vm4 = vmmov %vm22082_vm0 }
 0xb60   : > { %v10612_v35 = vsel %vm487_vm8, %v10592_v1, 0  ;;  %vm22111_vm14 = vmmov %vm22082_vm0 }
 0xb61   : > { %10464 = vmatpush1.bf16.msra.mxu1 %v10421_v39  ;;  %v20323_v3 = vpop.permute.xlu0 %11207  ;;  %14931 = vmatpush3.bf16.msra.mxu0 %v10423_v41  ;;  %v20328_v32 = vpop.permute.xlu1 %11201  ;;  %v22080_v39 = vld [vmem:[#allocation105_spill] sm:$0xff]  ;;  %v22083_v41 = vld [vmem:[#allocation30_spill] sm:$0xff]  ;;  %vm22113_vm6 = vmmov %vm22082_vm0 }
 0xb62   : > { %22073 = vst [vmem:[#allocation39_spill] sm:$0xff] %v20323_v3  ;;  %10465 = vmatprep.subr.bf16.mxu1 %v10419_v17  ;;  %22077 = vst [vmem:[#allocation53_spill] sm:$0xff] %v20328_v32  ;;  %14932 = vmatprep.subr.bf16.mxu0 %v21736_v45  ;;  %v22081_v17 = vld [vmem:[#allocation108_spill] sm:$0xff]  ;;  %v10420_v3 = vsel %vm22050_vm1, %v22074_v48, %v22083_v41  ;;  %v10591_v33 = vsel %vm22084_vm13, %v22080_v39, %v19708_v6  ;;  %v22093_v41 = vld [vmem:[#allocation91_spill] sm:$0xff] }
 0xb63   : > { %11865 = vrot.lane.b32.xlu0 %v18980_v34, %s22045_s21  ;;  %11863 = vrot.lane.b32.xlu1 %v18926_v50, %s22045_s21  ;;  %v10590_v29 = vsel %vm22082_vm0, %v22081_v17, %v22080_v39  ;;  %vm22116_vm0 = vcmask 646144  }
 0xb64   : > { %v10606_v48 = vsel %vm487_vm8, %v10590_v29, 0  ;;  %vm22117_vm1 = vmmov %vm22116_vm0 }
 0xb65   : > { %10466 = vmatpush1.bf16.msra.mxu1 %v10418_v44  ;;  %v20347_v32 = vpop.permute.xlu0 %11390  ;;  %14933 = vmatpush3.bf16.msra.mxu0 %v10420_v3  ;;  %v20356_v13 = vpop.permute.xlu1 %11388  ;;  %v22087_v3 = vld [vmem:[#allocation89_spill] sm:$0xff]  ;;  %v22088_v44 = vld [vmem:[#allocation76_spill] sm:$0xff]  ;;  %vm22118_vm13 = vmmov %vm22116_vm0 }
 0xb66   : > { %13938 = vmatprep.subr.msk.bf16.mxu1 %vm487_vm8, %v10591_v33  ;;  %14938 = vmatprep.subr.bf16.mxu0 %v21736_v45  ;;  %v10588_v39 = vsel %vm22089_vm2, %v22088_v44, %v22087_v3  ;;  %v10589_v33 = vsel %vm22094_vm15, %v22087_v3, %v22093_v41  ;;  %v22100_v3 = vld [vmem:[#allocation49_spill] sm:$0xff]  ;;  %vm22120_vm3 = vmmov %vm22116_vm0 }
 0xb67   : > { %11867 = vrot.lane.b32.xlu0 %v18974_v20, %s22045_s21  ;;  %11861 = vrot.lane.b32.xlu1 %v18928_v8, %s22045_s21  ;;  %vm22121_vm2 = vmmov %vm22116_vm0 }
 0xb68   : > { %13933 = vmatmul.mubr.msk.bf16.vlgmr.msra.gmra.mxu1 %vm3721_vm12, %v15492_v28  ;;  %14935 = vmatmul.mubr.msk.bf16.vlgmr.msra.gmra.mxu0 %vm3721_vm12, %v15492_v28  ;;  %v22091_v28 = vld [vmem:[#allocation78_spill] sm:$0xff]  ;;  %vm22123_vm15 = vmmov %vm22116_vm0 }
 0xb69   : > { %10623 = vmatpush1.bf16.msra.mxu1 %v10606_v48  ;;  %v20367_v6 = vpop.permute.xlu0 %11394  ;;  %14939 = vmatpush3.bf16.msra.mxu0 %v10612_v35  ;;  %v20372_v17 = vpop.permute.xlu1 %11392  ;;  %v10587_v29 = vsel %vm22092_vm7, %v22091_v28, %v22088_v44  ;;  %v22096_v48 = vld [vmem:[#allocation61_spill] sm:$0xff]  ;;  %v22097_v35 = vld [vmem:[#allocation47_spill] sm:$0xff]  ;;  %vm22122_vm7 = vmmov %vm22116_vm0 }
 0xb6a   : > { %22086 = vst [vmem:[#allocation27_spill] sm:$0xff] %v20367_v6  ;;  %10624 = vmatprep.subr.bf16.mxu1 %v10588_v39  ;;  %22090 = vst [vmem:[#allocation6_spill] sm:$0xff] %v20372_v17  ;;  %14940 = vmatprep.subr.bf16.mxu0 %v21736_v45  ;;  %v10585_v39 = vsel %vm22098_vm10, %v22097_v35, %v22096_v48  ;;  %v10584_v28 = vsel %vm22101_vm5, %v22100_v3, %v22097_v35  ;;  %v22110_v35 = vld [vmem:[#allocation19_spill] sm:$0xff]  ;;  %v15493_v3 = vld [vmem:[%s21441_s11 + $0x50] sm:$0xff]  }
 0xb6b   : > { %11857 = vrot.lane.b32.xlu0 %v18888_v16, %s22045_s21  ;;  %11855 = vrot.lane.b32.xlu1 %v18809_v62, %s22045_s21  ;;  %vm22124_vm10 = vmmov %vm22116_vm0 }
 0xb6c   : > { %10646 = vmatprep.mubr.bf16.mxu1 %v21731_v9  ;;  %14946 = vmatprep.mubr.msk.bf16.mxu0 %vm15671_vm11, %v21736_v45  ;;  %vm22125_vm5 = vmmov %vm22116_vm0 }
 0xb6d   : > { %10625 = vmatpush1.bf16.msra.mxu1 %v10587_v29  ;;  %v20386_v1 = vpop.permute.xlu0 %11384  ;;  %14941 = vmatpush3.bf16.msra.mxu0 %v10589_v33  ;;  %v20393_v44 = vpop.permute.xlu1 %11382  ;;  %v22102_v29 = vld [vmem:[#allocation63_spill] sm:$0xff] }
 0xb6e   : > { %22095 = vst [vmem:[#allocation9_spill] sm:$0xff] %v20386_v1  ;;  %10626 = vmatprep.subr.bf16.mxu1 %v10585_v39  ;;  %22099 = vst [vmem:[#allocation97_spill] sm:$0xff] %v20393_v44  ;;  %14942 = vmatprep.subr.bf16.mxu0 %v21736_v45  ;;  %v10586_v41 = vsel %vm22103_vm9, %v22096_v48, %v22102_v29  ;;  %v22105_v39 = vld [vmem:[#allocation32_spill] sm:$0xff]  ;;  %v22106_v44 = vld [vmem:[#allocation18_spill] sm:$0xff] }
 0xb6f   : > { %11859 = vrot.lane.b32.xlu0 %v18878_v38, %s22045_s21  ;;  %11853 = vrot.lane.b32.xlu1 %v18807_v2, %s22045_s21  ;;  %v10582_v1 = vsel %vm22107_vm4, %v22106_v44, %v22105_v39  ;;  %v10581_v48 = vsel %vm22111_vm14, %v22110_v35, %v22106_v44  ;;  %v22114_v29 = vld [vmem:[#allocation107_spill] sm:$0xff]  ;;  %v10755_v35 = vsel %vm22118_vm13, %v19729_v49, %v19703_v53  ;;  %vm22126_vm9 = vmmov %vm22116_vm0 }
 0xb70   : > { %v10754_v44 = vsel %vm22117_vm1, %v22114_v29, %v19729_v49  ;;  %v10775_v53 = vsel %vm487_vm8, %v10755_v35, 0  ;;  %v10745_v35 = vsel %vm22126_vm9, %v19812_v59, %v19805_v40  ;;  %vm22127_vm4 = vmmov %vm22116_vm0 }
 0xb71   : > { %10627 = vmatpush1.bf16.msra.mxu1 %v10584_v28  ;;  %v20406_v33 = vpop.permute.xlu0 %11386  ;;  %14943 = vmatpush3.bf16.msra.mxu0 %v10586_v41  ;;  %v20411_v6 = vpop.permute.xlu1 %11380  ;;  %v22112_v28 = vld [vmem:[#allocation34_spill] sm:$0xff]  ;;  %v22115_v41 = vld [vmem:[#allocation109_spill] sm:$0xff]  ;;  %vm22128_vm14 = vmmov %vm22116_vm0 }
 0xb72   : > { %22104 = vst [vmem:[#allocation100_spill] sm:$0xff] %v20406_v33  ;;  %10628 = vmatprep.subr.bf16.mxu1 %v10582_v1  ;;  %22108 = vst [vmem:[#allocation22_spill] sm:$0xff] %v20411_v6  ;;  %14944 = vmatprep.subr.bf16.mxu0 %v21736_v45  ;;  %v10583_v1 = vsel %vm22113_vm6, %v22105_v39, %v22112_v28  ;;  %v10753_v33 = vsel %vm22116_vm0, %v22115_v41, %v22114_v29  ;;  %vm22129_vm6 = vcmask 637952  }
 0xb73   : > { %12042 = vrot.lane.b32.xlu0 %v19226_v37, %s22109_s28  ;;  %12040 = vrot.lane.b32.xlu1 %v19238_v10, %s22109_s28  ;;  %v10769_v39 = vsel %vm487_vm8, %v10753_v33, 0  ;;  %v10748_v41 = vsel %vm22123_vm15, %v19775_v36, %v19766_v56  ;;  %vm22130_vm0 = vmmov %vm22129_vm6 }
 0xb74   : > { %vm22131_vm1 = vmmov %vm22130_vm0 }
 0xb75   : > { %10629 = vmatpush1.bf16.msra.mxu1 %v10581_v48  ;;  %v20430_v6 = vpop.permute.xlu0 %11376  ;;  %14945 = vmatpush3.bf16.msra.mxu0 %v10583_v1  ;;  %v20439_v17 = vpop.permute.xlu1 %11374  ;;  %v22119_v48 = vld [vmem:[#allocation79_spill] sm:$0xff]  ;;  %vm22132_vm13 = vmmov %vm22130_vm0 }
 0xb76   : > { %13944 = vmatprep.subr.msk.bf16.mxu1 %vm487_vm8, %v10754_v44  ;;  %14950 = vmatprep.subr.bf16.mxu0 %v21736_v45  ;;  %v10751_v28 = vsel %vm22120_vm3, %v22119_v48, %v19722_v60  ;;  %v10750_v33 = vsel %vm22121_vm2, %v19747_v19, %v22119_v48  ;;  %vm22133_vm3 = vmmov %vm22130_vm0 }
 0xb77   : > { %12046 = vrot.lane.b32.xlu0 %v19318_v4, %s22109_s28  ;;  %12044 = vrot.lane.b32.xlu1 %v19330_v24, %s22109_s28  ;;  %vm22134_vm2 = vmmov %vm22130_vm0 }
 0xb78   : > { %13939 = vmatmul.mubr.msk.bf16.vlgmr.msra.gmra.mxu1 %vm3721_vm12, %v15493_v3  ;;  %14947 = vmatmul.mubr.msk.bf16.vlgmr.msra.gmra.mxu0 %vm3721_vm12, %v15493_v3  ;;  %v10752_v3 = vsel %vm22122_vm7, %v19722_v60, %v19742_v55  ;;  %v10747_v60 = vsel %vm22124_vm10, %v19791_v27, %v19775_v36  ;;  %v10749_v55 = vsel %vm22125_vm5, %v19766_v56, %v19786_v22  ;;  %v15494_v36 = vld [vmem:[%s21441_s11 + $0x58] sm:$0xff]   ;;  %vm22135_vm7 = vmmov %vm22130_vm0 }
 0xb79   : > { %10786 = vmatpush1.bf16.msra.mxu1 %v10769_v39  ;;  %v20450_v49 = vpop.permute.xlu0 %11378  ;;  %14951 = vmatpush3.bf16.msra.mxu0 %v10775_v53  ;;  %v20455_v1 = vpop.permute.xlu1 %11372  ;;  %v10744_v56 = vsel %vm22127_vm4, %v19830_v51, %v19812_v59  ;;  %v10746_v22 = vsel %vm22128_vm14, %v19805_v40, %v19825_v11  ;;  %v10916_v27 = vsel %vm22129_vm6, %v19858_v12, %v19849_v47  ;;  %vm22136_vm15 = vmmov %vm22130_vm0  ;;  %vm22147_vm14 = vcmask 629760  }
 0xb7a   : > { %10787 = vmatprep.subr.bf16.mxu1 %v10751_v28  ;;  %14952 = vmatprep.subr.bf16.mxu0 %v21736_v45  ;;  %v10917_v59 = vsel %vm22130_vm0, %v19849_v47, %v19874_v63  ;;  %v10918_v51 = vsel %vm22131_vm1, %v19874_v63, %v19869_v14  ;;  %v10932_v40 = vsel %vm487_vm8, %v10916_v27, 0  ;;  %v10914_v12 = vsel %vm22132_vm13, %v19895_v58, %v19888_v23  ;;  %vm22138_vm10 = vmmov %vm22130_vm0 }
 0xb7b   : > { %12036 = vrot.lane.b32.xlu0 %v19154_v0, %s22109_s28  ;;  %12034 = vrot.lane.b32.xlu1 %v19058_v30, %s22109_s28  ;;  %v10938_v11 = vsel %vm487_vm8, %v10918_v51, 0  ;;  %v10913_v63 = vsel %vm22133_vm3, %v19913_v26, %v19895_v58  ;;  %v10915_v28 = vsel %vm22134_vm2, %v19888_v23, %v19908_v61  ;;  %v10910_v23 = vsel %vm22136_vm15, %v19957_v52, %v19941_v15  ;;  %v22137_v61 = vld [vmem:[#allocation50_spill] sm:$0xff]  ;;  %vm22141_vm5 = vmmov %vm22130_vm0  ;;  %v15495_v52 = vld [vmem:[%s21441_s11 + $0x60] sm:$0xff]  }
 0xb7c   : > { %10809 = vmatprep.mubr.bf16.mxu1 %v21731_v9  ;;  %14958 = vmatprep.mubr.msk.bf16.mxu0 %vm15671_vm11, %v21736_v45  ;;  %v10912_v26 = vsel %vm22138_vm10, %v19932_v21, %v22137_v61  ;;  %vm22144_vm9 = vmmov %vm22130_vm0  ;;  %v11079_v27 = vsel %vm22147_vm14, %v20024_v18, %v20015_v31  ;;  %v22148_v51 = vld [vmem:[#allocation20_spill] sm:$0xff]  ;;  %v22153_v61 = vld [vmem:[#allocation65_spill] sm:$0xff] }
 0xb7d   : > { %10788 = vmatpush1.bf16.msra.mxu1 %v10750_v33  ;;  %v20469_v29 = vpop.permute.xlu0 %11368  ;;  %14953 = vmatpush3.bf16.msra.mxu0 %v10752_v3  ;;  %v20476_v19 = vpop.permute.xlu1 %11366  ;;  %v10911_v3 = vsel %vm22135_vm7, %v19941_v15, %v19932_v21  ;;  %v22143_v15 = vld [vmem:[#allocation94_spill] sm:$0xff]  ;;  %vm22146_vm4 = vmmov %vm22130_vm0  ;;  %v11095_v18 = vsel %vm487_vm8, %v11079_v27, 0 }
 0xb7e   : > { %10789 = vmatprep.subr.bf16.mxu1 %v10748_v41  ;;  %14954 = vmatprep.subr.bf16.mxu0 %v21736_v45  ;;  %vm22149_vm6 = vmmov %vm22147_vm14 }
 0xb7f   : > { %12038 = vrot.lane.b32.xlu0 %v19142_v43, %s22109_s28  ;;  %12032 = vrot.lane.b32.xlu1 %v19062_v5, %s22109_s28  ;;  %vm22151_vm0 = vmmov %vm22149_vm6 }
 0xb80   : > { %vm22154_vm1 = vmmov %vm22151_vm0 }
 0xb81   : > { %10790 = vmatpush1.bf16.msra.mxu1 %v10747_v60  ;;  %v20489_v44 = vpop.permute.xlu0 %11370  ;;  %14955 = vmatpush3.bf16.msra.mxu0 %v10749_v55  ;;  %v20494_v39 = vpop.permute.xlu1 %11364  ;;  %v22139_v60 = vld [vmem:[#allocation23_spill] sm:$0xff]  ;;  %v22140_v55 = vld [vmem:[#allocation8_spill] sm:$0xff]  ;;  %vm22156_vm13 = vmmov %vm22151_vm0 }
 0xb82   : > { %10791 = vmatprep.subr.bf16.mxu1 %v10745_v35  ;;  %14956 = vmatprep.subr.bf16.mxu0 %v21736_v45  ;;  %v10908_v35 = vsel %vm22141_vm5, %v22140_v55, %v22139_v60  ;;  %v10907_v21 = vsel %vm22144_vm9, %v22143_v15, %v22140_v55  ;;  %v22155_v15 = vld [vmem:[#allocation80_spill] sm:$0xff]  ;;  %vm22158_vm3 = vmmov %vm22151_vm0 }
 0xb83   : > { %12028 = vrot.lane.b32.xlu0 %v18980_v34, %s22109_s28  ;;  %12026 = vrot.lane.b32.xlu1 %v18926_v50, %s22109_s28  ;;  %vm22159_vm2 = vmmov %vm22151_vm0 }
 0xb84   : > { %vm22161_vm7 = vmmov %vm22151_vm0 }
 0xb85   : > { %10792 = vmatpush1.bf16.msra.mxu1 %v10744_v56  ;;  %v20513_v53 = vpop.permute.xlu0 %11553  ;;  %14957 = vmatpush3.bf16.msra.mxu0 %v10746_v22  ;;  %v20522_v48 = vpop.permute.xlu1 %11551  ;;  %vm22163_vm15 = vmmov %vm22151_vm0 }
 0xb86   : > { %13950 = vmatprep.subr.msk.bf16.mxu1 %vm487_vm8, %v10917_v59  ;;  %14962 = vmatprep.subr.bf16.mxu0 %v21736_v45  ;;  %vm22167_vm10 = vmmov %vm22151_vm0 }
 0xb87   : > { %12030 = vrot.lane.b32.xlu0 %v18974_v20, %s22109_s28  ;;  %12024 = vrot.lane.b32.xlu1 %v18928_v8, %s22109_s28  ;;  %vm22170_vm5 = vmmov %vm22151_vm0 }
 0xb88   : > { %13945 = vmatmul.mubr.msk.bf16.vlgmr.msra.gmra.mxu1 %vm3721_vm12, %v15494_v36  ;;  %14959 = vmatmul.mubr.msk.bf16.vlgmr.msra.gmra.mxu0 %vm3721_vm12, %v15494_v36  ;;  %v22145_v36 = vld [vmem:[#allocation7_spill] sm:$0xff]  ;;  %vm22172_vm9 = vmmov %vm22151_vm0 }
 0xb89   : > { %10949 = vmatpush1.bf16.msra.mxu1 %v10932_v40  ;;  %v20533_v47 = vpop.permute.xlu0 %11557  ;;  %14963 = vmatpush3.bf16.msra.mxu0 %v10938_v11  ;;  %v20538_v14 = vpop.permute.xlu1 %11555  ;;  %v10909_v22 = vsel %vm22146_vm4, %v22139_v60, %v22145_v36  ;;  %v11080_v40 = vsel %vm22149_vm6, %v20015_v31, %v22148_v51  ;;  %v22150_v11 = vld [vmem:[#allocation96_spill] sm:$0xff]  ;;  %v22157_v36 = vld [vmem:[#allocation66_spill] sm:$0xff]  ;;  %vm22173_vm4 = vcmask 621568  }
 0xb8a   : > { %10950 = vmatprep.subr.bf16.mxu1 %v10914_v12  ;;  %14964 = vmatprep.subr.bf16.mxu0 %v21736_v45  ;;  %v11081_v12 = vsel %vm22151_vm0, %v22148_v51, %v22150_v11  ;;  %v11074_v51 = vsel %vm22159_vm2, %v20107_v7, %v20098_v25  ;;  %vm22175_vm14 = vmmov %vm22173_vm4 }
 0xb8b   : > { %12020 = vrot.lane.b32.xlu0 %v18888_v16, %s22109_s28  ;;  %12018 = vrot.lane.b32.xlu1 %v18809_v62, %s22109_s28  ;;  %vm22177_vm6 = vmmov %vm22173_vm4 }
 0xb8c   : > { %10972 = vmatprep.mubr.bf16.mxu1 %v21731_v9  ;;  %14970 = vmatprep.mubr.msk.bf16.mxu0 %vm15671_vm11, %v21736_v45  ;;  %vm22181_vm0 = vmmov %vm22173_vm4 }
 0xb8d   : > { %10951 = vmatpush1.bf16.msra.mxu1 %v10913_v63  ;;  %v20552_v33 = vpop.permute.xlu0 %11547  ;;  %14965 = vmatpush3.bf16.msra.mxu0 %v10915_v28  ;;  %v20559_v58 = vpop.permute.xlu1 %11545  ;;  %v11101_v28 = vsel %vm487_vm8, %v11081_v12, 0  ;;  %vm22189_vm2 = vmmov %vm22181_vm0 }
 0xb8e   : > { %10952 = vmatprep.subr.bf16.mxu1 %v10911_v3  ;;  %14966 = vmatprep.subr.bf16.mxu0 %v21736_v45 }
 0xb8f   : > { %12022 = vrot.lane.b32.xlu0 %v18878_v38, %s22109_s28  ;;  %12016 = vrot.lane.b32.xlu1 %v18807_v2, %s22109_s28 }
 0xb91   : > { %10953 = vmatpush1.bf16.msra.mxu1 %v10910_v23  ;;  %v20572_v41 = vpop.permute.xlu0 %11549  ;;  %14967 = vmatpush3.bf16.msra.mxu0 %v10912_v26  ;;  %v20577_v56 = vpop.permute.xlu1 %11543  ;;  %v22152_v23 = vld [vmem:[#allocation82_spill] sm:$0xff] }
 0xb92   : > { %10954 = vmatprep.subr.bf16.mxu1 %v10908_v35  ;;  %14968 = vmatprep.subr.bf16.mxu0 %v21736_v45  ;;  %v11077_v26 = vsel %vm22154_vm1, %v22153_v61, %v22152_v23  ;;  %vm22183_vm1 = vmmov %vm22181_vm0 }
 0xb93   : > { %12205 = vrot.lane.b32.xlu0 %v19226_v37, %s22142_s22  ;;  %12203 = vrot.lane.b32.xlu1 %v19238_v10, %s22142_s22 }
 0xb95   : > { %10955 = vmatpush1.bf16.msra.mxu1 %v10907_v21  ;;  %v20596_v59 = vpop.permute.xlu0 %11539  ;;  %14969 = vmatpush3.bf16.msra.mxu0 %v10909_v22  ;;  %v20605_v63 = vpop.permute.xlu1 %11537  ;;  %v11076_v21 = vsel %vm22156_vm13, %v22155_v15, %v22153_v61  ;;  %v11078_v22 = vsel %vm22158_vm3, %v22152_v23, %v22157_v36  ;;  %v22162_v61 = vld [vmem:[#allocation52_spill] sm:$0xff]  ;;  %v22165_v15 = vld [vmem:[#allocation37_spill] sm:$0xff]  ;;  %vm22185_vm13 = vmmov %vm22181_vm0 }
 0xb96   : > { %13956 = vmatprep.subr.msk.bf16.mxu1 %vm487_vm8, %v11080_v40  ;;  %14974 = vmatprep.subr.bf16.mxu0 %v21736_v45  ;;  %vm22186_vm3 = vmmov %vm22181_vm0 }
 0xb97   : > { %12209 = vrot.lane.b32.xlu0 %v19318_v4, %s22142_s22  ;;  %12207 = vrot.lane.b32.xlu1 %v19330_v24, %s22142_s22 }
 0xb98   : > { %13951 = vmatmul.mubr.msk.bf16.vlgmr.msra.gmra.mxu1 %vm3721_vm12, %v15495_v52  ;;  %v20614_v31 = vpop.f32.mrf.mxu1  ;;  %14971 = vmatmul.mubr.msk.bf16.vlgmr.msra.gmra.mxu0 %vm3721_vm12, %v15495_v52  ;;  %v20623_v60 = vpop.f32.mrf.mxu0 }
 0xb99   : > { %11112 = vmatpush1.bf16.msra.mxu1 %v11095_v18  ;;  %v20618_v3 = vpop.permute.xlu0 %11541  ;;  %14975 = vmatpush3.bf16.msra.mxu0 %v11101_v28  ;;  %v20625_v55 = vpop.permute.xlu1 %11535  ;;  %v22160_v18 = vld [vmem:[#allocation36_spill] sm:$0xff] }
 0xb9a   : > { %11113 = vmatprep.subr.bf16.mxu1 %v11077_v26  ;;  %14976 = vmatprep.subr.bf16.mxu0 %v21736_v45  ;;  %v14828_v35 = vpop.f32.mrf.mxu0  ;;  %v9061_v52 = vpop.f32.mrf.mxu1  ;;  %v11073_v28 = vsel %vm22161_vm7, %v22160_v18, %v20107_v7  ;;  %v11075_v26 = vsel %vm22163_vm15, %v20098_v25, %v22162_v61  ;;  %v22169_v7 = vld [vmem:[#allocation4_spill] sm:$0xff]  ;;  %v22171_v18 = vld [vmem:[#allocation25_spill] sm:$0xff]  ;;  %v11242_v61 = vsel %vm22173_vm4, %v20190_v46, %v20181_v57  ;;  %vm22191_vm7 = vmmov %vm22181_vm0 }
 0xb9b   : > { %12199 = vrot.lane.b32.xlu0 %v19154_v0, %s22142_s22  ;;  %12197 = vrot.lane.b32.xlu1 %v19058_v30, %s22142_s22  ;;  %v11258_v46 = vsel %vm487_vm8, %v11242_v61, 0  ;;  %vm22195_vm15 = vmmov %vm22181_vm0 }
 0xb9c   : > { %11135 = vmatprep.mubr.bf16.mxu1 %v21731_v9  ;;  %14982 = vmatprep.mubr.msk.bf16.mxu0 %vm15671_vm11, %v21736_v45  ;;  %v20646_v40 = vpop.f32.mrf.mxu0  ;;  %v9063_v23 = vpop.f32.mrf.mxu1 }
 0xb9d   : > { %11114 = vmatpush1.bf16.msra.mxu1 %v11076_v21  ;;  %v20639_v27 = vpop.permute.xlu0 %11531  ;;  %14977 = vmatpush3.bf16.msra.mxu0 %v11078_v22  ;;  %v20648_v11 = vpop.permute.xlu1 %11529  ;;  %v22166_v21 = vld [vmem:[#allocation51_spill] sm:$0xff] }
 0xb9e   : > { %11115 = vmatprep.subr.bf16.mxu1 %v11074_v51  ;;  %14978 = vmatprep.subr.bf16.mxu0 %v21736_v45  ;;  %v14829_v12 = vpop.f32.mrf.mxu0  ;;  %v11071_v36 = vsel %vm22167_vm10, %v22166_v21, %v22165_v15  ;;  %v11070_v25 = vsel %vm22170_vm5, %v22169_v7, %v22166_v21  ;;  %v15496_v51 = vld [vmem:[%s21441_s11 + $0x68] sm:$0xff]   ;;  %v22174_v21 = vld [vmem:[#allocation95_spill] sm:$0xff]  ;;  %vm22199_vm10 = vmmov %vm22181_vm0 }
 0xb9f   : > { %12201 = vrot.lane.b32.xlu0 %v19142_v43, %s22142_s22  ;;  %12195 = vrot.lane.b32.xlu1 %v19062_v5, %s22142_s22  ;;  %v9065_v12 = vpop.f32.mrf.mxu1  ;;  %v22176_v7 = vld [vmem:[#allocation5_spill] sm:$0xff]  ;;  %vm22201_vm5 = vmmov %vm22181_vm0 }
 0xba1   : > { %11116 = vmatpush1.bf16.msra.mxu1 %v11073_v28  ;;  %v20661_v35 = vpop.permute.xlu0 %11533  ;;  %14979 = vmatpush3.bf16.msra.mxu0 %v11075_v26  ;;  %v20666_v22 = vpop.permute.xlu1 %11527  ;;  %v11072_v28 = vsel %vm22172_vm9, %v22165_v15, %v22171_v18  ;;  %v22179_v18 = vld [vmem:[#allocation98_spill] sm:$0xff]  ;;  %vm22209_vm9 = vcmask 449536  }
 0xba2   : > { %22164 = vst [vmem:[#allocation86_spill] sm:$0xff] %v20661_v35  ;;  %11117 = vmatprep.subr.bf16.mxu1 %v11071_v36  ;;  %22168 = vst [vmem:[#allocation69_spill] sm:$0xff] %v20666_v22  ;;  %14980 = vmatprep.subr.bf16.mxu0 %v21736_v45  ;;  %v11243_v36 = vsel %vm22175_vm14, %v20181_v57, %v22174_v21  ;;  %v11244_v35 = vsel %vm22177_vm6, %v22174_v21, %v22176_v7 }
 0xba3   : > { %12191 = vrot.lane.b32.xlu0 %v18980_v34, %s22142_s22  ;;  %12189 = vrot.lane.b32.xlu1 %v18926_v50, %s22142_s22  ;;  %v11264_v15 = vsel %vm487_vm8, %v11244_v35, 0  ;;  %vm22210_vm4 = vmmov %vm22209_vm9 }
 0xba4   : > { %vm22211_vm14 = vmmov %vm22210_vm4 }
 0xba5   : > { %11118 = vmatpush1.bf16.msra.mxu1 %v11070_v25  ;;  %v20685_v26 = vpop.permute.xlu0 %11716  ;;  %14981 = vmatpush3.bf16.msra.mxu0 %v11072_v28  ;;  %v20694_v22 = vpop.permute.xlu1 %11714  ;;  %v22180_v28 = vld [vmem:[#allocation21_spill] sm:$0xff]  ;;  %vm22212_vm6 = vmmov %vm22210_vm4 }
 0xba6   : > { %13962 = vmatprep.subr.msk.bf16.mxu1 %vm487_vm8, %v11243_v36  ;;  %22178 = vst [vmem:[#allocation70_spill] sm:$0xff] %v20694_v22  ;;  %14986 = vmatprep.subr.bf16.mxu0 %v21736_v45  ;;  %v11240_v21 = vsel %vm22181_vm0, %v22180_v28, %v22179_v18  ;;  %vm22213_vm0 = vmmov %vm22210_vm4 }
 0xba7   : > { %12193 = vrot.lane.b32.xlu0 %v18974_v20, %s22142_s22  ;;  %12187 = vrot.lane.b32.xlu1 %v18928_v8, %s22142_s22 }
 0xba8   : > { %13957 = vmatmul.mubr.msk.bf16.vlgmr.msra.gmra.mxu1 %vm3721_vm12, %v15496_v51  ;;  %v9187_v57 = vpop.f32.mrf.mxu1  ;;  %14983 = vmatmul.mubr.msk.bf16.vlgmr.msra.gmra.mxu0 %vm3721_vm12, %v15496_v51  ;;  %v9230_v61 = vpop.f32.mrf.mxu0 }
 0xba9   : > { %11275 = vmatpush1.bf16.msra.mxu1 %v11258_v46  ;;  %v20705_v25 = vpop.permute.xlu0 %11720  ;;  %v20711_v36 = vadd.f32 %v9187_v57, %v20614_v31  ;;  %14987 = vmatpush3.bf16.msra.mxu0 %v11264_v15  ;;  %v20713_v7 = vpop.permute.xlu1 %11718  ;;  %v20716_v51 = vadd.f32 %v9230_v61, %v20623_v60  ;;  %v22182_v31 = vld [vmem:[#allocation67_spill] sm:$0xff]  ;;  %v22184_v60 = vld [vmem:[#allocation84_spill] sm:$0xff] }
 0xbaa   : > { %11276 = vmatprep.subr.bf16.mxu1 %v11240_v21  ;;  %v9189_v22 = vpop.f32.mrf.mxu1  ;;  %14988 = vmatprep.subr.bf16.mxu0 %v21736_v45  ;;  %v14840_v46 = vpop.f32.mrf.mxu0  ;;  %v11239_v57 = vsel %vm22183_vm1, %v22182_v31, %v22180_v28  ;;  %v11241_v21 = vsel %vm22185_vm13, %v22179_v18, %v22184_v60  ;;  %vm22214_vm1 = vmmov %vm22213_vm0 }
 0xbab   : > { %12183 = vrot.lane.b32.xlu0 %v18888_v16, %s22142_s22  ;;  %v20721_v35 = vadd.f32 %v9189_v22, %v9061_v52  ;;  %12181 = vrot.lane.b32.xlu1 %v18809_v62, %s22142_s22  ;;  %v11237_v52 = vsel %vm22186_vm3, %v20273_v54, %v20264_v42  ;;  %vm22215_vm13 = vmmov %vm22213_vm0 }
 0xbac   : > { %11298 = vmatprep.mubr.bf16.mxu1 %v21731_v9  ;;  %v9191_v15 = vpop.f32.mrf.mxu1  ;;  %14994 = vmatprep.mubr.msk.bf16.mxu0 %vm15671_vm11, %v21736_v45  ;;  %v9233_v28 = vpop.f32.mrf.mxu0  ;;  %vm22216_vm3 = vmmov %vm22213_vm0 }
 0xbad   : > { %11277 = vmatpush1.bf16.msra.mxu1 %v11239_v57  ;;  %v20732_v61 = vpop.permute.xlu0 %11710  ;;  %v20739_v22 = vadd.f32 %v9191_v15, %v9063_v23  ;;  %14989 = vmatpush3.bf16.msra.mxu0 %v11241_v21  ;;  %v20741_v46 = vpop.permute.xlu1 %11708  ;;  %v20744_v18 = vadd.f32 %v9233_v28, %v20646_v40  ;;  %v22188_v23 = vld [vmem:[#allocation81_spill] sm:$0xff]  ;;  %v22190_v21 = vld [vmem:[#allocation68_spill] sm:$0xff]  ;;  %v22193_v28 = vld [vmem:[#allocation54_spill] sm:$0xff] }
 0xbae   : > { %11278 = vmatprep.subr.bf16.mxu1 %v11237_v52  ;;  %22187 = vst [vmem:[#allocation83_spill] sm:$0xff] %v20741_v46  ;;  %v9193_v31 = vpop.f32.mrf.mxu1  ;;  %14990 = vmatprep.subr.bf16.mxu0 %v21736_v45  ;;  %v14841_v60 = vpop.f32.mrf.mxu0  ;;  %v11236_v15 = vsel %vm22189_vm2, %v22188_v23, %v20273_v54  ;;  %v11238_v40 = vsel %vm22191_vm7, %v20264_v42, %v22190_v21  ;;  %v22194_v46 = vld [vmem:[#allocation38_spill] sm:$0xff]  ;;  %v22198_v54 = vld [vmem:[#allocation53_spill] sm:$0xff]  ;;  %v22200_v23 = vld [vmem:[#allocation39_spill] sm:$0xff] }
 0xbaf   : > { %12185 = vrot.lane.b32.xlu0 %v18878_v38, %s22142_s22  ;;  %v20749_v57 = vadd.f32 %v9193_v31, %v9065_v12  ;;  %12179 = vrot.lane.b32.xlu1 %v18807_v2, %s22142_s22  ;;  %v11234_v12 = vsel %vm22195_vm15, %v22194_v46, %v22193_v28  ;;  %v11233_v42 = vsel %vm22199_vm10, %v22198_v54, %v22194_v46  ;;  %v15497_v60 = vld [vmem:[%s21441_s11 + $0x70] sm:$0xff]   ;;  %v22203_v54 = vld [vmem:[#allocation27_spill] sm:$0xff]  ;;  %vm22217_vm2 = vmmov %vm22213_vm0 }
 0xbb0   : > { %v11405_v21 = vsel %vm3721_vm12, %v20356_v13, %v20347_v32  ;;  %vm22218_vm7 = vmmov %vm22213_vm0 }
 0xbb1   : > { %11279 = vmatpush1.bf16.msra.mxu1 %v11236_v15  ;;  %v20759_v52 = vpop.permute.xlu0 %11712  ;;  %14991 = vmatpush3.bf16.msra.mxu0 %v11238_v40  ;;  %v20764_v31 = vpop.permute.xlu1 %11706  ;;  %v11235_v15 = vsel %vm22201_vm5, %v22193_v28, %v22200_v23  ;;  %v11421_v13 = vsel %vm487_vm8, %v11405_v21, 0  ;;  %v22205_v23 = vld [vmem:[#allocation9_spill] sm:$0xff]  ;;  %vm22221_vm15 = vmmov %vm22213_vm0  ;;  %vm22225_vm5 = vcmask 441344  }
 0xbb2   : > { %22192 = vst [vmem:[#allocation56_spill] sm:$0xff] %v20759_v52  ;;  %11280 = vmatprep.subr.bf16.mxu1 %v11234_v12  ;;  %22196 = vst [vmem:[#allocation40_spill] sm:$0xff] %v20764_v31  ;;  %14992 = vmatprep.subr.bf16.mxu0 %v21736_v45  ;;  %v22202_v12 = vld [vmem:[#allocation6_spill] sm:$0xff] }
 0xbb3   : > { %12368 = vrot.lane.b32.xlu0 %v19226_v37, %s22197_s14  ;;  %12366 = vrot.lane.b32.xlu1 %v19238_v10, %s22197_s14  ;;  %v11406_v46 = vsel %vm3721_vm12, %v20347_v32, %v22202_v12  ;;  %v11407_v52 = vsel %vm3721_vm12, %v22202_v12, %v22203_v54  ;;  %vm22223_vm10 = vmmov %vm22213_vm0 }
 0xbb4   : > { %v11427_v28 = vsel %vm487_vm8, %v11407_v52, 0 }
 0xbb5   : > { %11281 = vmatpush1.bf16.msra.mxu1 %v11233_v42  ;;  %v20783_v40 = vpop.permute.xlu0 %11702  ;;  %14993 = vmatpush3.bf16.msra.mxu0 %v11235_v15  ;;  %v20792_v31 = vpop.permute.xlu1 %11700  ;;  %v22206_v15 = vld [vmem:[#allocation97_spill] sm:$0xff] }
 0xbb6   : > { %13968 = vmatprep.subr.msk.bf16.mxu1 %vm487_vm8, %v11406_v46  ;;  %22204 = vst [vmem:[#allocation41_spill] sm:$0xff] %v20792_v31  ;;  %14998 = vmatprep.subr.bf16.mxu0 %v21736_v45  ;;  %v11403_v12 = vsel %vm3721_vm12, %v22206_v15, %v22205_v23 }
 0xbb7   : > { %12372 = vrot.lane.b32.xlu0 %v19318_v4, %s22197_s14  ;;  %12370 = vrot.lane.b32.xlu1 %v19330_v24, %s22197_s14 }
 0xbb8   : > { %13963 = vmatmul.mubr.msk.bf16.vlgmr.msra.gmra.mxu1 %vm3721_vm12, %v15497_v60  ;;  %v9344_v32 = vpop.f32.mrf.mxu1  ;;  %14995 = vmatmul.mubr.msk.bf16.vlgmr.msra.gmra.mxu0 %vm3721_vm12, %v15497_v60  ;;  %v9387_v21 = vpop.f32.mrf.mxu0 }
 0xbb9   : > { %11438 = vmatpush1.bf16.msra.mxu1 %v11421_v13  ;;  %v20803_v42 = vpop.permute.xlu0 %11704  ;;  %v20809_v46 = vadd.f32 %v9344_v32, %v20711_v36  ;;  %14999 = vmatpush3.bf16.msra.mxu0 %v11427_v28  ;;  %v20811_v54 = vpop.permute.xlu1 %11698  ;;  %v20814_v60 = vadd.f32 %v9387_v21, %v20716_v51  ;;  %v22207_v36 = vld [vmem:[#allocation22_spill] sm:$0xff]  ;;  %v22208_v28 = vld [vmem:[#allocation100_spill] sm:$0xff] }
 0xbba   : > { %11439 = vmatprep.subr.bf16.mxu1 %v11403_v12  ;;  %v9346_v31 = vpop.f32.mrf.mxu1  ;;  %15000 = vmatprep.subr.bf16.mxu0 %v21736_v45  ;;  %v14852_v13 = vpop.f32.mrf.mxu0  ;;  %v11402_v32 = vsel %vm3721_vm12, %v22207_v36, %v22206_v15  ;;  %v11404_v12 = vsel %vm3721_vm12, %v22205_v23, %v22208_v28 }
 0xbbb   : > { %12362 = vrot.lane.b32.xlu0 %v19154_v0, %s22197_s14  ;;  %v20820_v52 = vadd.f32 %v9346_v31, %v20721_v35  ;;  %12360 = vrot.lane.b32.xlu1 %v19058_v30, %s22197_s14  ;;  %v11400_v35 = vsel %vm3721_vm12, %v20439_v17, %v20430_v6 }
 0xbbc   : > { %11461 = vmatprep.mubr.bf16.mxu1 %v21731_v9  ;;  %v9348_v51 = vpop.f32.mrf.mxu1  ;;  %15006 = vmatprep.mubr.msk.bf16.mxu0 %vm15671_vm11, %v21736_v45  ;;  %v9390_v15 = vpop.f32.mrf.mxu0 }
 0xbbd   : > { %11440 = vmatpush1.bf16.msra.mxu1 %v11402_v32  ;;  %v20831_v21 = vpop.permute.xlu0 %11694  ;;  %v20839_v31 = vadd.f32 %v9348_v51, %v20739_v22  ;;  %15001 = vmatpush3.bf16.msra.mxu0 %v11404_v12  ;;  %v20841_v13 = vpop.permute.xlu1 %11692  ;;  %v20844_v23 = vadd.f32 %v9390_v15, %v20744_v18  ;;  %v11399_v22 = vsel %vm3721_vm12, %v20455_v1, %v20439_v17  ;;  %v15498_v17 = vld [vmem:[%s21441_s11 + $0x78] sm:$0xff]  }
 0xbbe   : > { %11441 = vmatprep.subr.bf16.mxu1 %v11400_v35  ;;  %v9350_v36 = vpop.f32.mrf.mxu1  ;;  %15002 = vmatprep.subr.bf16.mxu0 %v21736_v45  ;;  %v14853_v28 = vpop.f32.mrf.mxu0  ;;  %v11401_v18 = vsel %vm3721_vm12, %v20430_v6, %v20450_v49  ;;  %v11396_v6 = vsel %vm3721_vm12, %v20494_v39, %v20476_v19  ;;  %v11398_v49 = vsel %vm3721_vm12, %v20469_v29, %v20489_v44 }
 0xbbf   : > { %12364 = vrot.lane.b32.xlu0 %v19142_v43, %s22197_s14  ;;  %v20850_v32 = vadd.f32 %v9350_v36, %v20749_v57  ;;  %12358 = vrot.lane.b32.xlu1 %v19062_v5, %s22197_s14  ;;  %v11397_v57 = vsel %vm3721_vm12, %v20476_v19, %v20469_v29  ;;  %v11568_v1 = vsel %vm22209_vm9, %v20522_v48, %v20513_v53  ;;  %vm22226_vm9 = vmmov %vm22225_vm5 }
 0xbc0   : > { %v11569_v19 = vsel %vm22210_vm4, %v20513_v53, %v20538_v14  ;;  %v11570_v39 = vsel %vm22211_vm14, %v20538_v14, %v20533_v47  ;;  %v11584_v29 = vsel %vm487_vm8, %v11568_v1, 0  ;;  %v11566_v47 = vsel %vm22212_vm6, %v20559_v58, %v20552_v33  ;;  %vm22227_vm4 = vmmov %vm22225_vm5 }
 0xbc1   : > { %11442 = vmatpush1.bf16.msra.mxu1 %v11399_v22  ;;  %v20860_v51 = vpop.permute.xlu0 %11696  ;;  %15003 = vmatpush3.bf16.msra.mxu0 %v11401_v18  ;;  %v20865_v12 = vpop.permute.xlu1 %11690  ;;  %v11590_v53 = vsel %vm487_vm8, %v11570_v39, 0  ;;  %vm22229_vm14 = vmmov %vm22227_vm4 }
 0xbc2   : > { %11443 = vmatprep.subr.bf16.mxu1 %v11397_v57  ;;  %15004 = vmatprep.subr.bf16.mxu0 %v21736_v45  ;;  %vm22231_vm6 = vmmov %vm22227_vm4 }
 0xbc3   : > { %12354 = vrot.lane.b32.xlu0 %v18980_v34, %s22197_s14  ;;  %12352 = vrot.lane.b32.xlu1 %v18926_v50, %s22197_s14 }
 0xbc5   : > { %11444 = vmatpush1.bf16.msra.mxu1 %v11396_v6  ;;  %v20884_v35 = vpop.permute.xlu0 %11879  ;;  %15005 = vmatpush3.bf16.msra.mxu0 %v11398_v49  ;;  %v20893_v15 = vpop.permute.xlu1 %11877 }
 0xbc6   : > { %13974 = vmatprep.subr.msk.bf16.mxu1 %vm487_vm8, %v11569_v19  ;;  %15010 = vmatprep.subr.bf16.mxu0 %v21736_v45 }
 0xbc7   : > { %12356 = vrot.lane.b32.xlu0 %v18974_v20, %s22197_s14  ;;  %12350 = vrot.lane.b32.xlu1 %v18928_v8, %s22197_s14 }
 0xbc8   : > { %13969 = vmatmul.mubr.msk.bf16.vlgmr.msra.gmra.mxu1 %vm3721_vm12, %v15498_v17  ;;  %v9507_v44 = vpop.f32.mrf.mxu1  ;;  %15007 = vmatmul.mubr.msk.bf16.vlgmr.msra.gmra.mxu0 %vm3721_vm12, %v15498_v17  ;;  %v9550_v36 = vpop.f32.mrf.mxu0  ;;  %v11567_v17 = vsel %vm22214_vm1, %v20552_v33, %v20572_v41 }
 0xbc9   : > { %11601 = vmatpush1.bf16.msra.mxu1 %v11584_v29  ;;  %v20904_v48 = vpop.permute.xlu0 %11883  ;;  %v20910_v14 = vadd.f32 %v9507_v44, %v20809_v46  ;;  %15011 = vmatpush3.bf16.msra.mxu0 %v11590_v53  ;;  %v20912_v28 = vpop.permute.xlu1 %11881  ;;  %v20915_v18 = vadd.f32 %v9550_v36, %v20814_v60  ;;  %v11565_v46 = vsel %vm22213_vm0, %v20577_v56, %v20559_v58  ;;  %vm22233_vm0 = vmmov %vm22227_vm4 }
 0xbca   : > { %11602 = vmatprep.subr.bf16.mxu1 %v11566_v47  ;;  %v9509_v22 = vpop.f32.mrf.mxu1  ;;  %15012 = vmatprep.subr.bf16.mxu0 %v21736_v45  ;;  %v14864_v6 = vpop.f32.mrf.mxu0  ;;  %v22224_v47 = vld [vmem:[#allocation70_spill] sm:$0xff]  ;;  %vm22235_vm1 = vmmov %vm22233_vm0 }
 0xbcb   : > { %12346 = vrot.lane.b32.xlu0 %v18888_v16, %s22197_s14  ;;  %v20921_v57 = vadd.f32 %v9509_v22, %v20820_v52  ;;  %12344 = vrot.lane.b32.xlu1 %v18809_v62, %s22197_s14  ;;  %v11563_v52 = vsel %vm22215_vm13, %v20605_v63, %v20596_v59  ;;  %v11731_v36 = vsel %vm22225_vm5, %v22224_v47, %v20685_v26  ;;  %vm22236_vm13 = vmmov %vm22233_vm0 }
 0xbcc   : > { %11624 = vmatprep.mubr.bf16.mxu1 %v21731_v9  ;;  %v9511_v60 = vpop.f32.mrf.mxu1  ;;  %15018 = vmatprep.mubr.msk.bf16.mxu0 %vm15671_vm11, %v21736_v45  ;;  %v9553_v56 = vpop.f32.mrf.mxu0  ;;  %v11733_v6 = vsel %vm22227_vm4, %v20713_v7, %v20705_v25 }
 0xbcd   : > { %11603 = vmatpush1.bf16.msra.mxu1 %v11565_v46  ;;  %v20932_v49 = vpop.permute.xlu0 %11873  ;;  %v20940_v58 = vadd.f32 %v9511_v60, %v20839_v31  ;;  %15013 = vmatpush3.bf16.msra.mxu0 %v11567_v17  ;;  %v20942_v1 = vpop.permute.xlu1 %11871  ;;  %v20945_v33 = vadd.f32 %v9553_v56, %v20844_v23  ;;  %v11562_v31 = vsel %vm22216_vm3, %v20625_v55, %v20605_v63  ;;  %v22220_v63 = vld [vmem:[#allocation69_spill] sm:$0xff]  ;;  %v22222_v55 = vld [vmem:[#allocation86_spill] sm:$0xff]  ;;  %v11753_v25 = vsel %vm487_vm8, %v11733_v6, 0  ;;  %v22228_v60 = vld [vmem:[#allocation83_spill] sm:$0xff] }
 0xbce   : > { %11604 = vmatprep.subr.bf16.mxu1 %v11563_v52  ;;  %v9513_v19 = vpop.f32.mrf.mxu1  ;;  %15014 = vmatprep.subr.bf16.mxu0 %v21736_v45  ;;  %v14865_v39 = vpop.f32.mrf.mxu0  ;;  %v11564_v23 = vsel %vm22217_vm2, %v20596_v59, %v20618_v3  ;;  %v11559_v59 = vsel %vm22221_vm15, %v22220_v63, %v20648_v11  ;;  %v15499_v3 = vld [vmem:[%s21441_s11 + $0x80] sm:$0xff]   ;;  %v11561_v53 = vsel %vm22223_vm10, %v20639_v27, %v22222_v55  ;;  %vm22237_vm3 = vmmov %vm22233_vm0  ;;  %vm22241_vm10 = vcmask 433152  }
 0xbcf   : > { %12348 = vrot.lane.b32.xlu0 %v18878_v38, %s22197_s14  ;;  %v20951_v41 = vadd.f32 %v9513_v19, %v20850_v32  ;;  %12342 = vrot.lane.b32.xlu1 %v18807_v2, %s22197_s14  ;;  %v11560_v32 = vsel %vm22218_vm7, %v20648_v11, %v20639_v27  ;;  %v11732_v11 = vsel %vm22226_vm9, %v20685_v26, %v20713_v7  ;;  %v11747_v27 = vsel %vm487_vm8, %v11731_v36, 0  ;;  %vm22238_vm2 = vmmov %vm22233_vm0 }
 0xbd0   : > { %v11729_v17 = vsel %vm22229_vm14, %v22228_v60, %v20732_v61  ;;  %vm22239_vm7 = vmmov %vm22233_vm0 }
 0xbd1   : > { %11605 = vmatpush1.bf16.msra.mxu1 %v11562_v31  ;;  %v20961_v29 = vpop.permute.xlu0 %11875  ;;  %15015 = vmatpush3.bf16.msra.mxu0 %v11564_v23  ;;  %v20966_v44 = vpop.permute.xlu1 %11869  ;;  %vm22240_vm15 = vmmov %vm22233_vm0 }
 0xbd2   : > { %11606 = vmatprep.subr.bf16.mxu1 %v11560_v32  ;;  %15016 = vmatprep.subr.bf16.mxu0 %v21736_v45  ;;  %vm22242_vm5 = vmmov %vm22241_vm10 }
 0xbd3   : > { %12531 = vrot.lane.b32.xlu0 %v19226_v37, %s22219_s19  ;;  %12529 = vrot.lane.b32.xlu1 %v19238_v10, %s22219_s19  ;;  %vm22243_vm9 = vmmov %vm22242_vm5 }
 0xbd4   : > { %vm22244_vm4 = vmmov %vm22242_vm5 }
 0xbd5   : > { %11607 = vmatpush1.bf16.msra.mxu1 %v11559_v59  ;;  %v20985_v22 = vpop.permute.xlu0 %11865  ;;  %15017 = vmatpush3.bf16.msra.mxu0 %v11561_v53  ;;  %v20994_v46 = vpop.permute.xlu1 %11863  ;;  %vm22245_vm14 = vmmov %vm22244_vm4 }
 0xbd6   : > { %13980 = vmatprep.subr.msk.bf16.mxu1 %vm487_vm8, %v11732_v11  ;;  %15022 = vmatprep.subr.bf16.mxu0 %v21736_v45 }
 0xbd7   : > { %12535 = vrot.lane.b32.xlu0 %v19318_v4, %s22219_s19  ;;  %12533 = vrot.lane.b32.xlu1 %v19330_v24, %s22219_s19 }
 0xbd8   : > { %13975 = vmatmul.mubr.msk.bf16.vlgmr.msra.gmra.mxu1 %vm3721_vm12, %v15499_v3  ;;  %v9670_v26 = vpop.f32.mrf.mxu1  ;;  %15019 = vmatmul.mubr.msk.bf16.vlgmr.msra.gmra.mxu0 %vm3721_vm12, %v15499_v3  ;;  %v9713_v56 = vpop.f32.mrf.mxu0 }
 0xbd9   : > { %11764 = vmatpush1.bf16.msra.mxu1 %v11747_v27  ;;  %v21005_v7 = vpop.permute.xlu0 %11867  ;;  %v21011_v52 = vadd.f32 %v9670_v26, %v20910_v14  ;;  %15023 = vmatpush3.bf16.msra.mxu0 %v11753_v25  ;;  %v21013_v19 = vpop.permute.xlu1 %11861  ;;  %v21016_v31 = vadd.f32 %v9713_v56, %v20915_v18  ;;  %v22230_v14 = vld [vmem:[#allocation40_spill] sm:$0xff] }
 0xbda   : > { %11765 = vmatprep.subr.bf16.mxu1 %v11729_v17  ;;  %v9672_v39 = vpop.f32.mrf.mxu1  ;;  %15024 = vmatprep.subr.bf16.mxu0 %v21736_v45  ;;  %v14876_v32 = vpop.f32.mrf.mxu0  ;;  %v11728_v63 = vsel %vm22231_vm6, %v22230_v14, %v22228_v60  ;;  %v22232_v18 = vld [vmem:[#allocation56_spill] sm:$0xff]  ;;  %v11894_v17 = vsel %vm22241_vm10, %v20893_v15, %v20884_v35  ;;  %vm22246_vm6 = vmmov %vm22244_vm4 }
 0xbdb   : > { %12525 = vrot.lane.b32.xlu0 %v19154_v0, %s22219_s19  ;;  %v21022_v23 = vadd.f32 %v9672_v39, %v20921_v57  ;;  %12523 = vrot.lane.b32.xlu1 %v19058_v30, %s22219_s19  ;;  %v11730_v3 = vsel %vm22233_vm0, %v20732_v61, %v22232_v18  ;;  %v22234_v57 = vld [vmem:[#allocation41_spill] sm:$0xff]  ;;  %vm22247_vm0 = vmmov %vm22244_vm4 }
 0xbdc   : > { %v9674_v59 = vpop.f32.mrf.mxu1  ;;  %11787 = vmatprep.mubr.bf16.mxu1 %v21731_v9  ;;  %v11726_v53 = vsel %vm22235_vm1, %v22234_v57, %v20783_v40  ;;  %15030 = vmatprep.mubr.msk.bf16.mxu0 %vm15671_vm11, %v21736_v45  ;;  %v9716_v36 = vpop.f32.mrf.mxu0  ;;  %v11725_v26 = vsel %vm22236_vm13, %v20811_v54, %v22234_v57  ;;  %v11724_v54 = vsel %vm22240_vm15, %v20831_v21, %v20860_v51  ;;  %vm22248_vm1 = vmmov %vm22247_vm0  ;;  %vm22254_vm15 = vcmask 424960  }
 0xbdd   : > { %11766 = vmatpush1.bf16.msra.mxu1 %v11728_v63  ;;  %v21033_v55 = vpop.permute.xlu0 %11857  ;;  %v21039_v47 = vadd.f32 %v9674_v59, %v20940_v58  ;;  %15025 = vmatpush3.bf16.msra.mxu0 %v11730_v3  ;;  %v21043_v11 = vpop.permute.xlu1 %11855  ;;  %v21046_v61 = vadd.f32 %v9716_v36, %v20945_v33  ;;  %v11727_v33 = vsel %vm22237_vm3, %v20783_v40, %v20803_v42  ;;  %v15500_v42 = vld [vmem:[%s21441_s11 + $0x88] sm:$0xff]   ;;  %vm22249_vm13 = vmmov %vm22247_vm0 }
 0xbde   : > { %11767 = vmatprep.subr.bf16.mxu1 %v11726_v53  ;;  %v9676_v6 = vpop.f32.mrf.mxu1  ;;  %15026 = vmatprep.subr.bf16.mxu0 %v21736_v45  ;;  %v14877_v27 = vpop.f32.mrf.mxu0  ;;  %v11722_v40 = vsel %vm22239_vm7, %v20865_v12, %v20841_v13  ;;  %v11896_v12 = vsel %vm22243_vm9, %v20912_v28, %v20904_v48  ;;  %v11891_v3 = vsel %vm22245_vm14, %v20966_v44, %v20942_v1  ;;  %vm22250_vm3 = vmmov %vm22247_vm0 }
 0xbdf   : > { %12527 = vrot.lane.b32.xlu0 %v19142_v43, %s22219_s19  ;;  %v21052_v58 = vadd.f32 %v9676_v6, %v20951_v41  ;;  %12521 = vrot.lane.b32.xlu1 %v19062_v5, %s22219_s19  ;;  %v11723_v41 = vsel %vm22238_vm2, %v20841_v13, %v20831_v21  ;;  %v11895_v13 = vsel %vm22242_vm5, %v20884_v35, %v20912_v28  ;;  %v11910_v21 = vsel %vm487_vm8, %v11894_v17, 0  ;;  %vm22252_vm2 = vmmov %vm22247_vm0 }
 0xbe0   : > { %v11916_v35 = vsel %vm487_vm8, %v11896_v12, 0  ;;  %v11892_v28 = vsel %vm22244_vm4, %v20942_v1, %v20932_v49  ;;  %v11889_v1 = vsel %vm22247_vm0, %v20994_v46, %v20985_v22  ;;  %v11888_v27 = vsel %vm22248_vm1, %v21013_v19, %v20994_v46  ;;  %vm22253_vm7 = vmmov %vm22247_vm0 }
 0xbe1   : > { %11768 = vmatpush1.bf16.msra.mxu1 %v11725_v26  ;;  %v21062_v25 = vpop.permute.xlu0 %11859  ;;  %15027 = vmatpush3.bf16.msra.mxu0 %v11727_v33  ;;  %v21067_v60 = vpop.permute.xlu1 %11853  ;;  %vm22255_vm10 = vmmov %vm22254_vm15 }
 0xbe2   : > { %11769 = vmatprep.subr.bf16.mxu1 %v11723_v41  ;;  %15028 = vmatprep.subr.bf16.mxu0 %v21736_v45  ;;  %v11885_v46 = vsel %vm22252_vm2, %v21067_v60, %v21043_v11  ;;  %vm22256_vm5 = vmmov %vm22255_vm10 }
 0xbe3   : > { %12517 = vrot.lane.b32.xlu0 %v18980_v34, %s22219_s19  ;;  %12515 = vrot.lane.b32.xlu1 %v18926_v50, %s22219_s19  ;;  %vm22257_vm9 = vmmov %vm22256_vm5 }
 0xbe4   : > { %vm22258_vm4 = vmmov %vm22256_vm5 }
 0xbe5   : > { %11770 = vmatpush1.bf16.msra.mxu1 %v11722_v40  ;;  %v21086_v56 = vpop.permute.xlu0 %12042  ;;  %15029 = vmatpush3.bf16.msra.mxu0 %v11724_v54  ;;  %v12041_v39 = vpop.permute.xlu1 %12040  ;;  %vm22259_vm14 = vmmov %vm22258_vm4 }
 0xbe6   : > { %13986 = vmatprep.subr.msk.bf16.mxu1 %vm487_vm8, %v11895_v13  ;;  %15034 = vmatprep.subr.bf16.mxu0 %v21736_v45  ;;  %v12057_v19 = vsel %vm22254_vm15, %v12041_v39, %v21086_v56  ;;  %vm22261_vm0 = vmmov %vm22258_vm4 }
 0xbe7   : > { %12519 = vrot.lane.b32.xlu0 %v18974_v20, %s22219_s19  ;;  %12513 = vrot.lane.b32.xlu1 %v18928_v8, %s22219_s19  ;;  %vm22262_vm1 = vmmov %vm22261_vm0 }
 0xbe8   : > { %13981 = vmatmul.mubr.msk.bf16.vlgmr.msra.gmra.mxu1 %vm3721_vm12, %v15500_v42  ;;  %v9833_v51 = vpop.f32.mrf.mxu1  ;;  %15031 = vmatmul.mubr.msk.bf16.vlgmr.msra.gmra.mxu0 %vm3721_vm12, %v15500_v42  ;;  %v9876_v32 = vpop.f32.mrf.mxu0  ;;  %vm22265_vm2 = vmmov %vm22261_vm0 }
 0xbe9   : > { %11927 = vmatpush1.bf16.msra.mxu1 %v11910_v21  ;;  %v12047_v15 = vpop.permute.xlu0 %12046  ;;  %v9883_v48 = vadd.f32 %v9833_v51, %v21011_v52  ;;  %15035 = vmatpush3.bf16.msra.mxu0 %v11916_v35  ;;  %v12045_v14 = vpop.permute.xlu1 %12044  ;;  %v9885_v59 = vadd.f32 %v9876_v32, %v21016_v31  ;;  %v11893_v31 = vsel %vm22246_vm6, %v20932_v49, %v20961_v29  ;;  %vm22260_vm6 = vmmov %vm22258_vm4 }
 0xbea   : > { %11928 = vmatprep.subr.bf16.mxu1 %v11892_v28  ;;  %v9835_v63 = vpop.f32.mrf.mxu1  ;;  %15036 = vmatprep.subr.bf16.mxu0 %v21736_v45  ;;  %v14888_v52 = vpop.f32.mrf.mxu0  ;;  %v12058_v40 = vsel %vm22255_vm10, %v21086_v56, %v12045_v14 }
 0xbeb   : > { %12509 = vrot.lane.b32.xlu0 %v18888_v16, %s22219_s19  ;;  %v21112_v18 = vadd.f32 %v9835_v63, %v21022_v23  ;;  %12507 = vrot.lane.b32.xlu1 %v18809_v62, %s22219_s19 }
 0xbec   : > { %v9837_v57 = vpop.f32.mrf.mxu1  ;;  %11950 = vmatprep.mubr.bf16.mxu1 %v21731_v9  ;;  %v9879_v44 = vpop.f32.mrf.mxu0  ;;  %15042 = vmatprep.mubr.msk.bf16.mxu0 %vm15671_vm11, %v21736_v45 }
 0xbed   : > { %11929 = vmatpush1.bf16.msra.mxu1 %v11891_v3  ;;  %v21124_v23 = vpop.permute.xlu0 %12036  ;;  %v21127_v53 = vadd.f32 %v9837_v57, %v21039_v47  ;;  %15037 = vmatpush3.bf16.msra.mxu0 %v11893_v31  ;;  %v12035_v36 = vpop.permute.xlu1 %12034  ;;  %v9888_v49 = vadd.f32 %v9879_v44, %v21046_v61  ;;  %v11890_v61 = vsel %vm22249_vm13, %v20985_v22, %v21005_v7  ;;  %v15501_v22 = vld [vmem:[%s21441_s11 + $0x90] sm:$0xff]   ;;  %vm22263_vm13 = vmmov %vm22261_vm0 }
 0xbee   : > { %11930 = vmatprep.subr.bf16.mxu1 %v11889_v1  ;;  %v9839_v6 = vpop.f32.mrf.mxu1  ;;  %15038 = vmatprep.subr.bf16.mxu0 %v21736_v45  ;;  %v14889_v47 = vpop.f32.mrf.mxu0  ;;  %v11887_v7 = vsel %vm22253_vm7, %v21033_v55, %v21062_v25  ;;  %v12055_v13 = vsel %vm22257_vm9, %v12035_v36, %v21124_v23  ;;  %vm22266_vm7 = vcmask 261120  }
 0xbef   : > { %12511 = vrot.lane.b32.xlu0 %v18878_v38, %s22219_s19  ;;  %v21138_v29 = vadd.f32 %v9839_v6, %v21052_v58  ;;  %12505 = vrot.lane.b32.xlu1 %v18807_v2, %s22219_s19  ;;  %v11886_v58 = vsel %vm22250_vm3, %v21043_v11, %v21033_v55  ;;  %v12059_v11 = vsel %vm22256_vm5, %v12045_v14, %v12047_v15  ;;  %v12073_v55 = vsel %vm487_vm8, %v12057_v19, 0  ;;  %vm22264_vm3 = vmmov %vm22261_vm0 }
 0xbf0   : > { %v12079_v42 = vsel %vm487_vm8, %v12059_v11, 0  ;;  %vm22267_vm15 = vmmov %vm22266_vm7 }
 0xbf1   : > { %11931 = vmatpush1.bf16.msra.mxu1 %v11888_v27  ;;  %v12039_v26 = vpop.permute.xlu0 %12038  ;;  %15039 = vmatpush3.bf16.msra.mxu0 %v11890_v61  ;;  %v12033_v33 = vpop.permute.xlu1 %12032  ;;  %vm22268_vm10 = vmmov %vm22266_vm7 }
 0xbf2   : > { %11932 = vmatprep.subr.bf16.mxu1 %v11886_v58  ;;  %15040 = vmatprep.subr.bf16.mxu0 %v21736_v45  ;;  %v12054_v15 = vsel %vm22258_vm4, %v12033_v33, %v12035_v36  ;;  %v12056_v28 = vsel %vm22259_vm14, %v21124_v23, %v12039_v26  ;;  %vm22269_vm5 = vmmov %vm22266_vm7 }
 0xbf3   : > { %12694 = vrot.lane.b32.xlu0 %v19226_v37, %s22251_s17  ;;  %12692 = vrot.lane.b32.xlu1 %v19238_v10, %s22251_s17  ;;  %vm22270_vm9 = vmmov %vm22269_vm5 }
 0xbf4   : > { %vm22271_vm4 = vmmov %vm22269_vm5 }
 0xbf5   : > { %11933 = vmatpush1.bf16.msra.mxu1 %v11885_v46  ;;  %v12029_v41 = vpop.permute.xlu0 %12028  ;;  %15041 = vmatpush3.bf16.msra.mxu0 %v11887_v7  ;;  %v12027_v60 = vpop.permute.xlu1 %12026  ;;  %vm22273_vm14 = vmmov %vm22271_vm4 }
 0xbf6   : > { %13992 = vmatprep.subr.msk.bf16.mxu1 %vm487_vm8, %v12058_v40  ;;  %15046 = vmatprep.subr.bf16.mxu0 %v21736_v45 }
 0xbf7   : > { %12698 = vrot.lane.b32.xlu0 %v19318_v4, %s22251_s17  ;;  %12696 = vrot.lane.b32.xlu1 %v19330_v24, %s22251_s17 }
 0xbf8   : > { %v9996_v25 = vpop.f32.mrf.mxu1  ;;  %13987 = vmatmul.mubr.msk.bf16.vlgmr.msra.gmra.mxu1 %vm3721_vm12, %v15501_v22  ;;  %v10039_v17 = vpop.f32.mrf.mxu0  ;;  %15043 = vmatmul.mubr.msk.bf16.vlgmr.msra.gmra.mxu0 %vm3721_vm12, %v15501_v22 }
 0xbf9   : > { %v10046_v54 = vadd.f32 %v9996_v25, %v9883_v48  ;;  %12090 = vmatpush1.bf16.msra.mxu1 %v12073_v55  ;;  %v12031_v56 = vpop.permute.xlu0 %12030  ;;  %v10048_v12 = vadd.f32 %v10039_v17, %v9885_v59  ;;  %15047 = vmatpush3.bf16.msra.mxu0 %v12079_v42  ;;  %v12025_v21 = vpop.permute.xlu1 %12024  ;;  %v12052_v59 = vsel %vm22260_vm6, %v12027_v60, %v12029_v41  ;;  %vm22274_vm6 = vmmov %vm22271_vm4 }
 0xbfa   : > { %v9998_v39 = vpop.f32.mrf.mxu1  ;;  %12091 = vmatprep.subr.bf16.mxu1 %v12055_v13  ;;  %v14900_v35 = vpop.f32.mrf.mxu0  ;;  %15048 = vmatprep.subr.bf16.mxu0 %v21736_v45  ;;  %v12051_v23 = vsel %vm22261_vm0, %v12025_v21, %v12027_v60  ;;  %vm22275_vm0 = vmmov %vm22271_vm4 }
 0xbfb   : > { %v10047_v51 = vadd.f32 %v9998_v39, %v21112_v18  ;;  %12688 = vrot.lane.b32.xlu0 %v19154_v0, %s22251_s17  ;;  %12686 = vrot.lane.b32.xlu1 %v19058_v30, %s22251_s17 }
 0xbfc   : > { %v10000_v48 = vpop.f32.mrf.mxu1  ;;  %12113 = vmatprep.mubr.bf16.mxu1 %v21731_v9  ;;  %v10042_v14 = vpop.f32.mrf.mxu0  ;;  %15054 = vmatprep.mubr.msk.bf16.mxu0 %vm15671_vm11, %v21736_v45 }
 0xbfd   : > { %v10049_v32 = vadd.f32 %v10000_v48, %v21127_v53  ;;  %12092 = vmatpush1.bf16.msra.mxu1 %v12054_v15  ;;  %v12021_v63 = vpop.permute.xlu0 %12020  ;;  %v10051_v18 = vadd.f32 %v10042_v14, %v9888_v49  ;;  %15049 = vmatpush3.bf16.msra.mxu0 %v12056_v28  ;;  %v12019_v3 = vpop.permute.xlu1 %12018  ;;  %v12053_v53 = vsel %vm22262_vm1, %v12029_v41, %v12031_v56  ;;  %vm22276_vm1 = vmmov %vm22275_vm0 }
 0xbfe   : > { %v10002_v52 = vpop.f32.mrf.mxu1  ;;  %12093 = vmatprep.subr.bf16.mxu1 %v12052_v59  ;;  %15050 = vmatprep.subr.bf16.mxu0 %v21736_v45  ;;  %v14901_v31 = vpop.f32.mrf.mxu0  ;;  %v12049_v44 = vsel %vm22263_vm13, %v12019_v3, %v12021_v63  ;;  %vm22277_vm13 = vmmov %vm22275_vm0 }
 0xbff   : > { %v10050_v57 = vadd.f32 %v10002_v52, %v21138_v29  ;;  %12690 = vrot.lane.b32.xlu0 %v19142_v43, %s22251_s17  ;;  %12684 = vrot.lane.b32.xlu1 %v19062_v5, %s22251_s17  ;;  %v15502_v29 = vld [vmem:[%s21441_s11 + $0x98] sm:$0xff]  }
 0xc01   : > { %12094 = vmatpush1.bf16.msra.mxu1 %v12051_v23  ;;  %v12023_v1 = vpop.permute.xlu0 %12022  ;;  %15051 = vmatpush3.bf16.msra.mxu0 %v12053_v53  ;;  %v12017_v36 = vpop.permute.xlu1 %12016 }
 0xc02   : > { %12095 = vmatprep.subr.bf16.mxu1 %v12049_v44  ;;  %v12050_v6 = vsel %vm22264_vm3, %v12021_v63, %v12023_v1  ;;  %v12048_v49 = vsel %vm22265_vm2, %v12017_v36, %v12019_v3  ;;  %15052 = vmatprep.subr.bf16.mxu0 %v21736_v45  ;;  %vm22278_vm3 = vmmov %vm22275_vm0  ;;  %vm22279_vm2 = vcmask 252928  }
 0xc03   : > { %12680 = vrot.lane.b32.xlu0 %v18980_v34, %s22251_s17  ;;  %12678 = vrot.lane.b32.xlu1 %v18926_v50, %s22251_s17 }
 0xc05   : > { %12096 = vmatpush1.bf16.msra.mxu1 %v12048_v49  ;;  %v12206_v47 = vpop.permute.xlu0 %12205  ;;  %15053 = vmatpush3.bf16.msra.mxu0 %v12050_v6  ;;  %v12204_v27 = vpop.permute.xlu1 %12203 }
 0xc06   : > { %15058 = vmatprep.subr.bf16.mxu0 %v21736_v45  ;;  %v12220_v26 = vsel %vm22266_vm7, %v12204_v27, %v12206_v47  ;;  %vm22280_vm7 = vmmov %vm22279_vm2 }
 0xc07   : > { %12682 = vrot.lane.b32.xlu0 %v18974_v20, %s22251_s17  ;;  %12676 = vrot.lane.b32.xlu1 %v18928_v8, %s22251_s17  ;;  %v12236_v55 = vsel %vm487_vm8, %v12220_v26, 0 }
 0xc08   : > { %v10159_v61 = vpop.f32.mrf.mxu1  ;;  %13993 = vmatmul.mubr.msk.bf16.vlgmr.msra.gmra.mxu1 %vm3721_vm12, %v15502_v29  ;;  %v10202_v33 = vpop.f32.mrf.mxu0  ;;  %15055 = vmatmul.mubr.msk.bf16.vlgmr.msra.gmra.mxu0 %vm3721_vm12, %v15502_v29 }
 0xc09   : > { %v10209_v58 = vadd.f32 %v10159_v61, %v10046_v54  ;;  %v12210_v46 = vpop.permute.xlu0 %12209  ;;  %12276 = vmatprep.mubr.bf16.mxu1 %v21731_v9  ;;  %v10211_v22 = vadd.f32 %v10202_v33, %v10048_v12  ;;  %v12208_v19 = vpop.permute.xlu1 %12207  ;;  %15066 = vmatprep.mubr.msk.bf16.mxu0 %vm15671_vm11, %v21736_v45  ;;  %v15503_v33 = vld [vmem:[%s21441_s11 + $0xa0] sm:$0xff]  }
 0xc0a   : > { %v10161_v7 = vpop.f32.mrf.mxu1  ;;  %v14912_v40 = vpop.f32.mrf.mxu0  ;;  %v12222_v11 = vsel %vm22267_vm15, %v12208_v19, %v12210_v46  ;;  %v12221_v60 = vsel %vm22268_vm10, %v12206_v47, %v12208_v19  ;;  %vm22281_vm15 = vmmov %vm22279_vm2 }
 0xc0b   : > { %v10210_v41 = vadd.f32 %v10161_v7, %v10047_v51  ;;  %12672 = vrot.lane.b32.xlu0 %v18888_v16, %s22251_s17  ;;  %v12242_v25 = vsel %vm487_vm8, %v12222_v11, 0  ;;  %12670 = vrot.lane.b32.xlu1 %v18809_v62, %s22251_s17  ;;  %vm22282_vm10 = vmmov %vm22279_vm2 }
 0xc0c   : > { %v10163_v42 = vpop.f32.mrf.mxu1  ;;  %13998 = vmatprep.subr.msk.bf16.mxu1 %vm487_vm8, %v12221_v60  ;;  %v10205_v17 = vpop.f32.mrf.mxu0  ;;  %15059 = vmatpush3.bf16.msra.mxu0 %v12242_v25 }
 0xc0d   : > { %v10212_v54 = vadd.f32 %v10163_v42, %v10049_v32  ;;  %12253 = vmatpush1.bf16.msra.mxu1 %v12236_v55  ;;  %v12200_v56 = vpop.permute.xlu0 %12199  ;;  %v10214_v13 = vadd.f32 %v10205_v17, %v10051_v18  ;;  %v12198_v39 = vpop.permute.xlu1 %12197  ;;  %15060 = vmatprep.subr.bf16.mxu0 %v21736_v45 }
 0xc0e   : > { %v10165_v12 = vpop.f32.mrf.mxu1  ;;  %v12218_v51 = vsel %vm22269_vm5, %v12198_v39, %v12200_v56  ;;  %v14913_v35 = vpop.f32.mrf.mxu0  ;;  %vm22283_vm5 = vmmov %vm22279_vm2 }
 0xc0f   : > { %v10213_v21 = vadd.f32 %v10165_v12, %v10050_v57  ;;  %12674 = vrot.lane.b32.xlu0 %v18878_v38, %s22251_s17  ;;  %12668 = vrot.lane.b32.xlu1 %v18807_v2, %s22251_s17 }
 0xc10   : > { %12254 = vmatprep.subr.bf16.mxu1 %v12218_v51 }
 0xc11   : > { %v12202_v15 = vpop.permute.xlu0 %12201  ;;  %v12196_v28 = vpop.permute.xlu1 %12195 }
 0xc12   : > { %v12219_v48 = vsel %vm22270_vm9, %v12200_v56, %v12202_v15  ;;  %v12217_v32 = vsel %vm22271_vm4, %v12196_v28, %v12198_v39  ;;  %vm22284_vm9 = vmmov %vm22279_vm2 }
 0xc13   : > { %12857 = vrot.lane.b32.xlu0 %v19226_v37, %s22272_s26  ;;  %15061 = vmatpush3.bf16.msra.mxu0 %v12219_v48  ;;  %v12986_v48 = vld [vmem:[%s21442_s12] sm:$0xff]  ;;  %vm22285_vm4 = vmmov %vm22279_vm2 }
 0xc14   : > { %12855 = vrot.lane.b32.xlu1 %v19238_v10, %s22272_s26  ;;  %12255 = vmatpush1.bf16.msra.mxu1 %v12217_v32 }
 0xc15   : > { %v12192_v14 = vpop.permute.xlu0 %12191  ;;  %15062 = vmatprep.subr.bf16.mxu0 %v21736_v45  ;;  %v12190_v63 = vpop.permute.xlu1 %12189 }
 0xc16   : > { %v12215_v59 = vsel %vm22273_vm14, %v12190_v63, %v12192_v14  ;;  %vm22286_vm14 = vmmov %vm22279_vm2 }
 0xc17   : > { %12861 = vrot.lane.b32.xlu0 %v19318_v4, %s22272_s26  ;;  %12256 = vmatprep.subr.bf16.mxu1 %v12215_v59 }
 0xc18   : > { %v10322_v18 = vpop.f32.mrf.mxu1  ;;  %12859 = vrot.lane.b32.xlu1 %v19330_v24, %s22272_s26  ;;  %v10365_v52 = vpop.f32.mrf.mxu0 }
 0xc19   : > { %v10372_v37 = vadd.f32 %v10322_v18, %v10209_v58  ;;  %v12194_v3 = vpop.permute.xlu0 %12193  ;;  %v10374_v57 = vadd.f32 %v10365_v52, %v10211_v22  ;;  %v12188_v23 = vpop.permute.xlu1 %12187 }
 0xc1a   : > { %v12216_v10 = vsel %vm22274_vm6, %v12192_v14, %v12194_v3  ;;  %v10324_v31 = vpop.f32.mrf.mxu1  ;;  %v14924_v1 = vpop.f32.mrf.mxu0  ;;  %v12214_v44 = vsel %vm22275_vm0, %v12188_v23, %v12190_v63  ;;  %vm22287_vm6 = vmmov %vm22279_vm2 }
 0xc1b   : > { %v10373_v53 = vadd.f32 %v10324_v31, %v10210_v41  ;;  %12851 = vrot.lane.b32.xlu0 %v19154_v0, %s22272_s26  ;;  %15063 = vmatpush3.bf16.msra.mxu0 %v12216_v10  ;;  %vm22288_vm0 = vmmov %vm22279_vm2 }
 0xc1c   : > { %v10326_v4 = vpop.f32.mrf.mxu1  ;;  %12849 = vrot.lane.b32.xlu1 %v19058_v30, %s22272_s26  ;;  %12257 = vmatpush1.bf16.msra.mxu1 %v12214_v44  ;;  %v10368_v36 = vpop.f32.mrf.mxu0 }
 0xc1d   : > { %v10375_v24 = vadd.f32 %v10326_v4, %v10212_v54  ;;  %v12184_v6 = vpop.permute.xlu0 %12183  ;;  %15064 = vmatprep.subr.bf16.mxu0 %v21736_v45  ;;  %v10377_v49 = vadd.f32 %v10368_v36, %v10214_v13  ;;  %v12182_v47 = vpop.permute.xlu1 %12181 }
 0xc1e   : > { %v10328_v29 = vpop.f32.mrf.mxu1  ;;  %v12212_v0 = vsel %vm22276_vm1, %v12182_v47, %v12184_v6  ;;  %v14925_v61 = vpop.f32.mrf.mxu0  ;;  %vm22289_vm1 = vmmov %vm22288_vm0 }
 0xc1f   : > { %v10376_v27 = vadd.f32 %v10328_v29, %v10213_v21  ;;  %12853 = vrot.lane.b32.xlu0 %v19142_v43, %s22272_s26  ;;  %12258 = vmatprep.subr.bf16.mxu1 %v12212_v0 }
 0xc20   : > { %12847 = vrot.lane.b32.xlu1 %v19062_v5, %s22272_s26 }
 0xc21   : > { %v12186_v30 = vpop.permute.xlu0 %12185  ;;  %v12180_v58 = vpop.permute.xlu1 %12179 }
 0xc22   : > { %v12213_v26 = vsel %vm22277_vm13, %v12184_v6, %v12186_v30  ;;  %v12211_v46 = vsel %vm22278_vm3, %v12180_v58, %v12182_v47  ;;  %v15504_v58 = vld [vmem:[%s21441_s11 + $0xa8] sm:$0xff]   ;;  %vm22290_vm13 = vmmov %vm22288_vm0  ;;  %vm22291_vm3 = vcmask 244736  }
 0xc23   : > { %12843 = vrot.lane.b32.xlu0 %v18980_v34, %s22272_s26  ;;  %15065 = vmatpush3.bf16.msra.mxu0 %v12213_v26 }
 0xc24   : > { %12841 = vrot.lane.b32.xlu1 %v18926_v50, %s22272_s26  ;;  %12259 = vmatpush1.bf16.msra.mxu1 %v12211_v46 }
 0xc25   : > { %v12369_v5 = vpop.permute.xlu0 %12368  ;;  %15070 = vmatprep.subr.bf16.mxu0 %v21736_v45  ;;  %v12367_v43 = vpop.permute.xlu1 %12366 }
 0xc26   : > { %15067 = vmatmul.mubr.msk.bf16.vlgmr.msra.gmra.mxu0 %vm3721_vm12, %v15503_v33  ;;  %v12383_v50 = vsel %vm22279_vm2, %v12367_v43, %v12369_v5  ;;  %vm22292_vm2 = vmmov %vm22291_vm3 }
 0xc27   : > { %13999 = vmatmul.mubr.msk.bf16.vlgmr.msra.gmra.mxu1 %vm3721_vm12, %v15503_v33  ;;  %12845 = vrot.lane.b32.xlu0 %v18974_v20, %s22272_s26  ;;  %v12399_v25 = vsel %vm487_vm8, %v12383_v50, 0 }
 0xc28   : > { %v10485_v22 = vpop.f32.mrf.mxu1  ;;  %12839 = vrot.lane.b32.xlu1 %v18928_v8, %s22272_s26  ;;  %12439 = vmatprep.mubr.bf16.mxu1 %v21731_v9  ;;  %v10528_v7 = vpop.f32.mrf.mxu0 }
 0xc29   : > { %v10535_v34 = vadd.f32 %v10485_v22, %v10372_v37  ;;  %v12373_v19 = vpop.permute.xlu0 %12372  ;;  %15078 = vmatprep.mubr.msk.bf16.mxu0 %vm15671_vm11, %v21736_v45  ;;  %v10537_v41 = vadd.f32 %v10528_v7, %v10374_v57  ;;  %v12371_v11 = vpop.permute.xlu1 %12370 }
 0xc2a   : > { %v10487_v40 = vpop.f32.mrf.mxu1  ;;  %v14936_v55 = vpop.f32.mrf.mxu0  ;;  %v12385_v20 = vsel %vm22280_vm7, %v12371_v11, %v12373_v19  ;;  %v12384_v8 = vsel %vm22281_vm15, %v12369_v5, %v12371_v11  ;;  %vm22293_vm7 = vmmov %vm22292_vm2 }
 0xc2b   : > { %v10536_v60 = vadd.f32 %v10487_v40, %v10373_v53  ;;  %12835 = vrot.lane.b32.xlu0 %v18888_v16, %s22272_s26  ;;  %v12405_v42 = vsel %vm487_vm8, %v12385_v20, 0  ;;  %14004 = vmatprep.subr.msk.bf16.mxu1 %vm487_vm8, %v12384_v8  ;;  %vm22294_vm15 = vmmov %vm22292_vm2 }
 0xc2c   : > { %v10489_v54 = vpop.f32.mrf.mxu1  ;;  %12833 = vrot.lane.b32.xlu1 %v18809_v62, %s22272_s26  ;;  %v10531_v56 = vpop.f32.mrf.mxu0  ;;  %12416 = vmatpush1.bf16.msra.mxu1 %v12399_v25  ;;  %v12987_v62 = vld [vmem:[%s21442_s12 + $0x8] sm:$0xff] }
 0xc2d   : > { %v10538_v17 = vadd.f32 %v10489_v54, %v10375_v24  ;;  %15071 = vmatpush3.bf16.msra.mxu0 %v12405_v42  ;;  %v12363_v13 = vpop.permute.xlu0 %12362  ;;  %v10540_v12 = vadd.f32 %v10531_v56, %v10377_v49  ;;  %v12361_v16 = vpop.permute.xlu1 %12360 }
 0xc2e   : > { %v10491_v39 = vpop.f32.mrf.mxu1  ;;  %15072 = vmatprep.subr.bf16.mxu0 %v21736_v45  ;;  %v12381_v51 = vsel %vm22282_vm10, %v12361_v16, %v12363_v13  ;;  %v14937_v35 = vpop.f32.mrf.mxu0  ;;  %vm22295_vm10 = vmmov %vm22292_vm2 }
 0xc2f   : > { %v10539_v21 = vadd.f32 %v10491_v39, %v10376_v27  ;;  %12837 = vrot.lane.b32.xlu0 %v18878_v38, %s22272_s26  ;;  %12417 = vmatprep.subr.bf16.mxu1 %v12381_v51 }
 0xc30   : > { %12831 = vrot.lane.b32.xlu1 %v18807_v2, %s22272_s26 }
 0xc31   : > { %v12365_v15 = vpop.permute.xlu0 %12364  ;;  %v12359_v32 = vpop.permute.xlu1 %12358 }
 0xc32   : > { %v12382_v28 = vsel %vm22283_vm5, %v12363_v13, %v12365_v15  ;;  %v12380_v38 = vsel %vm22284_vm9, %v12359_v32, %v12361_v16  ;;  %vm22296_vm5 = vmmov %vm22292_vm2 }
 0xc33   : > { %12995 = vperm.xlu0 %15469, %v12987_v62   ;;  %15073 = vmatpush3.bf16.msra.mxu0 %v12382_v28  ;;  %vm22297_vm9 = vmmov %vm22292_vm2 }
 0xc34   : > { %12990 = vperm.xlu1 %15470, %v12986_v48   ;;  %12418 = vmatpush1.bf16.msra.mxu1 %v12380_v38 }
 0xc35   : > { %v12355_v2 = vpop.permute.xlu0 %12354  ;;  %15074 = vmatprep.subr.bf16.mxu0 %v21736_v45  ;;  %v12353_v14 = vpop.permute.xlu1 %12352 }
 0xc36   : > { %v12378_v63 = vsel %vm22285_vm4, %v12353_v14, %v12355_v2  ;;  %vm22298_vm4 = vmmov %vm22292_vm2 }
 0xc37   : > { %12419 = vmatprep.subr.bf16.mxu1 %v12378_v63 }
 0xc38   : > { %v10648_v59 = vpop.f32.mrf.mxu1  ;;  %v10691_v37 = vpop.f32.mrf.mxu0 }
 0xc39   : > { %v10698_v18 = vadd.f32 %v10648_v59, %v10535_v34  ;;  %v12357_v52 = vpop.permute.xlu0 %12356  ;;  %v10700_v3 = vadd.f32 %v10691_v37, %v10537_v41  ;;  %v12351_v31 = vpop.permute.xlu1 %12350 }
 0xc3a   : > { %v12379_v57 = vsel %vm22286_vm14, %v12355_v2, %v12357_v52  ;;  %v10650_v10 = vpop.f32.mrf.mxu1  ;;  %v14948_v53 = vpop.f32.mrf.mxu0  ;;  %v12377_v1 = vsel %vm22287_vm6, %v12351_v31, %v12353_v14  ;;  %vm22299_vm14 = vmmov %vm22292_vm2 }
 0xc3b   : > { %v10699_v23 = vadd.f32 %v10650_v10, %v10536_v60  ;;  %15075 = vmatpush3.bf16.msra.mxu0 %v12379_v57  ;;  %12420 = vmatpush1.bf16.msra.mxu1 %v12377_v1  ;;  %vm22300_vm6 = vmmov %vm22292_vm2 }
 0xc3c   : > { %v10652_v44 = vpop.f32.mrf.mxu1  ;;  %15076 = vmatprep.subr.bf16.mxu0 %v21736_v45  ;;  %v10694_v24 = vpop.f32.mrf.mxu0 }
 0xc3d   : > { %v10701_v4 = vadd.f32 %v10652_v44, %v10538_v17  ;;  %v12347_v36 = vpop.permute.xlu0 %12346  ;;  %v10703_v6 = vadd.f32 %v10694_v24, %v10540_v12  ;;  %v12345_v29 = vpop.permute.xlu1 %12344 }
 0xc3e   : > { %v10654_v49 = vpop.f32.mrf.mxu1  ;;  %v12375_v27 = vsel %vm22288_vm0, %v12345_v29, %v12347_v36  ;;  %v14949_v0 = vpop.f32.mrf.mxu0  ;;  %vm22301_vm0 = vmmov %vm22292_vm2 }
 0xc3f   : > { %v10702_v47 = vadd.f32 %v10654_v49, %v10539_v21  ;;  %12421 = vmatprep.subr.bf16.mxu1 %v12375_v27 }
 0xc41   : > { %v12349_v61 = vpop.permute.xlu0 %12348  ;;  %v12343_v26 = vpop.permute.xlu1 %12342 }
 0xc42   : > { %v12376_v30 = vsel %vm22289_vm1, %v12347_v36, %v12349_v61  ;;  %v12374_v33 = vsel %vm22290_vm13, %v12343_v26, %v12345_v29  ;;  %v15505_v61 = vld [vmem:[%s21441_s11 + $0xb0] sm:$0xff]   ;;  %vm22302_vm1 = vmmov %vm22301_vm0  ;;  %vm22303_vm13 = vcmask 236544  }
 0xc43   : > { %15077 = vmatpush3.bf16.msra.mxu0 %v12376_v30  ;;  %12422 = vmatpush1.bf16.msra.mxu1 %v12374_v33 }
 0xc44   : > { %15082 = vmatprep.subr.bf16.mxu0 %v21736_v45 }
 0xc45   : > { %v12532_v46 = vpop.permute.xlu0 %12531  ;;  %v12530_v5 = vpop.permute.xlu1 %12529 }
 0xc46   : > { %15079 = vmatmul.mubr.msk.bf16.vlgmr.msra.gmra.mxu0 %vm3721_vm12, %v15504_v58  ;;  %14005 = vmatmul.mubr.msk.bf16.vlgmr.msra.gmra.mxu1 %vm3721_vm12, %v15504_v58  ;;  %v12546_v22 = vsel %vm22291_vm3, %v12530_v5, %v12532_v46  ;;  %vm22304_vm3 = vmmov %vm22303_vm13 }
 0xc47   : > { %15090 = vmatprep.mubr.msk.bf16.mxu0 %vm15671_vm11, %v21736_v45  ;;  %12602 = vmatprep.mubr.bf16.mxu1 %v21731_v9  ;;  %v12562_v8 = vsel %vm487_vm8, %v12546_v22, 0 }
 0xc48   : > { %v10811_v43 = vpop.f32.mrf.mxu1  ;;  %v10854_v34 = vpop.f32.mrf.mxu0 }
 0xc49   : > { %v10861_v50 = vadd.f32 %v10811_v43, %v10698_v18  ;;  %v12536_v7 = vpop.permute.xlu0 %12535  ;;  %v10863_v19 = vadd.f32 %v10854_v34, %v10700_v3  ;;  %v12534_v40 = vpop.permute.xlu1 %12533 }
 0xc4a   : > { %v10813_v41 = vpop.f32.mrf.mxu1  ;;  %v14960_v60 = vpop.f32.mrf.mxu0  ;;  %v12548_v55 = vsel %vm22292_vm2, %v12534_v40, %v12536_v7  ;;  %v12547_v20 = vsel %vm22293_vm7, %v12532_v46, %v12534_v40  ;;  %vm22305_vm2 = vmmov %vm22304_vm3 }
 0xc4b   : > { %v10862_v11 = vadd.f32 %v10813_v41, %v10699_v23  ;;  %v12568_v25 = vsel %vm487_vm8, %v12548_v55, 0  ;;  %14010 = vmatprep.subr.msk.bf16.mxu1 %vm487_vm8, %v12547_v20  ;;  %vm22306_vm7 = vmmov %vm22305_vm2 }
 0xc4c   : > { %v10815_v42 = vpop.f32.mrf.mxu1  ;;  %v10857_v17 = vpop.f32.mrf.mxu0  ;;  %12579 = vmatpush1.bf16.msra.mxu1 %v12562_v8  ;;  %15083 = vmatpush3.bf16.msra.mxu0 %v12568_v25 }
 0xc4d   : > { %v10864_v54 = vadd.f32 %v10815_v42, %v10701_v4  ;;  %v12526_v56 = vpop.permute.xlu0 %12525  ;;  %v10866_v13 = vadd.f32 %v10857_v17, %v10703_v6  ;;  %v12524_v39 = vpop.permute.xlu1 %12523  ;;  %15084 = vmatprep.subr.bf16.mxu0 %v21736_v45 }
 0xc4e   : > { %v10817_v12 = vpop.f32.mrf.mxu1  ;;  %v12544_v21 = vsel %vm22294_vm15, %v12524_v39, %v12526_v56  ;;  %v14961_v51 = vpop.f32.mrf.mxu0  ;;  %vm22307_vm15 = vmmov %vm22305_vm2 }
 0xc4f   : > { %v10865_v16 = vadd.f32 %v10817_v12, %v10702_v47  ;;  %12580 = vmatprep.subr.bf16.mxu1 %v12544_v21 }
 0xc51   : > { %v12528_v35 = vpop.permute.xlu0 %12527  ;;  %v12522_v15 = vpop.permute.xlu1 %12521 }
 0xc52   : > { %v12545_v62 = vsel %vm22295_vm10, %v12526_v56, %v12528_v35  ;;  %v12543_v48 = vsel %vm22296_vm5, %v12522_v15, %v12524_v39  ;;  %vm22308_vm10 = vmmov %vm22305_vm2 }
 0xc53   : > { %15085 = vmatpush3.bf16.msra.mxu0 %v12545_v62  ;;  %12581 = vmatpush1.bf16.msra.mxu1 %v12543_v48  ;;  %vm22309_vm5 = vmmov %vm22305_vm2 }
 0xc54   : > { %15086 = vmatprep.subr.bf16.mxu0 %v21736_v45 }
 0xc55   : > { %v12518_v28 = vpop.permute.xlu0 %12517  ;;  %v12516_v32 = vpop.permute.xlu1 %12515 }
 0xc56   : > { %v12541_v38 = vsel %vm22297_vm9, %v12516_v32, %v12518_v28  ;;  %vm22310_vm9 = vmmov %vm22305_vm2 }
 0xc57   : > { %12582 = vmatprep.subr.bf16.mxu1 %v12541_v38 }
 0xc58   : > { %v10974_v2 = vpop.f32.mrf.mxu1  ;;  %v11017_v63 = vpop.f32.mrf.mxu0 }
 0xc59   : > { %v11024_v14 = vadd.f32 %v10974_v2, %v10861_v50  ;;  %v12520_v59 = vpop.permute.xlu0 %12519  ;;  %v11026_v18 = vadd.f32 %v11017_v63, %v10863_v19  ;;  %v12514_v3 = vpop.permute.xlu1 %12513 }
 0xc5a   : > { %v12542_v37 = vsel %vm22298_vm4, %v12518_v28, %v12520_v59  ;;  %v10976_v52 = vpop.f32.mrf.mxu1  ;;  %v14972_v10 = vpop.f32.mrf.mxu0  ;;  %v12540_v31 = vsel %vm22299_vm14, %v12514_v3, %v12516_v32  ;;  %vm22311_vm4 = vmmov %vm22305_vm2 }
 0xc5b   : > { %v11025_v57 = vadd.f32 %v10976_v52, %v10862_v11  ;;  %15087 = vmatpush3.bf16.msra.mxu0 %v12542_v37  ;;  %12583 = vmatpush1.bf16.msra.mxu1 %v12540_v31  ;;  %vm22312_vm14 = vmmov %vm22305_vm2 }
 0xc5c   : > { %v10978_v23 = vpop.f32.mrf.mxu1  ;;  %15088 = vmatprep.subr.bf16.mxu0 %v21736_v45  ;;  %v11020_v1 = vpop.f32.mrf.mxu0 }
 0xc5d   : > { %v11027_v53 = vadd.f32 %v10978_v23, %v10864_v54  ;;  %v12510_v44 = vpop.permute.xlu0 %12509  ;;  %v11029_v4 = vadd.f32 %v11020_v1, %v10866_v13  ;;  %v12508_v36 = vpop.permute.xlu1 %12507  ;;  %v15506_v1 = vld [vmem:[%s21441_s11 + $0xb8] sm:$0xff]  }
 0xc5e   : > { %v10980_v24 = vpop.f32.mrf.mxu1  ;;  %v12538_v49 = vsel %vm22300_vm6, %v12508_v36, %v12510_v44  ;;  %v14973_v29 = vpop.f32.mrf.mxu0  ;;  %vm22313_vm6 = vmmov %vm22305_vm2 }
 0xc5f   : > { %v11028_v6 = vadd.f32 %v10980_v24, %v10865_v16  ;;  %12584 = vmatprep.subr.bf16.mxu1 %v12538_v49 }
 0xc61   : > { %v12512_v47 = vpop.permute.xlu0 %12511  ;;  %v12506_v0 = vpop.permute.xlu1 %12505 }
 0xc62   : > { %v12539_v27 = vsel %vm22301_vm0, %v12510_v44, %v12512_v47  ;;  %v12537_v30 = vsel %vm22302_vm1, %v12506_v0, %v12508_v36  ;;  %vm22314_vm0 = vmmov %vm22305_vm2  ;;  %vm22315_vm1 = vcmask 228352  }
 0xc63   : > { %15089 = vmatpush3.bf16.msra.mxu0 %v12539_v27  ;;  %12585 = vmatpush1.bf16.msra.mxu1 %v12537_v30 }
 0xc64   : > { %15094 = vmatprep.subr.bf16.mxu0 %v21736_v45 }
 0xc65   : > { %v12695_v26 = vpop.permute.xlu0 %12694  ;;  %v12693_v58 = vpop.permute.xlu1 %12692 }
 0xc66   : > { %15091 = vmatmul.mubr.msk.bf16.vlgmr.msra.gmra.mxu0 %vm3721_vm12, %v15505_v61  ;;  %14011 = vmatmul.mubr.msk.bf16.vlgmr.msra.gmra.mxu1 %vm3721_vm12, %v15505_v61  ;;  %v12709_v46 = vsel %vm22303_vm13, %v12693_v58, %v12695_v26  ;;  %vm22316_vm13 = vmmov %vm22315_vm1 }
 0xc67   : > { %15102 = vmatprep.mubr.msk.bf16.mxu0 %vm15671_vm11, %v21736_v45  ;;  %12765 = vmatprep.mubr.bf16.mxu1 %v21731_v9  ;;  %v12725_v60 = vsel %vm487_vm8, %v12709_v46, 0 }
 0xc68   : > { %v11137_v33 = vpop.f32.mrf.mxu1  ;;  %v11180_v43 = vpop.f32.mrf.mxu0 }
 0xc69   : > { %v21354_v5 = vadd.f32 %v11137_v33, %v11024_v14  ;;  %v12699_v22 = vpop.permute.xlu0 %12698  ;;  %v11189_v50 = vadd.f32 %v11180_v43, %v11026_v18  ;;  %v12697_v7 = vpop.permute.xlu1 %12696 }
 0xc6a   : > { %v11139_v34 = vpop.f32.mrf.mxu1  ;;  %v14984_v41 = vpop.f32.mrf.mxu0  ;;  %v12711_v40 = vsel %vm22304_vm3, %v12697_v7, %v12699_v22  ;;  %v12710_v11 = vsel %vm22305_vm2, %v12695_v26, %v12697_v7  ;;  %vm22317_vm3 = vmmov %vm22315_vm1 }
 0xc6b   : > { %v21356_v19 = vadd.f32 %v11139_v34, %v11025_v57  ;;  %v12731_v55 = vsel %vm487_vm8, %v12711_v40, 0  ;;  %14016 = vmatprep.subr.msk.bf16.mxu1 %vm487_vm8, %v12710_v11  ;;  %vm22319_vm2 = vmmov %vm22315_vm1 }
 0xc6c   : > { %v11141_v20 = vpop.f32.mrf.mxu1  ;;  %v11183_v25 = vpop.f32.mrf.mxu0  ;;  %12742 = vmatpush1.bf16.msra.mxu1 %v12725_v60  ;;  %15095 = vmatpush3.bf16.msra.mxu0 %v12731_v55 }
 0xc6d   : > { %v21363_v8 = vadd.f32 %v11141_v20, %v11027_v53  ;;  %v12689_v42 = vpop.permute.xlu0 %12688  ;;  %v11192_v54 = vadd.f32 %v11183_v25, %v11029_v4  ;;  %v12687_v56 = vpop.permute.xlu1 %12686  ;;  %15096 = vmatprep.subr.bf16.mxu0 %v21736_v45 }
 0xc6e   : > { %v11143_v17 = vpop.f32.mrf.mxu1  ;;  %v12707_v12 = vsel %vm22306_vm7, %v12687_v56, %v12689_v42  ;;  %v14985_v39 = vpop.f32.mrf.mxu0  ;;  %vm22320_vm7 = vmmov %vm22315_vm1 }
 0xc6f   : > { %v21366_v13 = vadd.f32 %v11143_v17, %v11028_v6  ;;  %12743 = vmatprep.subr.bf16.mxu1 %v12707_v12 }
 0xc71   : > { %v12691_v16 = vpop.permute.xlu0 %12690  ;;  %v12685_v51 = vpop.permute.xlu1 %12684 }
 0xc72   : > { %v12708_v21 = vsel %vm22307_vm15, %v12689_v42, %v12691_v16  ;;  %v12706_v35 = vsel %vm22308_vm10, %v12685_v51, %v12687_v56  ;;  %vm22322_vm15 = vmmov %vm22315_vm1 }
 0xc73   : > { %15097 = vmatpush3.bf16.msra.mxu0 %v12708_v21  ;;  %12744 = vmatpush1.bf16.msra.mxu1 %v12706_v35  ;;  %vm22323_vm10 = vmmov %vm22315_vm1 }
 0xc74   : > { %15098 = vmatprep.subr.bf16.mxu0 %v21736_v45 }
 0xc75   : > { %v12681_v62 = vpop.permute.xlu0 %12680  ;;  %v12679_v15 = vpop.permute.xlu1 %12678 }
 0xc76   : > { %v12704_v48 = vsel %vm22309_vm5, %v12679_v15, %v12681_v62  ;;  %vm22324_vm5 = vmmov %vm22315_vm1 }
 0xc77   : > { %12745 = vmatprep.subr.bf16.mxu1 %v12704_v48 }
 0xc78   : > { %v11343_v28 = vpop.f32.mrf.mxu0 }
 0xc79   : > { %v12683_v32 = vpop.permute.xlu0 %12682  ;;  %v11352_v38 = vadd.f32 %v11343_v28, %v11189_v50  ;;  %v12677_v14 = vpop.permute.xlu1 %12676  ;;  %v15507_v28 = vld [vmem:[%s21441_s11 + $0xc0] sm:$0xff]  }
 0xc7a   : > { %v12705_v2 = vsel %vm22310_vm9, %v12681_v62, %v12683_v32  ;;  %v14996_v63 = vpop.f32.mrf.mxu0  ;;  %v12703_v59 = vsel %vm22311_vm4, %v12677_v14, %v12679_v15  ;;  %vm22325_vm9 = vmmov %vm22315_vm1 }
 0xc7b   : > { %15099 = vmatpush3.bf16.msra.mxu0 %v12705_v2  ;;  %12746 = vmatpush1.bf16.msra.mxu1 %v12703_v59  ;;  %vm22326_vm4 = vmmov %vm22315_vm1 }
 0xc7c   : > { %15100 = vmatprep.subr.bf16.mxu0 %v21736_v45  ;;  %v11346_v18 = vpop.f32.mrf.mxu0 }
 0xc7d   : > { %v12673_v37 = vpop.permute.xlu0 %12672  ;;  %v11355_v52 = vadd.f32 %v11346_v18, %v11192_v54  ;;  %v12671_v3 = vpop.permute.xlu1 %12670 }
 0xc7e   : > { %v12701_v57 = vsel %vm22312_vm14, %v12671_v3, %v12673_v37  ;;  %v14997_v10 = vpop.f32.mrf.mxu0 }
 0xc7f   : > { %12747 = vmatprep.subr.bf16.mxu1 %v12701_v57 }
 0xc81   : > { %v12675_v31 = vpop.permute.xlu0 %12674  ;;  %v12669_v53 = vpop.permute.xlu1 %12668 }
 0xc82   : > { %v12702_v23 = vsel %vm22313_vm6, %v12673_v37, %v12675_v31  ;;  %v12700_v44 = vsel %vm22314_vm0, %v12669_v53, %v12671_v3 }
 0xc83   : > { %15101 = vmatpush3.bf16.msra.mxu0 %v12702_v23  ;;  %12748 = vmatpush1.bf16.msra.mxu1 %v12700_v44 }
 0xc84   : > { %15106 = vmatprep.subr.bf16.mxu0 %v21736_v45 }
 0xc85   : > { %v12858_v4 = vpop.permute.xlu0 %12857 }
 0xc86   : > { %v12856_v24 = vpop.permute.xlu1 %12855  ;;  %15103 = vmatmul.mubr.msk.bf16.vlgmr.msra.gmra.mxu0 %vm3721_vm12, %v15506_v1  ;;  %14017 = vmatmul.mubr.msk.bf16.vlgmr.msra.gmra.mxu1 %vm3721_vm12, %v15506_v1 }
 0xc87   : > { %15114 = vmatprep.mubr.msk.bf16.mxu0 %vm15671_vm11, %v21736_v45  ;;  %12928 = vmatprep.mubr.bf16.mxu1 %v21731_v9  ;;  %v12872_v36 = vsel %vm22315_vm1, %v12856_v24, %v12858_v4  ;;  %vm22318_vm11 = vmmov %vm22315_vm1  ;;  %v11300_v24 = vpop.f32.mrf.mxu1 }
 0xc88   : > { %v11506_v6 = vpop.f32.mrf.mxu0  ;;  %v12888_v30 = vsel %vm487_vm8, %v12872_v36, 0 }
 0xc89   : > { %v12862_v49 = vpop.permute.xlu0 %12861  ;;  %v11515_v29 = vadd.f32 %v11506_v6, %v11352_v38  ;;  %v11302_v36 = vpop.f32.mrf.mxu1 }
 0xc8a   : > { %v12860_v47 = vpop.permute.xlu1 %12859  ;;  %v15008_v27 = vpop.f32.mrf.mxu0 }
 0xc8b   : > { %v12874_v0 = vsel %vm22316_vm13, %v12860_v47, %v12862_v49  ;;  %v12873_v61 = vsel %vm22317_vm3, %v12858_v4, %v12860_v47  ;;  %v11304_v6 = vpop.f32.mrf.mxu1 }
 0xc8c   : > { %v12894_v26 = vsel %vm487_vm8, %v12874_v0, 0  ;;  %14022 = vmatprep.subr.msk.bf16.mxu1 %vm487_vm8, %v12873_v61  ;;  %v11509_v58 = vpop.f32.mrf.mxu0  ;;  %vm22321_vm8 = vmmov %vm22315_vm1 }
 0xc8d   : > { %12905 = vmatpush1.bf16.msra.mxu1 %v12888_v30  ;;  %15107 = vmatpush3.bf16.msra.mxu0 %v12894_v26  ;;  %v12852_v9 = vpop.permute.xlu0 %12851  ;;  %v11518_v33 = vadd.f32 %v11509_v58, %v11355_v52 }
 0xc8e   : > { %v12850_v46 = vpop.permute.xlu1 %12849  ;;  %15108 = vmatprep.subr.bf16.mxu0 %v21736_v45  ;;  %v15009_v22 = vpop.f32.mrf.mxu0 }
 0xc8f   : > { %v12870_v43 = vsel %vm22318_vm11, %v12850_v46, %v12852_v9 }
 0xc90   : > { %12906 = vmatprep.subr.bf16.mxu1 %v12870_v43 }
 0xc91   : > { %v12854_v50 = vpop.permute.xlu0 %12853 }
 0xc92   : > { %v12871_v34 = vsel %vm22319_vm2, %v12852_v9, %v12854_v50  ;;  %v12848_v7 = vpop.permute.xlu1 %12847 }
 0xc93   : > { %v12869_v41 = vsel %vm22320_vm7, %v12848_v7, %v12850_v46  ;;  %15109 = vmatpush3.bf16.msra.mxu0 %v12871_v34 }
 0xc94   : > { %12907 = vmatpush1.bf16.msra.mxu1 %v12869_v41  ;;  %15110 = vmatprep.subr.bf16.mxu0 %v21736_v45 }
 0xc95   : > { %v12844_v40 = vpop.permute.xlu0 %12843 }
 0xc96   : > { %v12842_v11 = vpop.permute.xlu1 %12841 }
 0xc97   : > { %v12867_v60 = vsel %vm22321_vm8, %v12842_v11, %v12844_v40 }
 0xc98   : > { %12908 = vmatprep.subr.bf16.mxu1 %v12867_v60  ;;  %v11669_v55 = vpop.f32.mrf.mxu0 }
 0xc99   : > { %v12846_v20 = vpop.permute.xlu0 %12845  ;;  %v11678_v25 = vadd.f32 %v11669_v55, %v11515_v29  ;;  %v11306_v29 = vpop.f32.mrf.mxu1 }
 0xc9a   : > { %v12868_v42 = vsel %vm22322_vm15, %v12844_v40, %v12846_v20  ;;  %v12840_v54 = vpop.permute.xlu1 %12839  ;;  %v15020_v17 = vpop.f32.mrf.mxu0 }
 0xc9b   : > { %v12866_v56 = vsel %vm22323_vm10, %v12840_v54, %v12842_v11  ;;  %15111 = vmatpush3.bf16.msra.mxu0 %v12868_v42  ;;  %v11463_v0 = vpop.f32.mrf.mxu1 }
 0xc9c   : > { %12909 = vmatpush1.bf16.msra.mxu1 %v12866_v56  ;;  %15112 = vmatprep.subr.bf16.mxu0 %v21736_v45  ;;  %v11672_v12 = vpop.f32.mrf.mxu0 }
 0xc9d   : > { %v12836_v39 = vpop.permute.xlu0 %12835  ;;  %v11681_v16 = vadd.f32 %v11672_v12, %v11518_v33  ;;  %v11465_v58 = vpop.f32.mrf.mxu1 }
 0xc9e   : > { %v12834_v21 = vpop.permute.xlu1 %12833  ;;  %v15021_v35 = vpop.f32.mrf.mxu0 }
 0xc9f   : > { %v12864_v51 = vsel %vm22324_vm5, %v12834_v21, %v12836_v39  ;;  %v11467_v9 = vpop.f32.mrf.mxu1 }
 0xca0   : > { %12910 = vmatprep.subr.bf16.mxu1 %v12864_v51 }
 0xca1   : > { %v12838_v62 = vpop.permute.xlu0 %12837  ;;  %v11469_v33 = vpop.f32.mrf.mxu1 }
 0xca2   : > { %v12865_v15 = vsel %vm22325_vm9, %v12836_v39, %v12838_v62  ;;  %v12832_v48 = vpop.permute.xlu1 %12831 }
 0xca3   : > { %v12863_v32 = vsel %vm22326_vm4, %v12832_v48, %v12834_v21  ;;  %15113 = vmatpush3.bf16.msra.mxu0 %v12865_v15  ;;  %v11626_v46 = vpop.f32.mrf.mxu1 }
 0xca4   : > { %12911 = vmatpush1.bf16.msra.mxu1 %v12863_v32 }
 0xca5   : > { %v11628_v43 = vpop.f32.mrf.mxu1 }
 0xca6   : > { %15115 = vmatmul.mubr.msk.bf16.vlgmr.msra.gmra.mxu0 %vm3721_vm12, %v15507_v28 }
 0xca7   : > { %14023 = vmatmul.mubr.msk.bf16.vlgmr.msra.gmra.mxu1 %vm3721_vm12, %v15507_v28  ;;  %v11630_v22 = vpop.f32.mrf.mxu1 }
 0xca8   : > { %v11832_v45 = vpop.f32.mrf.mxu0 }
 0xca9   : > { %v11841_v38 = vadd.f32 %v11832_v45, %v11678_v25  ;;  %v11632_v50 = vpop.f32.mrf.mxu1 }
 0xcaa   : > { %v15032_v2 = vpop.f32.mrf.mxu0 }
 0xcab   : > { %v11789_v34 = vpop.f32.mrf.mxu1 }
 0xcac   : > { %v11835_v14 = vpop.f32.mrf.mxu0 }
 0xcad   : > { %v11844_v63 = vadd.f32 %v11835_v14, %v11681_v16  ;;  %v11791_v11 = vpop.f32.mrf.mxu1 }
 0xcae   : > { %v15033_v59 = vpop.f32.mrf.mxu0 }
 0xcaf   : > { %v11793_v25 = vpop.f32.mrf.mxu1 }
 0xcb1   : > { %v11795_v42 = vpop.f32.mrf.mxu1 }
 0xcb8   : > { %v11995_v18 = vpop.f32.mrf.mxu0  ;;  %v11952_v54 = vpop.f32.mrf.mxu1 }
 0xcb9   : > { %v12004_v37 = vadd.f32 %v11995_v18, %v11841_v38 }
 0xcba   : > { %v15044_v52 = vpop.f32.mrf.mxu0  ;;  %v11954_v17 = vpop.f32.mrf.mxu1 }
 0xcbc   : > { %v11998_v3 = vpop.f32.mrf.mxu0  ;;  %v11956_v56 = vpop.f32.mrf.mxu1 }
 0xcbd   : > { %v12007_v57 = vadd.f32 %v11998_v3, %v11844_v63 }
 0xcbe   : > { %v15045_v10 = vpop.f32.mrf.mxu0  ;;  %v11958_v12 = vpop.f32.mrf.mxu1 }
 0xcc8   : > { %v12158_v31 = vpop.f32.mrf.mxu0  ;;  %v12115_v39 = vpop.f32.mrf.mxu1 }
 0xcc9   : > { %v12167_v23 = vadd.f32 %v12158_v31, %v12004_v37 }
 0xcca   : > { %v15056_v53 = vpop.f32.mrf.mxu0  ;;  %v12117_v16 = vpop.f32.mrf.mxu1 }
 0xccb   : > { %v11351_v53 = vadd.f32 %v11302_v36, %v21356_v19 }
 0xccc   : > { %v12161_v1 = vpop.f32.mrf.mxu0  ;;  %v12119_v35 = vpop.f32.mrf.mxu1 }
 0xccd   : > { %v12170_v44 = vadd.f32 %v12161_v1, %v12007_v57 }
 0xcce   : > { %v15057_v4 = vpop.f32.mrf.mxu0  ;;  %v12121_v48 = vpop.f32.mrf.mxu1 }
 0xccf   : > { %v11353_v4 = vadd.f32 %v11304_v6, %v21363_v8 }
 0xce6   : > { %v12321_v49 = vpop.f32.mrf.mxu0 }
 0xce7   : > { %v12330_v47 = vadd.f32 %v12321_v49, %v12167_v23  ;;  %v12278_v28 = vpop.f32.mrf.mxu1  ;;  %v11350_v23 = vadd.f32 %v11300_v24, %v21354_v5  ;;  %v11514_v49 = vadd.f32 %v11465_v58, %v11351_v53 }
 0xce8   : > { %v15068_v27 = vpop.f32.mrf.mxu0 }
 0xce9   : > { %v12280_v32 = vpop.f32.mrf.mxu1  ;;  %v11513_v1 = vadd.f32 %v11463_v0, %v11350_v23 }
 0xcea   : > { %v12324_v61 = vpop.f32.mrf.mxu0 }
 0xceb   : > { %v12333_v30 = vadd.f32 %v12324_v61, %v12170_v44  ;;  %v12282_v45 = vpop.f32.mrf.mxu1  ;;  %v11354_v61 = vadd.f32 %v11306_v29, %v21366_v13 }
 0xcec   : > { %v15069_v26 = vpop.f32.mrf.mxu0 }
 0xced   : > { %v12284_v38 = vpop.f32.mrf.mxu1  ;;  %v11677_v26 = vadd.f32 %v11628_v43, %v11514_v49 }
 0xd06   : > { %v12484_v7 = vpop.f32.mrf.mxu0  ;;  %v12441_v2 = vpop.f32.mrf.mxu1 }
 0xd07   : > { %v21411_v41 = vadd.f32 %v12484_v7, %v12330_v47  ;;  %v11676_v47 = vadd.f32 %v11626_v46, %v11513_v1 }
 0xd08   : > { %v15080_v40 = vpop.f32.mrf.mxu0  ;;  %v12443_v14 = vpop.f32.mrf.mxu1 }
 0xd09   : > { %v11839_v7 = vadd.f32 %v11789_v34, %v11676_v47  ;;  %v11517_v40 = vadd.f32 %v11469_v33, %v11354_v61 }
 0xd0a   : > { %v12487_v60 = vpop.f32.mrf.mxu0  ;;  %v12445_v63 = vpop.f32.mrf.mxu1 }
 0xd0b   : > { %v21413_v55 = vadd.f32 %v12487_v60, %v12333_v30  ;;  %v11516_v30 = vadd.f32 %v11467_v9, %v11353_v4  ;;  %v11680_v5 = vadd.f32 %v11632_v50, %v11517_v40 }
 0xd0c   : > { %v15081_v20 = vpop.f32.mrf.mxu0  ;;  %v12447_v37 = vpop.f32.mrf.mxu1 }
 0xd0d   : > { %v11679_v60 = vadd.f32 %v11630_v22, %v11516_v30  ;;  %v11840_v20 = vadd.f32 %v11791_v11, %v11677_v26  ;;  %v11843_v0 = vadd.f32 %v11795_v42, %v11680_v5 }
 0xd0f   : > { %v11842_v24 = vadd.f32 %v11793_v25, %v11679_v60  ;;  %v12003_v19 = vadd.f32 %v11954_v17, %v11840_v20  ;;  %v12006_v46 = vadd.f32 %v11958_v12, %v11843_v0 }
 0xd11   : > { %v12166_v8 = vadd.f32 %v12117_v16, %v12003_v19  ;;  %v12169_v33 = vadd.f32 %v12121_v48, %v12006_v46 }
 0xd13   : > { %v12329_v13 = vadd.f32 %v12280_v32, %v12166_v8  ;;  %v12332_v25 = vadd.f32 %v12284_v38, %v12169_v33 }
 0xd15   : > { %v12492_v22 = vadd.f32 %v12443_v14, %v12329_v13 }
 0xd26   : > { %v12647_v21 = vpop.f32.mrf.mxu0  ;;  %v12604_v3 = vpop.f32.mrf.mxu1 }
 0xd27   : > { %v12656_v9 = vadd.f32 %v12647_v21, %v21411_v41 }
 0xd28   : > { %v15092_v51 = vpop.f32.mrf.mxu0  ;;  %v12606_v10 = vpop.f32.mrf.mxu1 }
 0xd29   : > { %v12002_v51 = vadd.f32 %v11952_v54, %v11839_v7  ;;  %v12655_v17 = vadd.f32 %v12606_v10, %v12492_v22  ;;  %v12996_v10 = vpop.permute.xlu0 %12995 }
 0xd2a   : > { %v12650_v62 = vpop.f32.mrf.mxu0  ;;  %v12608_v31 = vpop.f32.mrf.mxu1 }
 0xd2b   : > { %v12165_v36 = vadd.f32 %v12115_v39, %v12002_v51  ;;  %v12659_v39 = vadd.f32 %v12650_v62, %v21413_v55 }
 0xd2c   : > { %v15093_v15 = vpop.f32.mrf.mxu0  ;;  %v12610_v44 = vpop.f32.mrf.mxu1 }
 0xd2d   : > { %v12328_v6 = vadd.f32 %v12278_v28, %v12165_v36  ;;  %v12495_v28 = vadd.f32 %v12447_v37, %v12332_v25 }
 0xd2f   : > { %v12491_v29 = vadd.f32 %v12441_v2, %v12328_v6  ;;  %v12658_v38 = vadd.f32 %v12610_v44, %v12495_v28 }
 0xd31   : > { %v12654_v34 = vadd.f32 %v12604_v3, %v12491_v29 }
 0xd46   : > { %v12810_v59 = vpop.f32.mrf.mxu0  ;;  %v12767_v27 = vpop.f32.mrf.mxu1 }
 0xd47   : > { %v12819_v11 = vadd.f32 %v12810_v59, %v12656_v9  ;;  %v12817_v42 = vadd.f32 %v12767_v27, %v12654_v34 }
 0xd48   : > { %v15104_v18 = vpop.f32.mrf.mxu0  ;;  %v12769_v15 = vpop.f32.mrf.mxu1 }
 0xd49   : > { %v12005_v18 = vadd.f32 %v11956_v56, %v11842_v24  ;;  %v12818_v41 = vadd.f32 %v12769_v15, %v12655_v17 }
 0xd4a   : > { %v12813_v52 = vpop.f32.mrf.mxu0  ;;  %v12771_v58 = vpop.f32.mrf.mxu1 }
 0xd4c   : > { %v15105_v57 = vpop.f32.mrf.mxu0  ;;  %v12773_v50 = vpop.f32.mrf.mxu1 }
 0xd4d   : > { %v12168_v57 = vadd.f32 %v12119_v35, %v12005_v18  ;;  %v12991_v35 = vpop.permute.xlu1 %12990 }
 0xd4f   : > { %v12331_v43 = vadd.f32 %v12282_v45, %v12168_v57  ;;  %v12822_v45 = vadd.f32 %v12813_v52, %v12659_v39 }
 0xd51   : > { %v12494_v54 = vadd.f32 %v12445_v63, %v12331_v43 }
 0xd53   : > { %v12657_v32 = vadd.f32 %v12608_v31, %v12494_v54  ;;  %v12821_v31 = vadd.f32 %v12773_v50, %v12658_v38 }
 0xd55   : > { %v12820_v63 = vadd.f32 %v12771_v58, %v12657_v32 }
 0xd66   : > { %v12973_v56 = vpop.f32.mrf.mxu0 }
 0xd67   : > { %v12930_v16 = vpop.f32.mrf.mxu1  ;;  %v12982_v12 = vadd.f32 %v12973_v56, %v12819_v11 }
 0xd68   : > { %v12980_v21 = vadd.f32 %v12930_v16, %v12817_v42  ;;  %v15116_v48 = vpop.f32.mrf.mxu0 }
 0xd69   : > { %v13000_v2 = vadd.f32 %v12991_v35, %v12982_v12  ;;  %v12932_v14 = vpop.f32.mrf.mxu1 }
 0xd6a   : > { %v12998_v59 = vadd.f32 %v12991_v35, %v12980_v21  ;;  %v12981_v3 = vadd.f32 %v12932_v14, %v12818_v41  ;;  %v12976_v55 = vpop.f32.mrf.mxu0 }
 0xd6b   : > { %13006 = vst [vmem:[%s15797_s18 + $0x10] sm:$0xff] %v13000_v2  ;;  %v12934_v62 = vpop.f32.mrf.mxu1  ;;  %v12985_v37 = vadd.f32 %v12976_v55, %v12822_v45 }
 0xd6c   : > { %13004 = vst [vmem:[%s15797_s18] sm:$0xff] %v12998_v59  ;;  %v12999_v23 = vadd.f32 %v12991_v35, %v12981_v3  ;;  %v12983_v53 = vadd.f32 %v12934_v62, %v12820_v63  ;;  %v15117_v52 = vpop.f32.mrf.mxu0 }
 0xd6d   : > { %v13003_v1 = vadd.f32 %v12996_v10, %v12985_v37  ;;  %v12936_v4 = vpop.f32.mrf.mxu1 }
 0xd6e   : > { %13005 = vst [vmem:[%s15797_s18 + $0x8] sm:$0xff] %v12999_v23  ;;  %v13001_v44 = vadd.f32 %v12996_v10, %v12983_v53  ;;  %v12984_v49 = vadd.f32 %v12936_v4, %v12821_v31 }
 0xd6f   : > { %13009 = vst [vmem:[%s15797_s18 + $0x28] sm:$0xff] %v13003_v1 }
 0xd70   : > { %13007 = vst [vmem:[%s15797_s18 + $0x18] sm:$0xff] %v13001_v44  ;;  %v13002_v47 = vadd.f32 %v12996_v10, %v12984_v49 }
 0xd72   : > { %13008 = vst [vmem:[%s15797_s18 + $0x20] sm:$0xff] %v13002_v47 }
 0xd73 PF: > { %s24_s27 = sadd.s32 1, %s15578_s27  }
 0xd74   : > { %p21_p5 = scmp.ge.s32.totalorder %s24_s27, 4  }
 0xd76   :  { %23 = sbr.rel (!%p21_p5) target bundleno = 2 (0x2), region = 178 }

</bundles_post_ra>
